<compile_context>
chip_gen: v7x
topology: tpu7x:2x2x1
jax: 0.10.0
libtpu: 0.0.40
codegen_flags: <defaults>
</compile_context>

<pallas_src>
import functools

import numpy as np
import jax
import jax.numpy as jnp
from jax import lax
from jax.experimental import pallas as pl
from jax.experimental.pallas import tpu as pltpu

VMEM_LIMIT = 40 * 1024 * 1024


def _cp(sem):
    return pltpu.CompilerParams(
        dimension_semantics=sem, vmem_limit_bytes=VMEM_LIMIT)


# ----- conv1: 5x5 (C_in=1) + ReLU + 2x2 maxpool, two pooled rows / iter ------
def _conv1_kernel(xw_ref, w_ref, b_ref, o_ref, *, n_rows):
    # xw_ref: (41, 112, 16) f32, xw[j, u, r*2+p] = x[4j+r, 2u+p]
    # w_ref : (48, 256) bf16, row = q*16 + r*2 + p,
    #         col = a*128 + b*64 + t*32 + co  (a,b: pool offsets, t: row pair)
    # b_ref : (1, 256) f32
    # o_ref : (41, 110, 64) bf16, o[j, wp, t*32+co] = pool1[co, 2j+t, wp]
    def body(j, carry):
        lhs = jnp.concatenate(
            [xw_ref[j, pl.ds(q, 110), :] for q in range(3)], axis=-1)
        acc = jnp.dot(lhs.astype(jnp.bfloat16), w_ref[...],
                      preferred_element_type=jnp.float32)        # (110, 256)
        acc = jnp.maximum(acc + b_ref[...], 0.0)
        out = jnp.maximum(jnp.maximum(acc[:, 0:64], acc[:, 64:128]),
                          jnp.maximum(acc[:, 128:192], acc[:, 192:256]))
        o_ref[j] = out.astype(o_ref.dtype)                       # (110, 64)
        return carry

    lax.fori_loop(0, n_rows, body, 0)


def conv1_relu_pool(xwin, wq, bias):
    N, n_rows, wu, kc = xwin.shape
    kernel = functools.partial(_conv1_kernel, n_rows=n_rows)
    return pl.pallas_call(
        kernel,
        out_shape=jax.ShapeDtypeStruct((N, n_rows, 110, 64), jnp.bfloat16),
        grid=(N,),
        in_specs=[
            pl.BlockSpec((None, n_rows, wu, kc), lambda n: (n, 0, 0, 0)),
            pl.BlockSpec((48, 256), lambda n: (0, 0)),
            pl.BlockSpec((1, 256), lambda n: (0, 0)),
        ],
        out_specs=pl.BlockSpec((None, n_rows, 110, 64), lambda n: (n, 0, 0, 0)),
        compiler_params=_cp(("parallel",)),
    )(xwin, wq, bias)


# ----- 3x3 conv + ReLU + 2x2 maxpool on row-pair-packed bf16 activations -----
def _conv3x3_pool_kernel(x_ref, w_ref, b_ref, o_ref, xrow_ref, hrow_ref, *,
                         n_out, in_rows, w_out, wp, cg):
    # x_ref   : (in_rows, w_in, cg) bf16  row-pair packed input
    # w_ref   : (3, 3*cg, 256) bf16, col = a*128 + tout*64 + co
    # b_ref   : (1, 256) f32
    # o_ref   : (n_out, wp, 128) bf16  row-pair packed output
    # xrow_ref: (w_in, 3*cg) f32 scratch (3 packed input rows, lane-concat)
    # hrow_ref: (w_out, 128) f32 scratch (H-pooled rows, pre W-pool)
    def body(j, carry):
        for s in range(3):
            r = jnp.minimum(2 * j + s, in_rows - 1)
            xrow_ref[:, s * cg:(s + 1) * cg] = x_ref[r].astype(jnp.float32)
        acc = jnp.dot(xrow_ref[pl.ds(0, w_out), :].astype(jnp.bfloat16),
                      w_ref[0], preferred_element_type=jnp.float32)
        acc = acc + jnp.dot(xrow_ref[pl.ds(1, w_out), :].astype(jnp.bfloat16),
                            w_ref[1], preferred_element_type=jnp.float32)
        acc = acc + jnp.dot(xrow_ref[pl.ds(2, w_out), :].astype(jnp.bfloat16),
                            w_ref[2], preferred_element_type=jnp.float32)
        acc = jnp.maximum(acc + b_ref[...], 0.0)                 # (w_out, 256)
        hrow_ref[...] = jnp.maximum(acc[:, 0:128], acc[:, 128:256])   # H-pool
        o_ref[j] = jnp.maximum(hrow_ref[pl.ds(0, wp, 2), :],          # W-pool
                               hrow_ref[pl.ds(1, wp, 2), :]).astype(o_ref.dtype)
        return carry

    lax.fori_loop(0, n_out, body, 0)


def conv3x3_relu_pool(x, wbig, bias):
    N, in_rows, w_in, cg = x.shape
    w_out = w_in - 2
    wp = w_out // 2
    n_out = in_rows // 2
    K = 3 * cg
    kernel = functools.partial(_conv3x3_pool_kernel, n_out=n_out,
                               in_rows=in_rows, w_out=w_out, wp=wp, cg=cg)
    return pl.pallas_call(
        kernel,
        out_shape=jax.ShapeDtypeStruct((N, n_out, wp, 128), jnp.bfloat16),
        grid=(N,),
        in_specs=[
            pl.BlockSpec((None, in_rows, w_in, cg), lambda n: (n, 0, 0, 0)),
            pl.BlockSpec((3, K, 256), lambda n: (0, 0, 0)),
            pl.BlockSpec((1, 256), lambda n: (0, 0)),
        ],
        out_specs=pl.BlockSpec((None, n_out, wp, 128), lambda n: (n, 0, 0, 0)),
        scratch_shapes=[pltpu.VMEM((w_in, K), jnp.float32),
                        pltpu.VMEM((w_out, 128), jnp.float32)],
        compiler_params=_cp(("parallel",)),
    )(x, wbig, bias)


# -------------------- Linear -> ReLU -> Linear -> Softmax --------------------
def _mlp_kernel(x_ref, w1_ref, b1_ref, w2_ref, b2_ref, o_ref, acc_ref):
    k = pl.program_id(0)

    @pl.when(k == 0)
    def _init():
        acc_ref[...] = jnp.zeros_like(acc_ref)

    acc_ref[...] += jnp.dot(x_ref[...], w1_ref[...],
                            preferred_element_type=jnp.float32)

    @pl.when(k == pl.num_programs(0) - 1)
    def _final():
        h = jnp.maximum(acc_ref[...] + b1_ref[...], 0.0)
        logits = jnp.dot(h, w2_ref[...],
                         preferred_element_type=jnp.float32) + b2_ref[...]
        m = jnp.max(logits, axis=1, keepdims=True)
        e = jnp.exp(logits - m)
        o_ref[...] = e / jnp.sum(e, axis=1, keepdims=True)


def mlp_softmax_head(xf, w1, b1, w2, b2, num_blocks=4):
    N, Kdim = xf.shape
    H1 = w1.shape[1]
    O = w2.shape[1]
    assert Kdim % num_blocks == 0
    tk = Kdim // num_blocks
    return pl.pallas_call(
        _mlp_kernel,
        out_shape=jax.ShapeDtypeStruct((N, O), jnp.float32),
        grid=(num_blocks,),
        in_specs=[
            pl.BlockSpec((N, tk), lambda k: (0, k)),
            pl.BlockSpec((tk, H1), lambda k: (k, 0)),
            pl.BlockSpec((1, H1), lambda k: (0, 0)),
            pl.BlockSpec((H1, O), lambda k: (0, 0)),
            pl.BlockSpec((1, O), lambda k: (0, 0)),
        ],
        out_specs=pl.BlockSpec((N, O), lambda k: (0, 0)),
        scratch_shapes=[pltpu.VMEM((N, H1), jnp.float32)],
        compiler_params=_cp(("arbitrary",)),
    )(xf, w1, b1, w2, b2)


# ----------------------------- parameter prep --------------------------------
def init_params(key):
    # Torch-layout parameters (Conv2d OIHW weights, Linear (out, in) weights).
    ks = jax.random.split(key, 10)
    p = {}
    p["conv1_w"] = jax.random.normal(ks[0], (32, 1, 5, 5), jnp.float32) * 0.1
    p["conv1_b"] = jax.random.normal(ks[1], (32,), jnp.float32) * 0.01
    p["conv2_w"] = jax.random.normal(ks[2], (64, 32, 3, 3), jnp.float32) * 0.05
    p["conv2_b"] = jax.random.normal(ks[3], (64,), jnp.float32) * 0.01
    p["conv3_w"] = jax.random.normal(ks[4], (64, 64, 3, 3), jnp.float32) * 0.05
    p["conv3_b"] = jax.random.normal(ks[5], (64,), jnp.float32) * 0.01
    p["fc1_w"] = jax.random.normal(ks[6], (128, 31616), jnp.float32) * 0.01
    p["fc1_b"] = jax.random.normal(ks[7], (128,), jnp.float32) * 0.01
    p["fc2_w"] = jax.random.normal(ks[8], (10, 128), jnp.float32) * 0.1
    p["fc2_b"] = jax.random.normal(ks[9], (10,), jnp.float32) * 0.01
    return p


def _prep_conv1(w_oihw, b):
    # -> (48, 256) bf16: row = q*16 + r*2 + p, col = a*128 + bb*64 + t*32 + co.
    w = np.asarray(w_oihw, np.float32)[:, 0]          # (32, 5, 5) [co, ky, kx]
    wq = np.zeros((48, 256), np.float32)
    for q in range(3):
        for r in range(8):
            for p in range(2):
                row = q * 16 + r * 2 + p
                for t in range(2):
                    for a in range(2):
                        for bb in range(2):
                            ky = r - 2 * t - a
                            kx = 2 * q + p - bb
                            if 0 <= ky <= 4 and 0 <= kx <= 4:
                                c0 = a * 128 + bb * 64 + t * 32
                                wq[row, c0:c0 + 32] = w[:, ky, kx]
    bias = np.tile(np.asarray(b, np.float32), 8).reshape(1, 256)
    return jnp.asarray(wq, jnp.bfloat16), jnp.asarray(bias)


def _prep_conv3x3(w_oihw, b):
    # -> (3, 6*cin, 256) bf16: row = s*2*cin + tin*cin + ci,
    #    col = a*128 + tout*64 + co.
    w = np.asarray(w_oihw, np.float32)                # (64, cin, 3, 3)
    cin = w.shape[1]
    wk = np.zeros((3, 6 * cin, 256), np.float32)
    for kx in range(3):
        for s in range(3):
            for tin in range(2):
                for tout in range(2):
                    for a in range(2):
                        ky = 2 * s + tin - 2 * tout - a
                        if 0 <= ky <= 2:
                            rs = s * 2 * cin + tin * cin
                            cs = a * 128 + tout * 64
                            wk[kx, rs:rs + cin, cs:cs + 64] = w[:, :, ky, kx].T
    bias = np.tile(np.asarray(b, np.float32), 4).reshape(1, 256)
    return jnp.asarray(wk, jnp.bfloat16), jnp.asarray(bias)


def _prep_fc1(w, b):
    # Fold torch's (C, H, W) flatten order and the packed conv3 output layout
    # (j, wp, t*64+co) into the fc1 weight; rows that would hit the padded
    # (non-existent) pooled row 19 are zeroed so the garbage lane block of the
    # last packed row contributes nothing.
    w = np.asarray(w, np.float32)                     # (128, 31616)
    wt = w.T.reshape(64, 19, 26, 128)                 # [co, i, u, out]
    wt = np.pad(wt, ((0, 0), (0, 1), (0, 0), (0, 0)))
    wt = wt.reshape(64, 10, 2, 26, 128)               # [co, j, t, u, out]
    wt = np.transpose(wt, (1, 3, 2, 0, 4)).reshape(10 * 26 * 128, 128)
    bias = np.asarray(b, np.float32).reshape(1, 128)
    return jnp.asarray(wt, jnp.bfloat16), jnp.asarray(bias)


def prepare_params(p):
    q = {}
    q["w1"], q["b1"] = _prep_conv1(p["conv1_w"], p["conv1_b"])
    q["w2"], q["b2"] = _prep_conv3x3(p["conv2_w"], p["conv2_b"])
    q["w3"], q["b3"] = _prep_conv3x3(p["conv3_w"], p["conv3_b"])
    q["wf1"], q["bf1"] = _prep_fc1(p["fc1_w"], p["fc1_b"])
    q["wf2"] = jnp.asarray(np.asarray(p["fc2_w"], np.float32).T)   # (128, 10)
    q["bf2"] = jnp.asarray(np.asarray(p["fc2_b"], np.float32).reshape(1, 10))
    return q


# --------------------------------- model -------------------------------------
@jax.jit
def forward(params, x):
    # x: (N, 1, 168, 224) NCHW, matching Linear(31616, 128) in the module.
    N = x.shape[0]
    x2d = x[:, 0]                                              # (N, 168, 224)
    # conv1 input windows: xwin[n, j, u, r*2+p] = x[n, 4j+r, 2u+p].
    xw = jnp.stack([x2d[:, r:r + 161:4, :] for r in range(8)], axis=-1)
    xw = xw.reshape(N, 41, 112, 2, 8)
    xwin = jnp.transpose(xw, (0, 1, 2, 4, 3)).reshape(N, 41, 112, 16)
    p1 = conv1_relu_pool(xwin, params["w1"], params["b1"])     # (N, 41, 110, 64)
    p2 = conv3x3_relu_pool(p1, params["w2"], params["b2"])     # (N, 20, 54, 128)
    p3 = conv3x3_relu_pool(p2, params["w3"], params["b3"])     # (N, 10, 26, 128)
    xf = p3.reshape(N, 10 * 26 * 128)   # packed flatten; fc1 rows pre-permuted
    return mlp_softmax_head(xf, params["wf1"], params["bf1"],
                            params["wf2"], params["bf2"])      # (N, 10)


# ------------------------- pure-JAX f32 reference -----------------------------
@jax.jit
def reference_forward(p, x):
    def conv(v, w, b):
        y = lax.conv_general_dilated(
            v, w, window_strides=(1, 1), padding="VALID",
            dimension_numbers=("NCHW", "OIHW", "NCHW"))
        return y + b[None, :, None, None]

    def pool(v):
        return lax.reduce_window(v, -jnp.inf, lax.max,
                                 (1, 1, 2, 2), (1, 1, 2, 2), "VALID")

    y = pool(jax.nn.relu(conv(x, p["conv1_w"], p["conv1_b"])))
    y = pool(jax.nn.relu(conv(y, p["conv2_w"], p["conv2_b"])))
    y = pool(jax.nn.relu(conv(y, p["conv3_w"], p["conv3_b"])))
    y = y.reshape(x.shape[0], -1)
    y = jax.nn.relu(y @ p["fc1_w"].T + p["fc1_b"])
    y = y @ p["fc2_w"].T + p["fc2_b"]
    return jax.nn.softmax(y, axis=1)


if __name__ == "__main__":
    key = jax.random.PRNGKey(0)
    kx_, kp_ = jax.random.split(key)
    x = jax.random.normal(kx_, (2, 1, 168, 224), jnp.float32)
    raw = init_params(kp_)
    params = prepare_params(raw)
    out = jax.block_until_ready(forward(params, x))
    assert out.shape == (2, 10)
    assert bool(jnp.all(jnp.isfinite(out)))
    assert bool(jnp.allclose(jnp.sum(out, axis=1), 1.0, atol=1e-3))
    # End-to-end check vs. an f32 XLA reference (bf16 weights/activations in the
    # Pallas path give small numeric differences).
    ref = jax.block_until_ready(reference_forward(raw, x))
    assert bool(jnp.max(jnp.abs(out - ref)) < 3e-2)
    print("KERNEL_OK")
</pallas_src>

<mosaic_0001>
module attributes {stable_mosaic.version = 11 : i64} {
  func.func @_conv1_kernel(%arg0: i32, %arg1: memref<1x41x112x16xf32, #tpu.memory_space<vmem>>, %arg2: memref<48x256xbf16, #tpu.memory_space<vmem>>, %arg3: memref<1x256xf32, #tpu.memory_space<vmem>>, %arg4: memref<1x41x110x64xbf16, #tpu.memory_space<vmem>>) attributes {dimension_semantics = [#tpu.dimension_semantics<parallel>], iteration_bounds = array<i64: 2>, scalar_prefetch = 0 : i64, scratch_operands = 0 : i64, tpu.core_type = #tpu.core_type<tc>, window_params = [{transform_indices = @transform_0, window_bounds = array<i64: 1, 41, 112, 16>}, {pipeline_mode = #tpu.pipeline_mode<synchronous>, transform_indices = @transform_1, window_bounds = array<i64: 48, 256>}, {pipeline_mode = #tpu.pipeline_mode<synchronous>, transform_indices = @transform_2, window_bounds = array<i64: 1, 256>}, {transform_indices = @transform_3, window_bounds = array<i64: 1, 41, 110, 64>}]} {
    %c0_i32 = arith.constant 0 : i32
    %c41_i32 = arith.constant 41 : i32
    %0 = arith.addi %c0_i32, %c41_i32 : i32
    %c1_i32 = arith.constant 1 : i32
    scf.for %arg5 = %c0_i32 to %0 step %c1_i32  : i32 {
      %c0 = arith.constant 0 : index
      %1 = arith.index_cast %arg5 : i32 to index
      %c0_1 = arith.constant 0 : index
      %c0_2 = arith.constant 0 : index
      %2 = vector.load %arg1[%c0, %1, %c0_1, %c0_2] : memref<1x41x112x16xf32, #tpu.memory_space<vmem>>, vector<1x1x110x16xf32>
      %3 = vector.shape_cast %2 : vector<1x1x110x16xf32> to vector<110x16xf32>
      %c0_3 = arith.constant 0 : index
      %4 = arith.index_cast %arg5 : i32 to index
      %c1 = arith.constant 1 : index
      %c0_4 = arith.constant 0 : index
      %5 = vector.load %arg1[%c0_3, %4, %c1, %c0_4] : memref<1x41x112x16xf32, #tpu.memory_space<vmem>>, vector<1x1x110x16xf32>
      %6 = vector.shape_cast %5 : vector<1x1x110x16xf32> to vector<110x16xf32>
      %c0_5 = arith.constant 0 : index
      %7 = arith.index_cast %arg5 : i32 to index
      %c2 = arith.constant 2 : index
      %c0_6 = arith.constant 0 : index
      %8 = vector.load %arg1[%c0_5, %7, %c2, %c0_6] : memref<1x41x112x16xf32, #tpu.memory_space<vmem>>, vector<1x1x110x16xf32>
      %9 = vector.shape_cast %8 : vector<1x1x110x16xf32> to vector<110x16xf32>
      %10 = tpu.concatenate %3, %6, %9 in 1 : vector<110x16xf32>, vector<110x16xf32>, vector<110x16xf32> -> vector<110x48xf32>
      %11 = arith.truncf %10 : vector<110x48xf32> to vector<110x48xbf16>
      %c0_7 = arith.constant 0 : index
      %c0_8 = arith.constant 0 : index
      %12 = vector.load %arg2[%c0_7, %c0_8] : memref<48x256xbf16, #tpu.memory_space<vmem>>, vector<48x256xbf16>
      %cst = arith.constant dense<0.000000e+00> : vector<110x256xf32>
      %13 = tpu.matmul %11, %12, %cst {dimension_numbers = #tpu.dot_dimension_numbers<[1], [0], [0], [1], [0, 0, 1, 1], [], []>} : vector<110x48xbf16>, vector<48x256xbf16>, vector<110x256xf32> -> vector<110x256xf32>
      %c0_9 = arith.constant 0 : index
      %c0_10 = arith.constant 0 : index
      %14 = vector.load %arg3[%c0_9, %c0_10] : memref<1x256xf32, #tpu.memory_space<vmem>>, vector<1x256xf32>
      %15 = vector.broadcast %14 : vector<1x256xf32> to vector<110x256xf32>
      %16 = arith.addf %13, %15 : vector<110x256xf32>
      %cst_11 = arith.constant 0.000000e+00 : f32
      %17 = vector.broadcast %cst_11 : f32 to vector<110x256xf32>
      %18 = arith.maximumf %16, %17 : vector<110x256xf32>
      %19 = vector.extract_strided_slice %18 {offsets = [0, 0], sizes = [110, 64], strides = [1, 1]} : vector<110x256xf32> to vector<110x64xf32>
      %20 = vector.extract_strided_slice %18 {offsets = [0, 64], sizes = [110, 64], strides = [1, 1]} : vector<110x256xf32> to vector<110x64xf32>
      %21 = arith.maximumf %19, %20 : vector<110x64xf32>
      %22 = vector.extract_strided_slice %18 {offsets = [0, 128], sizes = [110, 64], strides = [1, 1]} : vector<110x256xf32> to vector<110x64xf32>
      %23 = vector.extract_strided_slice %18 {offsets = [0, 192], sizes = [110, 64], strides = [1, 1]} : vector<110x256xf32> to vector<110x64xf32>
      %24 = arith.maximumf %22, %23 : vector<110x64xf32>
      %25 = arith.maximumf %21, %24 : vector<110x64xf32>
      %26 = arith.truncf %25 : vector<110x64xf32> to vector<110x64xbf16>
      %c0_12 = arith.constant 0 : index
      %27 = arith.index_cast %arg5 : i32 to index
      %c0_13 = arith.constant 0 : index
      %c0_14 = arith.constant 0 : index
      %28 = vector.load %arg4[%c0_12, %27, %c0_13, %c0_14] : memref<1x41x110x64xbf16, #tpu.memory_space<vmem>>, vector<1x1x110x64xbf16>
      %29 = vector.shape_cast %28 : vector<1x1x110x64xbf16> to vector<110x64xbf16>
      %30 = vector.shape_cast %26 : vector<110x64xbf16> to vector<1x1x110x64xbf16>
      tpu.vector_store %arg4[%c0_12, %27, %c0_13, %c0_14], %30 {strides = array<i32>} : memref<1x41x110x64xbf16, #tpu.memory_space<vmem>>, vector<1x1x110x64xbf16>,
    }
    %c41_i32_0 = arith.constant 41 : i32
    return
  }
  func.func @transform_0(%arg0: i32) -> (i32, i32, i32, i32) {
    %c0_i32 = arith.constant 0 : i32
    %c0_i32_0 = arith.constant 0 : i32
    %c0_i32_1 = arith.constant 0 : i32
    %c0_i32_2 = arith.constant 0 : i32
    return %arg0, %c0_i32, %c0_i32_0, %c0_i32_1 : i32, i32, i32, i32
  }
  func.func @transform_1(%arg0: i32) -> (i32, i32) {
    %c0_i32 = arith.constant 0 : i32
    %c0_i32_0 = arith.constant 0 : i32
    %c0_i32_1 = arith.constant 0 : i32
    return %c0_i32, %c0_i32_0 : i32, i32
  }
  func.func @transform_2(%arg0: i32) -> (i32, i32) {
    %c0_i32 = arith.constant 0 : i32
    %c0_i32_0 = arith.constant 0 : i32
    %c0_i32_1 = arith.constant 0 : i32
    return %c0_i32, %c0_i32_0 : i32, i32
  }
  func.func @transform_3(%arg0: i32) -> (i32, i32, i32, i32) {
    %c0_i32 = arith.constant 0 : i32
    %c0_i32_0 = arith.constant 0 : i32
    %c0_i32_1 = arith.constant 0 : i32
    %c0_i32_2 = arith.constant 0 : i32
    return %arg0, %c0_i32, %c0_i32_0, %c0_i32_1 : i32, i32, i32, i32
  }
}

module attributes {stable_mosaic.version = 11 : i64} {
  func.func @_conv3x3_pool_kernel(%arg0: i32, %arg1: memref<1x41x110x64xbf16, #tpu.memory_space<vmem>>, %arg2: memref<3x192x256xbf16, #tpu.memory_space<vmem>>, %arg3: memref<1x256xf32, #tpu.memory_space<vmem>>, %arg4: memref<1x20x54x128xbf16, #tpu.memory_space<vmem>>, %arg5: memref<110x192xf32, #tpu.memory_space<vmem>>, %arg6: memref<108x128xf32, #tpu.memory_space<vmem>>) attributes {dimension_semantics = [#tpu.dimension_semantics<parallel>], iteration_bounds = array<i64: 2>, scalar_prefetch = 0 : i64, scratch_operands = 2 : i64, tpu.core_type = #tpu.core_type<tc>, window_params = [{transform_indices = @transform_0, window_bounds = array<i64: 1, 41, 110, 64>}, {pipeline_mode = #tpu.pipeline_mode<synchronous>, transform_indices = @transform_1, window_bounds = array<i64: 3, 192, 256>}, {pipeline_mode = #tpu.pipeline_mode<synchronous>, transform_indices = @transform_2, window_bounds = array<i64: 1, 256>}, {transform_indices = @transform_3, window_bounds = array<i64: 1, 20, 54, 128>}]} {
    %c0_i32 = arith.constant 0 : i32
    %c20_i32 = arith.constant 20 : i32
    %0 = arith.addi %c0_i32, %c20_i32 : i32
    %c1_i32 = arith.constant 1 : i32
    scf.for %arg7 = %c0_i32 to %0 step %c1_i32  : i32 {
      %c2_i32 = arith.constant 2 : i32
      %1 = arith.muli %c2_i32, %arg7 : i32
      %c0_i32_1 = arith.constant 0 : i32
      %2 = arith.addi %1, %c0_i32_1 : i32
      %c40_i32 = arith.constant 40 : i32
      %3 = arith.minsi %2, %c40_i32 : i32
      %c0 = arith.constant 0 : index
      %4 = arith.index_cast %3 : i32 to index
      %c0_2 = arith.constant 0 : index
      %c0_3 = arith.constant 0 : index
      %5 = vector.load %arg1[%c0, %4, %c0_2, %c0_3] : memref<1x41x110x64xbf16, #tpu.memory_space<vmem>>, vector<1x1x110x64xbf16>
      %6 = vector.shape_cast %5 : vector<1x1x110x64xbf16> to vector<110x64xbf16>
      %7 = arith.extf %6 : vector<110x64xbf16> to vector<110x64xf32>
      %c0_4 = arith.constant 0 : index
      %c0_5 = arith.constant 0 : index
      %8 = vector.load %arg5[%c0_4, %c0_5] : memref<110x192xf32, #tpu.memory_space<vmem>>, vector<110x64xf32>
      tpu.vector_store %arg5[%c0_4, %c0_5], %7 {strides = array<i32>} : memref<110x192xf32, #tpu.memory_space<vmem>>, vector<110x64xf32>,
      %c2_i32_6 = arith.constant 2 : i32
      %9 = arith.muli %c2_i32_6, %arg7 : i32
      %c1_i32_7 = arith.constant 1 : i32
      %10 = arith.addi %9, %c1_i32_7 : i32
      %c40_i32_8 = arith.constant 40 : i32
      %11 = arith.minsi %10, %c40_i32_8 : i32
      %c0_9 = arith.constant 0 : index
      %12 = arith.index_cast %11 : i32 to index
      %c0_10 = arith.constant 0 : index
      %c0_11 = arith.constant 0 : index
      %13 = vector.load %arg1[%c0_9, %12, %c0_10, %c0_11] : memref<1x41x110x64xbf16, #tpu.memory_space<vmem>>, vector<1x1x110x64xbf16>
      %14 = vector.shape_cast %13 : vector<1x1x110x64xbf16> to vector<110x64xbf16>
      %15 = arith.extf %14 : vector<110x64xbf16> to vector<110x64xf32>
      %c0_12 = arith.constant 0 : index
      %c64 = arith.constant 64 : index
      %16 = vector.load %arg5[%c0_12, %c64] : memref<110x192xf32, #tpu.memory_space<vmem>>, vector<110x64xf32>
      tpu.vector_store %arg5[%c0_12, %c64], %15 {strides = array<i32>} : memref<110x192xf32, #tpu.memory_space<vmem>>, vector<110x64xf32>,
      %c2_i32_13 = arith.constant 2 : i32
      %17 = arith.muli %c2_i32_13, %arg7 : i32
      %c2_i32_14 = arith.constant 2 : i32
      %18 = arith.addi %17, %c2_i32_14 : i32
      %c40_i32_15 = arith.constant 40 : i32
      %19 = arith.minsi %18, %c40_i32_15 : i32
      %c0_16 = arith.constant 0 : index
      %20 = arith.index_cast %19 : i32 to index
      %c0_17 = arith.constant 0 : index
      %c0_18 = arith.constant 0 : index
      %21 = vector.load %arg1[%c0_16, %20, %c0_17, %c0_18] : memref<1x41x110x64xbf16, #tpu.memory_space<vmem>>, vector<1x1x110x64xbf16>
      %22 = vector.shape_cast %21 : vector<1x1x110x64xbf16> to vector<110x64xbf16>
      %23 = arith.extf %22 : vector<110x64xbf16> to vector<110x64xf32>
      %c0_19 = arith.constant 0 : index
      %c128 = arith.constant 128 : index
      %24 = vector.load %arg5[%c0_19, %c128] : memref<110x192xf32, #tpu.memory_space<vmem>>, vector<110x64xf32>
      tpu.vector_store %arg5[%c0_19, %c128], %23 {strides = array<i32>} : memref<110x192xf32, #tpu.memory_space<vmem>>, vector<110x64xf32>,
      %c0_20 = arith.constant 0 : index
      %c0_21 = arith.constant 0 : index
      %25 = vector.load %arg5[%c0_20, %c0_21] : memref<110x192xf32, #tpu.memory_space<vmem>>, vector<108x192xf32>
      %26 = arith.truncf %25 : vector<108x192xf32> to vector<108x192xbf16>
      %c0_22 = arith.constant 0 : index
      %c0_23 = arith.constant 0 : index
      %c0_24 = arith.constant 0 : index
      %27 = vector.load %arg2[%c0_22, %c0_23, %c0_24] : memref<3x192x256xbf16, #tpu.memory_space<vmem>>, vector<1x192x256xbf16>
      %28 = vector.shape_cast %27 : vector<1x192x256xbf16> to vector<192x256xbf16>
      %cst = arith.constant dense<0.000000e+00> : vector<108x256xf32>
      %29 = tpu.matmul %26, %28, %cst {dimension_numbers = #tpu.dot_dimension_numbers<[1], [0], [0], [1], [0, 0, 1, 1], [], []>} : vector<108x192xbf16>, vector<192x256xbf16>, vector<108x256xf32> -> vector<108x256xf32>
      %c1 = arith.constant 1 : index
      %c0_25 = arith.constant 0 : index
      %30 = vector.load %arg5[%c1, %c0_25] : memref<110x192xf32, #tpu.memory_space<vmem>>, vector<108x192xf32>
      %31 = arith.truncf %30 : vector<108x192xf32> to vector<108x192xbf16>
      %c1_26 = arith.constant 1 : index
      %c0_27 = arith.constant 0 : index
      %c0_28 = arith.constant 0 : index
      %32 = vector.load %arg2[%c1_26, %c0_27, %c0_28] : memref<3x192x256xbf16, #tpu.memory_space<vmem>>, vector<1x192x256xbf16>
      %33 = vector.shape_cast %32 : vector<1x192x256xbf16> to vector<192x256xbf16>
      %cst_29 = arith.constant dense<0.000000e+00> : vector<108x256xf32>
      %34 = tpu.matmul %31, %33, %cst_29 {dimension_numbers = #tpu.dot_dimension_numbers<[1], [0], [0], [1], [0, 0, 1, 1], [], []>} : vector<108x192xbf16>, vector<192x256xbf16>, vector<108x256xf32> -> vector<108x256xf32>
      %35 = arith.addf %29, %34 : vector<108x256xf32>
      %c2 = arith.constant 2 : index
      %c0_30 = arith.constant 0 : index
      %36 = vector.load %arg5[%c2, %c0_30] : memref<110x192xf32, #tpu.memory_space<vmem>>, vector<108x192xf32>
      %37 = arith.truncf %36 : vector<108x192xf32> to vector<108x192xbf16>
      %c2_31 = arith.constant 2 : index
      %c0_32 = arith.constant 0 : index
      %c0_33 = arith.constant 0 : index
      %38 = vector.load %arg2[%c2_31, %c0_32, %c0_33] : memref<3x192x256xbf16, #tpu.memory_space<vmem>>, vector<1x192x256xbf16>
      %39 = vector.shape_cast %38 : vector<1x192x256xbf16> to vector<192x256xbf16>
      %cst_34 = arith.constant dense<0.000000e+00> : vector<108x256xf32>
      %40 = tpu.matmul %37, %39, %cst_34 {dimension_numbers = #tpu.dot_dimension_numbers<[1], [0], [0], [1], [0, 0, 1, 1], [], []>} : vector<108x192xbf16>, vector<192x256xbf16>, vector<108x256xf32> -> vector<108x256xf32>
      %41 = arith.addf %35, %40 : vector<108x256xf32>
      %c0_35 = arith.constant 0 : index
      %c0_36 = arith.constant 0 : index
      %42 = vector.load %arg3[%c0_35, %c0_36] : memref<1x256xf32, #tpu.memory_space<vmem>>, vector<1x256xf32>
      %43 = vector.broadcast %42 : vector<1x256xf32> to vector<108x256xf32>
      %44 = arith.addf %41, %43 : vector<108x256xf32>
      %cst_37 = arith.constant 0.000000e+00 : f32
      %45 = vector.broadcast %cst_37 : f32 to vector<108x256xf32>
      %46 = arith.maximumf %44, %45 : vector<108x256xf32>
      %47 = vector.extract_strided_slice %46 {offsets = [0, 0], sizes = [108, 128], strides = [1, 1]} : vector<108x256xf32> to vector<108x128xf32>
      %48 = vector.extract_strided_slice %46 {offsets = [0, 128], sizes = [108, 128], strides = [1, 1]} : vector<108x256xf32> to vector<108x128xf32>
      %49 = arith.maximumf %47, %48 : vector<108x128xf32>
      %c0_38 = arith.constant 0 : index
      %c0_39 = arith.constant 0 : index
      %50 = vector.load %arg6[%c0_38, %c0_39] : memref<108x128xf32, #tpu.memory_space<vmem>>, vector<108x128xf32>
      tpu.vector_store %arg6[%c0_38, %c0_39], %49 {strides = array<i32>} : memref<108x128xf32, #tpu.memory_space<vmem>>, vector<108x128xf32>,
      %c0_40 = arith.constant 0 : index
      %c0_41 = arith.constant 0 : index
      %51 = tpu.strided_load %arg6[%c0_40, %c0_41] {strides = array<i32: 2, 1>} : memref<108x128xf32, #tpu.memory_space<vmem>>, vector<54x128xf32>
      %c1_42 = arith.constant 1 : index
      %c0_43 = arith.constant 0 : index
      %52 = tpu.strided_load %arg6[%c1_42, %c0_43] {strides = array<i32: 2, 1>} : memref<108x128xf32, #tpu.memory_space<vmem>>, vector<54x128xf32>
      %53 = arith.maximumf %51, %52 : vector<54x128xf32>
      %54 = arith.truncf %53 : vector<54x128xf32> to vector<54x128xbf16>
      %c0_44 = arith.constant 0 : index
      %55 = arith.index_cast %arg7 : i32 to index
      %c0_45 = arith.constant 0 : index
      %c0_46 = arith.constant 0 : index
      %56 = vector.load %arg4[%c0_44, %55, %c0_45, %c0_46] : memref<1x20x54x128xbf16, #tpu.memory_space<vmem>>, vector<1x1x54x128xbf16>
      %57 = vector.shape_cast %56 : vector<1x1x54x128xbf16> to vector<54x128xbf16>
      %58 = vector.shape_cast %54 : vector<54x128xbf16> to vector<1x1x54x128xbf16>
      tpu.vector_store %arg4[%c0_44, %55, %c0_45, %c0_46], %58 {strides = array<i32>} : memref<1x20x54x128xbf16, #tpu.memory_space<vmem>>, vector<1x1x54x128xbf16>,
    }
    %c20_i32_0 = arith.constant 20 : i32
    return
  }
  func.func @transform_0(%arg0: i32) -> (i32, i32, i32, i32) {
    %c0_i32 = arith.constant 0 : i32
    %c0_i32_0 = arith.constant 0 : i32
    %c0_i32_1 = arith.constant 0 : i32
    %c0_i32_2 = arith.constant 0 : i32
    return %arg0, %c0_i32, %c0_i32_0, %c0_i32_1 : i32, i32, i32, i32
  }
  func.func @transform_1(%arg0: i32) -> (i32, i32, i32) {
    %c0_i32 = arith.constant 0 : i32
    %c0_i32_0 = arith.constant 0 : i32
    %c0_i32_1 = arith.constant 0 : i32
    %c0_i32_2 = arith.constant 0 : i32
    return %c0_i32, %c0_i32_0, %c0_i32_1 : i32, i32, i32
  }
  func.func @transform_2(%arg0: i32) -> (i32, i32) {
    %c0_i32 = arith.constant 0 : i32
    %c0_i32_0 = arith.constant 0 : i32
    %c0_i32_1 = arith.constant 0 : i32
    return %c0_i32, %c0_i32_0 : i32, i32
  }
  func.func @transform_3(%arg0: i32) -> (i32, i32, i32, i32) {
    %c0_i32 = arith.constant 0 : i32
    %c0_i32_0 = arith.constant 0 : i32
    %c0_i32_1 = arith.constant 0 : i32
    %c0_i32_2 = arith.constant 0 : i32
    return %arg0, %c0_i32, %c0_i32_0, %c0_i32_1 : i32, i32, i32, i32
  }
}

module attributes {stable_mosaic.version = 11 : i64} {
  func.func @_conv3x3_pool_kernel(%arg0: i32, %arg1: memref<1x20x54x128xbf16, #tpu.memory_space<vmem>>, %arg2: memref<3x384x256xbf16, #tpu.memory_space<vmem>>, %arg3: memref<1x256xf32, #tpu.memory_space<vmem>>, %arg4: memref<1x10x26x128xbf16, #tpu.memory_space<vmem>>, %arg5: memref<54x384xf32, #tpu.memory_space<vmem>>, %arg6: memref<52x128xf32, #tpu.memory_space<vmem>>) attributes {dimension_semantics = [#tpu.dimension_semantics<parallel>], iteration_bounds = array<i64: 2>, scalar_prefetch = 0 : i64, scratch_operands = 2 : i64, tpu.core_type = #tpu.core_type<tc>, window_params = [{transform_indices = @transform_0, window_bounds = array<i64: 1, 20, 54, 128>}, {pipeline_mode = #tpu.pipeline_mode<synchronous>, transform_indices = @transform_1, window_bounds = array<i64: 3, 384, 256>}, {pipeline_mode = #tpu.pipeline_mode<synchronous>, transform_indices = @transform_2, window_bounds = array<i64: 1, 256>}, {transform_indices = @transform_3, window_bounds = array<i64: 1, 10, 26, 128>}]} {
    %c0_i32 = arith.constant 0 : i32
    %c10_i32 = arith.constant 10 : i32
    %0 = arith.addi %c0_i32, %c10_i32 : i32
    %c1_i32 = arith.constant 1 : i32
    scf.for %arg7 = %c0_i32 to %0 step %c1_i32  : i32 {
      %c2_i32 = arith.constant 2 : i32
      %1 = arith.muli %c2_i32, %arg7 : i32
      %c0_i32_1 = arith.constant 0 : i32
      %2 = arith.addi %1, %c0_i32_1 : i32
      %c19_i32 = arith.constant 19 : i32
      %3 = arith.minsi %2, %c19_i32 : i32
      %c0 = arith.constant 0 : index
      %4 = arith.index_cast %3 : i32 to index
      %c0_2 = arith.constant 0 : index
      %c0_3 = arith.constant 0 : index
      %5 = vector.load %arg1[%c0, %4, %c0_2, %c0_3] : memref<1x20x54x128xbf16, #tpu.memory_space<vmem>>, vector<1x1x54x128xbf16>
      %6 = vector.shape_cast %5 : vector<1x1x54x128xbf16> to vector<54x128xbf16>
      %7 = arith.extf %6 : vector<54x128xbf16> to vector<54x128xf32>
      %c0_4 = arith.constant 0 : index
      %c0_5 = arith.constant 0 : index
      %8 = vector.load %arg5[%c0_4, %c0_5] : memref<54x384xf32, #tpu.memory_space<vmem>>, vector<54x128xf32>
      tpu.vector_store %arg5[%c0_4, %c0_5], %7 {strides = array<i32>} : memref<54x384xf32, #tpu.memory_space<vmem>>, vector<54x128xf32>,
      %c2_i32_6 = arith.constant 2 : i32
      %9 = arith.muli %c2_i32_6, %arg7 : i32
      %c1_i32_7 = arith.constant 1 : i32
      %10 = arith.addi %9, %c1_i32_7 : i32
      %c19_i32_8 = arith.constant 19 : i32
      %11 = arith.minsi %10, %c19_i32_8 : i32
      %c0_9 = arith.constant 0 : index
      %12 = arith.index_cast %11 : i32 to index
      %c0_10 = arith.constant 0 : index
      %c0_11 = arith.constant 0 : index
      %13 = vector.load %arg1[%c0_9, %12, %c0_10, %c0_11] : memref<1x20x54x128xbf16, #tpu.memory_space<vmem>>, vector<1x1x54x128xbf16>
      %14 = vector.shape_cast %13 : vector<1x1x54x128xbf16> to vector<54x128xbf16>
      %15 = arith.extf %14 : vector<54x128xbf16> to vector<54x128xf32>
      %c0_12 = arith.constant 0 : index
      %c128 = arith.constant 128 : index
      %16 = vector.load %arg5[%c0_12, %c128] : memref<54x384xf32, #tpu.memory_space<vmem>>, vector<54x128xf32>
      tpu.vector_store %arg5[%c0_12, %c128], %15 {strides = array<i32>} : memref<54x384xf32, #tpu.memory_space<vmem>>, vector<54x128xf32>,
      %c2_i32_13 = arith.constant 2 : i32
      %17 = arith.muli %c2_i32_13, %arg7 : i32
      %c2_i32_14 = arith.constant 2 : i32
      %18 = arith.addi %17, %c2_i32_14 : i32
      %c19_i32_15 = arith.constant 19 : i32
      %19 = arith.minsi %18, %c19_i32_15 : i32
      %c0_16 = arith.constant 0 : index
      %20 = arith.index_cast %19 : i32 to index
      %c0_17 = arith.constant 0 : index
      %c0_18 = arith.constant 0 : index
      %21 = vector.load %arg1[%c0_16, %20, %c0_17, %c0_18] : memref<1x20x54x128xbf16, #tpu.memory_space<vmem>>, vector<1x1x54x128xbf16>
      %22 = vector.shape_cast %21 : vector<1x1x54x128xbf16> to vector<54x128xbf16>
      %23 = arith.extf %22 : vector<54x128xbf16> to vector<54x128xf32>
      %c0_19 = arith.constant 0 : index
      %c256 = arith.constant 256 : index
      %24 = vector.load %arg5[%c0_19, %c256] : memref<54x384xf32, #tpu.memory_space<vmem>>, vector<54x128xf32>
      tpu.vector_store %arg5[%c0_19, %c256], %23 {strides = array<i32>} : memref<54x384xf32, #tpu.memory_space<vmem>>, vector<54x128xf32>,
      %c0_20 = arith.constant 0 : index
      %c0_21 = arith.constant 0 : index
      %25 = vector.load %arg5[%c0_20, %c0_21] : memref<54x384xf32, #tpu.memory_space<vmem>>, vector<52x384xf32>
      %26 = arith.truncf %25 : vector<52x384xf32> to vector<52x384xbf16>
      %c0_22 = arith.constant 0 : index
      %c0_23 = arith.constant 0 : index
      %c0_24 = arith.constant 0 : index
      %27 = vector.load %arg2[%c0_22, %c0_23, %c0_24] : memref<3x384x256xbf16, #tpu.memory_space<vmem>>, vector<1x384x256xbf16>
      %28 = vector.shape_cast %27 : vector<1x384x256xbf16> to vector<384x256xbf16>
      %cst = arith.constant dense<0.000000e+00> : vector<52x256xf32>
      %29 = tpu.matmul %26, %28, %cst {dimension_numbers = #tpu.dot_dimension_numbers<[1], [0], [0], [1], [0, 0, 1, 1], [], []>} : vector<52x384xbf16>, vector<384x256xbf16>, vector<52x256xf32> -> vector<52x256xf32>
      %c1 = arith.constant 1 : index
      %c0_25 = arith.constant 0 : index
      %30 = vector.load %arg5[%c1, %c0_25] : memref<54x384xf32, #tpu.memory_space<vmem>>, vector<52x384xf32>
      %31 = arith.truncf %30 : vector<52x384xf32> to vector<52x384xbf16>
      %c1_26 = arith.constant 1 : index
      %c0_27 = arith.constant 0 : index
      %c0_28 = arith.constant 0 : index
      %32 = vector.load %arg2[%c1_26, %c0_27, %c0_28] : memref<3x384x256xbf16, #tpu.memory_space<vmem>>, vector<1x384x256xbf16>
      %33 = vector.shape_cast %32 : vector<1x384x256xbf16> to vector<384x256xbf16>
      %cst_29 = arith.constant dense<0.000000e+00> : vector<52x256xf32>
      %34 = tpu.matmul %31, %33, %cst_29 {dimension_numbers = #tpu.dot_dimension_numbers<[1], [0], [0], [1], [0, 0, 1, 1], [], []>} : vector<52x384xbf16>, vector<384x256xbf16>, vector<52x256xf32> -> vector<52x256xf32>
      %35 = arith.addf %29, %34 : vector<52x256xf32>
      %c2 = arith.constant 2 : index
      %c0_30 = arith.constant 0 : index
      %36 = vector.load %arg5[%c2, %c0_30] : memref<54x384xf32, #tpu.memory_space<vmem>>, vector<52x384xf32>
      %37 = arith.truncf %36 : vector<52x384xf32> to vector<52x384xbf16>
      %c2_31 = arith.constant 2 : index
      %c0_32 = arith.constant 0 : index
      %c0_33 = arith.constant 0 : index
      %38 = vector.load %arg2[%c2_31, %c0_32, %c0_33] : memref<3x384x256xbf16, #tpu.memory_space<vmem>>, vector<1x384x256xbf16>
      %39 = vector.shape_cast %38 : vector<1x384x256xbf16> to vector<384x256xbf16>
      %cst_34 = arith.constant dense<0.000000e+00> : vector<52x256xf32>
      %40 = tpu.matmul %37, %39, %cst_34 {dimension_numbers = #tpu.dot_dimension_numbers<[1], [0], [0], [1], [0, 0, 1, 1], [], []>} : vector<52x384xbf16>, vector<384x256xbf16>, vector<52x256xf32> -> vector<52x256xf32>
      %41 = arith.addf %35, %40 : vector<52x256xf32>
      %c0_35 = arith.constant 0 : index
      %c0_36 = arith.constant 0 : index
      %42 = vector.load %arg3[%c0_35, %c0_36] : memref<1x256xf32, #tpu.memory_space<vmem>>, vector<1x256xf32>
      %43 = vector.broadcast %42 : vector<1x256xf32> to vector<52x256xf32>
      %44 = arith.addf %41, %43 : vector<52x256xf32>
      %cst_37 = arith.constant 0.000000e+00 : f32
      %45 = vector.broadcast %cst_37 : f32 to vector<52x256xf32>
      %46 = arith.maximumf %44, %45 : vector<52x256xf32>
      %47 = vector.extract_strided_slice %46 {offsets = [0, 0], sizes = [52, 128], strides = [1, 1]} : vector<52x256xf32> to vector<52x128xf32>
      %48 = vector.extract_strided_slice %46 {offsets = [0, 128], sizes = [52, 128], strides = [1, 1]} : vector<52x256xf32> to vector<52x128xf32>
      %49 = arith.maximumf %47, %48 : vector<52x128xf32>
      %c0_38 = arith.constant 0 : index
      %c0_39 = arith.constant 0 : index
      %50 = vector.load %arg6[%c0_38, %c0_39] : memref<52x128xf32, #tpu.memory_space<vmem>>, vector<52x128xf32>
      tpu.vector_store %arg6[%c0_38, %c0_39], %49 {strides = array<i32>} : memref<52x128xf32, #tpu.memory_space<vmem>>, vector<52x128xf32>,
      %c0_40 = arith.constant 0 : index
      %c0_41 = arith.constant 0 : index
      %51 = tpu.strided_load %arg6[%c0_40, %c0_41] {strides = array<i32: 2, 1>} : memref<52x128xf32, #tpu.memory_space<vmem>>, vector<26x128xf32>
      %c1_42 = arith.constant 1 : index
      %c0_43 = arith.constant 0 : index
      %52 = tpu.strided_load %arg6[%c1_42, %c0_43] {strides = array<i32: 2, 1>} : memref<52x128xf32, #tpu.memory_space<vmem>>, vector<26x128xf32>
      %53 = arith.maximumf %51, %52 : vector<26x128xf32>
      %54 = arith.truncf %53 : vector<26x128xf32> to vector<26x128xbf16>
      %c0_44 = arith.constant 0 : index
      %55 = arith.index_cast %arg7 : i32 to index
      %c0_45 = arith.constant 0 : index
      %c0_46 = arith.constant 0 : index
      %56 = vector.load %arg4[%c0_44, %55, %c0_45, %c0_46] : memref<1x10x26x128xbf16, #tpu.memory_space<vmem>>, vector<1x1x26x128xbf16>
      %57 = vector.shape_cast %56 : vector<1x1x26x128xbf16> to vector<26x128xbf16>
      %58 = vector.shape_cast %54 : vector<26x128xbf16> to vector<1x1x26x128xbf16>
      tpu.vector_store %arg4[%c0_44, %55, %c0_45, %c0_46], %58 {strides = array<i32>} : memref<1x10x26x128xbf16, #tpu.memory_space<vmem>>, vector<1x1x26x128xbf16>,
    }
    %c10_i32_0 = arith.constant 10 : i32
    return
  }
  func.func @transform_0(%arg0: i32) -> (i32, i32, i32, i32) {
    %c0_i32 = arith.constant 0 : i32
    %c0_i32_0 = arith.constant 0 : i32
    %c0_i32_1 = arith.constant 0 : i32
    %c0_i32_2 = arith.constant 0 : i32
    return %arg0, %c0_i32, %c0_i32_0, %c0_i32_1 : i32, i32, i32, i32
  }
  func.func @transform_1(%arg0: i32) -> (i32, i32, i32) {
    %c0_i32 = arith.constant 0 : i32
    %c0_i32_0 = arith.constant 0 : i32
    %c0_i32_1 = arith.constant 0 : i32
    %c0_i32_2 = arith.constant 0 : i32
    return %c0_i32, %c0_i32_0, %c0_i32_1 : i32, i32, i32
  }
  func.func @transform_2(%arg0: i32) -> (i32, i32) {
    %c0_i32 = arith.constant 0 : i32
    %c0_i32_0 = arith.constant 0 : i32
    %c0_i32_1 = arith.constant 0 : i32
    return %c0_i32, %c0_i32_0 : i32, i32
  }
  func.func @transform_3(%arg0: i32) -> (i32, i32, i32, i32) {
    %c0_i32 = arith.constant 0 : i32
    %c0_i32_0 = arith.constant 0 : i32
    %c0_i32_1 = arith.constant 0 : i32
    %c0_i32_2 = arith.constant 0 : i32
    return %arg0, %c0_i32, %c0_i32_0, %c0_i32_1 : i32, i32, i32, i32
  }
}

module attributes {stable_mosaic.version = 11 : i64} {
  func.func @_mlp_kernel(%arg0: i32, %arg1: memref<2x8320xbf16, #tpu.memory_space<vmem>>, %arg2: memref<8320x128xbf16, #tpu.memory_space<vmem>>, %arg3: memref<1x128xf32, #tpu.memory_space<vmem>>, %arg4: memref<128x10xf32, #tpu.memory_space<vmem>>, %arg5: memref<1x10xf32, #tpu.memory_space<vmem>>, %arg6: memref<2x10xf32, #tpu.memory_space<vmem>>, %arg7: memref<2x128xf32, #tpu.memory_space<vmem>>) attributes {dimension_semantics = [#tpu.dimension_semantics<arbitrary>], iteration_bounds = array<i64: 4>, scalar_prefetch = 0 : i64, scratch_operands = 1 : i64, tpu.core_type = #tpu.core_type<tc>, window_params = [{transform_indices = @transform_0, window_bounds = array<i64: 2, 8320>}, {transform_indices = @transform_1, window_bounds = array<i64: 8320, 128>}, {pipeline_mode = #tpu.pipeline_mode<synchronous>, transform_indices = @transform_2, window_bounds = array<i64: 1, 128>}, {pipeline_mode = #tpu.pipeline_mode<synchronous>, transform_indices = @transform_3, window_bounds = array<i64: 128, 10>}, {pipeline_mode = #tpu.pipeline_mode<synchronous>, transform_indices = @transform_4, window_bounds = array<i64: 1, 10>}, {pipeline_mode = #tpu.pipeline_mode<synchronous>, transform_indices = @transform_5, window_bounds = array<i64: 2, 10>}]} {
    %c0_i32 = arith.constant 0 : i32
    %0 = arith.cmpi eq, %arg0, %c0_i32 : i32
    %1 = arith.extui %0 : i1 to i32
    %c0_i32_0 = arith.constant 0 : i32
    %2 = arith.cmpi ne, %1, %c0_i32_0 : i32
    scf.if %2 {
      %cst_9 = arith.constant 0.000000e+00 : f32
      %12 = vector.broadcast %cst_9 : f32 to vector<2x128xf32>
      %c0_10 = arith.constant 0 : index
      %c0_11 = arith.constant 0 : index
      %13 = vector.load %arg7[%c0_10, %c0_11] : memref<2x128xf32, #tpu.memory_space<vmem>>, vector<2x128xf32>
      tpu.vector_store %arg7[%c0_10, %c0_11], %12 {strides = array<i32>} : memref<2x128xf32, #tpu.memory_space<vmem>>, vector<2x128xf32>,
    } else {
    }
    %c0 = arith.constant 0 : index
    %c0_1 = arith.constant 0 : index
    %3 = vector.load %arg7[%c0, %c0_1] : memref<2x128xf32, #tpu.memory_space<vmem>>, vector<2x128xf32>
    %c0_2 = arith.constant 0 : index
    %c0_3 = arith.constant 0 : index
    %4 = vector.load %arg1[%c0_2, %c0_3] : memref<2x8320xbf16, #tpu.memory_space<vmem>>, vector<2x8320xbf16>
    %c0_4 = arith.constant 0 : index
    %c0_5 = arith.constant 0 : index
    %5 = vector.load %arg2[%c0_4, %c0_5] : memref<8320x128xbf16, #tpu.memory_space<vmem>>, vector<8320x128xbf16>
    %cst = arith.constant dense<0.000000e+00> : vector<2x128xf32>
    %6 = tpu.matmul %4, %5, %cst {dimension_numbers = #tpu.dot_dimension_numbers<[1], [0], [0], [1], [0, 0, 1, 1], [], []>} : vector<2x8320xbf16>, vector<8320x128xbf16>, vector<2x128xf32> -> vector<2x128xf32>
    %7 = arith.addf %3, %6 : vector<2x128xf32>
    %c0_6 = arith.constant 0 : index
    %c0_7 = arith.constant 0 : index
    %8 = vector.load %arg7[%c0_6, %c0_7] : memref<2x128xf32, #tpu.memory_space<vmem>>, vector<2x128xf32>
    tpu.vector_store %arg7[%c0_6, %c0_7], %7 {strides = array<i32>} : memref<2x128xf32, #tpu.memory_space<vmem>>, vector<2x128xf32>,
    %c3_i32 = arith.constant 3 : i32
    %9 = arith.cmpi eq, %arg0, %c3_i32 : i32
    %10 = arith.extui %9 : i1 to i32
    %c0_i32_8 = arith.constant 0 : i32
    %11 = arith.cmpi ne, %10, %c0_i32_8 : i32
    scf.if %11 {
      %c0_9 = arith.constant 0 : index
      %c0_10 = arith.constant 0 : index
      %12 = vector.load %arg7[%c0_9, %c0_10] : memref<2x128xf32, #tpu.memory_space<vmem>>, vector<2x128xf32>
      %c0_11 = arith.constant 0 : index
      %c0_12 = arith.constant 0 : index
      %13 = vector.load %arg3[%c0_11, %c0_12] : memref<1x128xf32, #tpu.memory_space<vmem>>, vector<1x128xf32>
      %14 = vector.broadcast %13 : vector<1x128xf32> to vector<2x128xf32>
      %15 = arith.addf %12, %14 : vector<2x128xf32>
      %cst_13 = arith.constant 0.000000e+00 : f32
      %16 = vector.broadcast %cst_13 : f32 to vector<2x128xf32>
      %17 = arith.maximumf %15, %16 : vector<2x128xf32>
      %c0_14 = arith.constant 0 : index
      %c0_15 = arith.constant 0 : index
      %18 = vector.load %arg4[%c0_14, %c0_15] : memref<128x10xf32, #tpu.memory_space<vmem>>, vector<128x10xf32>
      %cst_16 = arith.constant dense<0.000000e+00> : vector<2x10xf32>
      %19 = tpu.matmul %17, %18, %cst_16 {dimension_numbers = #tpu.dot_dimension_numbers<[1], [0], [0], [1], [0, 0, 1, 1], [], []>} : vector<2x128xf32>, vector<128x10xf32>, vector<2x10xf32> -> vector<2x10xf32>
      %c0_17 = arith.constant 0 : index
      %c0_18 = arith.constant 0 : index
      %20 = vector.load %arg5[%c0_17, %c0_18] : memref<1x10xf32, #tpu.memory_space<vmem>>, vector<1x10xf32>
      %21 = vector.broadcast %20 : vector<1x10xf32> to vector<2x10xf32>
      %22 = arith.addf %19, %21 : vector<2x10xf32>
      %cst_19 = arith.constant dense<0xFF800000> : vector<2xf32>
      %23 = vector.multi_reduction <maximumf>, %22, %cst_19 [1] : vector<2x10xf32> to vector<2xf32>
      %24 = vector.shape_cast %23 : vector<2xf32> to vector<2x1xf32>
      %25 = vector.broadcast %24 : vector<2x1xf32> to vector<2x10xf32>
      %26 = arith.subf %22, %25 : vector<2x10xf32>
      %27 = math.exp %26 : vector<2x10xf32>
      %cst_20 = arith.constant dense<0.000000e+00> : vector<2xf32>
      %28 = vector.multi_reduction <add>, %27, %cst_20 [1] : vector<2x10xf32> to vector<2xf32>
      %29 = vector.shape_cast %28 : vector<2xf32> to vector<2x1xf32>
      %30 = vector.broadcast %29 : vector<2x1xf32> to vector<2x10xf32>
      %31 = arith.divf %27, %30 : vector<2x10xf32>
      %c0_21 = arith.constant 0 : index
      %c0_22 = arith.constant 0 : index
      %32 = vector.load %arg6[%c0_21, %c0_22] : memref<2x10xf32, #tpu.memory_space<vmem>>, vector<2x10xf32>
      tpu.vector_store %arg6[%c0_21, %c0_22], %31 {strides = array<i32>} : memref<2x10xf32, #tpu.memory_space<vmem>>, vector<2x10xf32>,
    } else {
    }
    return
  }
  func.func @transform_0(%arg0: i32) -> (i32, i32) {
    %c0_i32 = arith.constant 0 : i32
    %c0_i32_0 = arith.constant 0 : i32
    return %c0_i32, %arg0 : i32, i32
  }
  func.func @transform_1(%arg0: i32) -> (i32, i32) {
    %c0_i32 = arith.constant 0 : i32
    %c0_i32_0 = arith.constant 0 : i32
    return %arg0, %c0_i32 : i32, i32
  }
  func.func @transform_2(%arg0: i32) -> (i32, i32) {
    %c0_i32 = arith.constant 0 : i32
    %c0_i32_0 = arith.constant 0 : i32
    %c0_i32_1 = arith.constant 0 : i32
    return %c0_i32, %c0_i32_0 : i32, i32
  }
  func.func @transform_3(%arg0: i32) -> (i32, i32) {
    %c0_i32 = arith.constant 0 : i32
    %c0_i32_0 = arith.constant 0 : i32
    %c0_i32_1 = arith.constant 0 : i32
    return %c0_i32, %c0_i32_0 : i32, i32
  }
  func.func @transform_4(%arg0: i32) -> (i32, i32) {
    %c0_i32 = arith.constant 0 : i32
    %c0_i32_0 = arith.constant 0 : i32
    %c0_i32_1 = arith.constant 0 : i32
    return %c0_i32, %c0_i32_0 : i32, i32
  }
  func.func @transform_5(%arg0: i32) -> (i32, i32) {
    %c0_i32 = arith.constant 0 : i32
    %c0_i32_0 = arith.constant 0 : i32
    %c0_i32_1 = arith.constant 0 : i32
    return %c0_i32, %c0_i32_0 : i32, i32
  }
}

</mosaic_0001>

<bundles_post_ra>
// kernel: forward.4
= control target key start
LH: loop header
LB: loop body
LE: loop exit
PB: predicated region body
PF: predicated region fallthrough
CT: control target
= control target key end

     0   :  { %s1134_s12 = smov 0   ;;  %s1559_s0 = inlined_call_operand.vmem [shape: f32[2,41,112,16], index: 0, kind: input, shape index: {}]   ;;  %s1560_s1 = inlined_call_operand.vmem [shape: bf16[48,256], index: 1, kind: input, shape index: {}]   ;;  %s1561_s2 = inlined_call_operand.vmem [shape: f32[1,256], index: 2, kind: input, shape index: {}]   ;;  %s1562_s3 = inlined_call_operand.vmem [shape: bf16[2,41,110,64], index: 3, kind: output, shape index: {}]  }
   0x1 LB: > { %s865_s13 = sadd.s32 4294967295, %s1104_s12   ;;  %p869_p0 = scmp.ge.s32.totalorder %s1104_s12, 1  ;;  %s1104_s12 = sphi %s1134_s12, %s13_s12  }
   0x2   : > { %p137_p1 = scmp.lt.s32.totalorder %s1104_s12, 3 }
   0x4   : > { %p138_p2 = pnand %p869_p0, %p137_p1 }
   0x5   : > { %p161_p3 = scmp.lt.s32.totalorder (!%p138_p2), %s865_s13, 1  ;;  %s1152_s22 = smov (!%p138_p2), 0  }
   0x6   : > { %141 = sbr.rel (%p138_p2) target bundleno = 524 (0x20c), region = 32 }
   0xd   : > { %s1580_s13 = smov (!%p161_p3, %s865_s13), 1 }
   0xe   : > { %s923_s14 = smul.u32 4592, %s1580_s13 }
   0xf   : > { %s924_s15 = smul.u32 2296, %s1580_s13 }
  0x10   : > { %s1145_s18 = scalar_lea.vmem %s1559_s0, %s923_s14 }
  0x11   : > { %s1150_s21 = scalar_lea.vmem %s1562_s3, %s924_s15 }
  0x12 LB: >> { %v1085_v0 = vld [vmem:[%s1560_s1 + $0x4] ss:$8 sps:$4 sm:$0xff]   ;;  %v1087_v1 = vld [vmem:[%s1560_s1] ss:$8 sps:$4 sm:$0xff]   ;;  %s178_s27 = smul.u32 112, %s1108_s22  ;;  %v1110_v8 = vmov 0   ;;  %s1108_s22 = sphi %s1152_s22, %s177_s22  }
  0x13   : >> { %441 = vmatprep.subr.bf16.mxu0 %v1085_v0  ;;  %917 = vmatprep.subr.bf16.mxu1 %v1085_v0  ;;  %v1088_v2 = vld [vmem:[%s1560_s1 + $0x14] ss:$8 sps:$4 sm:$0xff]   ;;  %v1090_v3 = vld [vmem:[%s1560_s1 + $0x10] ss:$8 sps:$4 sm:$0xff]   ;;  %v1091_v4 = vld [vmem:[%s1560_s1 + $0x24] ss:$8 sps:$4 sm:$0xff]  }
  0x14   : >> { %442 = vmatpush1.bf16.msra.mxu0 %v1087_v1  ;;  %920 = vmatpush1.bf16.msra.mxu1 %v1087_v1  ;;  %s1171_s5 = scalar_lea.vmem %s1145_s18, %s178_s27  ;;  %v1093_v16 = vld [vmem:[%s1560_s1 + $0x20] ss:$8 sps:$4 sm:$0xff]   ;;  %s1111_s10 = smov 16   ;;  %vm334_vm0 = vcmask 130048   ;;  %vm349_vm1 = vcmask 261120   ;;  %vm419_vm2 = vcmask 392192  }
  0x15   : >> { %443 = vmatprep.subr.bf16.mxu0 %v1088_v2  ;;  %918 = vmatprep.subr.bf16.mxu1 %v1088_v2  ;;  %v196_v5 = vld [vmem:[%s1171_s5 + $0x11] sm:$0xff]  ;;  %v197_v6 = vld [vmem:[%s1171_s5 + $0x19] sm:$0xff]  ;;  %v194_v7 = vld [vmem:[%s1171_s5 + $0x1] sm:$0xff]  ;;  %s1112_s11 = smov 32   ;;  %s1113_s15 = smov 64   ;;  %vm785_vm3 = vcmask 519168  }
  0x16   : >> { %473 = vmatprep.mubr.bf16.mxu0 %v1110_v8  ;;  %513 = vmatprep.mubr.bf16.mxu1 %v1110_v8  ;;  %v955_v9 = vpack.i.bf16 %v197_v6, %v196_v5  ;;  %v195_v10 = vld [vmem:[%s1171_s5 + $0x9] sm:$0xff]  ;;  %v202_v11 = vld [vmem:[%s1171_s5 + $0x41] sm:$0xff]  ;;  %v210_v21 = vld [vmem:[%s1171_s5 + $0x12] sm:$0xff]  ;;  %s916_s16 = smul.u32 56, %s1108_s22  ;;  %vm799_vm4 = vcmask 518144   ;;  %s177_s22 = sadd.s32 1, %s1108_s22  }
  0x17   : >> { %v203_v12 = vld [vmem:[%s1171_s5 + $0x49] sm:$0xff]  ;;  %v945_v13 = vpack.i.bf16 %v195_v10, %v194_v7  ;;  %v211_v22 = vld [vmem:[%s1171_s5 + $0x1a] sm:$0xff]  ;;  %v204_v25 = vld [vmem:[%s1171_s5 + $0x51] sm:$0xff]  ;;  %p174_p4 = scmp.ge.s32.totalorder %s177_s22, 41  }
  0x18   : >> { %v208_v14 = vld [vmem:[%s1171_s5 + $0x2] sm:$0xff]  ;;  %v209_v15 = vld [vmem:[%s1171_s5 + $0xa] sm:$0xff]  ;;  %444 = vmatpush1.bf16.msra.mxu0 %v1090_v3  ;;  %921 = vmatpush1.bf16.msra.mxu1 %v1090_v3  ;;  %v960_v17 = vpack.i.bf16 %v203_v12, %v202_v11  ;;  %v965_v24 = vpack.i.bf16 %v211_v22, %v210_v21  ;;  %v205_v26 = vld [vmem:[%s1171_s5 + $0x59] sm:$0xff]  ;;  %s1476_s17 = scalar_lea.vmem %s1150_s21, %s916_s16 }
  0x19   : >> { %956 = vrot.lane.b32.xlu1 %v955_v9, %s1111_s10  ;;  %445 = vmatprep.subr.bf16.mxu0 %v1091_v4  ;;  %v950_v18 = vpack.i.bf16 %v209_v15, %v208_v14  ;;  %v216_v19 = vld [vmem:[%s1171_s5 + $0x42] sm:$0xff]  ;;  %v217_v20 = vld [vmem:[%s1171_s5 + $0x4a] sm:$0xff]  ;;  %v980_v29 = vpack.i.bf16 %v205_v26, %v204_v25  ;;  %v218_v31 = vld [vmem:[%s1171_s5 + $0x52] sm:$0xff] }
  0x1a   : >> { %946 = vrot.lane.b32.xlu0 %v945_v13, %s1111_s10  ;;  %919 = vmatprep.subr.bf16.mxu1 %v1091_v4  ;;  %v970_v23 = vpack.i.bf16 %v217_v20, %v216_v19  ;;  %v198_v27 = vld [vmem:[%s1171_s5 + $0x21] sm:$0xff]  ;;  %v199_v28 = vld [vmem:[%s1171_s5 + $0x29] sm:$0xff]  ;;  %v200_v39 = vld [vmem:[%s1171_s5 + $0x31] sm:$0xff] }
  0x1b   : >> { %v975_v30 = vpack.i.bf16 %v199_v28, %v198_v27  ;;  %v219_v32 = vld [vmem:[%s1171_s5 + $0x5a] sm:$0xff]  ;;  %v212_v33 = vld [vmem:[%s1171_s5 + $0x22] sm:$0xff]  ;;  %v213_v34 = vld [vmem:[%s1171_s5 + $0x2a] sm:$0xff] }
  0x1c   : >> { %446 = vmatpush1.bf16.msra.mxu0 %v1093_v16  ;;  %922 = vmatpush1.bf16.msra.mxu1 %v1093_v16  ;;  %v990_v35 = vpack.i.bf16 %v219_v32, %v218_v31  ;;  %v985_v36 = vpack.i.bf16 %v213_v34, %v212_v33  ;;  %v206_v37 = vld [vmem:[%s1171_s5 + $0x61] sm:$0xff]  ;;  %v207_v38 = vld [vmem:[%s1171_s5 + $0x69] sm:$0x3f]  ;;  %v201_v40 = vld [vmem:[%s1171_s5 + $0x39] sm:$0xff] }
  0x1d   : >> { %961 = vrot.lane.b32.xlu1 %v960_v17, %s1111_s10  ;;  %v1000_v41 = vpack.i.bf16 %v207_v38, %v206_v37  ;;  %v995_v42 = vpack.i.bf16 %v201_v40, %v200_v39  ;;  %v220_v43 = vld [vmem:[%s1171_s5 + $0x62] sm:$0xff]  ;;  %v221_v44 = vld [vmem:[%s1171_s5 + $0x6a] sm:$0x3f]  ;;  %v214_v45 = vld [vmem:[%s1171_s5 + $0x32] sm:$0xff] }
  0x1e   : >> { %951 = vrot.lane.b32.xlu0 %v950_v18, %s1112_s11  ;;  %v215_v46 = vld [vmem:[%s1171_s5 + $0x3a] sm:$0xff]  ;;  %v1010_v47 = vpack.i.bf16 %v221_v44, %v220_v43  ;;  %v181_v54 = vld [vmem:[%s1171_s5 + $0x8] sm:$0xff]  ;;  %v182_v11 = vld [vmem:[%s1171_s5 + $0x10] sm:$0xff] }
  0x1f   : >> { %v1005_v48 = vpack.i.bf16 %v215_v46, %v214_v45  ;;  %v180_v53 = vld [vmem:[%s1171_s5] sm:$0xff]  ;;  %v189_v0 = vld [vmem:[%s1171_s5 + $0x48] sm:$0xff]  ;;  %v183_v12 = vld [vmem:[%s1171_s5 + $0x18] sm:$0xff] }
  0x20   : >> { %v188_v63 = vld [vmem:[%s1171_s5 + $0x40] sm:$0xff]  ;;  %v190_v28 = vld [vmem:[%s1171_s5 + $0x50] sm:$0xff]  ;;  %v185_v33 = vld [vmem:[%s1171_s5 + $0x28] sm:$0xff] }
  0x21   : >> { %971 = vrot.lane.b32.xlu1 %v970_v23, %s1112_s11  ;;  %v184_v32 = vld [vmem:[%s1171_s5 + $0x20] sm:$0xff] }
  0x22   : >> { %966 = vrot.lane.b32.xlu0 %v965_v24, %s1112_s11 }
  0x25   : >> { %981 = vrot.lane.b32.xlu1 %v980_v29, %s1111_s10  ;;  %v191_v29 = vld [vmem:[%s1171_s5 + $0x58] sm:$0xff] }
  0x26   : >> { %976 = vrot.lane.b32.xlu0 %v975_v30, %s1111_s10 }
  0x29   : >> { %991 = vrot.lane.b32.xlu1 %v990_v35, %s1112_s11 }
  0x2a   : >> { %986 = vrot.lane.b32.xlu0 %v985_v36, %s1112_s11 }
  0x2d   : >> { %1001 = vrot.lane.b32.xlu1 %v1000_v41, %s1111_s10 }
  0x2e   : >> { %996 = vrot.lane.b32.xlu0 %v995_v42, %s1111_s10 }
  0x31   : >> { %1011 = vrot.lane.b32.xlu1 %v1010_v47, %s1112_s11 }
  0x32   : >> { %1006 = vrot.lane.b32.xlu0 %v1005_v48, %s1112_s11 }
  0x8b   : >> { %v957_v49 = vpop.permute.xlu1 %956 }
  0x8c   : >> { %v947_v50 = vpop.permute.xlu0 %946  ;;  %v959_v1 = vunpack.i.h.bf16 %v957_v49  ;;  %v958_v5 = vunpack.i.l.bf16 %v957_v49 }
  0x8d   : >> { %v949_v51 = vunpack.i.h.bf16 %v947_v50  ;;  %v948_v52 = vunpack.i.l.bf16 %v947_v50 }
  0x8e   : >> { %v337_v21 = vsel %vm334_vm0, %v182_v11, %v958_v5  ;;  %v338_v22 = vsel %vm334_vm0, %v183_v12, %v959_v1 }
  0x8f   : >> { %v962_v55 = vpop.permute.xlu1 %961  ;;  %v335_v61 = vsel %vm334_vm0, %v180_v53, %v948_v52  ;;  %v336_v62 = vsel %vm334_vm0, %v181_v54, %v949_v51  ;;  %v192_v54 = vld [vmem:[%s1171_s5 + $0x60] sm:$0xff] }
  0x90   : >> { %v952_v56 = vpop.permute.xlu0 %951  ;;  %v964_v57 = vunpack.i.h.bf16 %v962_v55  ;;  %v963_v58 = vunpack.i.l.bf16 %v962_v55  ;;  %v193_v55 = vld [vmem:[%s1171_s5 + $0x68] sm:$0x3f] }
  0x91   : >> { %v954_v59 = vunpack.i.h.bf16 %v952_v56  ;;  %v953_v60 = vunpack.i.l.bf16 %v952_v56 }
  0x92   : >> { %v343_v13 = vsel %vm334_vm0, %v188_v63, %v963_v58  ;;  %v344_v14 = vsel %vm334_vm0, %v189_v0, %v964_v57  ;;  %v186_v58 = vld [vmem:[%s1171_s5 + $0x30] sm:$0xff] }
  0x93   : >> { %v350_v2 = vsel %vm349_vm1, %v335_v61, %v953_v60  ;;  %v351_v3 = vsel %vm349_vm1, %v336_v62, %v954_v59  ;;  %v972_v4 = vpop.permute.xlu1 %971  ;;  %v187_v59 = vld [vmem:[%s1171_s5 + $0x38] sm:$0xff] }
  0x94   : >> { %v364_v6 = vpack.c.bf16 %v351_v3, %v350_v2  ;;  %v974_v7 = vunpack.i.h.bf16 %v972_v4  ;;  %v973_v9 = vunpack.i.l.bf16 %v972_v4  ;;  %v967_v10 = vpop.permute.xlu0 %966 }
  0x95   : >> { %v969_v15 = vunpack.i.h.bf16 %v967_v10  ;;  %v968_v16 = vunpack.i.l.bf16 %v967_v10 }
  0x96   : >> { %v358_v17 = vsel %vm349_vm1, %v343_v13, %v973_v9  ;;  %v359_v18 = vsel %vm349_vm1, %v344_v14, %v974_v7  ;;  %878 = vmatmul.mubr.msk.bf16.vlgmr.msra.gmra.mrb[0].mxu0 %vm419_vm2, %v364_v6  ;;  %v379_v14 = vlaneseq }
  0x97   : >> { %v368_v19 = vpack.c.bf16 %v359_v18, %v358_v17  ;;  %v982_v20 = vpop.permute.xlu1 %981  ;;  %483 = vmatprep.mubr.bf16.mxu0 %v1110_v8  ;;  %v352_v24 = vsel %vm349_vm1, %v337_v21, %v968_v16  ;;  %v353_v25 = vsel %vm349_vm1, %v338_v22, %v969_v15  ;;  %v377_v17 = vld [vmem:[%s1561_s2] sm:$0x3] }
  0x98   : >> { %v977_v23 = vpop.permute.xlu0 %976  ;;  %v984_v26 = vunpack.i.h.bf16 %v982_v20  ;;  %v983_v27 = vunpack.i.l.bf16 %v982_v20  ;;  %v365_v35 = vpack.c.bf16 %v353_v25, %v352_v24  ;;  %v380_v15 = vshrl.u32 %v379_v14, 7 }
  0x99   : >> { %882 = vmatmul.mubr.msk.bf16.vlgmr.msra.gmra.mrb[0].mxu1 %vm419_vm2, %v368_v19  ;;  %v979_v30 = vunpack.i.h.bf16 %v977_v23  ;;  %v978_v31 = vunpack.i.l.bf16 %v977_v23 }
  0x9a   : >> { %523 = vmatprep.mubr.bf16.mxu1 %v1110_v8  ;;  %v345_v39 = vsel %vm334_vm0, %v190_v28, %v983_v27  ;;  %v346_v40 = vsel %vm334_vm0, %v191_v29, %v984_v26  ;;  %v381_v16 = vsub.s32 0, %v380_v15  ;;  %v385_v18 = vsub.s32 1, %v380_v15 }
  0x9b   : >> { %v992_v34 = vpop.permute.xlu1 %991  ;;  %v339_v43 = vsel %vm334_vm0, %v184_v32, %v978_v31  ;;  %v340_v44 = vsel %vm334_vm0, %v185_v33, %v979_v30 }
  0x9c   : >> { %v994_v36 = vunpack.i.h.bf16 %v992_v34  ;;  %v993_v37 = vunpack.i.l.bf16 %v992_v34  ;;  %v987_v38 = vpop.permute.xlu0 %986  ;;  %v1280_v19 = vrot.slane %v377_v17, %v381_v16 }
  0x9d   : >> { %v989_v41 = vunpack.i.h.bf16 %v987_v38  ;;  %v988_v42 = vunpack.i.l.bf16 %v987_v38 }
  0x9e   : >> { %v360_v45 = vsel %vm349_vm1, %v345_v39, %v993_v37  ;;  %v361_v46 = vsel %vm349_vm1, %v346_v40, %v994_v36  ;;  %879 = vmatmul.mubr.msk.bf16.gmra.mrb[4].mxu0 %vm419_vm2, %v365_v35 }
  0x9f   : >> { %v369_v47 = vpack.c.bf16 %v361_v46, %v360_v45  ;;  %v1002_v48 = vpop.permute.xlu1 %1001  ;;  %493 = vmatprep.mubr.bf16.mxu0 %v1110_v8  ;;  %v354_v50 = vsel %vm349_vm1, %v339_v43, %v988_v42  ;;  %v355_v51 = vsel %vm349_vm1, %v340_v44, %v989_v41 }
  0xa0   : >> { %v997_v49 = vpop.permute.xlu0 %996  ;;  %v1004_v52 = vunpack.i.h.bf16 %v1002_v48  ;;  %v1003_v53 = vunpack.i.l.bf16 %v1002_v48  ;;  %v366_v61 = vpack.c.bf16 %v355_v51, %v354_v50 }
  0xa1   : >> { %883 = vmatmul.mubr.msk.bf16.gmra.mrb[4].mxu1 %vm419_vm2, %v369_v47  ;;  %v999_v56 = vunpack.i.h.bf16 %v997_v49  ;;  %v998_v57 = vunpack.i.l.bf16 %v997_v49 }
  0xa2   : >> { %533 = vmatprep.mubr.bf16.mxu1 %v1110_v8  ;;  %v347_v1 = vsel %vm334_vm0, %v192_v54, %v1003_v53  ;;  %v348_v2 = vsel %vm334_vm0, %v193_v55, %v1004_v52 }
  0xa3   : >> { %v1012_v60 = vpop.permute.xlu1 %1011  ;;  %v341_v5 = vsel %vm334_vm0, %v186_v58, %v998_v57  ;;  %v342_v6 = vsel %vm334_vm0, %v187_v59, %v999_v56 }
  0xa4   : >> { %v1014_v62 = vunpack.i.h.bf16 %v1012_v60  ;;  %v1013_v63 = vunpack.i.l.bf16 %v1012_v60  ;;  %v1007_v0 = vpop.permute.xlu0 %1006 }
  0xa5   : >> { %v1009_v3 = vunpack.i.h.bf16 %v1007_v0  ;;  %v1008_v4 = vunpack.i.l.bf16 %v1007_v0 }
  0xa6   : >> { %v362_v7 = vsel %vm349_vm1, %v347_v1, %v1013_v63  ;;  %v363_v9 = vsel %vm349_vm1, %v348_v2, %v1014_v62  ;;  %880 = vmatmul.mubr.msk.bf16.gmra.mrb[8].mxu0 %vm419_vm2, %v366_v61 }
  0xa7   : >> { %v370_v10 = vpack.c.bf16 %v363_v9, %v362_v7  ;;  %503 = vmatprep.mubr.bf16.mxu0 %v1110_v8  ;;  %v356_v11 = vsel %vm349_vm1, %v341_v5, %v1008_v4  ;;  %v357_v12 = vsel %vm349_vm1, %v342_v6, %v1009_v3  ;;  %v1282_v8 = vrot.slane %v377_v17, %v385_v18 }
  0xa8   : >> { %v367_v13 = vpack.c.bf16 %v357_v12, %v356_v11 }
  0xa9   : >> { %884 = vmatmul.mubr.msk.bf16.gmra.mrb[8].mxu1 %vm419_vm2, %v370_v10 }
  0xae   : >> { %881 = vmatmul.mubr.msk.bf16.gmra.mrb[12].mxu0 %vm419_vm2, %v367_v13 }
 0x169   : >> { %v475_v20 = vpop.f32.mrb[0].mxu0 }
 0x16a   : >> { %v1285_v21 = vadd.f32 %v475_v20, %v1280_v19  ;;  %v477_v22 = vpop.f32.mrb[1].mxu0 }
 0x16b   : >> { %v1288_v23 = vadd.f32 %v477_v22, %v1282_v8  ;;  %v479_v24 = vpop.f32.mrb[2].mxu0 }
 0x16c   : >> { %v1291_v25 = vadd.f32 %v479_v24, %v1280_v19  ;;  %v481_v26 = vpop.f32.mrb[3].mxu0  ;;  %v515_v27 = vpop.f32.mrb[0].mxu1  ;;  %v544_v31 = vmax.f32 %v1285_v21, 0.0 }
 0x16d   : >> { %v1294_v28 = vadd.f32 %v481_v26, %v1282_v8  ;;  %v1297_v29 = vadd.f32 %v515_v27, %v1280_v19  ;;  %v517_v30 = vpop.f32.mrb[1].mxu1  ;;  %v545_v35 = vmax.f32 %v1288_v23, 0.0 }
 0x16e   : >> { %v546_v32 = vmax.f32 %v1291_v25, 0.0  ;;  %v1302_v33 = vadd.f32 %v517_v30, %v1282_v8  ;;  %v519_v34 = vpop.f32.mrb[2].mxu1 }
 0x16f   : >> { %v547_v36 = vmax.f32 %v1294_v28, 0.0  ;;  %v1307_v37 = vadd.f32 %v519_v34, %v1280_v19  ;;  %v521_v38 = vpop.f32.mrb[3].mxu1  ;;  %v560_v42 = vmax.f32 %v1297_v29, 0.0 }
 0x170   : >> { %v1015_v39 = vpack.i.bf16 %v546_v32, %v544_v31  ;;  %v1314_v40 = vadd.f32 %v521_v38, %v1282_v8  ;;  %v561_v45 = vmax.f32 %v1302_v33, 0.0 }
 0x171   : >> { %v1025_v41 = vpack.i.bf16 %v547_v36, %v545_v35  ;;  %v562_v43 = vmax.f32 %v1307_v37, 0.0  ;;  %v485_v44 = vpop.f32.mrb[4].mxu0 }
 0x172   : >> { %v563_v46 = vmax.f32 %v1314_v40, 0.0  ;;  %v1325_v47 = vadd.f32 %v485_v44, %v1280_v19  ;;  %v487_v48 = vpop.f32.mrb[5].mxu0  ;;  %1016 = vrot.lane.b32.xlu0 %v1015_v39, %s1113_s15 }
 0x173   : >> { %v1020_v49 = vpack.i.bf16 %v562_v43, %v560_v42  ;;  %v1333_v50 = vadd.f32 %v487_v48, %v1282_v8  ;;  %v489_v51 = vpop.f32.mrb[6].mxu0  ;;  %1026 = vrot.lane.b32.xlu1 %v1025_v41, %s1113_s15 }
 0x174   : >> { %v1030_v52 = vpack.i.bf16 %v563_v46, %v561_v45  ;;  %v1341_v53 = vadd.f32 %v489_v51, %v1280_v19  ;;  %v491_v54 = vpop.f32.mrb[7].mxu0  ;;  %v525_v55 = vpop.f32.mrb[4].mxu1  ;;  %v548_v59 = vmax.f32 %v1325_v47, 0.0 }
 0x175   : >> { %v1344_v56 = vadd.f32 %v491_v54, %v1282_v8  ;;  %v1347_v57 = vadd.f32 %v525_v55, %v1280_v19  ;;  %v527_v58 = vpop.f32.mrb[5].mxu1  ;;  %v549_v62 = vmax.f32 %v1333_v50, 0.0 }
 0x176   : >> { %v550_v60 = vmax.f32 %v1341_v53, 0.0  ;;  %1021 = vrot.lane.b32.xlu0 %v1020_v49, %s1113_s15  ;;  %v529_v61 = vpop.f32.mrb[6].mxu1 }
 0x177   : >> { %v551_v63 = vmax.f32 %v1344_v56, 0.0  ;;  %v1355_v0 = vadd.f32 %v529_v61, %v1280_v19  ;;  %1031 = vrot.lane.b32.xlu1 %v1030_v52, %s1113_s15  ;;  %v531_v1 = vpop.f32.mrb[7].mxu1  ;;  %v1569_v4 = vmax.f32 %v1347_v57, 0.0 }
 0x178   : >> { %v1035_v2 = vpack.i.bf16 %v550_v60, %v548_v59 }
 0x179   : >> { %v1045_v3 = vpack.i.bf16 %v551_v63, %v549_v62  ;;  %v1570_v5 = vmax.f32 %v1355_v0, 0.0  ;;  %v495_v6 = vpop.f32.mrb[8].mxu0 }
 0x17a   : >> { %v1369_v7 = vadd.f32 %v495_v6, %v1280_v19  ;;  %v497_v9 = vpop.f32.mrb[9].mxu0  ;;  %v1426_v6 = vadd.f32 %v531_v1, %v1282_v8 }
 0x17b   : >> { %v1040_v10 = vpack.i.bf16 %v1570_v5, %v1569_v4  ;;  %v1376_v11 = vadd.f32 %v497_v9, %v1282_v8  ;;  %v499_v12 = vpop.f32.mrb[10].mxu0  ;;  %1036 = vrot.lane.b32.xlu1 %v1035_v2, %s1113_s15  ;;  %1046 = vrot.lane.b32.xlu0 %v1045_v3, %s1113_s15 }
 0x17c   : >> { %v1381_v13 = vadd.f32 %v499_v12, %v1280_v19  ;;  %v501_v14 = vpop.f32.mrb[11].mxu0  ;;  %v535_v15 = vpop.f32.mrb[8].mxu1  ;;  %v552_v20 = vmax.f32 %v1369_v7, 0.0 }
 0x17d   : >> { %v1384_v16 = vadd.f32 %v501_v14, %v1282_v8  ;;  %v1387_v17 = vadd.f32 %v535_v15, %v1280_v19  ;;  %v537_v18 = vpop.f32.mrb[9].mxu1  ;;  %v553_v26 = vmax.f32 %v1376_v11, 0.0  ;;  %v1438_v15 = vadd.f32 %v527_v58, %v1282_v8 }
 0x17e   : >> { %v554_v22 = vmax.f32 %v1381_v13, 0.0  ;;  %v539_v24 = vpop.f32.mrb[10].mxu1 }
 0x17f   : >> { %v555_v27 = vmax.f32 %v1384_v16, 0.0  ;;  %v1394_v30 = vadd.f32 %v539_v24, %v1280_v19  ;;  %1041 = vrot.lane.b32.xlu1 %v1040_v10, %s1113_s15  ;;  %v541_v34 = vpop.f32.mrb[11].mxu1  ;;  %v1563_v41 = vmax.f32 %v1387_v17, 0.0  ;;  %v1432_v10 = vadd.f32 %v537_v18, %v1282_v8 }
 0x180   : >> { %v1050_v38 = vpack.i.bf16 %v554_v22, %v552_v20  ;;  %v1420_v61 = vadd.f32 %v541_v34, %v1282_v8  ;;  %v1566_v34 = vmax.f32 %v1426_v6, 0.0  ;;  %v1565_v58 = vmax.f32 %v1438_v15, 0.0 }
 0x181   : >> { %v1060_v39 = vpack.i.bf16 %v555_v27, %v553_v26  ;;  %v1568_v44 = vmax.f32 %v1394_v30, 0.0  ;;  %v505_v48 = vpop.f32.mrb[12].mxu0 }
 0x182   : >> { %v1408_v49 = vadd.f32 %v505_v48, %v1280_v19  ;;  %v507_v51 = vpop.f32.mrb[13].mxu0  ;;  %1051 = vrot.lane.b32.xlu0 %v1050_v38, %s1113_s15  ;;  %v1567_v24 = vmax.f32 %v1420_v61, 0.0  ;;  %v1075_v48 = vpack.i.bf16 %v1566_v34, %v1565_v58 }
 0x183   : >> { %v1055_v52 = vpack.i.bf16 %v1568_v44, %v1563_v41  ;;  %v1416_v54 = vadd.f32 %v507_v51, %v1282_v8  ;;  %v509_v55 = vpop.f32.mrb[14].mxu0  ;;  %1061 = vrot.lane.b32.xlu1 %v1060_v39, %s1113_s15 }
 0x184   : >> { %v1423_v2 = vadd.f32 %v509_v55, %v1280_v19  ;;  %v511_v3 = vpop.f32.mrb[15].mxu0  ;;  %v556_v12 = vmax.f32 %v1408_v49, 0.0 }
 0x185   : >> { %v1429_v9 = vadd.f32 %v511_v3, %v1282_v8  ;;  %v557_v19 = vmax.f32 %v1416_v54, 0.0  ;;  %v1564_v8 = vmax.f32 %v1432_v10, 0.0 }
 0x186   : >> { %v558_v14 = vmax.f32 %v1423_v2, 0.0  ;;  %1056 = vrot.lane.b32.xlu0 %v1055_v52, %s1113_s15 }
 0x187   : >> { %v559_v1 = vmax.f32 %v1429_v9, 0.0  ;;  %v1080_v39 = vpack.i.bf16 %v1567_v24, %v1564_v8 }
 0x188   : >> { %v1065_v18 = vpack.i.bf16 %v558_v14, %v556_v12 }
 0x189   : >> { %v1070_v38 = vpack.i.bf16 %v559_v1, %v557_v19 }
 0x18a   : >> { %1066 = vrot.lane.b32.xlu1 %v1065_v18, %s1113_s15 }
 0x18b   : >> { %1071 = vrot.lane.b32.xlu0 %v1070_v38, %s1113_s15 }
 0x18e   : >> { %1081 = vrot.lane.b32.xlu1 %v1080_v39, %s1113_s15 }
 0x18f   : >> { %1076 = vrot.lane.b32.xlu0 %v1075_v48, %s1113_s15 }
 0x1e4   : >> { %v1017_v51 = vpop.permute.xlu0 %1016 }
 0x1e5   : >> { %v1019_v52 = vunpack.i.h.bf16 %v1017_v51  ;;  %v1018_v55 = vunpack.i.l.bf16 %v1017_v51  ;;  %v1027_v3 = vpop.permute.xlu1 %1026 }
 0x1e6   : >> { %v1029_v18 = vunpack.i.h.bf16 %v1027_v3  ;;  %v1028_v38 = vunpack.i.l.bf16 %v1027_v3 }
 0x1e7   : >> { %v629_v41 = vmax.f32 %v546_v32, %v1019_v52  ;;  %v628_v8 = vmax.f32 %v544_v31, %v1018_v55 }
 0x1e8   : >> { %v699_v58 = vmax.f32 %v547_v36, %v1029_v18  ;;  %v698_v39 = vmax.f32 %v545_v35, %v1028_v38  ;;  %v1022_v48 = vpop.permute.xlu0 %1021 }
 0x1e9   : >> { %v1024_v34 = vunpack.i.h.bf16 %v1022_v48  ;;  %v1023_v51 = vunpack.i.l.bf16 %v1022_v48  ;;  %v1032_v24 = vpop.permute.xlu1 %1031 }
 0x1ea   : >> { %v712_v44 = vmax.f32 %v628_v8, %v698_v39  ;;  %v713_v4 = vmax.f32 %v629_v41, %v699_v58  ;;  %v1034_v3 = vunpack.i.h.bf16 %v1032_v24  ;;  %v1033_v5 = vunpack.i.l.bf16 %v1032_v24 }
 0x1eb   : >> { %v637_v21 = vmax.f32 %v562_v43, %v1024_v34  ;;  %v636_v23 = vmax.f32 %v560_v42, %v1023_v51 }
 0x1ec   : >> { %v902_v25 = vpack.c.bf16 %v712_v44, %v712_v44  ;;  %v903_v28 = vpack.c.bf16 %v713_v4, %v713_v4  ;;  %v707_v31 = vmax.f32 %v563_v46, %v1034_v3  ;;  %v706_v32 = vmax.f32 %v561_v45, %v1033_v5 }
 0x1ed   : >> { %v1037_v35 = vpop.permute.xlu1 %1036  ;;  %v1047_v36 = vpop.permute.xlu0 %1046 }
 0x1ee   : >> { %786 = vst.msk [vmem:[%s1476_s17] sm:$0xf] %vm785_vm3, %v902_v25  ;;  %787 = vst.msk [vmem:[%s1476_s17 + $0x4] sm:$0xf] %vm785_vm3, %v903_v28  ;;  %v720_v37 = vmax.f32 %v636_v23, %v706_v32  ;;  %v721_v43 = vmax.f32 %v637_v21, %v707_v31  ;;  %v1039_v29 = vunpack.i.h.bf16 %v1037_v35  ;;  %v1038_v42 = vunpack.i.l.bf16 %v1037_v35 }
 0x1ef   : >> { %v1049_v41 = vunpack.i.h.bf16 %v1047_v36  ;;  %v1048_v4 = vunpack.i.l.bf16 %v1047_v36  ;;  %v1571_v36 = vmax.f32 %v1355_v0, 0.0  ;;  %v1575_v0 = vmax.f32 %v1420_v61, 0.0 }
 0x1f0   : >> { %v910_v44 = vpack.c.bf16 %v720_v37, %v720_v37  ;;  %v911_v40 = vpack.c.bf16 %v721_v43, %v721_v43  ;;  %v631_v33 = vmax.f32 %v550_v60, %v1039_v29  ;;  %v630_v45 = vmax.f32 %v548_v59, %v1038_v42 }
 0x1f1   : >> { %v701_v46 = vmax.f32 %v551_v63, %v1049_v41  ;;  %v700_v5 = vmax.f32 %v549_v62, %v1048_v4  ;;  %v1042_v24 = vpop.permute.xlu1 %1041  ;;  %v1572_v43 = vmax.f32 %v1347_v57, 0.0  ;;  %v1576_v57 = vmax.f32 %v1432_v10, 0.0 }
 0x1f2   : >> { %794 = vst.msk [vmem:[%s1476_s17 + $0x20] sm:$0xf] %vm785_vm3, %v910_v44  ;;  %795 = vst.msk [vmem:[%s1476_s17 + $0x24] sm:$0xf] %vm785_vm3, %v911_v40  ;;  %v1044_v23 = vunpack.i.h.bf16 %v1042_v24  ;;  %v1043_v13 = vunpack.i.l.bf16 %v1042_v24 }
 0x1f3   : >> { %v715_v34 = vmax.f32 %v631_v33, %v701_v46  ;;  %v714_v8 = vmax.f32 %v630_v45, %v700_v5  ;;  %v1577_v46 = vmax.f32 %v1426_v6, 0.0 }
 0x1f4   : >> { %v1052_v53 = vpop.permute.xlu0 %1051  ;;  %v639_v37 = vmax.f32 %v1571_v36, %v1044_v23  ;;  %v638_v29 = vmax.f32 %v1572_v43, %v1043_v13 }
 0x1f5   : >> { %v905_v60 = vpack.c.bf16 %v715_v34, %v715_v34  ;;  %v904_v58 = vpack.c.bf16 %v714_v8, %v714_v8  ;;  %v1054_v47 = vunpack.i.h.bf16 %v1052_v53  ;;  %v1053_v59 = vunpack.i.l.bf16 %v1052_v53  ;;  %v1062_v52 = vpop.permute.xlu1 %1061 }
 0x1f6   : >> { %v1064_v56 = vunpack.i.h.bf16 %v1062_v52  ;;  %v1063_v55 = vunpack.i.l.bf16 %v1062_v52 }
 0x1f7   : >> { %789 = vst.msk [vmem:[%s1476_s17 + $0xc] sm:$0xf] %vm785_vm3, %v905_v60  ;;  %788 = vst.msk [vmem:[%s1476_s17 + $0x8] sm:$0xf] %vm785_vm3, %v904_v58  ;;  %v633_v50 = vmax.f32 %v554_v22, %v1054_v47  ;;  %v632_v62 = vmax.f32 %v552_v20, %v1053_v59 }
 0x1f8   : >> { %v703_v63 = vmax.f32 %v555_v27, %v1064_v56  ;;  %v702_v18 = vmax.f32 %v553_v26, %v1063_v55  ;;  %v1057_v38 = vpop.permute.xlu0 %1056 }
 0x1f9   : >> { %v1059_v20 = vunpack.i.h.bf16 %v1057_v38  ;;  %v1058_v11 = vunpack.i.l.bf16 %v1057_v38 }
 0x1fa   : >> { %v716_v39 = vmax.f32 %v632_v62, %v702_v18  ;;  %v717_v48 = vmax.f32 %v633_v50, %v703_v63 }
 0x1fc   : >> { %v906_v51 = vpack.c.bf16 %v716_v39, %v716_v39  ;;  %v907_v3 = vpack.c.bf16 %v717_v48, %v717_v48  ;;  %v1067_v21 = vpop.permute.xlu1 %1066 }
 0x1fd   : >> { %v1069_v25 = vunpack.i.h.bf16 %v1067_v21  ;;  %v1068_v22 = vunpack.i.l.bf16 %v1067_v21  ;;  %v1072_v28 = vpop.permute.xlu0 %1071 }
 0x1fe   : >> { %790 = vst.msk [vmem:[%s1476_s17 + $0x10] sm:$0xf] %vm785_vm3, %v906_v51  ;;  %791 = vst.msk [vmem:[%s1476_s17 + $0x14] sm:$0xf] %vm785_vm3, %v907_v3  ;;  %v1074_v7 = vunpack.i.h.bf16 %v1072_v28  ;;  %v1073_v16 = vunpack.i.l.bf16 %v1072_v28 }
 0x1ff   : >> { %v635_v26 = vmax.f32 %v558_v14, %v1069_v25  ;;  %v634_v27 = vmax.f32 %v556_v12, %v1068_v22 }
 0x200   : >> { %v705_v31 = vmax.f32 %v559_v1, %v1074_v7  ;;  %v704_v32 = vmax.f32 %v557_v19, %v1073_v16  ;;  %v1082_v35 = vpop.permute.xlu1 %1081  ;;  %v1573_v1 = vmax.f32 %v1394_v30, 0.0  ;;  %v1574_v19 = vmax.f32 %v1387_v17, 0.0 }
 0x201   : >> { %v1084_v42 = vunpack.i.h.bf16 %v1082_v35  ;;  %v1083_v41 = vunpack.i.l.bf16 %v1082_v35  ;;  %v1077_v2 = vpop.permute.xlu0 %1076  ;;  %v1578_v30 = vmax.f32 %v1438_v15, 0.0 }
 0x202   : >> { %v719_v49 = vmax.f32 %v635_v26, %v705_v31  ;;  %v718_v12 = vmax.f32 %v634_v27, %v704_v32  ;;  %v1079_v14 = vunpack.i.h.bf16 %v1077_v2  ;;  %v1078_v9 = vunpack.i.l.bf16 %v1077_v2 }
 0x203   : >> { %v641_v54 = vmax.f32 %v1573_v1, %v1059_v20  ;;  %v640_v4 = vmax.f32 %v1574_v19, %v1058_v11  ;;  %v711_v44 = vmax.f32 %v1575_v0, %v1084_v42  ;;  %v710_v40 = vmax.f32 %v1576_v57, %v1083_v41 }
 0x204   : >> { %v909_v33 = vpack.c.bf16 %v719_v49, %v719_v49  ;;  %v908_v45 = vpack.c.bf16 %v718_v12, %v718_v12  ;;  %v709_v5 = vmax.f32 %v1577_v46, %v1079_v14  ;;  %v708_v24 = vmax.f32 %v1578_v30, %v1078_v9 }
 0x205   : >> { %v724_v17 = vmax.f32 %v640_v4, %v710_v40  ;;  %v725_v34 = vmax.f32 %v641_v54, %v711_v44  ;;  %176 = sbr.rel (!%p174_p4) target bundleno = 18 (0x12), region = 71 }
 0x206   : >> { %793 = vst.msk [vmem:[%s1476_s17 + $0x1c] sm:$0xf] %vm785_vm3, %v909_v33  ;;  %792 = vst.msk [vmem:[%s1476_s17 + $0x18] sm:$0xf] %vm785_vm3, %v908_v45  ;;  %v723_v61 = vmax.f32 %v639_v37, %v709_v5  ;;  %v722_v10 = vmax.f32 %v638_v29, %v708_v24 }
 0x207   : >> { %v914_v8 = vpack.c.bf16 %v724_v17, %v724_v17  ;;  %v915_v53 = vpack.c.bf16 %v725_v34, %v725_v34 }
 0x208   : >> { %v913_v60 = vpack.c.bf16 %v723_v61, %v723_v61  ;;  %v912_v58 = vpack.c.bf16 %v722_v10, %v722_v10 }
 0x209   : >> { %798 = vst.msk [vmem:[%s1476_s17 + $0x30] sm:$0xf] %vm785_vm3, %v914_v8 }
 0x20a   : >> { %800 = vst.msk [vmem:[%s1476_s17 + $0x34] sm:$0x7] %vm799_vm4, %v915_v53 }
 0x20b   : >> { %797 = vst.msk [vmem:[%s1476_s17 + $0x2c] sm:$0xf] %vm785_vm3, %v913_v60  ;;  %796 = vst.msk [vmem:[%s1476_s17 + $0x28] sm:$0xf] %vm785_vm3, %v912_v58 }
 0x20c PF: > { %s13_s12 = sadd.s32 1, %s1104_s12  }
 0x20d   : > { %p10_p5 = scmp.ge.s32.totalorder %s13_s12, 4  }
 0x20f   :  { %12 = sbr.rel (!%p10_p5) target bundleno = 1 (0x1), region = 82 }

// kernel: forward.5
= control target key start
LH: loop header
LB: loop body
LE: loop exit
PB: predicated region body
PF: predicated region fallthrough
CT: control target
= control target key end

     0   :  { %s2228_s12 = smov 0   ;;  %s2827_s0 = inlined_call_operand.vmem [shape: bf16[2,41,110,64], index: 0, kind: input, shape index: {}]   ;;  %s2828_s1 = inlined_call_operand.vmem [shape: bf16[3,192,256], index: 1, kind: input, shape index: {}]   ;;  %s2829_s2 = inlined_call_operand.vmem [shape: f32[1,256], index: 2, kind: input, shape index: {}]   ;;  %s2830_s3 = inlined_call_operand.vmem [shape: bf16[2,20,54,128], index: 3, kind: output, shape index: {}]  }
   0x1 LB: > { %s1672_s13 = sadd.s32 4294967295, %s2201_s12   ;;  %p1676_p0 = scmp.ge.s32.totalorder %s2201_s12, 1  ;;  %s2201_s12 = sphi %s2228_s12, %s13_s12  }
   0x2   : > { %p137_p1 = scmp.lt.s32.totalorder %s2201_s12, 3 }
   0x4   : > { %p138_p2 = pnand %p1676_p0, %p137_p1 }
   0x5   : > { %p161_p3 = scmp.lt.s32.totalorder (!%p138_p2), %s1672_s13, 1  ;;  %s2246_s22 = smov (!%p138_p2), 0  }
   0x6   : > { %141 = sbr.rel (%p138_p2) target bundleno = 476 (0x1dc), region = 32 }
   0xd   : > { %s2833_s13 = smov (!%p161_p3, %s1672_s13), 1 }
   0xe   : > { %s2029_s14 = smul.u32 2296, %s2833_s13 }
   0xf   : > { %s2030_s15 = smul.u32 560, %s2833_s13 }
  0x10   : > { %s2239_s18 = scalar_lea.vmem %s2827_s0, %s2029_s14 }
  0x11   : > { %s2244_s21 = scalar_lea.vmem %s2830_s3, %s2030_s15 }
  0x12 LB: >> { %v2083_v0 = vld [vmem:[%s2828_s1 + $0x4] ss:$8 sps:$4 sm:$0xff]   ;;  %v2085_v1 = vld [vmem:[%s2828_s1] ss:$8 sps:$4 sm:$0xff]   ;;  %s2258_s27 = sshll.u32 %s2205_s22, 1  ;;  %s2207_s17 = smov 64   ;;  %s2205_s22 = sphi %s2246_s22, %s177_s22  }
  0x13   : >> { %979 = vmatprep.subr.bf16.mxu0 %v2083_v0  ;;  %v2086_v2 = vld [vmem:[%s2828_s1 + $0x14] ss:$8 sps:$4 sm:$0xff]   ;;  %v2088_v3 = vld [vmem:[%s2828_s1 + $0x10] ss:$8 sps:$4 sm:$0xff]   ;;  %s228_s5 = sadd.s32 1, %s2258_s27  ;;  %p179_p5 = scmp.lt.s32.totalorder %s2258_s27, 40 }
  0x14   : >> { %980 = vmatpush1.bf16.msra.mxu0 %v2085_v1  ;;  %v2089_v4 = vld [vmem:[%s2828_s1 + $0xc4] ss:$8 sps:$4 sm:$0xff]   ;;  %p229_p4 = scmp.lt.s32.totalorder %s228_s5, 40  ;;  %v2093_v6 = vld [vmem:[%s2828_s1 + $0xc0] ss:$8 sps:$4 sm:$0xff]   ;;  %s334_s16 = sadd.s32 2, %s2258_s27 }
  0x15   : >> { %981 = vmatprep.subr.bf16.mxu0 %v2086_v2  ;;  %v2091_v5 = vld [vmem:[%s2828_s1 + $0x24] ss:$8 sps:$4 sm:$0xff]   ;;  %740 = vmatprep.subr.bf16.mxu1 %v2089_v4  ;;  %v2095_v7 = vld [vmem:[%s2828_s1 + $0xd4] ss:$8 sps:$4 sm:$0xff]   ;;  %v2094_v8 = vld [vmem:[%s2828_s1 + $0x20] ss:$8 sps:$4 sm:$0xff]  }
  0x16   : >> { %s2835_s5 = smov (!%p229_p4, %s228_s5), 40  ;;  %741 = vmatpush1.bf16.msra.mxu1 %v2093_v6  ;;  %v2099_v9 = vld [vmem:[%s2828_s1 + $0xd0] ss:$8 sps:$4 sm:$0xff]   ;;  %v2097_v10 = vld [vmem:[%s2828_s1 + $0x34] ss:$8 sps:$4 sm:$0xff]   ;;  %p2341_p6 = scmp.lt.s32.totalorder %s334_s16, 40 }
  0x17   : >> { %s1835_s20 = smul.u32 56, %s2835_s5  ;;  %742 = vmatprep.subr.bf16.mxu1 %v2095_v7  ;;  %v2101_v11 = vld [vmem:[%s2828_s1 + $0xe4] ss:$8 sps:$4 sm:$0xff]   ;;  %v2100_v12 = vld [vmem:[%s2828_s1 + $0x30] ss:$8 sps:$4 sm:$0xff]   ;;  %vm212_vm0 = vcmask 523264  }
  0x18   : >> { %982 = vmatpush1.bf16.msra.mxu0 %v2088_v3  ;;  %v2105_v13 = vld [vmem:[%s2828_s1 + $0xe0] ss:$8 sps:$4 sm:$0xff]   ;;  %v2103_v23 = vld [vmem:[%s2828_s1 + $0x44] ss:$8 sps:$4 sm:$0xff]   ;;  %v2107_v32 = vld [vmem:[%s2828_s1 + $0xf4] ss:$8 sps:$4 sm:$0xff]  }
  0x19   : >> { %983 = vmatprep.subr.bf16.mxu0 %v2091_v5  ;;  %s2292_s28 = scalar_lea.vmem %s2239_s18, %s1835_s20  ;;  %v2106_v29 = vld [vmem:[%s2828_s1 + $0x40] ss:$8 sps:$4 sm:$0xff]   ;;  %v2111_v37 = vld [vmem:[%s2828_s1 + $0xf0] ss:$8 sps:$4 sm:$0xff]   ;;  %v2109_v42 = vld [vmem:[%s2828_s1 + $0x54] ss:$8 sps:$4 sm:$0xff]  }
  0x1a   : >> { %v1870_v14 = vld [vmem:[%s2292_s28] sm:$0xff]   ;;  %v1938_v15 = vld [vmem:[%s2292_s28 + $0x10] sm:$0xff]   ;;  %v1937_v16 = vld [vmem:[%s2292_s28 + $0x8] sm:$0xff]   ;;  %743 = vmatpush1.bf16.msra.mxu1 %v2099_v9  ;;  %s2319_s13 = scalar_select %p179_p5, %s2258_s27, 40  ;;  %vm226_vm1 = vcmask 521216   ;;  %vm318_vm3 = vcmask 1048064  }
  0x1b   : >> { %v1871_v17 = vunpack.c.l.bf16 %v1870_v14  ;;  %v1872_v18 = vunpack.c.h.bf16 %v1870_v14  ;;  %v1879_v19 = vunpack.c.l.bf16 %v1938_v15  ;;  %v1880_v20 = vunpack.c.h.bf16 %v1938_v15  ;;  %v1939_v21 = vld [vmem:[%s2292_s28 + $0x18] sm:$0xff]   ;;  %v1940_v22 = vld [vmem:[%s2292_s28 + $0x20] sm:$0xff]   ;;  %744 = vmatprep.subr.bf16.mxu1 %v2101_v11  ;;  %v1941_v28 = vld [vmem:[%s2292_s28 + $0x28] sm:$0xff]   ;;  %s2837_s16 = smov (!%p2341_p6, %s334_s16), 40  ;;  %s1844_s24 = smul.u32 28, %s2205_s22 }
  0x1c   : >> { %984 = vmatpush1.bf16.msra.mxu0 %v2094_v8  ;;  %v1875_v24 = vunpack.c.l.bf16 %v1937_v16  ;;  %v1876_v25 = vunpack.c.h.bf16 %v1937_v16  ;;  %v1883_v26 = vunpack.c.l.bf16 %v1939_v21  ;;  %v1884_v27 = vunpack.c.h.bf16 %v1939_v21  ;;  %v246_v35 = vld [vmem:[%s2292_s28 + $0x30] sm:$0xf]  ;;  %v247_v36 = vld [vmem:[%s2292_s28 + $0x34] sm:$0x7]  ;;  %v2113_v43 = vld [vmem:[%s2828_s1 + $0x104] ss:$8 sps:$4 sm:$0xff]  }
  0x1d   : >> { %985 = vmatprep.subr.bf16.mxu0 %v2097_v10  ;;  %v2048_v30 = vpack.i.bf16 %v1872_v18, %v1871_v17  ;;  %v2058_v31 = vpack.i.bf16 %v1880_v20, %v1879_v19  ;;  %v1887_v33 = vunpack.c.l.bf16 %v1940_v22  ;;  %v1888_v34 = vunpack.c.h.bf16 %v1940_v22  ;;  %v2112_v44 = vld [vmem:[%s2828_s1 + $0x50] ss:$8 sps:$4 sm:$0xff]   ;;  %s1834_s28 = smul.u32 56, %s2319_s13  ;;  %v2117_v45 = vld [vmem:[%s2828_s1 + $0x100] ss:$8 sps:$4 sm:$0xff]   ;;  %s177_s22 = sadd.s32 1, %s2205_s22  }
  0x1e   : >> { %745 = vmatpush1.bf16.msra.mxu1 %v2105_v13  ;;  %v2053_v38 = vpack.i.bf16 %v1876_v25, %v1875_v24  ;;  %v2063_v39 = vpack.i.bf16 %v1884_v27, %v1883_v26  ;;  %v1891_v40 = vunpack.c.l.bf16 %v1941_v28  ;;  %v1892_v41 = vunpack.c.h.bf16 %v1941_v28  ;;  %v2115_v50 = vld [vmem:[%s2828_s1 + $0x64] ss:$8 sps:$4 sm:$0xff]   ;;  %v2119_v51 = vld [vmem:[%s2828_s1 + $0x114] ss:$8 sps:$4 sm:$0xff]   ;;  %v2118_v52 = vld [vmem:[%s2828_s1 + $0x60] ss:$8 sps:$4 sm:$0xff]  }
  0x1f   : >> { %2049 = vrot.lane.b32.xlu0 %v2048_v30, %s2207_s17  ;;  %2059 = vrot.lane.b32.xlu1 %v2058_v31, %s2207_s17  ;;  %v2068_v46 = vpack.i.bf16 %v1888_v34, %v1887_v33  ;;  %v260_v48 = vunpack.c.l.bf16 %v246_v35  ;;  %v261_v49 = vunpack.c.l.bf16 %v247_v36  ;;  %s2360_s11 = scalar_lea.vmem %s2239_s18, %s1834_s28  ;;  %v2123_v53 = vld [vmem:[%s2828_s1 + $0x110] ss:$8 sps:$4 sm:$0xff]   ;;  %v2121_v55 = vld [vmem:[%s2828_s1 + $0x74] ss:$8 sps:$4 sm:$0xff]   ;;  %s1836_s25 = smul.u32 56, %s2837_s16  ;;  %vm332_vm4 = vcmask 1046016  }
  0x20   : >> { %986 = vmatpush1.bf16.msra.mxu0 %v2100_v12  ;;  %746 = vmatprep.subr.bf16.mxu1 %v2107_v32  ;;  %v2073_v47 = vpack.i.bf16 %v1892_v41, %v1891_v40  ;;  %v2125_v56 = vld [vmem:[%s2828_s1 + $0x124] ss:$8 sps:$4 sm:$0xff]   ;;  %v2124_v58 = vld [vmem:[%s2828_s1 + $0x70] ss:$8 sps:$4 sm:$0xff]   ;;  %v2129_v62 = vld [vmem:[%s2828_s1 + $0x120] ss:$8 sps:$4 sm:$0xff]  }
  0x21   : >> { %987 = vmatprep.subr.bf16.mxu0 %v2103_v23  ;;  %v2078_v54 = vpack.i.bf16 %v261_v49, %v260_v48  ;;  %v1846_v57 = vld [vmem:[%s2360_s11] sm:$0xff]   ;;  %v2131_v63 = vld [vmem:[%s2828_s1 + $0x134] ss:$8 sps:$4 sm:$0xff]   ;;  %v1932_v1 = vld [vmem:[%s2360_s11 + $0x8] sm:$0xff]   ;;  %vm481_vm2 = vsmask.f32 7424 }
  0x22   : >> { %747 = vmatpush1.bf16.msra.mxu1 %v2111_v37  ;;  %v1847_v59 = vunpack.c.l.bf16 %v1846_v57  ;;  %v1848_v60 = vunpack.c.h.bf16 %v1846_v57  ;;  %v2127_v61 = vld [vmem:[%s2828_s1 + $0x84] ss:$8 sps:$4 sm:$0xff]   ;;  %v1933_v0 = vld [vmem:[%s2360_s11 + $0x10] sm:$0xff]   ;;  %v1851_v4 = vunpack.c.l.bf16 %v1932_v1  ;;  %v1852_v5 = vunpack.c.h.bf16 %v1932_v1  ;;  %v2130_v6 = vld [vmem:[%s2828_s1 + $0x80] ss:$8 sps:$4 sm:$0xff]   ;;  %p174_p7 = scmp.ge.s32.totalorder %s177_s22, 20  }
  0x23   : >> { %2054 = vrot.lane.b32.xlu0 %v2053_v38, %s2207_s17  ;;  %2064 = vrot.lane.b32.xlu1 %v2063_v39, %s2207_s17  ;;  %v1855_v2 = vunpack.c.l.bf16 %v1933_v0  ;;  %v1856_v3 = vunpack.c.h.bf16 %v1933_v0  ;;  %v2133_v7 = vld [vmem:[%s2828_s1 + $0x94] ss:$8 sps:$4 sm:$0xff]   ;;  %v2135_v8 = vld [vmem:[%s2828_s1 + $0x130] ss:$8 sps:$4 sm:$0xff]   ;;  %vm1129_vm5 = vcmask 1046528  }
  0x24   : >> { %988 = vmatpush1.bf16.msra.mxu0 %v2106_v29  ;;  %748 = vmatprep.subr.bf16.mxu1 %v2113_v43  ;;  %213 = vst.msk [vmem:[#allocation2] sm:$0xff] %vm212_vm0, %v1847_v59  ;;  %214 = vst.msk [vmem:[#allocation2 + $0x10] sm:$0xff] %vm212_vm0, %v1848_v60  ;;  %v2137_v9 = vld [vmem:[%s2828_s1 + $0x144] ss:$8 sps:$4 sm:$0xff]   ;;  %v2136_v10 = vld [vmem:[%s2828_s1 + $0x90] ss:$8 sps:$4 sm:$0xff]  }
  0x25   : >> { %989 = vmatprep.subr.bf16.mxu0 %v2109_v42  ;;  %217 = vst.msk [vmem:[#allocation2 + $0x40] sm:$0xff] %vm212_vm0, %v1855_v2  ;;  %218 = vst.msk [vmem:[#allocation2 + $0x50] sm:$0xff] %vm212_vm0, %v1856_v3  ;;  %v2139_v11 = vld [vmem:[%s2828_s1 + $0xa4] ss:$8 sps:$4 sm:$0xff]   ;;  %v1934_v13 = vld [vmem:[%s2360_s11 + $0x18] sm:$0xff]  }
  0x26   : >> { %749 = vmatpush1.bf16.msra.mxu1 %v2117_v45  ;;  %215 = vst.msk [vmem:[#allocation2 + $0x20] sm:$0xff] %vm212_vm0, %v1851_v4  ;;  %216 = vst.msk [vmem:[#allocation2 + $0x30] sm:$0xff] %vm212_vm0, %v1852_v5  ;;  %v2141_v14 = vld [vmem:[%s2828_s1 + $0x140] ss:$8 sps:$4 sm:$0xff]   ;;  %v1859_v17 = vunpack.c.l.bf16 %v1934_v13  ;;  %v1860_v18 = vunpack.c.h.bf16 %v1934_v13  ;;  %v2143_v19 = vld [vmem:[%s2828_s1 + $0x154] ss:$8 sps:$4 sm:$0xff]  }
  0x27   : >> { %2069 = vrot.lane.b32.xlu0 %v2068_v46, %s2207_s17  ;;  %2074 = vrot.lane.b32.xlu1 %v2073_v47, %s2207_s17  ;;  %v2142_v20 = vld [vmem:[%s2828_s1 + $0xa0] ss:$8 sps:$4 sm:$0xff]   ;;  %v2145_v21 = vld [vmem:[%s2828_s1 + $0xb4] ss:$8 sps:$4 sm:$0xff]  }
  0x28   : >> { %990 = vmatpush1.bf16.msra.mxu0 %v2112_v44  ;;  %750 = vmatprep.subr.bf16.mxu1 %v2119_v51  ;;  %219 = vst.msk [vmem:[#allocation2 + $0x60] sm:$0xff] %vm212_vm0, %v1859_v17  ;;  %220 = vst.msk [vmem:[#allocation2 + $0x70] sm:$0xff] %vm212_vm0, %v1860_v18  ;;  %v2147_v22 = vld [vmem:[%s2828_s1 + $0x150] ss:$8 sps:$4 sm:$0xff]   ;;  %v2149_v23 = vld [vmem:[%s2828_s1 + $0x164] ss:$8 sps:$4 sm:$0xff]  }
  0x29   : >> { %991 = vmatprep.subr.bf16.mxu0 %v2115_v50  ;;  %v1935_v24 = vld [vmem:[%s2360_s11 + $0x20] sm:$0xff]   ;;  %v2148_v30 = vld [vmem:[%s2828_s1 + $0xb0] ss:$8 sps:$4 sm:$0xff]   ;;  %v1936_v33 = vld [vmem:[%s2360_s11 + $0x28] sm:$0xff]  }
  0x2a   : >> { %751 = vmatpush1.bf16.msra.mxu1 %v2123_v53  ;;  %v1863_v26 = vunpack.c.l.bf16 %v1935_v24  ;;  %v1864_v27 = vunpack.c.h.bf16 %v1935_v24  ;;  %v2153_v31 = vld [vmem:[%s2828_s1 + $0x184] ss:$8 sps:$4 sm:$0xff]   ;;  %v2154_v32 = vld [vmem:[%s2828_s1 + $0x160] ss:$8 sps:$4 sm:$0xff]   ;;  %v1867_v37 = vunpack.c.l.bf16 %v1936_v33  ;;  %v1868_v38 = vunpack.c.h.bf16 %v1936_v33  ;;  %v2155_v41 = vld [vmem:[%s2828_s1 + $0x174] ss:$8 sps:$4 sm:$0xff]  }
  0x2b   : >> { %2079 = vrot.lane.b32.xlu0 %v2078_v54, %s2207_s17  ;;  %752 = vmatprep.subr.bf16.mxu1 %v2125_v56  ;;  %s2402_s17 = scalar_lea.vmem %s2239_s18, %s1836_s25  ;;  %v2157_v43 = vld [vmem:[%s2828_s1 + $0x170] ss:$8 sps:$4 sm:$0xff]   ;;  %v197_v51 = vld [vmem:[%s2360_s11 + $0x34] sm:$0x7]  ;;  %s2807_s25 = scalar_lea.vmem %s2244_s21, %s1844_s24 }
  0x2c   : >> { %992 = vmatpush1.bf16.msra.mxu0 %v2118_v52  ;;  %v1894_v12 = vld [vmem:[%s2402_s17] sm:$0xff]   ;;  %v1942_v25 = vld [vmem:[%s2402_s17 + $0x8] sm:$0xff]   ;;  %221 = vst.msk [vmem:[#allocation2 + $0x80] sm:$0xff] %vm212_vm0, %v1863_v26  ;;  %222 = vst.msk [vmem:[#allocation2 + $0x90] sm:$0xff] %vm212_vm0, %v1864_v27 }
  0x2d   : >> { %993 = vmatprep.subr.bf16.mxu0 %v2121_v55  ;;  %v1895_v15 = vunpack.c.l.bf16 %v1894_v12  ;;  %v1896_v16 = vunpack.c.h.bf16 %v1894_v12  ;;  %v1899_v28 = vunpack.c.l.bf16 %v1942_v25  ;;  %v1900_v29 = vunpack.c.h.bf16 %v1942_v25  ;;  %v1943_v42 = vld [vmem:[%s2402_s17 + $0x10] sm:$0xff]   ;;  %223 = vst.msk [vmem:[#allocation2 + $0xa0] sm:$0xff] %vm212_vm0, %v1867_v37  ;;  %224 = vst.msk [vmem:[#allocation2 + $0xb0] sm:$0xff] %vm212_vm0, %v1868_v38  ;;  %v1944_v53 = vld [vmem:[%s2402_s17 + $0x18] sm:$0xff]  }
  0x2e   : >> { %753 = vmatpush1.bf16.msra.mxu1 %v2129_v62  ;;  %v1903_v44 = vunpack.c.l.bf16 %v1943_v42  ;;  %v1904_v45 = vunpack.c.h.bf16 %v1943_v42  ;;  %v353_v47 = vld [vmem:[%s2402_s17 + $0x34] sm:$0x7]  ;;  %v196_v48 = vld [vmem:[%s2360_s11 + $0x30] sm:$0xf]  ;;  %v211_v55 = vunpack.c.l.bf16 %v197_v51  ;;  %v1907_v56 = vunpack.c.l.bf16 %v1944_v53  ;;  %v1946_v3 = vld [vmem:[%s2402_s17 + $0x28] sm:$0xff]  }
  0x2f   : >> { %754 = vmatprep.subr.bf16.mxu1 %v2131_v63  ;;  %368 = vst.msk [vmem:[#allocation2 + $0x8] sm:$0xff] %vm212_vm0, %v1895_v15  ;;  %369 = vst.msk [vmem:[#allocation2 + $0x18] sm:$0xff] %vm212_vm0, %v1896_v16  ;;  %v367_v50 = vunpack.c.l.bf16 %v353_v47  ;;  %v210_v52 = vunpack.c.l.bf16 %v196_v48  ;;  %v1908_v57 = vunpack.c.h.bf16 %v1944_v53  ;;  %v1915_v5 = vunpack.c.l.bf16 %v1946_v3  ;;  %v2513_v25 = vld [vmem:[%s2828_s1 + $0x180] ss:$8 sps:$4 sm:$0xff]   ;;  %v2160_v37 = vld [vmem:[%s2828_s1 + $0x194] ss:$8 sps:$4 sm:$0xff]  }
  0x30   : >> { %994 = vmatpush1.bf16.msra.mxu0 %v2124_v58  ;;  %370 = vst.msk [vmem:[#allocation2 + $0x28] sm:$0xff] %vm212_vm0, %v1899_v28  ;;  %371 = vst.msk [vmem:[#allocation2 + $0x38] sm:$0xff] %vm212_vm0, %v1900_v29  ;;  %v2163_v51 = vld [vmem:[%s2828_s1 + $0x1a4] ss:$8 sps:$4 sm:$0xff]  }
  0x31   : >> { %995 = vmatprep.subr.bf16.mxu0 %v2127_v61  ;;  %372 = vst.msk [vmem:[#allocation2 + $0x48] sm:$0xff] %vm212_vm0, %v1903_v44  ;;  %373 = vst.msk [vmem:[#allocation2 + $0x58] sm:$0xff] %vm212_vm0, %v1904_v45  ;;  %v1945_v61 = vld [vmem:[%s2402_s17 + $0x20] sm:$0xff]  }
  0x32   : >> { %755 = vmatpush1.bf16.msra.mxu1 %v2135_v8  ;;  %381 = vst.msk [vmem:[#allocation2 + $0xd8] sm:$0x3f] %vm226_vm1, %v367_v50  ;;  %227 = vst.msk [vmem:[#allocation2 + $0xd0] sm:$0x3f] %vm226_vm1, %v211_v55  ;;  %v1911_v0 = vunpack.c.l.bf16 %v1945_v61  ;;  %v1912_v1 = vunpack.c.h.bf16 %v1945_v61 }
  0x33   : >> { %756 = vmatprep.subr.bf16.mxu1 %v2137_v9  ;;  %225 = vst.msk [vmem:[#allocation2 + $0xc0] sm:$0xff] %vm212_vm0, %v210_v52  ;;  %374 = vst.msk [vmem:[#allocation2 + $0x68] sm:$0xff] %vm212_vm0, %v1907_v56 }
  0x34   : >> { %996 = vmatpush1.bf16.msra.mxu0 %v2130_v6  ;;  %375 = vst.msk [vmem:[#allocation2 + $0x78] sm:$0xff] %vm212_vm0, %v1908_v57  ;;  %376 = vst.msk [vmem:[#allocation2 + $0x88] sm:$0xff] %vm212_vm0, %v1911_v0  ;;  %v1916_v6 = vunpack.c.h.bf16 %v1946_v3 }
  0x35   : >> { %997 = vmatprep.subr.bf16.mxu0 %v2133_v7  ;;  %377 = vst.msk [vmem:[#allocation2 + $0x98] sm:$0xff] %vm212_vm0, %v1912_v1  ;;  %v352_v7 = vld [vmem:[%s2402_s17 + $0x30] sm:$0xf]  ;;  %378 = vst.msk [vmem:[#allocation2 + $0xa8] sm:$0xff] %vm212_vm0, %v1915_v5 }
  0x36   : >> { %757 = vmatpush1.bf16.msra.mxu1 %v2141_v14  ;;  %v383_v34 = vld [vmem:[#allocation2 + $0x8] sm:$0xff]  ;;  %v2463_v35 = vld [vmem:[#allocation2 + $0x18] sm:$0xff]  ;;  %v366_v8 = vunpack.c.l.bf16 %v352_v7  ;;  %379 = vst.msk [vmem:[#allocation2 + $0xb8] sm:$0xff] %vm212_vm0, %v1916_v6 }
  0x37   : >> { %758 = vmatprep.subr.bf16.mxu1 %v2143_v19  ;;  %v449_v36 = vld [vmem:[#allocation2 + $0x8] sm:$0xfe]  ;;  %v411_v39 = vpack.c.bf16 %v2463_v35, %v383_v34  ;;  %v389_v59 = vld [vmem:[#allocation2 + $0x38] sm:$0xff] }
  0x38   : >> { %998 = vmatpush1.bf16.msra.mxu0 %v2136_v10  ;;  %v453_v40 = vpack.c.bf16 %v2463_v35, %v449_v36  ;;  %v387_v58 = vld [vmem:[#allocation2 + $0x28] sm:$0xff]  ;;  %380 = vst.msk [vmem:[#allocation2 + $0xc8] sm:$0xff] %vm212_vm0, %v366_v8  ;;  %v2164_v7 = vld [vmem:[%s2828_s1 + $0x1b0] ss:$8 sps:$4 sm:$0xff]  }
  0x39   : >> { %999 = vmatprep.subr.bf16.mxu0 %v2139_v11  ;;  %1762 = vmatprep.mubr.msk.bf16.mxu0 %vm212_vm0, %v411_v39  ;;  %v2484_v60 = vpack.c.bf16 %v389_v59, %v387_v58  ;;  %v2158_v39 = vld [vmem:[%s2828_s1 + $0x190] ss:$8 sps:$4 sm:$0xff]   ;;  %v2161_v58 = vld [vmem:[%s2828_s1 + $0x1a0] ss:$8 sps:$4 sm:$0xff]  }
  0x3a   : >> { %759 = vmatpush1.bf16.msra.mxu1 %v2147_v22  ;;  %v497_v46 = vshll.u32 %v453_v40, 16  ;;  %v495_v49 = vshrl.u32 %v453_v40, 16  ;;  %v393_v22 = vld [vmem:[#allocation2 + $0x58] sm:$0xff] }
  0x3b   : >> { %760 = vmatprep.subr.bf16.mxu1 %v2149_v23  ;;  %v502_v63 = vshll.u32 %v2484_v60, 16  ;;  %v514_v44 = vshrl.u32 %v2484_v60, 16  ;;  %v397_v48 = vld [vmem:[#allocation2 + $0x78] sm:$0xff]  ;;  %v399_v5 = vld [vmem:[#allocation2 + $0x88] sm:$0xff] }
  0x3c   : >> { %1000 = vmatpush1.bf16.msra.mxu0 %v2142_v20  ;;  %v499_v54 = vrot.slane %v497_v46, 1  ;;  %v401_v6 = vld [vmem:[#allocation2 + $0x98] sm:$0xff] }
  0x3d   : >> { %1001 = vmatprep.subr.bf16.mxu0 %v2145_v21  ;;  %v2490_v2 = vrot.slane %v502_v63, 1  ;;  %v391_v21 = vld [vmem:[#allocation2 + $0x48] sm:$0xff]  ;;  %v2166_v63 = vld [vmem:[%s2828_s1 + $0x1b4] ss:$8 sps:$4 sm:$0xff]  }
  0x3e   : >> { %761 = vmatpush1.bf16.msra.mxu1 %v2154_v32  ;;  %v500_v62 = vor.u32 %v499_v54, %v495_v49  ;;  %v2517_v33 = vpack.c.bf16 %v393_v22, %v391_v21 }
  0x3f   : >> { %762 = vmatprep.subr.bf16.mxu1 %v2155_v41  ;;  %v516_v57 = vor.u32 %v514_v44, %v2490_v2  ;;  %v2178_v44 = vld [vmem:[%s2828_s1 + $0x1f4] ss:$8 sps:$4 sm:$0xff]  }
  0x40   : >> { %1002 = vmatpush1.bf16.msra.mxu0 %v2148_v30  ;;  %v505_v4 = vsel %vm481_vm2, %v500_v62, %v2490_v2  ;;  %v518_v47 = vshll.u32 %v2517_v33, 16  ;;  %v530_v1 = vshrl.u32 %v2517_v33, 16 }
  0x41   : >> { %1304 = vmatprep.subr.bf16.mxu0 %v2153_v31  ;;  %1731 = vmatprep.mubr.msk.bf16.mxu1 %vm212_vm0, %v505_v4 }
  0x42   : >> { %763 = vmatpush1.bf16.msra.mxu1 %v2157_v43  ;;  %v395_v43 = vld [vmem:[#allocation2 + $0x68] sm:$0xff]  ;;  %v520_v59 = vrot.slane %v518_v47, 1 }
  0x43   : >> { %1949 = vmatprep.subr.bf16.mxu1 %v2153_v31  ;;  %v2544_v56 = vpack.c.bf16 %v397_v48, %v395_v43 }
  0x44   : >> { %v521_v8 = vsel %vm481_vm2, %v516_v57, %v520_v59  ;;  %v2181_v57 = vld [vmem:[%s2828_s1 + $0x204] ss:$8 sps:$4 sm:$0xff]  }
  0x45   : >> { %v534_v4 = vshll.u32 %v2544_v56, 16  ;;  %v546_v21 = vshrl.u32 %v2544_v56, 16 }
  0x91   : >> { %v2050_v9 = vpop.permute.xlu0 %2049  ;;  %v2060_v10 = vpop.permute.xlu1 %2059 }
  0x92   : >> { %v2052_v11 = vunpack.i.h.bf16 %v2050_v9  ;;  %v2051_v12 = vunpack.i.l.bf16 %v2050_v9  ;;  %v2062_v13 = vunpack.i.h.bf16 %v2060_v10  ;;  %v2061_v14 = vunpack.i.l.bf16 %v2060_v10 }
  0x94   : >> { %319 = vst.msk [vmem:[#allocation2] sm:$0xff] %vm318_vm3, %v2051_v12  ;;  %320 = vst.msk [vmem:[#allocation2 + $0x10] sm:$0xff] %vm318_vm3, %v2052_v11  ;;  %v2169_v12 = vld [vmem:[%s2828_s1 + $0x1c4] ss:$8 sps:$4 sm:$0xff]  }
  0x95   : >> { %323 = vst.msk [vmem:[#allocation2 + $0x40] sm:$0xff] %vm318_vm3, %v2061_v14  ;;  %324 = vst.msk [vmem:[#allocation2 + $0x50] sm:$0xff] %vm318_vm3, %v2062_v13  ;;  %v2055_v15 = vpop.permute.xlu0 %2054  ;;  %v2065_v16 = vpop.permute.xlu1 %2064  ;;  %v532_v13 = vor.u32 %v530_v1, %v520_v59  ;;  %v2571_v14 = vpack.c.bf16 %v401_v6, %v399_v5 }
  0x96   : >> { %v2057_v17 = vunpack.i.h.bf16 %v2055_v15  ;;  %v2056_v18 = vunpack.i.l.bf16 %v2055_v15  ;;  %v2067_v19 = vunpack.i.h.bf16 %v2065_v16  ;;  %v2066_v20 = vunpack.i.l.bf16 %v2065_v16 }
  0x97   : >> { %v550_v22 = vshll.u32 %v2571_v14, 16 }
  0x98   : >> { %321 = vst.msk [vmem:[#allocation2 + $0x20] sm:$0xff] %vm318_vm3, %v2056_v18  ;;  %322 = vst.msk [vmem:[#allocation2 + $0x30] sm:$0xff] %vm318_vm3, %v2057_v17  ;;  %v536_v17 = vrot.slane %v534_v4, 1 }
  0x99   : >> { %325 = vst.msk [vmem:[#allocation2 + $0x60] sm:$0xff] %vm318_vm3, %v2066_v20  ;;  %326 = vst.msk [vmem:[#allocation2 + $0x70] sm:$0xff] %vm318_vm3, %v2067_v19  ;;  %v2070_v23 = vpop.permute.xlu0 %2069  ;;  %v2075_v24 = vpop.permute.xlu1 %2074  ;;  %v2167_v19 = vld [vmem:[%s2828_s1 + $0x1c0] ss:$8 sps:$4 sm:$0xff]   ;;  %v2170_v20 = vld [vmem:[%s2828_s1 + $0x1d0] ss:$8 sps:$4 sm:$0xff]  }
  0x9a   : >> { %v2072_v26 = vunpack.i.h.bf16 %v2070_v23  ;;  %v2071_v27 = vunpack.i.l.bf16 %v2070_v23  ;;  %v2077_v28 = vunpack.i.h.bf16 %v2075_v24  ;;  %v2076_v29 = vunpack.i.l.bf16 %v2075_v24 }
  0x9b   : >> { %v382_v30 = vld [vmem:[#allocation2] sm:$0xff]  ;;  %v2515_v31 = vld [vmem:[#allocation2 + $0x10] sm:$0xff]  ;;  %v537_v24 = vsel %vm481_vm2, %v532_v13, %v536_v17  ;;  %v409_v13 = vld [vmem:[#allocation2 + $0xd8] sm:$0xf] }
  0x9c   : >> { %v448_v32 = vld [vmem:[#allocation2] sm:$0xfe]  ;;  %v410_v34 = vpack.c.bf16 %v2515_v31, %v382_v30  ;;  %327 = vst.msk [vmem:[#allocation2 + $0x80] sm:$0xff] %vm318_vm3, %v2071_v27  ;;  %328 = vst.msk [vmem:[#allocation2 + $0x90] sm:$0xff] %vm318_vm3, %v2072_v26  ;;  %v392_v53 = vld [vmem:[#allocation2 + $0x50] sm:$0xff] }
  0x9d   : >> { %v452_v36 = vpack.c.bf16 %v2515_v31, %v448_v32  ;;  %329 = vst.msk [vmem:[#allocation2 + $0xa0] sm:$0xff] %vm318_vm3, %v2076_v29  ;;  %330 = vst.msk [vmem:[#allocation2 + $0xb0] sm:$0xff] %vm318_vm3, %v2077_v28  ;;  %v2080_v38 = vpop.permute.xlu0 %2079  ;;  %v390_v52 = vld [vmem:[#allocation2 + $0x40] sm:$0xff]  ;;  %v403_v28 = vld [vmem:[#allocation2 + $0xa8] sm:$0xff] }
  0x9e   : >> { %1012 = vmatmul.mubr.bf16.vlgmr.msra.gmra.mrb[0].mxu0 %v410_v34  ;;  %v2082_v41 = vunpack.i.h.bf16 %v2080_v38  ;;  %v2081_v42 = vunpack.i.l.bf16 %v2080_v38  ;;  %v2553_v0 = vpack.c.bf16 %v392_v53, %v390_v52  ;;  %v405_v32 = vld [vmem:[#allocation2 + $0xb8] sm:$0xff]  ;;  %v2175_v34 = vld [vmem:[%s2828_s1 + $0x1e4] ss:$8 sps:$4 sm:$0xff]  }
  0x9f   : >> { %v485_v40 = vshll.u32 %v452_v36, 16  ;;  %1305 = vmatpush1.bf16.msra.mxu0 %v2513_v25  ;;  %1763 = vmatprep.mubr.msk.bf16.mxu0 %vm212_vm0, %v2484_v60  ;;  %v386_v45 = vld [vmem:[#allocation2 + $0x20] sm:$0xff]  ;;  %v388_v46 = vld [vmem:[#allocation2 + $0x30] sm:$0xff]  ;;  %v483_v54 = vshrl.u32 %v452_v36, 16  ;;  %v548_v36 = vor.u32 %v546_v21, %v536_v17  ;;  %v451_v52 = vld [vmem:[#allocation2 + $0xd8] sm:$0x1f] }
  0xa0   : >> { %1306 = vmatprep.subr.bf16.mxu0 %v2160_v37  ;;  %v2536_v49 = vpack.c.bf16 %v388_v46, %v386_v45  ;;  %331 = vst.msk [vmem:[#allocation2 + $0xc0] sm:$0xff] %vm318_vm3, %v2081_v42  ;;  %v510_v3 = vshll.u32 %v2553_v0, 16  ;;  %v394_v9 = vld [vmem:[#allocation2 + $0x60] sm:$0xff]  ;;  %v396_v10 = vld [vmem:[#allocation2 + $0x70] sm:$0xff]  ;;  %v522_v26 = vshrl.u32 %v2553_v0, 16  ;;  %v562_v45 = vshrl.u32 %v2571_v14, 16 }
  0xa1   : >> { %v487_v50 = vrot.slane %v485_v40, 1  ;;  %333 = vst.msk [vmem:[#allocation2 + $0xd0] sm:$0x3f] %vm332_vm4, %v2082_v41  ;;  %v2574_v18 = vpack.c.bf16 %v396_v10, %v394_v9  ;;  %v2600_v41 = vpack.c.bf16 %v405_v32, %v403_v28  ;;  %v2173_v42 = vld [vmem:[%s2828_s1 + $0x1e0] ss:$8 sps:$4 sm:$0xff]   ;;  %v1134_v32 = vrot.slane %v2484_v60, 1 }
  0xa2   : >> { %v490_v55 = vshll.u32 %v2536_v49, 16  ;;  %v506_v11 = vshrl.u32 %v2536_v49, 16  ;;  %v512_v16 = vrot.slane %v510_v3, 1  ;;  %v2176_v53 = vld [vmem:[%s2828_s1 + $0x1f0] ss:$8 sps:$4 sm:$0xff]  }
  0xa3   : >> { %1307 = vmatpush1.bf16.msra.mxu0 %v2158_v39  ;;  %v488_v61 = vor.u32 %v487_v50, %v483_v54  ;;  %v526_v27 = vshll.u32 %v2574_v18, 16  ;;  %v398_v29 = vld [vmem:[#allocation2 + $0x80] sm:$0xff]  ;;  %v400_v30 = vld [vmem:[#allocation2 + $0x90] sm:$0xff]  ;;  %v538_v47 = vshrl.u32 %v2574_v18, 16  ;;  %v566_v50 = vshll.u32 %v2600_v41, 16 }
  0xa4   : >> { %v492_v62 = vrot.slane %v490_v55, 1  ;;  %1308 = vmatprep.subr.bf16.mxu0 %v2163_v51  ;;  %v524_v38 = vor.u32 %v522_v26, %v512_v16  ;;  %v2598_v40 = vpack.c.bf16 %v400_v30, %v398_v29  ;;  %v402_v54 = vld [vmem:[#allocation2 + $0xa0] sm:$0xff]  ;;  %v404_v55 = vld [vmem:[#allocation2 + $0xb0] sm:$0xff]  ;;  %v578_v3 = vshrl.u32 %v2600_v41, 16 }
  0xa5   : >> { %v2629_v1 = vpack.c.bf16 %v404_v55, %v402_v54  ;;  %v2184_v9 = vld [vmem:[%s2828_s1 + $0x214] ss:$8 sps:$4 sm:$0xff]  }
  0xa6   : >> { %1022 = vmatmul.mubr.bf16.gmra.mrb[4].mxu0 %v2536_v49  ;;  %v493_v2 = vsel %vm481_vm2, %v488_v61, %v492_v62  ;;  %v508_v15 = vor.u32 %v506_v11, %v492_v62  ;;  %v542_v48 = vshll.u32 %v2598_v40, 16  ;;  %v1085_v54 = vld [vmem:[#allocation2 + $0xd8] sm:$0x3f] }
  0xa7   : >> { %773 = vmatmul.mubr.bf16.vlgmr.msra.gmra.mrb[0].mxu1 %v493_v2  ;;  %1309 = vmatpush1.bf16.msra.mxu0 %v2161_v58  ;;  %v2179_v2 = vld [vmem:[%s2828_s1 + $0x200] ss:$8 sps:$4 sm:$0xff]   ;;  %v570_v28 = vshrl.u32 %v2629_v1, 16 }
  0xa8   : >> { %1961 = vmatpush1.bf16.msra.mxu1 %v2513_v25  ;;  %1310 = vmatprep.subr.bf16.mxu0 %v2166_v63  ;;  %v513_v23 = vsel %vm481_vm2, %v508_v15, %v512_v16  ;;  %v2172_v25 = vld [vmem:[%s2828_s1 + $0x1d4] ss:$8 sps:$4 sm:$0xff]   ;;  %v544_v62 = vrot.slane %v542_v48, 1  ;;  %v2646_v10 = vld [vmem:[#allocation2 + $0xc0] sm:$0xff]  ;;  %v1083_v15 = vld [vmem:[#allocation2 + $0x8] sm:$0xfc] }
  0xa9   : >> { %1950 = vmatprep.subr.bf16.mxu1 %v2160_v37  ;;  %1764 = vmatprep.mubr.msk.bf16.mxu0 %vm212_vm0, %v2517_v33  ;;  %v552_v37 = vrot.slane %v550_v22, 1  ;;  %v450_v11 = vld [vmem:[#allocation2 + $0xd0] sm:$0x1f]  ;;  %v2187_v16 = vld [vmem:[%s2828_s1 + $0x224] ss:$8 sps:$4 sm:$0xff]   ;;  %v1131_v48 = vrot.slane %v2536_v49, 1 }
  0xaa   : >> { %1732 = vmatprep.mubr.msk.bf16.mxu1 %vm212_vm0, %v521_v8  ;;  %v558_v8 = vshll.u32 %v2629_v1, 16  ;;  %v454_v22 = vpack.c.bf16 %v450_v11, %v2646_v10  ;;  %v1142_v49 = vrot.slane %v2544_v56, 1 }
  0xab   : >> { %1311 = vmatpush1.bf16.msra.mxu0 %v2164_v7  ;;  %v553_v43 = vsel %vm481_vm2, %v548_v36, %v552_v37  ;;  %v408_v36 = vld [vmem:[#allocation2 + $0xd0] sm:$0xf] }
  0xac   : >> { %1962 = vmatpush1.bf16.msra.mxu1 %v2158_v39  ;;  %1312 = vmatprep.subr.bf16.mxu0 %v2169_v12  ;;  %v528_v39 = vrot.slane %v526_v27, 1  ;;  %v560_v21 = vrot.slane %v558_v8, 1  ;;  %v574_v29 = vshll.u32 %v454_v22, 16 }
  0xad   : >> { %1951 = vmatprep.subr.bf16.mxu1 %v2163_v51  ;;  %v2615_v51 = vld [vmem:[#allocation2 + $0xc8] sm:$0xff] }
  0xae   : >> { %1032 = vmatmul.mubr.bf16.gmra.mrb[8].mxu0 %v2553_v0  ;;  %v529_v46 = vsel %vm481_vm2, %v524_v38, %v528_v39  ;;  %v2627_v59 = vpack.c.bf16 %v451_v52, %v2615_v51  ;;  %v540_v61 = vor.u32 %v538_v47, %v528_v39  ;;  %v572_v38 = vor.u32 %v570_v28, %v560_v21 }
  0xaf   : >> { %783 = vmatmul.mubr.bf16.gmra.mrb[4].mxu1 %v513_v23  ;;  %1313 = vmatpush1.bf16.msra.mxu0 %v2167_v19  ;;  %v423_v23 = vpack.c.bf16 %v409_v13, %v2615_v51  ;;  %v576_v39 = vrot.slane %v574_v29, 1  ;;  %v1138_v47 = vrot.slane %v2517_v33, 1  ;;  %v1146_v52 = vrot.slane %v2571_v14, 1 }
  0xb0   : >> { %1963 = vmatpush1.bf16.msra.mxu1 %v2161_v58  ;;  %1765 = vmatprep.mubr.msk.bf16.mxu0 %vm212_vm0, %v2544_v56  ;;  %v564_v58 = vor.u32 %v562_v45, %v552_v37  ;;  %v582_v4 = vshll.u32 %v2627_v59, 16  ;;  %v545_v5 = vsel %vm481_vm2, %v540_v61, %v544_v62  ;;  %v2188_v37 = vld [vmem:[%s2828_s1 + $0x230] ss:$8 sps:$4 sm:$0xff]   ;;  %v1089_v33 = vpack.c.bf16 %v1085_v54, %v2615_v51 }
  0xb1   : >> { %1952 = vmatprep.subr.bf16.mxu1 %v2166_v63  ;;  %1733 = vmatprep.mubr.msk.bf16.mxu1 %vm212_vm0, %v537_v24  ;;  %v568_v63 = vrot.slane %v566_v50, 1  ;;  %v1087_v24 = vpack.c.bf16 %v2463_v35, %v1083_v15  ;;  %v2190_v35 = vld [vmem:[%s2828_s1 + $0x234] ss:$8 sps:$4 sm:$0xff]   ;;  %v577_v45 = vsel %vm481_vm2, %v572_v38, %v576_v39  ;;  %v586_v50 = vshrl.u32 %v454_v22, 16 }
  0xb2   : >> { %1314 = vmatprep.subr.bf16.mxu0 %v2172_v25  ;;  %v1148_v61 = vrot.slane %v2629_v1, 1  ;;  %v1140_v56 = vrot.slane %v2574_v18, 1 }
  0xb3   : >> { %1315 = vmatpush1.bf16.msra.mxu0 %v2170_v20  ;;  %v569_v6 = vsel %vm481_vm2, %v564_v58, %v568_v63  ;;  %v580_v17 = vor.u32 %v578_v3, %v568_v63  ;;  %v1133_v30 = vrot.slane %v1087_v24, 1  ;;  %v588_v58 = vor.u32 %v586_v50, %v576_v39 }
  0xb4   : >> { %1964 = vmatpush1.bf16.msra.mxu1 %v2164_v7  ;;  %1316 = vmatprep.subr.bf16.mxu0 %v2175_v34  ;;  %v554_v7 = vshrl.u32 %v2598_v40, 16  ;;  %v1144_v63 = vrot.slane %v2598_v40, 1 }
  0xb5   : >> { %1953 = vmatprep.subr.bf16.mxu1 %v2169_v12  ;;  %v2182_v12 = vld [vmem:[%s2828_s1 + $0x210] ss:$8 sps:$4 sm:$0xff]  }
  0xb6   : >> { %1042 = vmatmul.mubr.bf16.gmra.mrb[12].mxu0 %v2574_v18 }
  0xb7   : >> { %793 = vmatmul.mubr.bf16.gmra.mrb[8].mxu1 %v529_v46  ;;  %1317 = vmatpush1.bf16.msra.mxu0 %v2173_v42 }
  0xb8   : >> { %1965 = vmatpush1.bf16.msra.mxu1 %v2167_v19  ;;  %1766 = vmatprep.mubr.msk.bf16.mxu0 %vm212_vm0, %v2571_v14  ;;  %v584_v19 = vrot.slane %v582_v4, 1  ;;  %v1136_v14 = vrot.slane %v2553_v0, 1  ;;  %v1149_v4 = vsel %vm1129_vm5, %v1144_v63, %v1148_v61 }
  0xb9   : >> { %1734 = vmatprep.mubr.msk.bf16.mxu1 %vm212_vm0, %v553_v43  ;;  %1954 = vmatprep.subr.bf16.mxu1 %v2172_v25  ;;  %v2185_v25 = vld [vmem:[%s2828_s1 + $0x220] ss:$8 sps:$4 sm:$0xff]   ;;  %v422_v43 = vpack.c.bf16 %v408_v36, %v2646_v10 }
  0xba   : >> { %1318 = vmatprep.subr.bf16.mxu0 %v2178_v44  ;;  %v585_v26 = vsel %vm481_vm2, %v580_v17, %v584_v19  ;;  %v1137_v51 = vsel %vm1129_vm5, %v1131_v48, %v1136_v14 }
  0xbb   : >> { %1319 = vmatpush1.bf16.msra.mxu0 %v2176_v53 }
  0xbc   : >> { %1966 = vmatpush1.bf16.msra.mxu1 %v2170_v20  ;;  %1320 = vmatprep.subr.bf16.mxu0 %v2181_v57  ;;  %v556_v20 = vor.u32 %v554_v7, %v544_v62  ;;  %v1084_v62 = vld [vmem:[#allocation2 + $0xd0] sm:$0x3f]  ;;  %v1145_v7 = vsel %vm1129_vm5, %v1140_v56, %v1144_v63 }
  0xbd   : >> { %1955 = vmatprep.subr.bf16.mxu1 %v2175_v34  ;;  %v589_v34 = vshrl.u32 %v2627_v59, 16 }
  0xbe   : >> { %1052 = vmatmul.mubr.bf16.gmra.mrb[16].mxu0 %v2598_v40  ;;  %v561_v27 = vsel %vm481_vm2, %v556_v20, %v560_v21  ;;  %v1147_v40 = vsel %vm1129_vm5, %v1142_v49, %v1146_v52 }
  0xbf   : >> { %803 = vmatmul.mubr.bf16.gmra.mrb[12].mxu1 %v545_v5  ;;  %1767 = vmatprep.mubr.msk.bf16.mxu0 %vm212_vm0, %v2600_v41  ;;  %v591_v60 = vor.u32 %v589_v34, %v584_v19  ;;  %v1088_v5 = vpack.c.bf16 %v1084_v62, %v2646_v10 }
  0xc0   : >> { %1967 = vmatpush1.bf16.msra.mxu1 %v2173_v42  ;;  %1321 = vmatpush1.bf16.msra.mxu0 %v2179_v2  ;;  %v1082_v42 = vld [vmem:[#allocation2] sm:$0xfc] }
  0xc1   : >> { %1735 = vmatprep.mubr.msk.bf16.mxu1 %vm212_vm0, %v569_v6  ;;  %1956 = vmatprep.subr.bf16.mxu1 %v2178_v44  ;;  %v1135_v44 = vsel %vm1129_vm5, %v1133_v30, %v1134_v32  ;;  %v1086_v46 = vpack.c.bf16 %v2515_v31, %v1082_v42  ;;  %v1139_v31 = vsel %vm1129_vm5, %v1134_v32, %v1138_v47  ;;  %v1152_v0 = vrot.slane %v1088_v5, 1 }
  0xc2   : >> { %1322 = vmatprep.subr.bf16.mxu0 %v2184_v9  ;;  %v1437_v42 = vlaneseq }
  0xc3   : >> { %v1130_v55 = vrot.slane %v1086_v46, 1  ;;  %v1153_v6 = vsel %vm1129_vm5, %v1148_v61, %v1152_v0 }
  0xc4   : >> { %1968 = vmatpush1.bf16.msra.mxu1 %v2176_v53  ;;  %1323 = vmatpush1.bf16.msra.mxu0 %v2182_v12  ;;  %v1150_v53 = vrot.slane %v2600_v41, 1  ;;  %v1154_v41 = vrot.slane %v1089_v33, 1  ;;  %v1435_v33 = vld [vmem:[%s2829_s2] sm:$0x3] }
  0xc5   : >> { %1957 = vmatprep.subr.bf16.mxu1 %v2181_v57  ;;  %1324 = vmatprep.subr.bf16.mxu0 %v2187_v16  ;;  %v1132_v57 = vsel %vm1129_vm5, %v1130_v55, %v1131_v48 }
  0xc6   : >> { %1062 = vmatmul.mubr.bf16.gmra.mrb[20].mxu0 %v2629_v1  ;;  %v1151_v59 = vsel %vm1129_vm5, %v1146_v52, %v1150_v53  ;;  %v1155_v3 = vsel %vm1129_vm5, %v1150_v53, %v1154_v41  ;;  %v1141_v1 = vsel %vm1129_vm5, %v1136_v14, %v1140_v56 }
  0xc7   : >> { %813 = vmatmul.mubr.bf16.gmra.mrb[16].mxu1 %v561_v27  ;;  %1768 = vmatprep.mubr.msk.bf16.mxu0 %vm212_vm0, %v423_v23 }
  0xc8   : >> { %1969 = vmatpush1.bf16.msra.mxu1 %v2179_v2  ;;  %1736 = vmatprep.mubr.msk.bf16.mxu1 %vm212_vm0, %v585_v26  ;;  %v1143_v2 = vsel %vm1129_vm5, %v1138_v47, %v1142_v49 }
  0xc9   : >> { %1325 = vmatpush1.bf16.msra.mxu0 %v2185_v25  ;;  %1958 = vmatprep.subr.bf16.mxu1 %v2184_v9 }
  0xca   : >> { %1326 = vmatprep.subr.bf16.mxu0 %v2190_v35 }
  0xcc   : >> { %1970 = vmatpush1.bf16.msra.mxu1 %v2182_v12 }
  0xcd   : >> { %1327 = vmatpush1.bf16.msra.mxu0 %v2188_v37  ;;  %1959 = vmatprep.subr.bf16.mxu1 %v2187_v16 }
  0xce   : >> { %1072 = vmatmul.mubr.bf16.gmra.mrb[24].mxu0 %v422_v43 }
  0xcf   : >> { %823 = vmatmul.mubr.bf16.gmra.mrb[20].mxu1 %v577_v45  ;;  %1817 = vmatprep.mubr.msk.bf16.mxu0 %vm212_vm0, %v1135_v44  ;;  %v1438_v45 = vshrl.u32 %v1437_v42, 7 }
  0xd0   : >> { %1737 = vmatprep.mubr.msk.bf16.mxu1 %vm212_vm0, %v591_v60  ;;  %1971 = vmatpush1.bf16.msra.mxu1 %v2185_v25 }
  0xd1   : >> { %1960 = vmatprep.subr.bf16.mxu1 %v2190_v35  ;;  %v1443_v49 = vsub.s32 1, %v1438_v45 }
  0xd3   : >> { %v2752_v62 = vrot.slane %v1435_v33, %v1443_v49 }
  0xd4   : >> { %1972 = vmatpush1.bf16.msra.mxu1 %v2188_v37 }
  0xd6   : >> { %1337 = vmatmul.mubr.bf16.vlgmr.msra.gmra.mrb[0].mxu0 %v1132_v57  ;;  %v1439_v57 = vsub.s32 0, %v1438_v45 }
  0xd7   : >> { %833 = vmatmul.mubr.bf16.gmra.mrb[24].mxu1 %v588_v58  ;;  %1818 = vmatprep.mubr.msk.bf16.mxu0 %vm212_vm0, %v1139_v31 }
  0xd8   : >> { %1821 = vmatprep.mubr.msk.bf16.mxu1 %vm212_vm0, %v1151_v59 }
  0xde   : >> { %1347 = vmatmul.mubr.bf16.gmra.mrb[4].mxu0 %v1137_v51 }
  0xdf   : >> { %1377 = vmatmul.mubr.bf16.vlgmr.msra.gmra.mrb[28].mxu1 %v1149_v4  ;;  %1819 = vmatprep.mubr.msk.bf16.mxu0 %vm212_vm0, %v1143_v2 }
  0xe0   : >> { %1822 = vmatprep.mubr.msk.bf16.mxu1 %vm212_vm0, %v1155_v3 }
  0xe6   : >> { %1357 = vmatmul.mubr.bf16.gmra.mrb[8].mxu0 %v1141_v1 }
  0xe7   : >> { %1387 = vmatmul.mubr.bf16.gmra.mrb[32].mxu1 %v1153_v6  ;;  %1820 = vmatprep.mubr.msk.bf16.mxu0 %vm212_vm0, %v1147_v40 }
  0xe8   : >> { %1823 = vmatprep.mubr.msk.bf16.mxu1 %vm212_vm0, %v1154_v41  ;;  %v2750_v41 = vrot.slane %v1435_v33, %v1439_v57 }
  0xee   : >> { %1367 = vmatmul.mubr.bf16.gmra.mrb[12].mxu0 %v1145_v7 }
  0xef   : >> { %1397 = vmatmul.mubr.bf16.gmra.mrb[36].mxu1 %v1152_v0 }
 0x17a   : >> { %v774_v8 = vpop.f32.mrb[0].mxu1 }
 0x17b   : >> { %v776_v9 = vpop.f32.mrb[1].mxu1 }
 0x17c   : >> { %v778_v18 = vpop.f32.mrb[2].mxu1 }
 0x17d   : >> { %v2709_v10 = vpop.f32.mrb[3].mxu1 }
 0x182   : >> { %v2711_v11 = vpop.f32.mrb[4].mxu1 }
 0x183   : >> { %v2713_v12 = vpop.f32.mrb[5].mxu1 }
 0x184   : >> { %v2715_v13 = vpop.f32.mrb[6].mxu1 }
 0x185   : >> { %v2717_v15 = vpop.f32.mrb[7].mxu1 }
 0x18a   : >> { %v2719_v16 = vpop.f32.mrb[8].mxu1 }
 0x18b   : >> { %v2721_v17 = vpop.f32.mrb[9].mxu1 }
 0x18c   : >> { %v2723_v19 = vpop.f32.mrb[10].mxu1 }
 0x18d   : >> { %v2725_v20 = vpop.f32.mrb[11].mxu1 }
 0x191   : >> { %v1053_v21 = vpop.f32.mrb[16].mxu0 }
 0x192   : >> { %v2727_v22 = vpop.f32.mrb[12].mxu1  ;;  %v1055_v23 = vpop.f32.mrb[17].mxu0 }
 0x193   : >> { %v2729_v24 = vpop.f32.mrb[13].mxu1  ;;  %v1057_v25 = vpop.f32.mrb[18].mxu0 }
 0x194   : >> { %v2731_v26 = vpop.f32.mrb[14].mxu1  ;;  %v1059_v27 = vpop.f32.mrb[19].mxu0 }
 0x195   : >> { %v2733_v28 = vpop.f32.mrb[15].mxu1 }
 0x199   : >> { %v1063_v29 = vpop.f32.mrb[20].mxu0 }
 0x19a   : >> { %v814_v35 = vpop.f32.mrb[16].mxu1  ;;  %v1065_v30 = vpop.f32.mrb[21].mxu0 }
 0x19b   : >> { %v1054_v32 = vadd.f32 %v1053_v21, %v814_v35  ;;  %v816_v34 = vpop.f32.mrb[17].mxu1  ;;  %v1067_v36 = vpop.f32.mrb[22].mxu0 }
 0x19c   : >> { %v1056_v37 = vadd.f32 %v1055_v23, %v816_v34  ;;  %v818_v38 = vpop.f32.mrb[18].mxu1  ;;  %v1069_v39 = vpop.f32.mrb[23].mxu0 }
 0x19d   : >> { %v2735_v43 = vadd.f32 %v1057_v25, %v818_v38  ;;  %v820_v44 = vpop.f32.mrb[19].mxu1 }
 0x19e   : >> { %v2737_v60 = vadd.f32 %v1059_v27, %v820_v44 }
 0x1a1   : >> { %v1073_v46 = vpop.f32.mrb[24].mxu0 }
 0x1a2   : >> { %v824_v47 = vpop.f32.mrb[20].mxu1  ;;  %v1075_v48 = vpop.f32.mrb[25].mxu0 }
 0x1a3   : >> { %v2739_v50 = vadd.f32 %v1063_v29, %v824_v47  ;;  %v826_v52 = vpop.f32.mrb[21].mxu1  ;;  %v1077_v53 = vpop.f32.mrb[26].mxu0 }
 0x1a4   : >> { %v2741_v54 = vadd.f32 %v1065_v30, %v826_v52  ;;  %v828_v55 = vpop.f32.mrb[22].mxu1  ;;  %v1079_v31 = vpop.f32.mrb[27].mxu0 }
 0x1a5   : >> { %v2743_v58 = vadd.f32 %v1067_v36, %v828_v55  ;;  %v830_v59 = vpop.f32.mrb[23].mxu1 }
 0x1a6   : >> { %v2748_v14 = vadd.f32 %v1069_v39, %v830_v59 }
 0x1a9   : >> { %v1338_v61 = vpop.f32.mrb[0].mxu0 }
 0x1aa   : >> { %v1973_v63 = vadd.f32 %v1338_v61, %v774_v8  ;;  %v834_v2 = vpop.f32.mrb[24].mxu1  ;;  %v1340_v51 = vpop.f32.mrb[1].mxu0 }
 0x1ab   : >> { %v2754_v3 = vadd.f32 %v1073_v46, %v834_v2  ;;  %v1974_v4 = vadd.f32 %v1340_v51, %v776_v9  ;;  %v836_v5 = vpop.f32.mrb[25].mxu1  ;;  %v1342_v56 = vpop.f32.mrb[2].mxu0 }
 0x1ac   : >> { %v1447_v0 = vadd.f32 %v1973_v63, %v2750_v41  ;;  %v2757_v40 = vadd.f32 %v1075_v48, %v836_v5  ;;  %v1975_v1 = vadd.f32 %v1342_v56, %v778_v18  ;;  %v838_v6 = vpop.f32.mrb[26].mxu1  ;;  %v1344_v7 = vpop.f32.mrb[3].mxu0 }
 0x1ad   : >> { %v1448_v21 = vadd.f32 %v1974_v4, %v2752_v62  ;;  %v2760_v23 = vadd.f32 %v1077_v53, %v838_v6  ;;  %v1976_v8 = vadd.f32 %v1344_v7, %v2709_v10  ;;  %v840_v25 = vpop.f32.mrb[27].mxu1 }
 0x1ae   : >> { %v1475_v27 = vmax.f32 %v1447_v0, 0.0  ;;  %v1449_v29 = vadd.f32 %v1975_v1, %v2750_v41  ;;  %v2764_v9 = vadd.f32 %v1079_v31, %v840_v25 }
 0x1af   : >> { %v1476_v35 = vmax.f32 %v1448_v21, 0.0  ;;  %v1450_v30 = vadd.f32 %v1976_v8, %v2752_v62 }
 0x1b0   : >> { %v1477_v34 = vmax.f32 %v1449_v29, 0.0 }
 0x1b1   : >> { %v1503_v36 = vmax.f32 %v1475_v27, %v1476_v35  ;;  %v1478_v18 = vmax.f32 %v1450_v30, 0.0  ;;  %v1348_v38 = vpop.f32.mrb[4].mxu0 }
 0x1b2   : >> { %v1977_v39 = vadd.f32 %v1348_v38, %v2711_v11  ;;  %v1350_v42 = vpop.f32.mrb[5].mxu0  ;;  %v1378_v44 = vpop.f32.mrb[28].mxu1 }
 0x1b3   : >> { %1517 = vst [vmem:[#allocation3] sm:$0xff] %v1503_v36  ;;  %v1504_v45 = vmax.f32 %v1477_v34, %v1478_v18  ;;  %v1978_v10 = vadd.f32 %v1350_v42, %v2713_v12  ;;  %v1423_v46 = vadd.f32 %v1378_v44, %v1054_v32  ;;  %v1352_v47 = vpop.f32.mrb[6].mxu0  ;;  %v1380_v48 = vpop.f32.mrb[29].mxu1 }
 0x1b4   : >> { %v1451_v52 = vadd.f32 %v1977_v39, %v2750_v41  ;;  %v1979_v53 = vadd.f32 %v1352_v47, %v2715_v13  ;;  %v1424_v55 = vadd.f32 %v1380_v48, %v1056_v37  ;;  %v1354_v31 = vpop.f32.mrb[7].mxu0  ;;  %v1382_v57 = vpop.f32.mrb[30].mxu1 }
 0x1b5   : >> { %1518 = vst [vmem:[#allocation3 + $0x8] sm:$0xff] %v1504_v45  ;;  %v1452_v59 = vadd.f32 %v1978_v10, %v2752_v62  ;;  %v1463_v11 = vadd.f32 %v2750_v41, %v1423_v46  ;;  %v1980_v33 = vadd.f32 %v1354_v31, %v2717_v15  ;;  %v1425_v49 = vadd.f32 %v1382_v57, %v2735_v43  ;;  %v1384_v12 = vpop.f32.mrb[31].mxu1 }
 0x1b6   : >> { %v1479_v32 = vmax.f32 %v1451_v52, 0.0  ;;  %v1453_v61 = vadd.f32 %v1979_v53, %v2750_v41  ;;  %v1464_v63 = vadd.f32 %v2752_v62, %v1424_v55  ;;  %v1426_v13 = vadd.f32 %v1384_v12, %v2737_v60 }
 0x1b7   : >> { %v1480_v37 = vmax.f32 %v1452_v59, 0.0  ;;  %v1491_v2 = vmax.f32 %v1463_v11, 0.0  ;;  %v1454_v51 = vadd.f32 %v1980_v33, %v2752_v62  ;;  %v1465_v4 = vadd.f32 %v2750_v41, %v1425_v49 }
 0x1b8   : >> { %v1481_v5 = vmax.f32 %v1453_v61, 0.0  ;;  %v1492_v56 = vmax.f32 %v1464_v63, 0.0  ;;  %v1466_v15 = vadd.f32 %v2752_v62, %v1426_v13 }
 0x1b9   : >> { %v1505_v0 = vmax.f32 %v1479_v32, %v1480_v37  ;;  %v1482_v43 = vmax.f32 %v1454_v51, 0.0  ;;  %v1493_v1 = vmax.f32 %v1465_v4, 0.0  ;;  %v1358_v6 = vpop.f32.mrb[8].mxu0 }
 0x1ba   : >> { %v1511_v7 = vmax.f32 %v1491_v2, %v1492_v56  ;;  %v1494_v21 = vmax.f32 %v1466_v15, 0.0  ;;  %v1981_v8 = vadd.f32 %v1358_v6, %v2719_v16  ;;  %v1360_v25 = vpop.f32.mrb[9].mxu0  ;;  %v1388_v60 = vpop.f32.mrb[32].mxu1 }
 0x1bb   : >> { %1519 = vst [vmem:[#allocation3 + $0x10] sm:$0xff] %v1505_v0  ;;  %v1506_v27 = vmax.f32 %v1481_v5, %v1482_v43  ;;  %v1982_v29 = vadd.f32 %v1360_v25, %v2721_v17  ;;  %v1427_v35 = vadd.f32 %v1388_v60, %v2739_v50  ;;  %v1362_v30 = vpop.f32.mrb[10].mxu0  ;;  %v1390_v34 = vpop.f32.mrb[33].mxu1 }
 0x1bc   : >> { %1525 = vst [vmem:[#allocation3 + $0x40] sm:$0xff] %v1511_v7  ;;  %v1512_v36 = vmax.f32 %v1493_v1, %v1494_v21  ;;  %v1455_v18 = vadd.f32 %v1981_v8, %v2750_v41  ;;  %v1983_v38 = vadd.f32 %v1362_v30, %v2723_v19  ;;  %v1428_v39 = vadd.f32 %v1390_v34, %v2741_v54  ;;  %v1364_v42 = vpop.f32.mrb[11].mxu0  ;;  %v1392_v16 = vpop.f32.mrb[34].mxu1  ;;  %v1531_v57 = vld [vmem:[#allocation3] ss:$2 sm:$0xff] }
 0x1bd   : >> { %1520 = vst [vmem:[#allocation3 + $0x18] sm:$0xff] %v1506_v27  ;;  %v1456_v44 = vadd.f32 %v1982_v29, %v2752_v62  ;;  %v1467_v45 = vadd.f32 %v2750_v41, %v1427_v35  ;;  %v1984_v17 = vadd.f32 %v1364_v42, %v2725_v20  ;;  %v1394_v50 = vpop.f32.mrb[35].mxu1  ;;  %v1429_v19 = vadd.f32 %v1392_v16, %v2743_v58  ;;  %v1545_v59 = vld [vmem:[#allocation3 + $0x1] ss:$2 sm:$0xff] }
 0x1be   : >> { %1526 = vst [vmem:[#allocation3 + $0x48] sm:$0xff] %v1512_v36  ;;  %v1483_v10 = vmax.f32 %v1455_v18, 0.0  ;;  %v1457_v46 = vadd.f32 %v1983_v38, %v2750_v41  ;;  %v1468_v47 = vadd.f32 %v2752_v62, %v1428_v39  ;;  %v1430_v53 = vadd.f32 %v1394_v50, %v2748_v14 }
 0x1bf   : >> { %v1484_v54 = vmax.f32 %v1456_v44, 0.0  ;;  %v1495_v48 = vmax.f32 %v1467_v45, 0.0  ;;  %v1458_v52 = vadd.f32 %v1984_v17, %v2752_v62  ;;  %v1469_v20 = vadd.f32 %v2750_v41, %v1429_v19 }
 0x1c0   : >> { %v1485_v55 = vmax.f32 %v1457_v46, 0.0  ;;  %v1496_v31 = vmax.f32 %v1468_v47, 0.0  ;;  %v1470_v49 = vadd.f32 %v2752_v62, %v1430_v53  ;;  %v1558_v56 = vmax.f32 %v1531_v57, %v1545_v59 }
 0x1c1   : >> { %v1507_v11 = vmax.f32 %v1483_v10, %v1484_v54  ;;  %v1486_v33 = vmax.f32 %v1458_v52, 0.0  ;;  %v1368_v12 = vpop.f32.mrb[12].mxu0  ;;  %v1497_v58 = vmax.f32 %v1469_v20, 0.0 }
 0x1c2   : >> { %v1513_v32 = vmax.f32 %v1495_v48, %v1496_v31  ;;  %v1985_v61 = vadd.f32 %v1368_v12, %v2727_v22  ;;  %v1370_v63 = vpop.f32.mrb[13].mxu0  ;;  %v1398_v13 = vpop.f32.mrb[36].mxu1  ;;  %v1498_v37 = vmax.f32 %v1470_v49, 0.0 }
 0x1c3   : >> { %1521 = vst [vmem:[#allocation3 + $0x20] sm:$0xff] %v1507_v11  ;;  %v1508_v14 = vmax.f32 %v1485_v55, %v1486_v33  ;;  %v1986_v2 = vadd.f32 %v1370_v63, %v2729_v24  ;;  %v1431_v51 = vadd.f32 %v1398_v13, %v2754_v3  ;;  %v1372_v4 = vpop.f32.mrb[14].mxu0  ;;  %v1400_v5 = vpop.f32.mrb[37].mxu1 }
 0x1c4   : >> { %v1533_v15 = vld [vmem:[#allocation3 + $0x10] ss:$2 sm:$0xff]  ;;  %v1547_v0 = vld [vmem:[#allocation3 + $0x11] ss:$2 sm:$0xff]  ;;  %1527 = vst [vmem:[#allocation3 + $0x50] sm:$0xff] %v1513_v32  ;;  %v1459_v43 = vadd.f32 %v1985_v61, %v2750_v41  ;;  %v1987_v22 = vadd.f32 %v1372_v4, %v2731_v26  ;;  %v1432_v1 = vadd.f32 %v1400_v5, %v2757_v40  ;;  %v1374_v6 = vpop.f32.mrb[15].mxu0  ;;  %v1514_v24 = vmax.f32 %v1497_v58, %v1498_v37 }
 0x1c5   : >> { %v1402_v7 = vpop.f32.mrb[38].mxu1  ;;  %v1559_v21 = vmax.f32 %v1533_v15, %v1547_v0  ;;  %1522 = vst [vmem:[#allocation3 + $0x28] sm:$0xff] %v1508_v14  ;;  %v1460_v3 = vadd.f32 %v1986_v2, %v2752_v62  ;;  %v1471_v8 = vadd.f32 %v2750_v41, %v1431_v51  ;;  %v1988_v30 = vadd.f32 %v1374_v6, %v2733_v28  ;;  %v1539_v50 = vld [vmem:[#allocation3 + $0x40] ss:$2 sm:$0xff]  ;;  %v1553_v28 = vld [vmem:[#allocation3 + $0x41] ss:$2 sm:$0xff] }
 0x1c6   : >> { %v1404_v25 = vpop.f32.mrb[39].mxu1  ;;  %v1487_v60 = vmax.f32 %v1459_v43, 0.0  ;;  %v1461_v27 = vadd.f32 %v1987_v22, %v2750_v41  ;;  %v1472_v26 = vadd.f32 %v2752_v62, %v1432_v1  ;;  %1528 = vst [vmem:[#allocation3 + $0x58] sm:$0xff] %v1514_v24  ;;  %v1433_v36 = vadd.f32 %v1402_v7, %v2760_v23 }
 0x1c7   : >> { %v1920_v29 = vpack.c.bf16 %v1559_v21, %v1558_v56  ;;  %v1488_v40 = vmax.f32 %v1460_v3, 0.0  ;;  %v1499_v35 = vmax.f32 %v1471_v8, 0.0  ;;  %v1434_v18 = vadd.f32 %v1404_v25, %v2764_v9 }
 0x1c8   : >> { %v1500_v34 = vmax.f32 %v1472_v26, 0.0  ;;  %v1489_v39 = vmax.f32 %v1461_v27, 0.0  ;;  %v1462_v42 = vadd.f32 %v1988_v30, %v2752_v62  ;;  %v1473_v44 = vadd.f32 %v2750_v41, %v1433_v36 }
 0x1c9   : >> { %1921 = vst [vmem:[%s2807_s25] sm:$0xff] %v1920_v29   ;;  %v1509_v38 = vmax.f32 %v1487_v60, %v1488_v40  ;;  %v1474_v45 = vadd.f32 %v2752_v62, %v1434_v18  ;;  %v1562_v54 = vmax.f32 %v1539_v50, %v1553_v28 }
 0x1ca   : >> { %v1515_v16 = vmax.f32 %v1499_v35, %v1500_v34  ;;  %v1490_v17 = vmax.f32 %v1462_v42, 0.0  ;;  %v1501_v10 = vmax.f32 %v1473_v44, 0.0 }
 0x1cb   : >> { %1523 = vst [vmem:[#allocation3 + $0x30] sm:$0xff] %v1509_v38  ;;  %v1502_v23 = vmax.f32 %v1474_v45, 0.0 }
 0x1cc   : >> { %1529 = vst [vmem:[#allocation3 + $0x60] sm:$0xff] %v1515_v16  ;;  %v1510_v46 = vmax.f32 %v1489_v39, %v1490_v17  ;;  %v1535_v62 = vld [vmem:[#allocation3 + $0x20] ss:$2 sm:$0xff]  ;;  %v1549_v52 = vld [vmem:[#allocation3 + $0x21] ss:$2 sm:$0xff] }
 0x1cd   : >> { %v1541_v9 = vld [vmem:[#allocation3 + $0x50] ss:$2 sm:$0xff]  ;;  %v1555_v47 = vld [vmem:[#allocation3 + $0x51] ss:$2 sm:$0xff]  ;;  %v1516_v19 = vmax.f32 %v1501_v10, %v1502_v23  ;;  %v1560_v31 = vmax.f32 %v1535_v62, %v1549_v52 }
 0x1ce   : >> { %v1563_v48 = vmax.f32 %v1541_v9, %v1555_v47  ;;  %1524 = vst [vmem:[#allocation3 + $0x38] sm:$0xff] %v1510_v46 }
 0x1cf   : >> { %1530 = vst [vmem:[#allocation3 + $0x68] sm:$0xf] %v1516_v19 }
 0x1d0   : >> { %v1930_v41 = vpack.c.bf16 %v1563_v48, %v1562_v54 }
 0x1d2   : >> { %1948 = vst [vmem:[%s2807_s25 + $0x10] sm:$0xff] %v1930_v41  }
 0x1d5   : >> { %v1537_v53 = vld [vmem:[#allocation3 + $0x30] ss:$2 sm:$0xff]  ;;  %v1551_v55 = vld [vmem:[#allocation3 + $0x31] ss:$2 sm:$0xff]  ;;  %176 = sbr.rel (!%p174_p7) target bundleno = 18 (0x12), region = 88 }
 0x1d6   : >> { %v1561_v20 = vmax.f32 %v1537_v53, %v1551_v55  ;;  %v1543_v57 = vld [vmem:[#allocation3 + $0x60] ss:$2 sm:$0x3f]  ;;  %v1557_v59 = vld [vmem:[#allocation3 + $0x61] ss:$2 sm:$0x3f] }
 0x1d7   : >> { %v1564_v11 = vmax.f32 %v1543_v57, %v1557_v59 }
 0x1d8   : >> { %v1925_v33 = vpack.c.bf16 %v1561_v20, %v1560_v31 }
 0x1d9   : >> { %v1843_v49 = vpack.c.bf16 %v1564_v11, %v1564_v11 }
 0x1da   : >> { %1947 = vst [vmem:[%s2807_s25 + $0x8] sm:$0xff] %v1925_v33  }
 0x1db   : >> { %1603 = vst [vmem:[%s2807_s25 + $0x18] sm:$0x7] %v1843_v49 }
 0x1dc PF: > { %s13_s12 = sadd.s32 1, %s2201_s12  }
 0x1dd   : > { %p10_p8 = scmp.ge.s32.totalorder %s13_s12, 4  }
 0x1df   :  { %12 = sbr.rel (!%p10_p8) target bundleno = 1 (0x1), region = 99 }

// kernel: forward.6
= control target key start
LH: loop header
LB: loop body
LE: loop exit
PB: predicated region body
PF: predicated region fallthrough
CT: control target
= control target key end

     0   :  { %s2610_s12 = smov 0   ;;  %s3256_s0 = inlined_call_operand.vmem [shape: bf16[2,20,54,128], index: 0, kind: input, shape index: {}]   ;;  %s3257_s1 = inlined_call_operand.vmem [shape: bf16[3,384,256], index: 1, kind: input, shape index: {}]   ;;  %s3258_s2 = inlined_call_operand.vmem [shape: f32[1,256], index: 2, kind: input, shape index: {}]   ;;  %s3259_s3 = inlined_call_operand.vmem [shape: bf16[2,10,26,128], index: 3, kind: output, shape index: {}]  }
   0x1 LB: > { %s1938_s13 = sadd.s32 4294967295, %s2583_s12   ;;  %p1942_p0 = scmp.ge.s32.totalorder %s2583_s12, 1  ;;  %s2583_s12 = sphi %s2610_s12, %s13_s12  }
   0x2   : > { %p137_p1 = scmp.lt.s32.totalorder %s2583_s12, 3 }
   0x4   : > { %p138_p2 = pnand %p1942_p0, %p137_p1 }
   0x5   : > { %p161_p3 = scmp.lt.s32.totalorder (!%p138_p2), %s1938_s13, 1  ;;  %s2628_s22 = smov (!%p138_p2), 0  }
   0x6   : > { %141 = sbr.rel (%p138_p2) target bundleno = 425 (0x1a9), region = 32 }
   0xd   : > { %s3261_s13 = smov (!%p161_p3, %s1938_s13), 1 }
   0xe   : > { %s2328_s14 = smul.u32 560, %s3261_s13 }
   0xf   : > { %s2329_s15 = smul.u32 160, %s3261_s13 }
  0x10   : > { %s2621_s18 = scalar_lea.vmem %s3256_s0, %s2328_s14 }
  0x11   : > { %s2626_s21 = scalar_lea.vmem %s3259_s3, %s2329_s15 }
  0x12 LB: >> { %v2347_v0 = vld [vmem:[%s3257_s1 + $0x184] ss:$8 sps:$4 sm:$0xff]   ;;  %v2589_v2 = vmov 0   ;;  %v2351_v3 = vld [vmem:[%s3257_s1 + $0x180] ss:$8 sps:$4 sm:$0xff]   ;;  %s2647_s4 = sshll.u32 %s2587_s22, 1  ;;  %s2587_s22 = sphi %s2628_s22, %s177_s22  }
  0x13   : >> { %v2349_v1 = vld [vmem:[%s3257_s1 + $0x284] ss:$8 sps:$4 sm:$0xff]   ;;  %850 = vmatprep.mubr.bf16.mxu0 %v2589_v2  ;;  %747 = vmatprep.subr.bf16.mxu1 %v2347_v0  ;;  %v2352_v4 = vld [vmem:[%s3257_s1 + $0x280] ss:$8 sps:$4 sm:$0xff]   ;;  %v2353_v5 = vld [vmem:[%s3257_s1 + $0x194] ss:$8 sps:$4 sm:$0xff]  }
  0x14   : >> { %818 = vmatprep.subr.bf16.mxu0 %v2349_v1  ;;  %s232_s7 = sadd.s32 2, %s2647_s4  ;;  %748 = vmatpush1.bf16.msra.mxu1 %v2351_v3  ;;  %v2355_v6 = vld [vmem:[%s3257_s1 + $0x294] ss:$8 sps:$4 sm:$0xff]   ;;  %v2357_v7 = vld [vmem:[%s3257_s1 + $0x190] ss:$8 sps:$4 sm:$0xff]   ;;  %s205_s23 = sadd.s32 1, %s2647_s4 }
  0x15   : >> { %819 = vmatpush1.bf16.msra.mxu0 %v2352_v4  ;;  %749 = vmatprep.subr.bf16.mxu1 %v2353_v5  ;;  %v2358_v8 = vld [vmem:[%s3257_s1 + $0x290] ss:$8 sps:$4 sm:$0xff]   ;;  %v2359_v9 = vld [vmem:[%s3257_s1 + $0x1a4] ss:$8 sps:$4 sm:$0xff]   ;;  %p233_p4 = scmp.lt.s32.totalorder %s232_s7, 19  ;;  %p206_p5 = scmp.lt.s32.totalorder %s205_s23, 19 }
  0x16   : >> { %820 = vmatprep.subr.bf16.mxu0 %v2355_v6  ;;  %v2361_v10 = vld [vmem:[%s3257_s1 + $0x2a4] ss:$8 sps:$4 sm:$0xff]   ;;  %v2363_v11 = vld [vmem:[%s3257_s1 + $0x1a0] ss:$8 sps:$4 sm:$0xff]   ;;  %v2365_v13 = vld [vmem:[%s3257_s1 + $0x1b4] ss:$8 sps:$4 sm:$0xff]  }
  0x17   : >> { %v2364_v12 = vld [vmem:[%s3257_s1 + $0x2a0] ss:$8 sps:$4 sm:$0xff]   ;;  %v2367_v14 = vld [vmem:[%s3257_s1 + $0x2b4] ss:$8 sps:$4 sm:$0xff]   ;;  %v2369_v15 = vld [vmem:[%s3257_s1 + $0x1b0] ss:$8 sps:$4 sm:$0xff]  }
  0x18   : >> { %750 = vmatpush1.bf16.msra.mxu1 %v2357_v7  ;;  %s3263_s7 = smov (!%p233_p4, %s232_s7), 19  ;;  %v2370_v16 = vld [vmem:[%s3257_s1 + $0x2b0] ss:$8 sps:$4 sm:$0xff]   ;;  %v2371_v17 = vld [vmem:[%s3257_s1 + $0x1c4] ss:$8 sps:$4 sm:$0xff]   ;;  %p179_p6 = scmp.lt.s32.totalorder %s2647_s4, 19 }
  0x19   : >> { %821 = vmatpush1.bf16.msra.mxu0 %v2358_v8  ;;  %751 = vmatprep.subr.bf16.mxu1 %v2359_v9  ;;  %v2373_v18 = vld [vmem:[%s3257_s1 + $0x2c4] ss:$8 sps:$4 sm:$0xff]   ;;  %v2375_v19 = vld [vmem:[%s3257_s1 + $0x1c0] ss:$8 sps:$4 sm:$0xff]   ;;  %s2199_s19 = smul.u32 28, %s3263_s7  ;;  %s3265_s23 = smov (!%p206_p5, %s205_s23), 19 }
  0x1a   : >> { %822 = vmatprep.subr.bf16.mxu0 %v2361_v10  ;;  %v2376_v20 = vld [vmem:[%s3257_s1 + $0x2c0] ss:$8 sps:$4 sm:$0xff]   ;;  %v2377_v21 = vld [vmem:[%s3257_s1 + $0x1d4] ss:$8 sps:$4 sm:$0xff]   ;;  %v2381_v23 = vld [vmem:[%s3257_s1 + $0x1d0] ss:$8 sps:$4 sm:$0xff]  }
  0x1b   : >> { %v2379_v22 = vld [vmem:[%s3257_s1 + $0x2d4] ss:$8 sps:$4 sm:$0xff]   ;;  %s2708_s28 = scalar_lea.vmem %s2621_s18, %s2199_s19  ;;  %v2382_v24 = vld [vmem:[%s3257_s1 + $0x2d0] ss:$8 sps:$4 sm:$0xff]   ;;  %v2383_v25 = vld [vmem:[%s3257_s1 + $0x1e4] ss:$8 sps:$4 sm:$0xff]  }
  0x1c   : >> { %752 = vmatpush1.bf16.msra.mxu1 %v2363_v11  ;;  %v2385_v26 = vld [vmem:[%s3257_s1 + $0x2e4] ss:$8 sps:$4 sm:$0xff]   ;;  %v2387_v30 = vld [vmem:[%s3257_s1 + $0x1e0] ss:$8 sps:$4 sm:$0xff]   ;;  %v2389_v32 = vld [vmem:[%s3257_s1 + $0x1f4] ss:$8 sps:$4 sm:$0xff]  }
  0x1d   : >> { %823 = vmatpush1.bf16.msra.mxu0 %v2364_v12  ;;  %753 = vmatprep.subr.bf16.mxu1 %v2365_v13  ;;  %v2230_v27 = vld [vmem:[%s2708_s28] sm:$0xff]   ;;  %v2391_v33 = vld [vmem:[%s3257_s1 + $0x2f4] ss:$8 sps:$4 sm:$0xff]   ;;  %v2393_v34 = vld [vmem:[%s3257_s1 + $0x1f0] ss:$8 sps:$4 sm:$0xff]   ;;  %s3267_s4 = smov (!%p179_p6, %s2647_s4), 19 }
  0x1e   : >> { %824 = vmatprep.subr.bf16.mxu0 %v2367_v14  ;;  %v2231_v28 = vunpack.c.l.bf16 %v2230_v27  ;;  %v2232_v29 = vunpack.c.h.bf16 %v2230_v27  ;;  %v2388_v31 = vld [vmem:[%s3257_s1 + $0x2e0] ss:$8 sps:$4 sm:$0xff]   ;;  %v2394_v35 = vld [vmem:[%s3257_s1 + $0x2f0] ss:$8 sps:$4 sm:$0xff]   ;;  %v2395_v36 = vld [vmem:[%s3257_s1 + $0x204] ss:$8 sps:$4 sm:$0xff]  }
  0x1f   : >> { %v2743_v37 = vld [vmem:[%s2708_s28 + $0x8] sm:$0xff]  ;;  %v2402_v43 = vld [vmem:[%s3257_s1 + $0x214] ss:$8 sps:$4 sm:$0xff]   ;;  %v244_v47 = vld [vmem:[%s2708_s28 + $0x18] sm:$0x7]  ;;  %s2198_s14 = smul.u32 28, %s3265_s23 }
  0x20   : >> { %754 = vmatpush1.bf16.msra.mxu1 %v2369_v15  ;;  %252 = vst [vmem:[#allocation2 + $0x10] sm:$0xff] %v2231_v28  ;;  %253 = vst [vmem:[#allocation2 + $0x28] sm:$0xff] %v2232_v29  ;;  %v2400_v38 = vld [vmem:[%s3257_s1 + $0x104] ss:$8 sps:$4 sm:$0xff]   ;;  %v2401_v39 = vld [vmem:[%s3257_s1 + $0x200] ss:$8 sps:$4 sm:$0xff]   ;;  %v251_v51 = vunpack.c.l.bf16 %v244_v47 }
  0x21   : >> { %825 = vmatpush1.bf16.msra.mxu0 %v2370_v16  ;;  %755 = vmatprep.subr.bf16.mxu1 %v2371_v17  ;;  %v434_v41 = vshll.u32 %v2743_v37, 16  ;;  %v2757_v44 = vld [vmem:[%s2708_s28 + $0x10] sm:$0xff]  ;;  %v454_v50 = vshrl.u32 %v2743_v37, 16  ;;  %v2408_v53 = vld [vmem:[%s3257_s1 + $0x224] ss:$8 sps:$4 sm:$0xff]   ;;  %s2197_s20 = smul.u32 28, %s3267_s4  ;;  %s2791_s4 = scalar_lea.vmem %s2621_s18, %s2198_s14 }
  0x22   : >> { %826 = vmatprep.subr.bf16.mxu0 %v2373_v18  ;;  %v2407_v49 = vld [vmem:[%s3257_s1 + $0x210] ss:$8 sps:$4 sm:$0xff]   ;;  %v458_v54 = vshll.u32 %v2757_v44, 16  ;;  %vm401_vm0 = vsmask.f32 7424  ;;  %v1352_v63 = vrot.slane %v2743_v37, 1 }
  0x23   : >> { %v436_v48 = vrot.slane %v434_v41, 1  ;;  %258 = vst [vmem:[#allocation2 + $0xa0] sm:$0x3f] %v251_v51  ;;  %v2398_v56 = vld [vmem:[%s3257_s1 + $0x100] ss:$8 sps:$4 sm:$0xff]   ;;  %v1358_v0 = vrot.slane %v2757_v44, 1  ;;  %s2798_s29 = scalar_lea.vmem %s2621_s18, %s2197_s20 }
  0x24   : >> { %756 = vmatpush1.bf16.msra.mxu1 %v2375_v19  ;;  %v2406_v57 = vld [vmem:[%s3257_s1 + $0x114] ss:$8 sps:$4 sm:$0xff]   ;;  %v2414_v59 = vld [vmem:[%s3257_s1 + $0x220] ss:$8 sps:$4 sm:$0xff]   ;;  %v460_v61 = vrot.slane %v458_v54, 1  ;;  %vm1344_vm1 = vcmask 1046528  }
  0x25   : >> { %827 = vmatpush1.bf16.msra.mxu0 %v2376_v20  ;;  %757 = vmatprep.subr.bf16.mxu1 %v2377_v21  ;;  %v456_v58 = vor.u32 %v454_v50, %v436_v48  ;;  %v2415_v62 = vld [vmem:[%s3257_s1 + $0x234] ss:$8 sps:$4 sm:$0xff]   ;;  %v2404_v1 = vld [vmem:[%s3257_s1 + $0x110] ss:$8 sps:$4 sm:$0xff]   ;;  %v2805_v3 = vsel %vm1344_vm1, %v1352_v63, %v1358_v0  ;;  %v2413_v4 = vld [vmem:[%s3257_s1 + $0x124] ss:$8 sps:$4 sm:$0xff]  }
  0x26   : >> { %828 = vmatprep.subr.bf16.mxu0 %v2379_v22  ;;  %v2420_v5 = vld [vmem:[%s3257_s1 + $0x230] ss:$8 sps:$4 sm:$0xff]   ;;  %v2421_v6 = vld [vmem:[%s3257_s1 + $0x244] ss:$8 sps:$4 sm:$0xff]   ;;  %v478_v9 = vshrl.u32 %v2757_v44, 16  ;;  %s2204_s16 = sshll.u32 %s2587_s22, 4 }
  0x27   : >> { %v342_v40 = vld [vmem:[#allocation2 + $0x10] sm:$0xfe]  ;;  %v461_v7 = vsel %vm401_vm0, %v456_v58, %v460_v61  ;;  %v2819_v10 = vld [vmem:[%s2791_s4] sm:$0xff]   ;;  %s1865_s17 = scalar_lea.vmem %s2626_s21, %s2204_s16  ;;  %s177_s22 = sadd.s32 1, %s2587_s22  }
  0x28   : >> { %758 = vmatpush1.bf16.msra.mxu1 %v2381_v23  ;;  %v348_v42 = vpack.c.bf16 %v2232_v29, %v342_v40  ;;  %v2219_v12 = vunpack.c.l.bf16 %v2819_v10  ;;  %v2220_v13 = vunpack.c.h.bf16 %v2819_v10  ;;  %v2826_v14 = vld [vmem:[%s2798_s29] sm:$0xff]   ;;  %v2419_v18 = vld [vmem:[%s3257_s1 + $0x134] ss:$8 sps:$4 sm:$0xff]   ;;  %v2417_v22 = vld [vmem:[%s3257_s1 + $0x130] ss:$8 sps:$4 sm:$0xff]   ;;  %v480_v23 = vor.u32 %v478_v9, %v460_v61  ;;  %p174_p7 = scmp.ge.s32.totalorder %s177_s22, 10  }
  0x29   : >> { %829 = vmatpush1.bf16.msra.mxu0 %v2382_v24  ;;  %759 = vmatprep.subr.bf16.mxu1 %v2383_v25  ;;  %v2411_v15 = vld [vmem:[%s3257_s1 + $0x120] ss:$8 sps:$4 sm:$0xff]   ;;  %v2207_v16 = vunpack.c.l.bf16 %v2826_v14  ;;  %v2208_v17 = vunpack.c.h.bf16 %v2826_v14  ;;  %v2427_v21 = vld [vmem:[%s3257_s1 + $0x254] ss:$8 sps:$4 sm:$0xff]   ;;  %v2425_v25 = vld [vmem:[%s3257_s1 + $0x144] ss:$8 sps:$4 sm:$0xff]  }
  0x2a   : >> { %830 = vmatprep.subr.bf16.mxu0 %v2385_v26  ;;  %v427_v45 = vshrl.u32 %v348_v42, 16  ;;  %v429_v46 = vshll.u32 %v348_v42, 16  ;;  %v345_v8 = vld [vmem:[#allocation2 + $0xa0] sm:$0x1f]  ;;  %225 = vst [vmem:[#allocation2 + $0x8] sm:$0xff] %v2219_v12  ;;  %v2851_v26 = vld [vmem:[%s2791_s4 + $0x8] sm:$0xff] }
  0x2b   : >> { %v2821_v11 = vpack.c.bf16 %v345_v8, %v345_v8  ;;  %v2426_v20 = vld [vmem:[%s3257_s1 + $0x240] ss:$8 sps:$4 sm:$0xff]   ;;  %198 = vst [vmem:[#allocation2] sm:$0xff] %v2207_v16  ;;  %v2432_v27 = vld [vmem:[%s3257_s1 + $0x250] ss:$8 sps:$4 sm:$0xff]  }
  0x2c   : >> { %760 = vmatpush1.bf16.msra.mxu1 %v2387_v30  ;;  %v431_v52 = vrot.slane %v429_v46, 1  ;;  %v2423_v28 = vld [vmem:[%s3257_s1 + $0x140] ss:$8 sps:$4 sm:$0xff]   ;;  %v2433_v29 = vld [vmem:[%s3257_s1 + $0x264] ss:$8 sps:$4 sm:$0xff]   ;;  %v446_v46 = vshrl.u32 %v2851_v26, 16 }
  0x2d   : >> { %831 = vmatpush1.bf16.msra.mxu0 %v2388_v31  ;;  %761 = vmatprep.subr.bf16.mxu1 %v2389_v32  ;;  %v482_v19 = vshll.u32 %v2821_v11, 16  ;;  %v2863_v30 = vld [vmem:[%s2798_s29 + $0x8] sm:$0xff]  ;;  %v2866_v31 = vld [vmem:[%s2791_s4 + $0x10] sm:$0xff]  ;;  %v492_v41 = vshrl.u32 %v2821_v11, 16 }
  0x2e   : >> { %832 = vmatprep.subr.bf16.mxu0 %v2391_v33  ;;  %v432_v55 = vor.u32 %v431_v52, %v427_v45  ;;  %v2431_v33 = vld [vmem:[%s3257_s1 + $0x154] ss:$8 sps:$4 sm:$0xff]   ;;  %v2429_v40 = vld [vmem:[%s3257_s1 + $0x150] ss:$8 sps:$4 sm:$0xff]   ;;  %v410_v45 = vshll.u32 %v2863_v30, 16  ;;  %v450_v50 = vshll.u32 %v2866_v31, 16 }
  0x2f   : >> { %v484_v24 = vrot.slane %v482_v19, 1  ;;  %v2439_v42 = vld [vmem:[%s3257_s1 + $0x274] ss:$8 sps:$4 sm:$0xff]   ;;  %v2437_v47 = vld [vmem:[%s3257_s1 + $0x164] ss:$8 sps:$4 sm:$0xff]  }
  0x30   : >> { %762 = vmatpush1.bf16.msra.mxu1 %v2393_v34  ;;  %v437_v60 = vsel %vm401_vm0, %v432_v55, %v436_v48  ;;  %v2444_v51 = vld [vmem:[%s3257_s1 + $0x270] ss:$8 sps:$4 sm:$0xff]   ;;  %v2435_v8 = vld [vmem:[%s3257_s1 + $0x160] ss:$8 sps:$4 sm:$0xff]   ;;  %v2443_v11 = vld [vmem:[%s3257_s1 + $0x174] ss:$8 sps:$4 sm:$0xff]  }
  0x31   : >> { %833 = vmatpush1.bf16.msra.mxu0 %v2394_v35  ;;  %763 = vmatprep.subr.bf16.mxu1 %v2395_v36  ;;  %v485_v32 = vsel %vm401_vm0, %v480_v23, %v484_v24  ;;  %v341_v34 = vld [vmem:[#allocation2 + $0x8] sm:$0xfe]  ;;  %v422_v35 = vshll.u32 %v2851_v26, 16  ;;  %v494_v58 = vor.u32 %v492_v41, %v484_v24  ;;  %v2543_v14 = vld [vmem:[%s3257_s1 + $0x3f0] ss:$8 sps:$4 sm:$0xff]  }
  0x32   : >> { %1200 = vmatprep.subr.bf16.mxu0 %v2400_v38  ;;  %v2438_v36 = vld [vmem:[%s3257_s1 + $0x260] ss:$8 sps:$4 sm:$0xff]   ;;  %v347_v38 = vpack.c.bf16 %v2220_v13, %v341_v34  ;;  %v2452_v23 = vld [vmem:[%s3257_s1 + $0x304] ss:$8 sps:$4 sm:$0xff]  }
  0x33   : >> { %v424_v52 = vrot.slane %v422_v35, 1  ;;  %v2447_v19 = vld [vmem:[%s3257_s1] ss:$8 sps:$4 sm:$0xff]   ;;  %v2503_v10 = vld [vmem:[%s3257_s1 + $0x384] ss:$8 sps:$4 sm:$0xff]  }
  0x34   : >> { %764 = vmatpush1.bf16.msra.mxu1 %v2401_v39  ;;  %851 = vmatmul.mubr.bf16.vlgmr.msra.gmra.mrb[0].mxu0 %v437_v60  ;;  %v340_v39 = vld [vmem:[#allocation2] sm:$0xfe]  ;;  %v415_v48 = vshrl.u32 %v347_v38, 16  ;;  %v412_v60 = vrot.slane %v410_v45, 1 }
  0x35   : >> { %765 = vmatprep.subr.bf16.mxu1 %v2402_v43  ;;  %1201 = vmatpush1.bf16.msra.mxu0 %v2398_v56  ;;  %v346_v43 = vpack.c.bf16 %v2208_v17, %v340_v39  ;;  %v2449_v56 = vld [vmem:[%s3257_s1 + $0x4] ss:$8 sps:$4 sm:$0xff]   ;;  %v448_v61 = vor.u32 %v446_v46, %v424_v52 }
  0x36   : >> { %860 = vmatprep.mubr.bf16.mxu0 %v2589_v2  ;;  %1202 = vmatprep.subr.bf16.mxu0 %v2406_v57  ;;  %v2901_v57 = vld [vmem:[%s2798_s29 + $0x10] sm:$0xff] }
  0x37   : >> { %v405_v54 = vshll.u32 %v346_v43, 16  ;;  %v442_v16 = vshll.u32 %v2901_v57, 16  ;;  %v462_v41 = vshrl.u32 %v2901_v57, 16 }
  0x38   : >> { %766 = vmatpush1.bf16.msra.mxu1 %v2407_v49  ;;  %v417_v49 = vshll.u32 %v347_v38, 16 }
  0x39   : >> { %767 = vmatprep.subr.bf16.mxu1 %v2408_v53  ;;  %1203 = vmatpush1.bf16.msra.mxu0 %v2404_v1  ;;  %v403_v53 = vshrl.u32 %v346_v43, 16  ;;  %v190_v1 = vld [vmem:[%s2798_s29 + $0x18] sm:$0x7]  ;;  %v2470_v43 = vld [vmem:[%s3257_s1 + $0x34] ss:$8 sps:$4 sm:$0xff]  }
  0x3a   : >> { %1204 = vmatprep.subr.bf16.mxu0 %v2413_v4  ;;  %v419_v55 = vrot.slane %v417_v49, 1  ;;  %v2467_v49 = vld [vmem:[%s3257_s1 + $0x324] ss:$8 sps:$4 sm:$0xff]  }
  0x3c   : >> { %768 = vmatpush1.bf16.msra.mxu1 %v2414_v59  ;;  %861 = vmatmul.mubr.bf16.gmra.mrb[4].mxu0 %v461_v7  ;;  %v407_v59 = vrot.slane %v405_v54, 1  ;;  %v420_v4 = vor.u32 %v419_v55, %v415_v48  ;;  %v197_v7 = vunpack.c.l.bf16 %v190_v1  ;;  %v2457_v48 = vld [vmem:[%s3257_s1 + $0x310] ss:$8 sps:$4 sm:$0xff]   ;;  %v2482_v1 = vld [vmem:[%s3257_s1 + $0x54] ss:$8 sps:$4 sm:$0xff]  }
  0x3d   : >> { %769 = vmatprep.subr.bf16.mxu1 %v2415_v62  ;;  %1205 = vmatpush1.bf16.msra.mxu0 %v2411_v15  ;;  %v217_v62 = vld [vmem:[%s2791_s4 + $0x18] sm:$0x7]  ;;  %v438_v15 = vshrl.u32 %v2863_v30, 16 }
  0x3e   : >> { %870 = vmatprep.mubr.bf16.mxu0 %v2589_v2  ;;  %1206 = vmatprep.subr.bf16.mxu0 %v2419_v18  ;;  %v408_v9 = vor.u32 %v407_v59, %v403_v53  ;;  %v425_v12 = vsel %vm401_vm0, %v420_v4, %v424_v52  ;;  %204 = vst [vmem:[#allocation2 + $0x90] sm:$0x3f] %v197_v7  ;;  %v2468_v54 = vld [vmem:[%s3257_s1 + $0x30] ss:$8 sps:$4 sm:$0xff]   ;;  %v2473_v59 = vld [vmem:[%s3257_s1 + $0x334] ss:$8 sps:$4 sm:$0xff]  }
  0x3f   : >> { %779 = vmatprep.mubr.bf16.mxu1 %v425_v12  ;;  %v440_v24 = vor.u32 %v438_v15, %v412_v60  ;;  %v2471_v4 = vld [vmem:[%s3257_s1 + $0x330] ss:$8 sps:$4 sm:$0xff]   ;;  %v2485_v12 = vld [vmem:[%s3257_s1 + $0x354] ss:$8 sps:$4 sm:$0xff]   ;;  %v2486_v15 = vld [vmem:[%s3257_s1 + $0x60] ss:$8 sps:$4 sm:$0xff]  }
  0x40   : >> { %770 = vmatpush1.bf16.msra.mxu1 %v2420_v5  ;;  %v452_v5 = vrot.slane %v450_v50, 1  ;;  %v413_v18 = vsel %vm401_vm0, %v408_v9, %v412_v60  ;;  %v2480_v7 = vld [vmem:[%s3257_s1 + $0x50] ss:$8 sps:$4 sm:$0xff]   ;;  %v2477_v9 = vld [vmem:[%s3257_s1 + $0x340] ss:$8 sps:$4 sm:$0xff]  }
  0x41   : >> { %771 = vmatprep.subr.bf16.mxu1 %v2421_v6  ;;  %1207 = vmatpush1.bf16.msra.mxu0 %v2417_v22  ;;  %v224_v6 = vunpack.c.l.bf16 %v217_v62  ;;  %v2441_v22 = vld [vmem:[%s3257_s1 + $0x170] ss:$8 sps:$4 sm:$0xff]   ;;  %v2474_v62 = vld [vmem:[%s3257_s1 + $0x40] ss:$8 sps:$4 sm:$0xff]  }
  0x42   : >> { %1208 = vmatprep.subr.bf16.mxu0 %v2425_v25  ;;  %v444_v25 = vrot.slane %v442_v16, 1  ;;  %v2494_v16 = vld [vmem:[%s3257_s1 + $0x74] ss:$8 sps:$4 sm:$0xff]  }
  0x43   : >> { %231 = vst [vmem:[#allocation2 + $0x98] sm:$0x3f] %v224_v6  ;;  %v2479_v6 = vld [vmem:[%s3257_s1 + $0x344] ss:$8 sps:$4 sm:$0xff]  }
  0x44   : >> { %772 = vmatpush1.bf16.msra.mxu1 %v2426_v20  ;;  %871 = vmatmul.mubr.bf16.gmra.mrb[8].mxu0 %v485_v32  ;;  %v2456_v20 = vld [vmem:[%s3257_s1 + $0x14] ss:$8 sps:$4 sm:$0xff]   ;;  %v470_v32 = vshrl.u32 %v2866_v31, 16  ;;  %v445_v38 = vsel %vm401_vm0, %v440_v24, %v444_v25  ;;  %v2489_v24 = vld [vmem:[%s3257_s1 + $0x360] ss:$8 sps:$4 sm:$0xff]  }
  0x45   : >> { %773 = vmatprep.subr.bf16.mxu1 %v2427_v21  ;;  %1209 = vmatpush1.bf16.msra.mxu0 %v2423_v28  ;;  %v453_v21 = vsel %vm401_vm0, %v448_v61, %v452_v5  ;;  %v2454_v28 = vld [vmem:[%s3257_s1 + $0x10] ss:$8 sps:$4 sm:$0xff]  }
  0x46   : >> { %880 = vmatprep.mubr.bf16.mxu0 %v2589_v2  ;;  %1210 = vmatprep.subr.bf16.mxu0 %v2431_v33  ;;  %v2450_v33 = vld [vmem:[%s3257_s1 + $0x300] ss:$8 sps:$4 sm:$0xff]   ;;  %v343_v35 = vld [vmem:[#allocation2 + $0x90] sm:$0x1f]  ;;  %v472_v45 = vor.u32 %v470_v32, %v452_v5 }
  0x48   : >> { %774 = vmatpush1.bf16.msra.mxu1 %v2432_v27  ;;  %v2453_v27 = vld [vmem:[%s2708_s28] sm:$0xff] }
  0x49   : >> { %775 = vmatprep.subr.bf16.mxu1 %v2433_v29  ;;  %1211 = vmatpush1.bf16.msra.mxu0 %v2429_v40  ;;  %v2464_v29 = vld [vmem:[%s3257_s1 + $0x24] ss:$8 sps:$4 sm:$0xff]   ;;  %v349_v40 = vpack.c.bf16 %v343_v35, %v343_v35  ;;  %v2495_v35 = vld [vmem:[%s3257_s1 + $0x370] ss:$8 sps:$4 sm:$0xff]  }
  0x4a   : >> { %1212 = vmatprep.subr.bf16.mxu0 %v2437_v47  ;;  %v344_v34 = vld [vmem:[#allocation2 + $0x98] sm:$0x1f] }
  0x4b   : >> { %v350_v39 = vpack.c.bf16 %v344_v34, %v344_v34  ;;  %v466_v47 = vshll.u32 %v349_v40, 16  ;;  %v486_v5 = vshrl.u32 %v349_v40, 16  ;;  %v2506_v34 = vld [vmem:[%s3257_s1 + $0x94] ss:$8 sps:$4 sm:$0xff]   ;;  %v2501_v40 = vld [vmem:[%s3257_s1 + $0x380] ss:$8 sps:$4 sm:$0xff]  }
  0x4c   : >> { %776 = vmatpush1.bf16.msra.mxu1 %v2438_v36  ;;  %881 = vmatmul.mubr.bf16.gmra.mrb[12].mxu0 %v494_v58  ;;  %v2459_v36 = vld [vmem:[%s3257_s1 + $0x314] ss:$8 sps:$4 sm:$0xff]   ;;  %v2465_v58 = vld [vmem:[%s3257_s1 + $0x320] ss:$8 sps:$4 sm:$0xff]  }
  0x4d   : >> { %777 = vmatprep.subr.bf16.mxu1 %v2439_v42  ;;  %1213 = vmatpush1.bf16.msra.mxu0 %v2435_v8  ;;  %v2462_v42 = vld [vmem:[%s3257_s1 + $0x20] ss:$8 sps:$4 sm:$0xff]   ;;  %v474_v46 = vshll.u32 %v350_v39, 16  ;;  %v468_v52 = vrot.slane %v466_v47, 1  ;;  %v489_v53 = vshrl.u32 %v350_v39, 16 }
  0x4e   : >> { %1214 = vmatprep.subr.bf16.mxu0 %v2443_v11  ;;  %1232 = vmatprep.mubr.bf16.mxu0 %v2589_v2  ;;  %v2488_v8 = vld [vmem:[%s3257_s1 + $0x64] ss:$8 sps:$4 sm:$0xff]   ;;  %v2516_v47 = vld [vmem:[%s3257_s1 + $0xb0] ss:$8 sps:$4 sm:$0xff]  }
  0x4f   : >> { %v476_v50 = vrot.slane %v474_v46, 1  ;;  %v488_v11 = vor.u32 %v486_v5, %v468_v52  ;;  %v2512_v39 = vld [vmem:[%s3257_s1 + $0xa4] ss:$8 sps:$4 sm:$0xff]   ;;  %v2540_v5 = vld [vmem:[%s3257_s1 + $0xf0] ss:$8 sps:$4 sm:$0xff]  }
  0x50   : >> { %778 = vmatpush1.bf16.msra.mxu1 %v2444_v51  ;;  %v464_v51 = vor.u32 %v462_v41, %v444_v25  ;;  %v2497_v25 = vld [vmem:[%s3257_s1 + $0x374] ss:$8 sps:$4 sm:$0xff]   ;;  %v2515_v46 = vld [vmem:[%s3257_s1 + $0x3a4] ss:$8 sps:$4 sm:$0xff]  }
  0x51   : >> { %1129 = vmatprep.subr.bf16.mxu1 %v2449_v56  ;;  %1215 = vmatpush1.bf16.msra.mxu0 %v2441_v22  ;;  %v477_v55 = vsel %vm401_vm0, %v472_v45, %v476_v50  ;;  %v2476_v56 = vld [vmem:[%s3257_s1 + $0x44] ss:$8 sps:$4 sm:$0xff]   ;;  %v491_v61 = vor.u32 %v489_v53, %v476_v50  ;;  %v2509_v41 = vld [vmem:[%s3257_s1 + $0x394] ss:$8 sps:$4 sm:$0xff]   ;;  %v2507_v45 = vld [vmem:[%s3257_s1 + $0x390] ss:$8 sps:$4 sm:$0xff]  }
  0x52   : >> { %1618 = vmatprep.subr.bf16.mxu0 %v2452_v23  ;;  %v469_v60 = vsel %vm401_vm0, %v464_v51, %v468_v52  ;;  %v2500_v22 = vld [vmem:[%s3257_s1 + $0x84] ss:$8 sps:$4 sm:$0xff]   ;;  %v2521_v50 = vld [vmem:[%s3257_s1 + $0x3b4] ss:$8 sps:$4 sm:$0xff]   ;;  %v2522_v51 = vld [vmem:[%s3257_s1 + $0xc0] ss:$8 sps:$4 sm:$0xff]  }
  0x53   : >> { %780 = vmatmul.mubr.bf16.vlgmr.msra.gmra.mrb[0].mxu1 %v413_v18  ;;  %v2483_v18 = vld [vmem:[%s3257_s1 + $0x350] ss:$8 sps:$4 sm:$0xff]   ;;  %v2530_v52 = vld [vmem:[%s3257_s1 + $0xd4] ss:$8 sps:$4 sm:$0xff]  }
  0x54   : >> { %1130 = vmatpush1.bf16.msra.mxu1 %v2447_v19  ;;  %789 = vmatprep.mubr.bf16.mxu1 %v453_v21  ;;  %v279_v19 = vld [vmem:[#allocation2 + $0xa0] sm:$0xf]  ;;  %v2492_v21 = vld [vmem:[%s3257_s1 + $0x70] ss:$8 sps:$4 sm:$0xff]  }
  0x55   : >> { %1131 = vmatprep.subr.bf16.mxu1 %v2456_v20  ;;  %1233 = vmatmul.mubr.bf16.vlgmr.msra.gmra.mrb[16].mxu0 %v2453_v27  ;;  %v2491_v20 = vld [vmem:[%s3257_s1 + $0x364] ss:$8 sps:$4 sm:$0xff]   ;;  %v291_v23 = vpack.c.bf16 %v279_v19, %v279_v19  ;;  %v2519_v53 = vld [vmem:[%s3257_s1 + $0x3b0] ss:$8 sps:$4 sm:$0xff]  }
  0x56   : >> { %1619 = vmatpush1.bf16.msra.mxu0 %v2450_v33  ;;  %1242 = vmatprep.mubr.bf16.mxu0 %v2589_v2  ;;  %v2546_v27 = vld [vmem:[%s2791_s4] sm:$0xff]  ;;  %v1349_v33 = vrot.slane %v2851_v26, 1  ;;  %v2551_v19 = vld [vmem:[%s3257_s1 + $0x410] ss:$8 sps:$4 sm:$0xff]  }
  0x57   : >> { %1620 = vmatprep.subr.bf16.mxu0 %v2459_v36 }
  0x58   : >> { %1132 = vmatpush1.bf16.msra.mxu1 %v2454_v28  ;;  %v1272_v28 = vld [vmem:[#allocation2 + $0x8] sm:$0xfc] }
  0x59   : >> { %1133 = vmatprep.subr.bf16.mxu1 %v2464_v29  ;;  %v2498_v29 = vld [vmem:[%s3257_s1 + $0x80] ss:$8 sps:$4 sm:$0xff]   ;;  %v1278_v32 = vpack.c.bf16 %v2220_v13, %v1272_v28  ;;  %v2504_v13 = vld [vmem:[%s3257_s1 + $0x90] ss:$8 sps:$4 sm:$0xff]   ;;  %v1354_v28 = vrot.slane %v2901_v57, 1 }
  0x5a   : >> { %1621 = vmatpush1.bf16.msra.mxu0 %v2457_v48  ;;  %v2524_v48 = vld [vmem:[%s3257_s1 + $0xc4] ss:$8 sps:$4 sm:$0xff]  }
  0x5b   : >> { %790 = vmatmul.mubr.bf16.gmra.mrb[4].mxu1 %v445_v38  ;;  %1622 = vmatprep.subr.bf16.mxu0 %v2467_v49  ;;  %v1348_v36 = vrot.slane %v1278_v32, 1  ;;  %v2513_v49 = vld [vmem:[%s3257_s1 + $0x3a0] ss:$8 sps:$4 sm:$0xff]   ;;  %v2557_v32 = vld [vmem:[%s3257_s1 + $0x430] ss:$8 sps:$4 sm:$0xff]  }
  0x5c   : >> { %1134 = vmatpush1.bf16.msra.mxu1 %v2462_v42  ;;  %799 = vmatprep.mubr.bf16.mxu1 %v477_v55  ;;  %v2510_v42 = vld [vmem:[%s3257_s1 + $0xa0] ss:$8 sps:$4 sm:$0xff]   ;;  %v2528_v55 = vld [vmem:[%s3257_s1 + $0xd0] ss:$8 sps:$4 sm:$0xff]  }
  0x5d   : >> { %1135 = vmatprep.subr.bf16.mxu1 %v2470_v43  ;;  %1243 = vmatmul.mubr.bf16.gmra.mrb[20].mxu0 %v2743_v37  ;;  %v1350_v38 = vsel %vm1344_vm1, %v1348_v36, %v1349_v33  ;;  %v2518_v43 = vld [vmem:[%s3257_s1 + $0xb4] ss:$8 sps:$4 sm:$0xff]  }
  0x5e   : >> { %1623 = vmatpush1.bf16.msra.mxu0 %v2465_v58  ;;  %1252 = vmatprep.mubr.bf16.mxu0 %v2589_v2  ;;  %v2525_v58 = vld [vmem:[%s3257_s1 + $0x3c0] ss:$8 sps:$4 sm:$0xff]  }
  0x5f   : >> { %1624 = vmatprep.subr.bf16.mxu0 %v2473_v59  ;;  %v2533_v59 = vld [vmem:[%s3257_s1 + $0x3d4] ss:$8 sps:$4 sm:$0xff]  }
  0x60   : >> { %1136 = vmatpush1.bf16.msra.mxu1 %v2468_v54  ;;  %v2527_v54 = vld [vmem:[%s3257_s1 + $0x3c4] ss:$8 sps:$4 sm:$0xff]  }
  0x61   : >> { %1137 = vmatprep.subr.bf16.mxu1 %v2476_v56  ;;  %v2536_v56 = vld [vmem:[%s3257_s1 + $0xe4] ss:$8 sps:$4 sm:$0xff]  }
  0x62   : >> { %1625 = vmatpush1.bf16.msra.mxu0 %v2471_v4  ;;  %v1271_v4 = vld [vmem:[#allocation2] sm:$0xfc] }
  0x63   : >> { %800 = vmatmul.mubr.bf16.gmra.mrb[8].mxu1 %v469_v60  ;;  %1626 = vmatprep.subr.bf16.mxu0 %v2479_v6  ;;  %v2534_v60 = vld [vmem:[%s3257_s1 + $0xe0] ss:$8 sps:$4 sm:$0xff]   ;;  %v2550_v6 = vld [vmem:[%s3257_s1 + $0x404] ss:$8 sps:$4 sm:$0xff]  }
  0x64   : >> { %809 = vmatprep.mubr.bf16.mxu1 %v491_v61  ;;  %1138 = vmatpush1.bf16.msra.mxu1 %v2474_v62  ;;  %v2542_v61 = vld [vmem:[%s3257_s1 + $0xf4] ss:$8 sps:$4 sm:$0xff]   ;;  %v2531_v62 = vld [vmem:[%s3257_s1 + $0x3d0] ss:$8 sps:$4 sm:$0xff]  }
  0x65   : >> { %1139 = vmatprep.subr.bf16.mxu1 %v2482_v1  ;;  %1253 = vmatmul.mubr.bf16.gmra.mrb[24].mxu0 %v2757_v44  ;;  %v2539_v1 = vld [vmem:[%s3257_s1 + $0x3e4] ss:$8 sps:$4 sm:$0xff]  }
  0x66   : >> { %1627 = vmatpush1.bf16.msra.mxu0 %v2477_v9  ;;  %1262 = vmatprep.mubr.bf16.mxu0 %v2589_v2  ;;  %v2545_v9 = vld [vmem:[%s3257_s1 + $0x3f4] ss:$8 sps:$4 sm:$0xff]  }
  0x67   : >> { %1628 = vmatprep.subr.bf16.mxu0 %v2485_v12  ;;  %v2548_v12 = vld [vmem:[%s3257_s1 + $0x400] ss:$8 sps:$4 sm:$0xff]  }
  0x68   : >> { %1140 = vmatpush1.bf16.msra.mxu1 %v2480_v7  ;;  %v2537_v7 = vld [vmem:[%s3257_s1 + $0x3e0] ss:$8 sps:$4 sm:$0xff]  }
  0x69   : >> { %1141 = vmatprep.subr.bf16.mxu1 %v2488_v8  ;;  %v1277_v8 = vpack.c.bf16 %v2208_v17, %v1271_v4 }
  0x6a   : >> { %1629 = vmatpush1.bf16.msra.mxu0 %v2483_v18  ;;  %v1356_v18 = vrot.slane %v2866_v31, 1 }
  0x6b   : >> { %810 = vmatmul.mubr.bf16.gmra.mrb[12].mxu1 %v488_v11  ;;  %1630 = vmatprep.subr.bf16.mxu0 %v2491_v20  ;;  %v2547_v11 = vld [vmem:[%s2798_s29] sm:$0xff]  ;;  %v1345_v17 = vrot.slane %v1277_v8, 1  ;;  %v1275_v20 = vld [vmem:[#allocation2 + $0x98] sm:$0x3f] }
  0x6c   : >> { %1142 = vmatpush1.bf16.msra.mxu1 %v2486_v15  ;;  %1161 = vmatprep.mubr.bf16.mxu1 %v2546_v27  ;;  %v2553_v15 = vld [vmem:[%s3257_s1 + $0x414] ss:$8 sps:$4 sm:$0xff]  }
  0x6d   : >> { %1143 = vmatprep.subr.bf16.mxu1 %v2494_v16  ;;  %1263 = vmatmul.mubr.bf16.gmra.mrb[28].mxu0 %v291_v23  ;;  %v1346_v16 = vrot.slane %v2863_v30, 1  ;;  %v1357_v23 = vsel %vm1344_vm1, %v1349_v33, %v1356_v18  ;;  %v2559_v27 = vld [vmem:[%s3257_s1 + $0x434] ss:$8 sps:$4 sm:$0xff]   ;;  %v2562_v33 = vld [vmem:[%s3257_s1 + $0x444] ss:$8 sps:$4 sm:$0xff]  }
  0x6e   : >> { %1631 = vmatpush1.bf16.msra.mxu0 %v2489_v24  ;;  %1650 = vmatprep.mubr.bf16.mxu0 %v1350_v38  ;;  %v1281_v24 = vpack.c.bf16 %v1275_v20, %v1275_v20 }
  0x6f   : >> { %1632 = vmatprep.subr.bf16.mxu0 %v2497_v25  ;;  %v2554_v25 = vld [vmem:[%s3257_s1 + $0x420] ss:$8 sps:$4 sm:$0xff]  }
  0x70   : >> { %1144 = vmatpush1.bf16.msra.mxu1 %v2492_v21  ;;  %v2556_v21 = vld [vmem:[%s3257_s1 + $0x424] ss:$8 sps:$4 sm:$0xff]  }
  0x71   : >> { %1145 = vmatprep.subr.bf16.mxu1 %v2500_v22  ;;  %v1347_v22 = vsel %vm1344_vm1, %v1345_v17, %v1346_v16 }
  0x72   : >> { %1633 = vmatpush1.bf16.msra.mxu0 %v2495_v35  ;;  %v1355_v35 = vsel %vm1344_vm1, %v1346_v16, %v1354_v28 }
  0x73   : >> { %1634 = vmatprep.subr.bf16.mxu0 %v2503_v10  ;;  %v2560_v10 = vld [vmem:[%s3257_s1 + $0x440] ss:$8 sps:$4 sm:$0xff]  }
  0x74   : >> { %1146 = vmatpush1.bf16.msra.mxu1 %v2498_v29  ;;  %v1274_v29 = vld [vmem:[#allocation2 + $0x90] sm:$0x3f] }
  0x75   : >> { %1147 = vmatprep.subr.bf16.mxu1 %v2506_v34  ;;  %v278_v34 = vld [vmem:[#allocation2 + $0x98] sm:$0xf]  ;;  %v1280_v36 = vpack.c.bf16 %v1274_v29, %v1274_v29 }
  0x76   : >> { %1635 = vmatpush1.bf16.msra.mxu0 %v2501_v40  ;;  %v277_v40 = vld [vmem:[#allocation2 + $0x90] sm:$0xf] }
  0x77   : >> { %1636 = vmatprep.subr.bf16.mxu0 %v2509_v41  ;;  %v1360_v38 = vrot.slane %v1280_v36, 1  ;;  %v2568_v41 = vld [vmem:[%s3257_s1 + $0x464] ss:$8 sps:$4 sm:$0xff]  }
  0x78   : >> { %1148 = vmatpush1.bf16.msra.mxu1 %v2504_v13  ;;  %v290_v13 = vpack.c.bf16 %v278_v34, %v278_v34 }
  0x79   : >> { %1149 = vmatprep.subr.bf16.mxu1 %v2512_v39  ;;  %v2563_v39 = vld [vmem:[%s3257_s1 + $0x450] ss:$8 sps:$4 sm:$0xff]  }
  0x7a   : >> { %1637 = vmatpush1.bf16.msra.mxu0 %v2507_v45  ;;  %v289_v45 = vpack.c.bf16 %v277_v40, %v277_v40 }
  0x7b   : >> { %1638 = vmatprep.subr.bf16.mxu0 %v2515_v46 }
  0x7c   : >> { %1150 = vmatpush1.bf16.msra.mxu1 %v2510_v42  ;;  %v1276_v42 = vld [vmem:[#allocation2 + $0xa0] sm:$0x3f] }
  0x7d   : >> { %1151 = vmatprep.subr.bf16.mxu1 %v2518_v43  ;;  %v1361_v43 = vsel %vm1344_vm1, %v1354_v28, %v1360_v38  ;;  %v1282_v46 = vpack.c.bf16 %v1276_v42, %v1276_v42 }
  0x7e   : >> { %1639 = vmatpush1.bf16.msra.mxu0 %v2513_v49  ;;  %v2569_v49 = vld [vmem:[%s3257_s1 + $0x470] ss:$8 sps:$4 sm:$0xff]  }
  0x7f   : >> { %1640 = vmatprep.subr.bf16.mxu0 %v2521_v50  ;;  %v1364_v50 = vrot.slane %v1282_v46, 1 }
  0x80   : >> { %1152 = vmatpush1.bf16.msra.mxu1 %v2516_v47  ;;  %v2571_v47 = vld [vmem:[%s3257_s1 + $0x474] ss:$8 sps:$4 sm:$0xff]  }
  0x81   : >> { %1153 = vmatprep.subr.bf16.mxu1 %v2524_v48  ;;  %v1273_v48 = vld [vmem:[#allocation2 + $0x10] sm:$0xfc] }
  0x82   : >> { %1641 = vmatpush1.bf16.msra.mxu0 %v2519_v53  ;;  %v1365_v53 = vsel %vm1344_vm1, %v1358_v0, %v1364_v50 }
  0x83   : >> { %1642 = vmatprep.subr.bf16.mxu0 %v2527_v54 }
  0x84   : >> { %1154 = vmatpush1.bf16.msra.mxu1 %v2522_v51  ;;  %v2572_v51 = vld [vmem:[#allocation2 + $0x28] sm:$0xff] }
  0x85   : >> { %1155 = vmatprep.subr.bf16.mxu1 %v2530_v52  ;;  %v1279_v52 = vpack.c.bf16 %v2572_v51, %v1273_v48 }
  0x86   : >> { %1643 = vmatpush1.bf16.msra.mxu0 %v2525_v58 }
  0x87   : >> { %1644 = vmatprep.subr.bf16.mxu0 %v2533_v59  ;;  %v1351_v54 = vrot.slane %v1279_v52, 1 }
  0x88   : >> { %1156 = vmatpush1.bf16.msra.mxu1 %v2528_v55 }
  0x89   : >> { %1157 = vmatprep.subr.bf16.mxu1 %v2536_v56  ;;  %v1353_v55 = vsel %vm1344_vm1, %v1351_v54, %v1352_v63 }
  0x8a   : >> { %1645 = vmatpush1.bf16.msra.mxu0 %v2531_v62 }
  0x8b   : >> { %1646 = vmatprep.subr.bf16.mxu0 %v2539_v1 }
  0x8c   : >> { %1158 = vmatpush1.bf16.msra.mxu1 %v2534_v60 }
  0x8d   : >> { %1159 = vmatprep.subr.bf16.mxu1 %v2542_v61 }
  0x8e   : >> { %1647 = vmatpush1.bf16.msra.mxu0 %v2537_v7 }
  0x8f   : >> { %1648 = vmatprep.subr.bf16.mxu0 %v2545_v9 }
  0x90   : >> { %1160 = vmatpush1.bf16.msra.mxu1 %v2540_v5 }
  0x91   : >> { %2252 = vmatprep.subr.bf16.mxu1 %v2550_v6 }
  0x92   : >> { %1649 = vmatpush1.bf16.msra.mxu0 %v2543_v14 }
  0x93   : >> { %1162 = vmatmul.mubr.bf16.vlgmr.msra.gmra.mrb[16].mxu1 %v2547_v11  ;;  %1689 = vmatprep.subr.bf16.mxu0 %v2550_v6 }
  0x94   : >> { %2260 = vmatpush1.bf16.msra.mxu1 %v2548_v12  ;;  %1171 = vmatprep.mubr.bf16.mxu1 %v2851_v26  ;;  %v1362_v26 = vrot.slane %v1281_v24, 1 }
  0x95   : >> { %2253 = vmatprep.subr.bf16.mxu1 %v2553_v15  ;;  %1651 = vmatmul.mubr.bf16.vlgmr.msra.gmra.mrb[16].mxu0 %v1347_v22 }
  0x96   : >> { %1690 = vmatpush1.bf16.msra.mxu0 %v2548_v12  ;;  %1660 = vmatprep.mubr.bf16.mxu0 %v1357_v23 }
  0x97   : >> { %1691 = vmatprep.subr.bf16.mxu0 %v2553_v15 }
  0x98   : >> { %2261 = vmatpush1.bf16.msra.mxu1 %v2551_v19 }
  0x99   : >> { %2254 = vmatprep.subr.bf16.mxu1 %v2556_v21 }
  0x9a   : >> { %1692 = vmatpush1.bf16.msra.mxu0 %v2551_v19 }
  0x9b   : >> { %1172 = vmatmul.mubr.bf16.gmra.mrb[20].mxu1 %v2863_v30  ;;  %1693 = vmatprep.subr.bf16.mxu0 %v2556_v21  ;;  %v1363_v30 = vsel %vm1344_vm1, %v1356_v18, %v1362_v26 }
  0x9c   : >> { %2262 = vmatpush1.bf16.msra.mxu1 %v2554_v25  ;;  %1181 = vmatprep.mubr.bf16.mxu1 %v2866_v31  ;;  %v2565_v31 = vld [vmem:[%s3257_s1 + $0x454] ss:$8 sps:$4 sm:$0xff]  }
  0x9d   : >> { %2255 = vmatprep.subr.bf16.mxu1 %v2559_v27  ;;  %1661 = vmatmul.mubr.bf16.gmra.mrb[20].mxu0 %v1355_v35 }
  0x9e   : >> { %1694 = vmatpush1.bf16.msra.mxu0 %v2554_v25  ;;  %1670 = vmatprep.mubr.bf16.mxu0 %v1363_v30 }
  0x9f   : >> { %1695 = vmatprep.subr.bf16.mxu0 %v2559_v27 }
  0xa0   : >> { %2263 = vmatpush1.bf16.msra.mxu1 %v2557_v32 }
  0xa1   : >> { %2256 = vmatprep.subr.bf16.mxu1 %v2562_v33 }
  0xa2   : >> { %1696 = vmatpush1.bf16.msra.mxu0 %v2557_v32 }
  0xa3   : >> { %1182 = vmatmul.mubr.bf16.gmra.mrb[24].mxu1 %v2901_v57  ;;  %1697 = vmatprep.subr.bf16.mxu0 %v2562_v33  ;;  %v2566_v57 = vld [vmem:[%s3257_s1 + $0x460] ss:$8 sps:$4 sm:$0xff]  }
  0xa4   : >> { %2264 = vmatpush1.bf16.msra.mxu1 %v2560_v10  ;;  %1191 = vmatprep.mubr.bf16.mxu1 %v290_v13 }
  0xa5   : >> { %2257 = vmatprep.subr.bf16.mxu1 %v2565_v31  ;;  %1671 = vmatmul.mubr.bf16.gmra.mrb[24].mxu0 %v1361_v43 }
  0xa6   : >> { %1698 = vmatpush1.bf16.msra.mxu0 %v2560_v10  ;;  %1680 = vmatprep.mubr.bf16.mxu0 %v1362_v26 }
  0xa7   : >> { %1699 = vmatprep.subr.bf16.mxu0 %v2565_v31 }
  0xa8   : >> { %2265 = vmatpush1.bf16.msra.mxu1 %v2563_v39 }
  0xa9   : >> { %2258 = vmatprep.subr.bf16.mxu1 %v2568_v41 }
  0xaa   : >> { %1700 = vmatpush1.bf16.msra.mxu0 %v2563_v39 }
  0xab   : >> { %1192 = vmatmul.mubr.bf16.gmra.mrb[28].mxu1 %v289_v45  ;;  %1701 = vmatprep.subr.bf16.mxu0 %v2568_v41 }
  0xac   : >> { %2266 = vmatpush1.bf16.msra.mxu1 %v2566_v57  ;;  %1741 = vmatprep.mubr.bf16.mxu1 %v2589_v2 }
  0xad   : >> { %2259 = vmatprep.subr.bf16.mxu1 %v2571_v47  ;;  %1681 = vmatmul.mubr.bf16.gmra.mrb[32].mxu0 %v1360_v38 }
  0xae   : >> { %1702 = vmatpush1.bf16.msra.mxu0 %v2566_v57  ;;  %1721 = vmatprep.mubr.bf16.mxu0 %v2589_v2 }
  0xaf   : >> { %1703 = vmatprep.subr.bf16.mxu0 %v2571_v47 }
  0xb0   : >> { %2267 = vmatpush1.bf16.msra.mxu1 %v2569_v49 }
  0xb2   : >> { %1704 = vmatpush1.bf16.msra.mxu0 %v2569_v49 }
  0xb3   : >> { %1742 = vmatmul.mubr.bf16.vlgmr.msra.gmra.mrb[32].mxu1 %v1365_v53 }
  0xb4   : >> { %1751 = vmatprep.mubr.bf16.mxu1 %v2589_v2 }
  0xb5   : >> { %1722 = vmatmul.mubr.bf16.vlgmr.msra.gmra.mrb[16].mxu0 %v1353_v55 }
  0xb6   : >> { %1731 = vmatprep.mubr.bf16.mxu0 %v2589_v2 }
  0xbb   : >> { %1752 = vmatmul.mubr.bf16.gmra.mrb[36].mxu1 %v1364_v50 }
  0xbd   : >> { %1732 = vmatmul.mubr.bf16.gmra.mrb[20].mxu0 %v2805_v3 }
 0x107   : >> { %v852_v44 = vpop.f32.mrb[0].mxu0 }
 0x108   : >> { %v854_v0 = vpop.f32.mrb[1].mxu0 }
 0x109   : >> { %v856_v56 = vpop.f32.mrb[2].mxu0 }
 0x10a   : >> { %v858_v58 = vpop.f32.mrb[3].mxu0 }
 0x10f   : >> { %v862_v59 = vpop.f32.mrb[4].mxu0 }
 0x110   : >> { %v864_v60 = vpop.f32.mrb[5].mxu0 }
 0x111   : >> { %v866_v61 = vpop.f32.mrb[6].mxu0 }
 0x112   : >> { %v868_v62 = vpop.f32.mrb[7].mxu0 }
 0x117   : >> { %v872_v1 = vpop.f32.mrb[8].mxu0 }
 0x118   : >> { %v874_v4 = vpop.f32.mrb[9].mxu0 }
 0x119   : >> { %v876_v5 = vpop.f32.mrb[10].mxu0 }
 0x11a   : >> { %v878_v37 = vpop.f32.mrb[11].mxu0 }
 0x11f   : >> { %v882_v6 = vpop.f32.mrb[12].mxu0 }
 0x120   : >> { %v884_v63 = vpop.f32.mrb[13].mxu0 }
 0x121   : >> { %v886_v8 = vpop.f32.mrb[14].mxu0 }
 0x122   : >> { %v887_v11 = vpop.f32.mrb[15].mxu0 }
 0x126   : >> { %v781_v7 = vpop.f32.mrb[0].mxu1 }
 0x127   : >> { %v853_v2 = vadd.f32 %v852_v44, %v781_v7  ;;  %v783_v9 = vpop.f32.mrb[1].mxu1 }
 0x128   : >> { %v855_v3 = vadd.f32 %v854_v0, %v783_v9  ;;  %v785_v12 = vpop.f32.mrb[2].mxu1 }
 0x129   : >> { %v857_v15 = vadd.f32 %v856_v56, %v785_v12  ;;  %v787_v14 = vpop.f32.mrb[3].mxu1 }
 0x12a   : >> { %v859_v17 = vadd.f32 %v858_v58, %v787_v14 }
 0x12e   : >> { %v791_v16 = vpop.f32.mrb[4].mxu1 }
 0x12f   : >> { %v863_v18 = vadd.f32 %v862_v59, %v791_v16  ;;  %v793_v19 = vpop.f32.mrb[5].mxu1 }
 0x130   : >> { %v865_v20 = vadd.f32 %v864_v60, %v793_v19  ;;  %v795_v21 = vpop.f32.mrb[6].mxu1 }
 0x131   : >> { %v867_v22 = vadd.f32 %v866_v61, %v795_v21  ;;  %v797_v23 = vpop.f32.mrb[7].mxu1 }
 0x132   : >> { %v869_v24 = vadd.f32 %v868_v62, %v797_v23 }
 0x136   : >> { %v801_v25 = vpop.f32.mrb[8].mxu1 }
 0x137   : >> { %v873_v27 = vadd.f32 %v872_v1, %v801_v25  ;;  %v803_v28 = vpop.f32.mrb[9].mxu1 }
 0x138   : >> { %v875_v26 = vadd.f32 %v874_v4, %v803_v28  ;;  %v805_v29 = vpop.f32.mrb[10].mxu1  ;;  %v1776_v4 = vlaneseq }
 0x139   : >> { %v877_v32 = vadd.f32 %v876_v5, %v805_v29  ;;  %v807_v33 = vpop.f32.mrb[11].mxu1 }
 0x13a   : >> { %v879_v34 = vadd.f32 %v878_v37, %v807_v33  ;;  %v1777_v7 = vshrl.u32 %v1776_v4, 7 }
 0x13c   : >> { %v1782_v23 = vsub.s32 1, %v1777_v7 }
 0x13e   : >> { %v811_v35 = vpop.f32.mrb[12].mxu1 }
 0x13f   : >> { %v883_v36 = vadd.f32 %v882_v6, %v811_v35  ;;  %v813_v30 = vpop.f32.mrb[13].mxu1 }
 0x140   : >> { %v885_v10 = vadd.f32 %v884_v63, %v813_v30  ;;  %v815_v13 = vpop.f32.mrb[14].mxu1  ;;  %v1264_v38 = vpop.f32.mrb[28].mxu0 }
 0x141   : >> { %v816_v31 = vpop.f32.mrb[15].mxu1  ;;  %v1266_v39 = vpop.f32.mrb[29].mxu0 }
 0x142   : >> { %v1268_v40 = vpop.f32.mrb[30].mxu0 }
 0x143   : >> { %v1269_v41 = vpop.f32.mrb[31].mxu0 }
 0x166   : >> { %v1163_v42 = vpop.f32.mrb[16].mxu1 }
 0x167   : >> { %v3203_v43 = vadd.f32 %v1163_v42, %v853_v2  ;;  %v1165_v45 = vpop.f32.mrb[17].mxu1 }
 0x168   : >> { %v3205_v57 = vadd.f32 %v1165_v45, %v855_v3  ;;  %v1167_v46 = vpop.f32.mrb[18].mxu1 }
 0x169   : >> { %v3207_v47 = vadd.f32 %v1167_v46, %v857_v15  ;;  %v1169_v48 = vpop.f32.mrb[19].mxu1 }
 0x16a   : >> { %v3209_v49 = vadd.f32 %v1169_v48, %v859_v17 }
 0x16e   : >> { %v1173_v50 = vpop.f32.mrb[20].mxu1 }
 0x16f   : >> { %v3211_v51 = vadd.f32 %v1173_v50, %v863_v18  ;;  %v1175_v52 = vpop.f32.mrb[21].mxu1 }
 0x170   : >> { %v3213_v53 = vadd.f32 %v1175_v52, %v865_v20  ;;  %v1177_v54 = vpop.f32.mrb[22].mxu1  ;;  %v1778_v20 = vsub.s32 0, %v1777_v7 }
 0x171   : >> { %v3215_v55 = vadd.f32 %v1177_v54, %v867_v22  ;;  %v1179_v44 = vpop.f32.mrb[23].mxu1  ;;  %v1774_v22 = vld [vmem:[%s3258_s2] sm:$0x3] }
 0x172   : >> { %v3217_v0 = vadd.f32 %v1179_v44, %v869_v24  ;;  %v3224_v29 = vrot.slane %v1774_v22, %v1782_v23 }
 0x176   : >> { %v1183_v56 = vpop.f32.mrb[24].mxu1 }
 0x177   : >> { %v1184_v58 = vadd.f32 %v1183_v56, %v873_v27  ;;  %v1185_v59 = vpop.f32.mrb[25].mxu1  ;;  %v3222_v27 = vrot.slane %v1774_v22, %v1778_v20 }
 0x178   : >> { %v1186_v60 = vadd.f32 %v1185_v59, %v875_v26  ;;  %v1187_v61 = vpop.f32.mrb[26].mxu1  ;;  %v1672_v37 = vpop.f32.mrb[24].mxu0 }
 0x179   : >> { %v1188_v62 = vadd.f32 %v1187_v61, %v877_v32  ;;  %v1189_v1 = vpop.f32.mrb[27].mxu1  ;;  %v2294_v6 = vadd.f32 %v1672_v37, %v1184_v58  ;;  %v1674_v63 = vpop.f32.mrb[25].mxu0 }
 0x17a   : >> { %v1190_v5 = vadd.f32 %v1189_v1, %v879_v34  ;;  %v2298_v8 = vadd.f32 %v1674_v63, %v1186_v60  ;;  %v1676_v2 = vpop.f32.mrb[26].mxu0 }
 0x17b   : >> { %v2302_v11 = vadd.f32 %v1676_v2, %v1188_v62  ;;  %v1678_v3 = vpop.f32.mrb[27].mxu0 }
 0x17c   : >> { %v2306_v14 = vadd.f32 %v1678_v3, %v1190_v5 }
 0x17e   : >> { %v1193_v9 = vpop.f32.mrb[28].mxu1 }
 0x17f   : >> { %v1194_v12 = vadd.f32 %v1193_v9, %v883_v36  ;;  %v1195_v15 = vpop.f32.mrb[29].mxu1 }
 0x180   : >> { %v1196_v17 = vadd.f32 %v1195_v15, %v885_v10  ;;  %v1197_v16 = vpop.f32.mrb[30].mxu1  ;;  %v1682_v24 = vpop.f32.mrb[32].mxu0 }
 0x181   : >> { %v1265_v18 = vadd.f32 %v1264_v38, %v1194_v12  ;;  %v1198_v19 = vpop.f32.mrb[31].mxu1  ;;  %v1684_v25 = vpop.f32.mrb[33].mxu0 }
 0x182   : >> { %v1267_v21 = vadd.f32 %v1266_v39, %v1196_v17  ;;  %v1686_v28 = vpop.f32.mrb[34].mxu0 }
 0x183   : >> { %v1687_v32 = vpop.f32.mrb[35].mxu0 }
 0x186   : >> { %v1743_v26 = vpop.f32.mrb[32].mxu1 }
 0x187   : >> { %v2295_v33 = vadd.f32 %v2294_v6, %v1743_v26  ;;  %v1745_v34 = vpop.f32.mrb[33].mxu1 }
 0x188   : >> { %v2299_v35 = vadd.f32 %v2298_v8, %v1745_v34  ;;  %v1747_v36 = vpop.f32.mrb[34].mxu1  ;;  %v1723_v41 = vpop.f32.mrb[16].mxu0 }
 0x189   : >> { %v1794_v30 = vadd.f32 %v2295_v33, %v3222_v27  ;;  %v2303_v10 = vadd.f32 %v2302_v11, %v1747_v36  ;;  %v1749_v13 = vpop.f32.mrb[35].mxu1  ;;  %v2270_v46 = vadd.f32 %v1723_v41, %v3203_v43  ;;  %v1725_v48 = vpop.f32.mrb[17].mxu0 }
 0x18a   : >> { %v1795_v31 = vadd.f32 %v2299_v35, %v3224_v29  ;;  %v2307_v38 = vadd.f32 %v2306_v14, %v1749_v13  ;;  %v2273_v52 = vadd.f32 %v1725_v48, %v3205_v57  ;;  %v1727_v44 = vpop.f32.mrb[18].mxu0 }
 0x18b   : >> { %v1808_v39 = vmax.f32 %v1794_v30, 0.0  ;;  %v1796_v40 = vadd.f32 %v2303_v10, %v3222_v27  ;;  %v1786_v59 = vadd.f32 %v2270_v46, %v3222_v27  ;;  %v2276_v60 = vadd.f32 %v1727_v44, %v3207_v47  ;;  %v1729_v61 = vpop.f32.mrb[19].mxu0 }
 0x18c   : >> { %v1809_v42 = vmax.f32 %v1795_v31, 0.0  ;;  %v1797_v45 = vadd.f32 %v2307_v38, %v3224_v29  ;;  %v1787_v4 = vadd.f32 %v2273_v52, %v3224_v29  ;;  %v2279_v43 = vadd.f32 %v1729_v61, %v3209_v49 }
 0x18d   : >> { %v1810_v50 = vmax.f32 %v1796_v40, 0.0  ;;  %v1800_v57 = vmax.f32 %v1786_v59, 0.0  ;;  %v1788_v63 = vadd.f32 %v2276_v60, %v3222_v27 }
 0x18e   : >> { %v1818_v54 = vmax.f32 %v1808_v39, %v1809_v42  ;;  %v1811_v56 = vmax.f32 %v1797_v45, 0.0  ;;  %v1753_v58 = vpop.f32.mrb[36].mxu1  ;;  %v1801_v2 = vmax.f32 %v1787_v4, 0.0  ;;  %v1789_v9 = vadd.f32 %v2279_v43, %v3224_v29 }
 0x18f   : >> { %v1754_v62 = vadd.f32 %v1753_v58, %v1682_v24  ;;  %v1755_v1 = vpop.f32.mrb[37].mxu1  ;;  %v1802_v11 = vmax.f32 %v1788_v63, 0.0 }
 0x190   : >> { %1825 = vst [vmem:[#allocation3 + $0x20] sm:$0xff] %v1818_v54  ;;  %v1819_v5 = vmax.f32 %v1810_v50, %v1811_v56  ;;  %v1756_v37 = vadd.f32 %v1755_v1, %v1684_v25  ;;  %v1757_v6 = vpop.f32.mrb[38].mxu1  ;;  %v1814_v12 = vmax.f32 %v1800_v57, %v1801_v2  ;;  %v1803_v15 = vmax.f32 %v1789_v9, 0.0  ;;  %v1733_v49 = vpop.f32.mrb[20].mxu0 }
 0x191   : >> { %v1772_v7 = vadd.f32 %v1754_v62, %v1265_v18  ;;  %v1758_v8 = vpop.f32.mrb[39].mxu1  ;;  %v2282_v17 = vadd.f32 %v1733_v49, %v3211_v51  ;;  %v1735_v19 = vpop.f32.mrb[21].mxu0 }
 0x192   : >> { %1826 = vst [vmem:[#allocation3 + $0x28] sm:$0xff] %v1819_v5  ;;  %v1773_v47 = vadd.f32 %v1756_v37, %v1267_v21  ;;  %1821 = vst [vmem:[#allocation3] sm:$0xff] %v1814_v12  ;;  %v1815_v18 = vmax.f32 %v1802_v11, %v1803_v15  ;;  %v2285_v20 = vadd.f32 %v1735_v19, %v3213_v53  ;;  %v1737_v23 = vpop.f32.mrb[22].mxu0 }
 0x193   : >> { %v1798_v3 = vadd.f32 %v3222_v27, %v1772_v7  ;;  %v1790_v21 = vadd.f32 %v2282_v17, %v3222_v27  ;;  %v2288_v24 = vadd.f32 %v1737_v23, %v3215_v55  ;;  %v1739_v25 = vpop.f32.mrb[23].mxu0 }
 0x194   : >> { %v1799_v14 = vadd.f32 %v3224_v29, %v1773_v47  ;;  %1822 = vst [vmem:[#allocation3 + $0x8] sm:$0xff] %v1815_v18  ;;  %v1791_v28 = vadd.f32 %v2285_v20, %v3224_v29  ;;  %v2291_v51 = vadd.f32 %v1739_v25, %v3217_v0 }
 0x195   : >> { %v1812_v16 = vmax.f32 %v1798_v3, 0.0  ;;  %v1804_v34 = vmax.f32 %v1790_v21, 0.0  ;;  %v1792_v53 = vadd.f32 %v2288_v24, %v3222_v27 }
 0x196   : >> { %v1813_v22 = vmax.f32 %v1799_v14, 0.0  ;;  %v1805_v36 = vmax.f32 %v1791_v28, 0.0  ;;  %v1793_v30 = vadd.f32 %v2291_v51, %v3224_v29 }
 0x197   : >> { %v1806_v55 = vmax.f32 %v1792_v53, 0.0 }
 0x198   : >> { %v1820_v26 = vmax.f32 %v1812_v16, %v1813_v22  ;;  %v1816_v13 = vmax.f32 %v1804_v34, %v1805_v36  ;;  %v1807_v31 = vmax.f32 %v1793_v30, 0.0 }
 0x199   : >> { %v1832_v32 = vld [vmem:[#allocation3 + $0x20] ss:$2 sm:$0xff]  ;;  %v1840_v33 = vld [vmem:[#allocation3 + $0x21] ss:$2 sm:$0xff] }
 0x19a   : >> { %v1845_v35 = vmax.f32 %v1832_v32, %v1840_v33  ;;  %1827 = vst [vmem:[#allocation3 + $0x30] sm:$0xf] %v1820_v26  ;;  %1823 = vst [vmem:[#allocation3 + $0x10] sm:$0xff] %v1816_v13  ;;  %v1817_v38 = vmax.f32 %v1806_v55, %v1807_v31 }
 0x19b   : >> { %v1828_v42 = vld [vmem:[#allocation3] ss:$2 sm:$0xff]  ;;  %v1836_v27 = vld [vmem:[#allocation3 + $0x1] ss:$2 sm:$0xff] }
 0x19c   : >> { %v2202_v10 = vpack.c.bf16 %v1845_v35, %v1845_v35  ;;  %1824 = vst [vmem:[#allocation3 + $0x18] sm:$0xff] %v1817_v38  ;;  %v1843_v48 = vmax.f32 %v1828_v42, %v1836_v27 }
 0x19e   : >> { %1868 = vst [vmem:[%s1865_s17 + $0x8] sm:$0xf] %v2202_v10 }
 0x1a1   : >> { %v1834_v0 = vld [vmem:[#allocation3 + $0x30] ss:$2 sm:$0x3]  ;;  %v1842_v39 = vld [vmem:[#allocation3 + $0x31] ss:$2 sm:$0x3] }
 0x1a2   : >> { %v1846_v40 = vmax.f32 %v1834_v0, %v1842_v39  ;;  %176 = sbr.rel (!%p174_p7) target bundleno = 18 (0x12), region = 82 }
 0x1a3   : >> { %v1830_v45 = vld [vmem:[#allocation3 + $0x10] ss:$2 sm:$0xff]  ;;  %v1838_v46 = vld [vmem:[#allocation3 + $0x11] ss:$2 sm:$0xff] }
 0x1a4   : >> { %v2203_v41 = vpack.c.bf16 %v1846_v40, %v1846_v40  ;;  %v1844_v29 = vmax.f32 %v1830_v45, %v1838_v46 }
 0x1a6   : >> { %1869 = vst [vmem:[%s1865_s17 + $0xc] sm:$0x1] %v2203_v41  ;;  %v2244_v50 = vpack.c.bf16 %v1844_v29, %v1843_v48 }
 0x1a8   : >> { %2245 = vst [vmem:[%s1865_s17] sm:$0xff] %v2244_v50  }
 0x1a9 PF: > { %s13_s12 = sadd.s32 1, %s2583_s12  }
 0x1aa   : > { %p10_p8 = scmp.ge.s32.totalorder %s13_s12, 4  }
 0x1ac   :  { %12 = sbr.rel (!%p10_p8) target bundleno = 1 (0x1), region = 93 }

// kernel: forward.7
= control target key start
LH: loop header
LB: loop body
LE: loop exit
PB: predicated region body
PF: predicated region fallthrough
CT: control target
= control target key end

     0   :  { %10 = vsyncpa [#allocation4], 0  ;;  %s8358_s18 = smov 0   ;;  %s9109_s0 = inlined_call_operand.vmem [shape: bf16[2,33280], index: 0, kind: input, shape index: {}]   ;;  %s9110_s1 = inlined_call_operand.vmem [shape: bf16[33280,128], index: 1, kind: input, shape index: {}]   ;;  %s9111_s2 = inlined_call_operand.vmem [shape: f32[1,128], index: 2, kind: input, shape index: {}]   ;;  %s9112_s3 = inlined_call_operand.vmem [shape: f32[128,10], index: 3, kind: input, shape index: {}]   ;;  %s9113_s4 = inlined_call_operand.vmem [shape: f32[1,10], index: 4, kind: input, shape index: {}]   ;;  %s9114_s5 = inlined_call_operand.hbm [shape: f32[2,10], index: 5, kind: output, shape index: {}]  }
   0x1 LB: > { %s8364_s19 = sadd.s32 4294967295, %s8318_s18   ;;  %p6388_p0 = scmp.ge.s32.totalorder %s8318_s18, 1  ;;  %s8318_s18 = sphi %s8358_s18, %s16_s18  }
   0x2   : > { %p194_p1 = scmp.lt.s32.totalorder %s8318_s18, 5 }
   0x4   : > { %p195_p2 = pnand %p6388_p0, %p194_p1 }
   0x5   : > { %s221_s20 = smul.u32 (!%p195_p2), 65, %s8364_s19  ;;  %p6390_p5 = scmp.ne.s32.totalorder (!%p195_p2), %s8364_s19, 0 }
   0x6   : > { %198 = sbr.rel (%p195_p2) target bundleno = 1350 (0x546), region = 40 }
   0x7   : > { %s226_s21 = smul.u32 (!%p195_p2), 1040, %s8364_s19  ;;  %p222_p3 = scmp.lt.s32.totalorder (!%p195_p2), %s221_s20, 259 }
   0x9   : > { %p227_p4 = scmp.lt.s32.totalorder (!%p195_p2), %s226_s21, 4159 }
   0xd   : > { %s9116_s20 = smov (!%p222_p3, %s221_s20), 259  ;;  %s9118_s21 = smov (!%p227_p4, %s226_s21), 4159 }
   0xe   : > { %s8373_s24 = scalar_lea.vmem %s9109_s0, %s9116_s20  ;;  %s6389_s25 = sshll.u32 %s9118_s21, 2  ;;  %v8320_v0 = vmov (!%p6390_p5), 0.0  }
   0xf   : > { %s8378_s28 = scalar_lea.vmem %s9110_s1, %s6389_s25  ;;  %236 = sbr.rel (%p6390_p5) target bundleno = 22 (0x16), region = 44  ;;  %237 = vst [vmem:[#allocation2] sm:$0x3] (!%p6390_p5), %v8320_v0 }
  0x16 PF: > { %v7750_v1 = vld [vmem:[%s8378_s28 + $0x40] sm:$0xff]   ;;  %v7754_v5 = vld [vmem:[%s8378_s28 + $0x48] sm:$0xff]   ;;  %v7758_v9 = vld [vmem:[%s8378_s28 + $0x50] sm:$0xff]   ;;  %v1301_v30 = vlaneseq  ;;  %v8321_v36 = vmov 1966171168   ;;  %vm8323_vm0 = vmmov 0  }
  0x17   : > { %v7751_v2 = vld [vmem:[%s8378_s28 + $0xc0] sm:$0xff]   ;;  %6919 = vmatprep.subr.bf16.mxu0 %v7750_v1  ;;  %v7755_v6 = vld [vmem:[%s8378_s28 + $0xc8] sm:$0xff]   ;;  %v7759_v10 = vld [vmem:[%s8378_s28 + $0xd0] sm:$0xff]   ;;  %v1299_v37 = vunpack.c.l.s4 %v8321_v36  ;;  %p6912_p6 = scmp.ne.s32.totalorder %s8364_s19, 3 }
  0x18   : > { %v7752_v3 = vld [vmem:[%s8378_s28] sm:$0xff]   ;;  %6941 = vmatprep.subr.bf16.mxu1 %v7751_v2  ;;  %v7756_v7 = vld [vmem:[%s8378_s28 + $0x8] sm:$0xff]   ;;  %v7760_v11 = vld [vmem:[%s8378_s28 + $0x10] sm:$0xff]   ;;  %v1302_v34 = vshrl.u32 %v1301_v30, 7  ;;  %vm8325_vm1 = vmmov (!%p6912_p6), 0   ;;  %vm6317_vm2 = vcmask (!%p6912_p6), 74752  }
  0x19   : > { %v7753_v4 = vld [vmem:[%s8378_s28 + $0x80] sm:$0xff]   ;;  %6920 = vmatpush3.bf16.msra.mxu0 %v7752_v3  ;;  %v7757_v8 = vld [vmem:[%s8378_s28 + $0x88] sm:$0xff]   ;;  %v7761_v12 = vld [vmem:[%s8378_s28 + $0x90] sm:$0xff]   ;;  %v1300_v40 = vunpack.c.0.s8 %v1299_v37 }
  0x1a   : > { %6942 = vmatpush3.bf16.msra.mxu1 %v7753_v4  ;;  %6921 = vmatprep.subr.bf16.mxu0 %v7754_v5  ;;  %v7762_v13 = vld [vmem:[%s8378_s28 + $0x58] sm:$0xff]   ;;  %v7766_v17 = vld [vmem:[%s8378_s28 + $0x60] sm:$0xff]   ;;  %v7770_v21 = vld [vmem:[%s8378_s28 + $0x68] sm:$0xff]  }
  0x1b   : > { %6943 = vmatprep.subr.bf16.mxu1 %v7755_v6  ;;  %v7763_v14 = vld [vmem:[%s8378_s28 + $0xd8] sm:$0xff]   ;;  %v7767_v18 = vld [vmem:[%s8378_s28 + $0xe0] sm:$0xff]   ;;  %v7771_v22 = vld [vmem:[%s8378_s28 + $0xe8] sm:$0xff]   ;;  %v8416_v42 = vsub.s32 %v1300_v40, %v1302_v34 }
  0x1c   : > { %v7764_v15 = vld [vmem:[%s8378_s28 + $0x18] sm:$0xff]   ;;  %v7768_v19 = vld [vmem:[%s8378_s28 + $0x20] sm:$0xff]   ;;  %v7772_v23 = vld [vmem:[%s8378_s28 + $0x28] sm:$0xff]  }
  0x1d   : > { %6922 = vmatpush3.bf16.msra.mxu0 %v7756_v7  ;;  %v7765_v16 = vld [vmem:[%s8378_s28 + $0x98] sm:$0xff]   ;;  %v7769_v20 = vld [vmem:[%s8378_s28 + $0xa0] sm:$0xff]   ;;  %v7773_v24 = vld [vmem:[%s8378_s28 + $0xa8] sm:$0xff]  }
  0x1e   : > { %6944 = vmatpush3.bf16.msra.mxu1 %v7757_v8  ;;  %6923 = vmatprep.subr.bf16.mxu0 %v7758_v9  ;;  %v7774_v25 = vld [vmem:[%s8378_s28 + $0x70] sm:$0xff]   ;;  %v7778_v29 = vld [vmem:[%s8378_s28 + $0x78] sm:$0xff]   ;;  %v7783_v35 = vld [vmem:[%s8378_s28 + $0x140] sm:$0xff]  }
  0x1f   : > { %6945 = vmatprep.subr.bf16.mxu1 %v7759_v10  ;;  %v7775_v26 = vld [vmem:[%s8378_s28 + $0xf0] sm:$0xff]   ;;  %v7779_v31 = vld [vmem:[%s8378_s28 + $0xf8] sm:$0xff]   ;;  %v239_v38 = vld [vmem:[%s8373_s24] sm:$0xff] }
  0x20   : > { %v7776_v27 = vld [vmem:[%s8378_s28 + $0x30] sm:$0xff]   ;;  %v7780_v32 = vld [vmem:[%s8378_s28 + $0x38] sm:$0xff]   ;;  %v1297_v39 = vcombine.high %v239_v38, %v239_v38  ;;  %v7785_v41 = vld [vmem:[%s8378_s28 + $0x1c0] sm:$0xff]   ;;  %v1304_v43 = vrot.slane %v239_v38, %v8416_v42 }
  0x21   : > { %6924 = vmatpush3.bf16.msra.mxu0 %v7760_v11  ;;  %v7777_v28 = vld [vmem:[%s8378_s28 + $0xb0] sm:$0xff]   ;;  %v7781_v33 = vld [vmem:[%s8378_s28 + $0xb8] sm:$0xff]   ;;  %v7784_v48 = vld [vmem:[%s8378_s28 + $0x100] sm:$0xff]  }
  0x22   : > { %6946 = vmatpush3.bf16.msra.mxu1 %v7761_v12  ;;  %6925 = vmatprep.subr.bf16.mxu0 %v7762_v13  ;;  %v8420_v44 = vrot.slane %v1297_v39, %v8416_v42  ;;  %v1312_v45 = vcombine.high %v1304_v43, %v1304_v43  ;;  %v1320_v46 = vrot.slane %v1304_v43, %v8416_v42  ;;  %v7786_v50 = vld [vmem:[%s8378_s28 + $0x180] sm:$0xff]   ;;  %v7787_v53 = vld [vmem:[%s8378_s28 + $0x148] sm:$0xff]   ;;  %v7791_v59 = vld [vmem:[%s8378_s28 + $0x150] sm:$0xff]  }
  0x23   : > { %6947 = vmatprep.subr.bf16.mxu1 %v7763_v14  ;;  %v7788_v55 = vld [vmem:[%s8378_s28 + $0x108] sm:$0xff]   ;;  %v7792_v60 = vld [vmem:[%s8378_s28 + $0x110] sm:$0xff]   ;;  %v7795_v63 = vld [vmem:[%s8378_s28 + $0x158] sm:$0xff]  }
  0x24   : > { %v1313_v47 = vcombine.high %v8420_v44, %v8420_v44  ;;  %v1334_v49 = vrot.slane %v1312_v45, %v8416_v42  ;;  %v1342_v52 = vcombine.high %v1320_v46, %v1320_v46  ;;  %v7789_v56 = vld [vmem:[%s8378_s28 + $0x1c8] sm:$0xff]   ;;  %v7793_v61 = vld [vmem:[%s8378_s28 + $0x1d0] sm:$0xff]   ;;  %v7796_v0 = vld [vmem:[%s8378_s28 + $0x118] sm:$0xff]  }
  0x25   : > { %6926 = vmatpush3.bf16.msra.mxu0 %v7764_v15  ;;  %v7790_v58 = vld [vmem:[%s8378_s28 + $0x188] sm:$0xff]   ;;  %v7794_v62 = vld [vmem:[%s8378_s28 + $0x190] sm:$0xff]   ;;  %v7797_v1 = vld [vmem:[%s8378_s28 + $0x1d8] sm:$0xff]  }
  0x26   : > { %6948 = vmatpush3.bf16.msra.mxu1 %v7765_v16  ;;  %6927 = vmatprep.subr.bf16.mxu0 %v7766_v17  ;;  %v1341_v51 = vrot.slane %v1313_v47, %v8416_v42  ;;  %v1344_v54 = vcombine.high %v1334_v49, %v1334_v49  ;;  %v7798_v2 = vld [vmem:[%s8378_s28 + $0x198] sm:$0xff]   ;;  %v7799_v3 = vld [vmem:[%s8378_s28 + $0x160] sm:$0xff]   ;;  %v7803_v7 = vld [vmem:[%s8378_s28 + $0x168] sm:$0xff]  }
  0x27   : > { %6949 = vmatprep.subr.bf16.mxu1 %v7767_v18  ;;  %4920 = vmatprep.mubr.bf16.mxu0 %v1334_v49  ;;  %v7800_v4 = vld [vmem:[%s8378_s28 + $0x120] sm:$0xff]   ;;  %v7804_v8 = vld [vmem:[%s8378_s28 + $0x128] sm:$0xff]   ;;  %v7807_v11 = vld [vmem:[%s8378_s28 + $0x170] sm:$0xff]  }
  0x28   : > { %v1345_v57 = vcombine.high %v1341_v51, %v1341_v51  ;;  %4960 = vmatprep.mubr.bf16.mxu1 %v1344_v54  ;;  %v7801_v5 = vld [vmem:[%s8378_s28 + $0x1e0] sm:$0xff]   ;;  %v7805_v9 = vld [vmem:[%s8378_s28 + $0x1e8] sm:$0xff]   ;;  %v7808_v12 = vld [vmem:[%s8378_s28 + $0x130] sm:$0xff]  }
  0x29   : > { %6928 = vmatpush3.bf16.msra.mxu0 %v7768_v19  ;;  %v7802_v6 = vld [vmem:[%s8378_s28 + $0x1a0] sm:$0xff]   ;;  %v7806_v10 = vld [vmem:[%s8378_s28 + $0x1a8] sm:$0xff]   ;;  %v7809_v13 = vld [vmem:[%s8378_s28 + $0x1f0] sm:$0xff]   ;;  %v1327_v19 = vrot.slane %v8420_v44, %v8416_v42 }
  0x2a   : > { %6950 = vmatpush3.bf16.msra.mxu1 %v7769_v20  ;;  %6929 = vmatprep.subr.bf16.mxu0 %v7770_v21  ;;  %v7810_v14 = vld [vmem:[%s8378_s28 + $0x1b0] sm:$0xff]   ;;  %v7811_v15 = vld [vmem:[%s8378_s28 + $0x178] sm:$0xff]   ;;  %v7815_v20 = vld [vmem:[%s8378_s28 + $0x240] sm:$0xff]  }
  0x2b   : > { %6951 = vmatprep.subr.bf16.mxu1 %v7771_v22  ;;  %v7812_v16 = vld [vmem:[%s8378_s28 + $0x138] sm:$0xff]   ;;  %v7816_v21 = vld [vmem:[%s8378_s28 + $0x200] sm:$0xff]   ;;  %v7824_v30 = vld [vmem:[%s8378_s28 + $0x210] sm:$0xff]  }
  0x2c   : > { %v7813_v17 = vld [vmem:[%s8378_s28 + $0x1f8] sm:$0xff]   ;;  %v7817_v22 = vld [vmem:[%s8378_s28 + $0x2c0] sm:$0xff]   ;;  %v7836_v43 = vld [vmem:[%s8378_s28 + $0x228] sm:$0xff]  }
  0x2d   : > { %6930 = vmatpush3.bf16.msra.mxu0 %v7772_v23  ;;  %v7814_v18 = vld [vmem:[%s8378_s28 + $0x1b8] sm:$0xff]   ;;  %v7818_v23 = vld [vmem:[%s8378_s28 + $0x280] sm:$0xff]   ;;  %v7837_v44 = vld [vmem:[%s8378_s28 + $0x2e8] sm:$0xff]  }
  0x2e   : > { %6952 = vmatpush3.bf16.msra.mxu1 %v7773_v24  ;;  %6931 = vmatprep.subr.bf16.mxu0 %v7774_v25  ;;  %v1343_v24 = vcombine.high %v1327_v19, %v1327_v19  ;;  %v7819_v25 = vld [vmem:[%s8378_s28 + $0x248] sm:$0xff]   ;;  %v7828_v34 = vld [vmem:[%s8378_s28 + $0x218] sm:$0xff]   ;;  %v7831_v37 = vld [vmem:[%s8378_s28 + $0x260] sm:$0xff]  }
  0x2f   : > { %6953 = vmatprep.subr.bf16.mxu1 %v7775_v26  ;;  %v7820_v26 = vld [vmem:[%s8378_s28 + $0x208] sm:$0xff]   ;;  %v7830_v36 = vld [vmem:[%s8378_s28 + $0x298] sm:$0xff]   ;;  %v7832_v38 = vld [vmem:[%s8378_s28 + $0x220] sm:$0xff]  }
  0x30   : > { %v7833_v39 = vld [vmem:[%s8378_s28 + $0x2e0] sm:$0xff]   ;;  %v7838_v45 = vld [vmem:[%s8378_s28 + $0x2a8] sm:$0xff]   ;;  %v7839_v47 = vld [vmem:[%s8378_s28 + $0x270] sm:$0xff]  }
  0x31   : > { %6932 = vmatpush3.bf16.msra.mxu0 %v7776_v27  ;;  %v7821_v27 = vld [vmem:[%s8378_s28 + $0x2c8] sm:$0xff]   ;;  %v7834_v40 = vld [vmem:[%s8378_s28 + $0x2a0] sm:$0xff]   ;;  %v7842_v54 = vld [vmem:[%s8378_s28 + $0x2b0] sm:$0xff]  }
  0x32   : > { %6954 = vmatpush3.bf16.msra.mxu1 %v7777_v28  ;;  %6933 = vmatprep.subr.bf16.mxu0 %v7778_v29  ;;  %v7822_v28 = vld [vmem:[%s8378_s28 + $0x288] sm:$0xff]   ;;  %v7823_v29 = vld [vmem:[%s8378_s28 + $0x250] sm:$0xff]  }
  0x33   : > { %6955 = vmatprep.subr.bf16.mxu1 %v7779_v31  ;;  %v7825_v31 = vld [vmem:[%s8378_s28 + $0x2d0] sm:$0xff]  }
  0x35   : > { %6934 = vmatpush3.bf16.msra.mxu0 %v7780_v32  ;;  %v7826_v32 = vld [vmem:[%s8378_s28 + $0x290] sm:$0xff]  }
  0x36   : > { %6956 = vmatpush3.bf16.msra.mxu1 %v7781_v33  ;;  %6963 = vmatprep.subr.bf16.mxu0 %v7783_v35  ;;  %v7827_v33 = vld [vmem:[%s8378_s28 + $0x258] sm:$0xff]  }
  0x37   : > { %6985 = vmatprep.subr.bf16.mxu1 %v7785_v41  ;;  %v7829_v35 = vld [vmem:[%s8378_s28 + $0x2d8] sm:$0xff]   ;;  %v7835_v41 = vld [vmem:[%s8378_s28 + $0x268] sm:$0xff]  }
  0x38   : > { %4921 = vmatmul.mubr.bf16.vlgmr.msra.gmra.mrb[0].mxu0 %v1320_v46  ;;  %v240_v46 = vld [vmem:[%s8373_s24 + $0x8] sm:$0xff] }
  0x39   : > { %6964 = vmatpush3.bf16.msra.mxu0 %v7784_v48  ;;  %4961 = vmatmul.mubr.bf16.vlgmr.msra.gmra.mrb[0].mxu1 %v1342_v52  ;;  %v1353_v48 = vrot.slane %v240_v46, %v8416_v42  ;;  %v1346_v49 = vcombine.high %v240_v46, %v240_v46  ;;  %v7889_v46 = vld [vmem:[%s8378_s28 + $0x410] sm:$0xff]  }
  0x3a   : > { %6965 = vmatprep.subr.bf16.mxu0 %v7787_v53  ;;  %6986 = vmatpush3.bf16.msra.mxu1 %v7786_v50  ;;  %v7840_v50 = vld [vmem:[%s8378_s28 + $0x230] sm:$0xff]  }
  0x3b   : > { %5000 = vmatprep.mubr.bf16.mxu0 %v1341_v51  ;;  %6987 = vmatprep.subr.bf16.mxu1 %v7789_v56  ;;  %v7841_v51 = vld [vmem:[%s8378_s28 + $0x2f0] sm:$0xff]   ;;  %v1361_v52 = vcombine.high %v1353_v48, %v1353_v48  ;;  %v8489_v53 = vrot.slane %v1346_v49, %v8416_v42  ;;  %v7892_v49 = vld [vmem:[%s8378_s28 + $0x458] sm:$0xff]  }
  0x3c   : > { %5040 = vmatprep.mubr.bf16.mxu1 %v1345_v57  ;;  %v7844_v57 = vld [vmem:[%s8378_s28 + $0x238] sm:$0xff]  }
  0x3d   : > { %6966 = vmatpush3.bf16.msra.mxu0 %v7788_v55  ;;  %v7843_v55 = vld [vmem:[%s8378_s28 + $0x278] sm:$0xff]   ;;  %v1383_v56 = vrot.slane %v1361_v52, %v8416_v42 }
  0x3e   : > { %6967 = vmatprep.subr.bf16.mxu0 %v7791_v59  ;;  %6988 = vmatpush3.bf16.msra.mxu1 %v7790_v58  ;;  %v1362_v58 = vcombine.high %v8489_v53, %v8489_v53  ;;  %v7845_v59 = vld [vmem:[%s8378_s28 + $0x2f8] sm:$0xff]  }
  0x3f   : > { %6989 = vmatprep.subr.bf16.mxu1 %v7793_v61  ;;  %v7846_v61 = vld [vmem:[%s8378_s28 + $0x2b8] sm:$0xff]  }
  0x40   : > { %v7895_v52 = vld [vmem:[%s8378_s28 + $0x498] sm:$0xff]  }
  0x41   : > { %6968 = vmatpush3.bf16.msra.mxu0 %v7792_v60  ;;  %v1393_v60 = vcombine.high %v1383_v56, %v1383_v56 }
  0x42   : > { %6969 = vmatprep.subr.bf16.mxu0 %v7795_v63  ;;  %6990 = vmatpush3.bf16.msra.mxu1 %v7794_v62  ;;  %v1369_v62 = vrot.slane %v1353_v48, %v8416_v42  ;;  %v7847_v63 = vld [vmem:[%s8378_s28 + $0x340] sm:$0xff]   ;;  %v7891_v48 = vld [vmem:[%s8378_s28 + $0x490] sm:$0xff]  }
  0x43   : > { %6991 = vmatprep.subr.bf16.mxu1 %v7797_v1  ;;  %v1390_v1 = vrot.slane %v1362_v58, %v8416_v42  ;;  %v7901_v58 = vld [vmem:[%s8378_s28 + $0x428] sm:$0xff]  }
  0x45   : > { %6970 = vmatpush3.bf16.msra.mxu0 %v7796_v0  ;;  %v7848_v0 = vld [vmem:[%s8378_s28 + $0x300] sm:$0xff]  }
  0x46   : > { %6971 = vmatprep.subr.bf16.mxu0 %v7799_v3  ;;  %6992 = vmatpush3.bf16.msra.mxu1 %v7798_v2  ;;  %v7849_v2 = vld [vmem:[%s8378_s28 + $0x3c0] sm:$0xff]  }
  0x47   : > { %6993 = vmatprep.subr.bf16.mxu1 %v7801_v5  ;;  %v7850_v3 = vld [vmem:[%s8378_s28 + $0x380] sm:$0xff]   ;;  %v7851_v5 = vld [vmem:[%s8378_s28 + $0x348] sm:$0xff]  }
  0x49   : > { %6972 = vmatpush3.bf16.msra.mxu0 %v7800_v4  ;;  %v1391_v4 = vcombine.high %v1369_v62, %v1369_v62 }
  0x4a   : > { %6973 = vmatprep.subr.bf16.mxu0 %v7803_v7  ;;  %6994 = vmatpush3.bf16.msra.mxu1 %v7802_v6  ;;  %v7852_v6 = vld [vmem:[%s8378_s28 + $0x308] sm:$0xff]   ;;  %v1394_v7 = vcombine.high %v1390_v1, %v1390_v1 }
  0x4b   : > { %6995 = vmatprep.subr.bf16.mxu1 %v7805_v9  ;;  %v7854_v9 = vld [vmem:[%s8378_s28 + $0x388] sm:$0xff]  }
  0x4d   : > { %6974 = vmatpush3.bf16.msra.mxu0 %v7804_v8  ;;  %v7853_v8 = vld [vmem:[%s8378_s28 + $0x3c8] sm:$0xff]  }
  0x4e   : > { %6975 = vmatprep.subr.bf16.mxu0 %v7807_v11  ;;  %6996 = vmatpush3.bf16.msra.mxu1 %v7806_v10  ;;  %v7855_v10 = vld [vmem:[%s8378_s28 + $0x350] sm:$0xff]  }
  0x4f   : > { %6997 = vmatprep.subr.bf16.mxu1 %v7809_v13  ;;  %v7856_v11 = vld [vmem:[%s8378_s28 + $0x310] sm:$0xff]  }
  0x50   : > { %v7858_v13 = vld [vmem:[%s8378_s28 + $0x390] sm:$0xff]  }
  0x51   : > { %6976 = vmatpush3.bf16.msra.mxu0 %v7808_v12  ;;  %v7857_v12 = vld [vmem:[%s8378_s28 + $0x3d0] sm:$0xff]  }
  0x52   : > { %6977 = vmatprep.subr.bf16.mxu0 %v7811_v15  ;;  %6998 = vmatpush3.bf16.msra.mxu1 %v7810_v14  ;;  %v7859_v14 = vld [vmem:[%s8378_s28 + $0x358] sm:$0xff]  }
  0x53   : > { %6999 = vmatprep.subr.bf16.mxu1 %v7813_v17  ;;  %v7860_v15 = vld [vmem:[%s8378_s28 + $0x318] sm:$0xff]  }
  0x54   : > { %v7862_v17 = vld [vmem:[%s8378_s28 + $0x398] sm:$0xff]  }
  0x55   : > { %6978 = vmatpush3.bf16.msra.mxu0 %v7812_v16  ;;  %v7861_v16 = vld [vmem:[%s8378_s28 + $0x3d8] sm:$0xff]  }
  0x56   : > { %7007 = vmatprep.subr.bf16.mxu0 %v7815_v20  ;;  %7000 = vmatpush3.bf16.msra.mxu1 %v7814_v18  ;;  %v7863_v18 = vld [vmem:[%s8378_s28 + $0x360] sm:$0xff]  }
  0x57   : > { %7029 = vmatprep.subr.bf16.mxu1 %v7817_v22  ;;  %v7865_v20 = vld [vmem:[%s8378_s28 + $0x3e0] sm:$0xff]   ;;  %v7867_v22 = vld [vmem:[%s8378_s28 + $0x368] sm:$0xff]  }
  0x58   : > { %5001 = vmatmul.mubr.bf16.vlgmr.msra.gmra.mrb[4].mxu0 %v1327_v19  ;;  %v7864_v19 = vld [vmem:[%s8378_s28 + $0x320] sm:$0xff]  }
  0x59   : > { %7008 = vmatpush3.bf16.msra.mxu0 %v7816_v21  ;;  %5041 = vmatmul.mubr.bf16.vlgmr.msra.gmra.mrb[4].mxu1 %v1343_v24  ;;  %v7866_v21 = vld [vmem:[%s8378_s28 + $0x3a0] sm:$0xff]   ;;  %v7869_v24 = vld [vmem:[%s8378_s28 + $0x3e8] sm:$0xff]  }
  0x5a   : > { %7009 = vmatprep.subr.bf16.mxu0 %v7819_v25  ;;  %7030 = vmatpush3.bf16.msra.mxu1 %v7818_v23  ;;  %v7868_v23 = vld [vmem:[%s8378_s28 + $0x328] sm:$0xff]  }
  0x5b   : > { %7031 = vmatprep.subr.bf16.mxu1 %v7821_v27  ;;  %5080 = vmatprep.mubr.bf16.mxu0 %v1383_v56  ;;  %v7870_v25 = vld [vmem:[%s8378_s28 + $0x3a8] sm:$0xff]   ;;  %v7872_v27 = vld [vmem:[%s8378_s28 + $0x330] sm:$0xff]   ;;  %v7899_v56 = vld [vmem:[%s8378_s28 + $0x4a0] sm:$0xff]  }
  0x5c   : > { %5120 = vmatprep.mubr.bf16.mxu1 %v1393_v60  ;;  %v7903_v60 = vld [vmem:[%s8378_s28 + $0x4a8] sm:$0xff]  }
  0x5d   : > { %7010 = vmatpush3.bf16.msra.mxu0 %v7820_v26  ;;  %v7871_v26 = vld [vmem:[%s8378_s28 + $0x370] sm:$0xff]  }
  0x5e   : > { %7011 = vmatprep.subr.bf16.mxu0 %v7823_v29  ;;  %7032 = vmatpush3.bf16.msra.mxu1 %v7822_v28  ;;  %v7873_v28 = vld [vmem:[%s8378_s28 + $0x3f0] sm:$0xff]  }
  0x5f   : > { %7033 = vmatprep.subr.bf16.mxu1 %v7825_v31  ;;  %v7874_v29 = vld [vmem:[%s8378_s28 + $0x3b0] sm:$0xff]   ;;  %v7876_v31 = vld [vmem:[%s8378_s28 + $0x338] sm:$0xff]  }
  0x61   : > { %7012 = vmatpush3.bf16.msra.mxu0 %v7824_v30  ;;  %v7875_v30 = vld [vmem:[%s8378_s28 + $0x378] sm:$0xff]  }
  0x62   : > { %7013 = vmatprep.subr.bf16.mxu0 %v7827_v33  ;;  %7034 = vmatpush3.bf16.msra.mxu1 %v7826_v32  ;;  %v7877_v32 = vld [vmem:[%s8378_s28 + $0x3f8] sm:$0xff]  }
  0x63   : > { %7035 = vmatprep.subr.bf16.mxu1 %v7829_v35  ;;  %v7879_v33 = vld [vmem:[%s8378_s28 + $0x3b8] sm:$0xff]   ;;  %v7880_v35 = vld [vmem:[%s8378_s28 + $0x440] sm:$0xff]  }
  0x65   : > { %7014 = vmatpush3.bf16.msra.mxu0 %v7828_v34  ;;  %v1376_v34 = vrot.slane %v8489_v53, %v8416_v42  ;;  %v7896_v53 = vld [vmem:[%s8378_s28 + $0x460] sm:$0xff]  }
  0x66   : > { %7015 = vmatprep.subr.bf16.mxu0 %v7831_v37  ;;  %7036 = vmatpush3.bf16.msra.mxu1 %v7830_v36  ;;  %v7881_v36 = vld [vmem:[%s8378_s28 + $0x400] sm:$0xff]  }
  0x67   : > { %7037 = vmatprep.subr.bf16.mxu1 %v7833_v39  ;;  %v7882_v37 = vld [vmem:[%s8378_s28 + $0x4c0] sm:$0xff]   ;;  %v1392_v39 = vcombine.high %v1376_v34, %v1376_v34 }
  0x69   : > { %7016 = vmatpush3.bf16.msra.mxu0 %v7832_v38  ;;  %v7883_v38 = vld [vmem:[%s8378_s28 + $0x480] sm:$0xff]  }
  0x6a   : > { %7017 = vmatprep.subr.bf16.mxu0 %v7835_v41  ;;  %7038 = vmatpush3.bf16.msra.mxu1 %v7834_v40  ;;  %v7884_v40 = vld [vmem:[%s8378_s28 + $0x448] sm:$0xff]  }
  0x6b   : > { %7039 = vmatprep.subr.bf16.mxu1 %v7837_v44  ;;  %v7885_v41 = vld [vmem:[%s8378_s28 + $0x408] sm:$0xff]  }
  0x6c   : > { %v7887_v44 = vld [vmem:[%s8378_s28 + $0x488] sm:$0xff]  }
  0x6d   : > { %7018 = vmatpush3.bf16.msra.mxu0 %v7836_v43  ;;  %v7886_v43 = vld [vmem:[%s8378_s28 + $0x4c8] sm:$0xff]  }
  0x6e   : > { %7019 = vmatprep.subr.bf16.mxu0 %v7839_v47  ;;  %7040 = vmatpush3.bf16.msra.mxu1 %v7838_v45  ;;  %v7888_v45 = vld [vmem:[%s8378_s28 + $0x450] sm:$0xff]  }
  0x6f   : > { %7041 = vmatprep.subr.bf16.mxu1 %v7841_v51  ;;  %v7890_v47 = vld [vmem:[%s8378_s28 + $0x4d0] sm:$0xff]   ;;  %v7894_v51 = vld [vmem:[%s8378_s28 + $0x4d8] sm:$0xff]  }
  0x71   : > { %7020 = vmatpush3.bf16.msra.mxu0 %v7840_v50  ;;  %v7893_v50 = vld [vmem:[%s8378_s28 + $0x418] sm:$0xff]  }
  0x72   : > { %7021 = vmatprep.subr.bf16.mxu0 %v7843_v55  ;;  %7042 = vmatpush3.bf16.msra.mxu1 %v7842_v54  ;;  %v7897_v54 = vld [vmem:[%s8378_s28 + $0x420] sm:$0xff]  }
  0x73   : > { %7043 = vmatprep.subr.bf16.mxu1 %v7845_v59  ;;  %v7898_v55 = vld [vmem:[%s8378_s28 + $0x4e0] sm:$0xff]   ;;  %v7902_v59 = vld [vmem:[%s8378_s28 + $0x4e8] sm:$0xff]  }
  0x75   : > { %7022 = vmatpush3.bf16.msra.mxu0 %v7844_v57  ;;  %v7900_v57 = vld [vmem:[%s8378_s28 + $0x468] sm:$0xff]  }
  0x76   : > { %7051 = vmatprep.subr.bf16.mxu0 %v7847_v63  ;;  %7044 = vmatpush3.bf16.msra.mxu1 %v7846_v61  ;;  %v241_v61 = vld [vmem:[%s8373_s24 + $0x10] sm:$0xff] }
  0x77   : > { %7073 = vmatprep.subr.bf16.mxu1 %v7849_v2  ;;  %v1402_v63 = vrot.slane %v241_v61, %v8416_v42  ;;  %v7906_v2 = vld [vmem:[%s8378_s28 + $0x4f0] sm:$0xff]  }
  0x78   : > { %5081 = vmatmul.mubr.bf16.vlgmr.msra.gmra.mrb[8].mxu0 %v1369_v62  ;;  %v7904_v62 = vld [vmem:[%s8378_s28 + $0x470] sm:$0xff]  }
  0x79   : > { %7052 = vmatpush3.bf16.msra.mxu0 %v7848_v0  ;;  %5160 = vmatprep.mubr.bf16.mxu0 %v1390_v1  ;;  %v1395_v0 = vcombine.high %v241_v61, %v241_v61  ;;  %v7905_v1 = vld [vmem:[%s8378_s28 + $0x430] sm:$0xff]  }
  0x7a   : > { %5121 = vmatmul.mubr.bf16.vlgmr.msra.gmra.mrb[8].mxu1 %v1391_v4  ;;  %7053 = vmatprep.subr.bf16.mxu0 %v7851_v5  ;;  %v7907_v5 = vld [vmem:[%s8378_s28 + $0x4b0] sm:$0xff]  }
  0x7b   : > { %7074 = vmatpush3.bf16.msra.mxu1 %v7850_v3  ;;  %5200 = vmatprep.mubr.bf16.mxu1 %v1394_v7  ;;  %v1410_v3 = vcombine.high %v1402_v63, %v1402_v63  ;;  %v8565_v4 = vrot.slane %v1395_v0, %v8416_v42  ;;  %v7954_v61 = vld [vmem:[%s8378_s28 + $0x610] sm:$0xff]   ;;  %v7957_v0 = vld [vmem:[%s8378_s28 + $0x658] sm:$0xff]  }
  0x7c   : > { %7075 = vmatprep.subr.bf16.mxu1 %v7853_v8  ;;  %v7909_v8 = vld [vmem:[%s8378_s28 + $0x438] sm:$0xff]  }
  0x7d   : > { %7054 = vmatpush3.bf16.msra.mxu0 %v7852_v6  ;;  %v7908_v6 = vld [vmem:[%s8378_s28 + $0x478] sm:$0xff]   ;;  %v1432_v7 = vrot.slane %v1410_v3, %v8416_v42 }
  0x7e   : > { %7055 = vmatprep.subr.bf16.mxu0 %v7855_v10  ;;  %v7910_v10 = vld [vmem:[%s8378_s28 + $0x4f8] sm:$0xff]  }
  0x7f   : > { %7076 = vmatpush3.bf16.msra.mxu1 %v7854_v9  ;;  %v1411_v9 = vcombine.high %v8565_v4, %v8565_v4  ;;  %v7960_v3 = vld [vmem:[%s8378_s28 + $0x698] sm:$0xff]  }
  0x80   : > { %7077 = vmatprep.subr.bf16.mxu1 %v7857_v12  ;;  %v7911_v12 = vld [vmem:[%s8378_s28 + $0x4b8] sm:$0xff]  }
  0x81   : > { %7056 = vmatpush3.bf16.msra.mxu0 %v7856_v11  ;;  %v1442_v11 = vcombine.high %v1432_v7, %v1432_v7 }
  0x82   : > { %7057 = vmatprep.subr.bf16.mxu0 %v7859_v14  ;;  %v7912_v14 = vld [vmem:[%s8378_s28 + $0x540] sm:$0xff]  }
  0x83   : > { %7078 = vmatpush3.bf16.msra.mxu1 %v7858_v13  ;;  %v1418_v13 = vrot.slane %v1402_v63, %v8416_v42  ;;  %v7956_v63 = vld [vmem:[%s8378_s28 + $0x690] sm:$0xff]  }
  0x84   : > { %7079 = vmatprep.subr.bf16.mxu1 %v7861_v16  ;;  %v1439_v16 = vrot.slane %v1411_v9, %v8416_v42  ;;  %v7966_v9 = vld [vmem:[%s8378_s28 + $0x628] sm:$0xff]  }
  0x85   : > { %7058 = vmatpush3.bf16.msra.mxu0 %v7860_v15  ;;  %v7913_v15 = vld [vmem:[%s8378_s28 + $0x500] sm:$0xff]  }
  0x86   : > { %7059 = vmatprep.subr.bf16.mxu0 %v7863_v18  ;;  %v7915_v18 = vld [vmem:[%s8378_s28 + $0x580] sm:$0xff]  }
  0x87   : > { %7080 = vmatpush3.bf16.msra.mxu1 %v7862_v17  ;;  %v7914_v17 = vld [vmem:[%s8378_s28 + $0x5c0] sm:$0xff]  }
  0x88   : > { %7081 = vmatprep.subr.bf16.mxu1 %v7865_v20  ;;  %v7916_v20 = vld [vmem:[%s8378_s28 + $0x548] sm:$0xff]  }
  0x89   : > { %7060 = vmatpush3.bf16.msra.mxu0 %v7864_v19  ;;  %v1440_v19 = vcombine.high %v1418_v13, %v1418_v13 }
  0x8a   : > { %7061 = vmatprep.subr.bf16.mxu0 %v7867_v22  ;;  %v1443_v22 = vcombine.high %v1439_v16, %v1439_v16 }
  0x8b   : > { %7082 = vmatpush3.bf16.msra.mxu1 %v7866_v21  ;;  %v7917_v21 = vld [vmem:[%s8378_s28 + $0x508] sm:$0xff]  }
  0x8c   : > { %7083 = vmatprep.subr.bf16.mxu1 %v7869_v24  ;;  %v7919_v24 = vld [vmem:[%s8378_s28 + $0x588] sm:$0xff]  }
  0x8d   : > { %7062 = vmatpush3.bf16.msra.mxu0 %v7868_v23  ;;  %v7918_v23 = vld [vmem:[%s8378_s28 + $0x5c8] sm:$0xff]  }
  0x8e   : > { %7063 = vmatprep.subr.bf16.mxu0 %v7871_v26  ;;  %v7921_v26 = vld [vmem:[%s8378_s28 + $0x510] sm:$0xff]  }
  0x8f   : > { %7084 = vmatpush3.bf16.msra.mxu1 %v7870_v25  ;;  %v7920_v25 = vld [vmem:[%s8378_s28 + $0x550] sm:$0xff]  }
  0x90   : > { %7085 = vmatprep.subr.bf16.mxu1 %v7873_v28  ;;  %v7923_v28 = vld [vmem:[%s8378_s28 + $0x590] sm:$0xff]  }
  0x91   : > { %7064 = vmatpush3.bf16.msra.mxu0 %v7872_v27  ;;  %v7922_v27 = vld [vmem:[%s8378_s28 + $0x5d0] sm:$0xff]  }
  0x92   : > { %7065 = vmatprep.subr.bf16.mxu0 %v7875_v30  ;;  %v7925_v30 = vld [vmem:[%s8378_s28 + $0x518] sm:$0xff]  }
  0x93   : > { %7086 = vmatpush3.bf16.msra.mxu1 %v7874_v29  ;;  %v7924_v29 = vld [vmem:[%s8378_s28 + $0x558] sm:$0xff]  }
  0x94   : > { %7087 = vmatprep.subr.bf16.mxu1 %v7877_v32  ;;  %v7927_v32 = vld [vmem:[%s8378_s28 + $0x598] sm:$0xff]  }
  0x95   : > { %7066 = vmatpush3.bf16.msra.mxu0 %v7876_v31  ;;  %v7926_v31 = vld [vmem:[%s8378_s28 + $0x5d8] sm:$0xff]  }
  0x96   : > { %7095 = vmatprep.subr.bf16.mxu0 %v7880_v35  ;;  %v7930_v35 = vld [vmem:[%s8378_s28 + $0x5e0] sm:$0xff]  }
  0x97   : > { %7088 = vmatpush3.bf16.msra.mxu1 %v7879_v33  ;;  %v7928_v33 = vld [vmem:[%s8378_s28 + $0x560] sm:$0xff]  }
  0x98   : > { %5161 = vmatmul.mubr.bf16.vlgmr.msra.gmra.mrb[12].mxu0 %v1376_v34  ;;  %7117 = vmatprep.subr.bf16.mxu1 %v7882_v37  ;;  %v7929_v34 = vld [vmem:[%s8378_s28 + $0x520] sm:$0xff]   ;;  %v7932_v37 = vld [vmem:[%s8378_s28 + $0x568] sm:$0xff]  }
  0x99   : > { %7096 = vmatpush3.bf16.msra.mxu0 %v7881_v36  ;;  %5240 = vmatprep.mubr.bf16.mxu0 %v1432_v7  ;;  %v7931_v36 = vld [vmem:[%s8378_s28 + $0x5a0] sm:$0xff]  }
  0x9a   : > { %5201 = vmatmul.mubr.bf16.vlgmr.msra.gmra.mrb[12].mxu1 %v1392_v39  ;;  %7097 = vmatprep.subr.bf16.mxu0 %v7884_v40  ;;  %v7934_v39 = vld [vmem:[%s8378_s28 + $0x5e8] sm:$0xff]   ;;  %v7964_v7 = vld [vmem:[%s8378_s28 + $0x6a0] sm:$0xff]  }
  0x9b   : > { %7118 = vmatpush3.bf16.msra.mxu1 %v7883_v38  ;;  %5280 = vmatprep.mubr.bf16.mxu1 %v1442_v11  ;;  %v7933_v38 = vld [vmem:[%s8378_s28 + $0x528] sm:$0xff]  }
  0x9c   : > { %7119 = vmatprep.subr.bf16.mxu1 %v7886_v43  ;;  %v7935_v40 = vld [vmem:[%s8378_s28 + $0x5a8] sm:$0xff]   ;;  %v7937_v43 = vld [vmem:[%s8378_s28 + $0x530] sm:$0xff]  }
  0x9d   : > { %7098 = vmatpush3.bf16.msra.mxu0 %v7885_v41  ;;  %v7936_v41 = vld [vmem:[%s8378_s28 + $0x570] sm:$0xff]   ;;  %v7968_v11 = vld [vmem:[%s8378_s28 + $0x6a8] sm:$0xff]  }
  0x9e   : > { %7099 = vmatprep.subr.bf16.mxu0 %v7888_v45  ;;  %v7939_v45 = vld [vmem:[%s8378_s28 + $0x5b0] sm:$0xff]  }
  0x9f   : > { %7120 = vmatpush3.bf16.msra.mxu1 %v7887_v44  ;;  %v7938_v44 = vld [vmem:[%s8378_s28 + $0x5f0] sm:$0xff]  }
  0xa0   : > { %7121 = vmatprep.subr.bf16.mxu1 %v7890_v47  ;;  %v7941_v47 = vld [vmem:[%s8378_s28 + $0x538] sm:$0xff]  }
  0xa1   : > { %7100 = vmatpush3.bf16.msra.mxu0 %v7889_v46  ;;  %v7940_v46 = vld [vmem:[%s8378_s28 + $0x578] sm:$0xff]  }
  0xa2   : > { %7101 = vmatprep.subr.bf16.mxu0 %v7892_v49  ;;  %v7944_v49 = vld [vmem:[%s8378_s28 + $0x5b8] sm:$0xff]  }
  0xa3   : > { %7122 = vmatpush3.bf16.msra.mxu1 %v7891_v48  ;;  %v7942_v48 = vld [vmem:[%s8378_s28 + $0x5f8] sm:$0xff]  }
  0xa4   : > { %7123 = vmatprep.subr.bf16.mxu1 %v7894_v51  ;;  %v7945_v51 = vld [vmem:[%s8378_s28 + $0x640] sm:$0xff]  }
  0xa5   : > { %7102 = vmatpush3.bf16.msra.mxu0 %v7893_v50  ;;  %v1425_v50 = vrot.slane %v8565_v4, %v8416_v42  ;;  %v7961_v4 = vld [vmem:[%s8378_s28 + $0x660] sm:$0xff]  }
  0xa6   : > { %7103 = vmatprep.subr.bf16.mxu0 %v7896_v53  ;;  %v7947_v53 = vld [vmem:[%s8378_s28 + $0x6c0] sm:$0xff]  }
  0xa7   : > { %7124 = vmatpush3.bf16.msra.mxu1 %v7895_v52  ;;  %v7946_v52 = vld [vmem:[%s8378_s28 + $0x600] sm:$0xff]  }
  0xa8   : > { %7125 = vmatprep.subr.bf16.mxu1 %v7898_v55  ;;  %v1441_v55 = vcombine.high %v1425_v50, %v1425_v50 }
  0xa9   : > { %7104 = vmatpush3.bf16.msra.mxu0 %v7897_v54  ;;  %v7948_v54 = vld [vmem:[%s8378_s28 + $0x680] sm:$0xff]  }
  0xaa   : > { %7105 = vmatprep.subr.bf16.mxu0 %v7900_v57  ;;  %v7950_v57 = vld [vmem:[%s8378_s28 + $0x608] sm:$0xff]  }
  0xab   : > { %7126 = vmatpush3.bf16.msra.mxu1 %v7899_v56  ;;  %v7949_v56 = vld [vmem:[%s8378_s28 + $0x648] sm:$0xff]  }
  0xac   : > { %7127 = vmatprep.subr.bf16.mxu1 %v7902_v59  ;;  %v7952_v59 = vld [vmem:[%s8378_s28 + $0x688] sm:$0xff]  }
  0xad   : > { %7106 = vmatpush3.bf16.msra.mxu0 %v7901_v58  ;;  %v7951_v58 = vld [vmem:[%s8378_s28 + $0x6c8] sm:$0xff]  }
  0xae   : > { %7107 = vmatprep.subr.bf16.mxu0 %v7904_v62  ;;  %v7955_v62 = vld [vmem:[%s8378_s28 + $0x6d0] sm:$0xff]  }
  0xaf   : > { %7128 = vmatpush3.bf16.msra.mxu1 %v7903_v60  ;;  %v7953_v60 = vld [vmem:[%s8378_s28 + $0x650] sm:$0xff]  }
  0xb0   : > { %7129 = vmatprep.subr.bf16.mxu1 %v7906_v2  ;;  %v7959_v2 = vld [vmem:[%s8378_s28 + $0x6d8] sm:$0xff]  }
  0xb1   : > { %7108 = vmatpush3.bf16.msra.mxu0 %v7905_v1  ;;  %v7958_v1 = vld [vmem:[%s8378_s28 + $0x618] sm:$0xff]  }
  0xb2   : > { %7109 = vmatprep.subr.bf16.mxu0 %v7908_v6  ;;  %v7963_v6 = vld [vmem:[%s8378_s28 + $0x6e0] sm:$0xff]  }
  0xb3   : > { %7130 = vmatpush3.bf16.msra.mxu1 %v7907_v5  ;;  %v7962_v5 = vld [vmem:[%s8378_s28 + $0x620] sm:$0xff]  }
  0xb4   : > { %7131 = vmatprep.subr.bf16.mxu1 %v7910_v10  ;;  %v7967_v10 = vld [vmem:[%s8378_s28 + $0x6e8] sm:$0xff]  }
  0xb5   : > { %7110 = vmatpush3.bf16.msra.mxu0 %v7909_v8  ;;  %v7965_v8 = vld [vmem:[%s8378_s28 + $0x668] sm:$0xff]  }
  0xb6   : > { %7139 = vmatprep.subr.bf16.mxu0 %v7912_v14  ;;  %v7970_v14 = vld [vmem:[%s8378_s28 + $0x630] sm:$0xff]  }
  0xb7   : > { %7132 = vmatpush3.bf16.msra.mxu1 %v7911_v12  ;;  %v7969_v12 = vld [vmem:[%s8378_s28 + $0x670] sm:$0xff]  }
  0xb8   : > { %5241 = vmatmul.mubr.bf16.vlgmr.msra.gmra.mrb[16].mxu0 %v1418_v13  ;;  %7161 = vmatprep.subr.bf16.mxu1 %v7914_v17  ;;  %v242_v13 = vld [vmem:[%s8373_s24 + $0x18] sm:$0xff]  ;;  %v7971_v17 = vld [vmem:[%s8378_s28 + $0x6f0] sm:$0xff]  }
  0xb9   : > { %7140 = vmatpush3.bf16.msra.mxu0 %v7913_v15  ;;  %5320 = vmatprep.mubr.bf16.mxu0 %v1439_v16  ;;  %v1451_v15 = vrot.slane %v242_v13, %v8416_v42  ;;  %v1444_v16 = vcombine.high %v242_v13, %v242_v13  ;;  %v8010_v13 = vld [vmem:[%s8378_s28 + $0x840] sm:$0xff]  }
  0xba   : > { %5281 = vmatmul.mubr.bf16.vlgmr.msra.gmra.mrb[16].mxu1 %v1440_v19  ;;  %7141 = vmatprep.subr.bf16.mxu0 %v7916_v20 }
  0xbb   : > { %7162 = vmatpush3.bf16.msra.mxu1 %v7915_v18  ;;  %5360 = vmatprep.mubr.bf16.mxu1 %v1443_v22  ;;  %v7972_v18 = vld [vmem:[%s8378_s28 + $0x6b0] sm:$0xff]   ;;  %v1459_v19 = vcombine.high %v1451_v15, %v1451_v15  ;;  %v8642_v20 = vrot.slane %v1444_v16, %v8416_v42  ;;  %v7974_v22 = vld [vmem:[%s8378_s28 + $0x638] sm:$0xff]   ;;  %v8013_v16 = vld [vmem:[%s8378_s28 + $0x880] sm:$0xff]  }
  0xbc   : > { %7163 = vmatprep.subr.bf16.mxu1 %v7918_v23 }
  0xbd   : > { %7142 = vmatpush3.bf16.msra.mxu0 %v7917_v21  ;;  %v7973_v21 = vld [vmem:[%s8378_s28 + $0x678] sm:$0xff]   ;;  %v1481_v23 = vrot.slane %v1459_v19, %v8416_v42  ;;  %v8015_v19 = vld [vmem:[%s8378_s28 + $0x808] sm:$0xff]  }
  0xbe   : > { %7143 = vmatprep.subr.bf16.mxu0 %v7920_v25  ;;  %v7975_v25 = vld [vmem:[%s8378_s28 + $0x6f8] sm:$0xff]  }
  0xbf   : > { %7164 = vmatpush3.bf16.msra.mxu1 %v7919_v24  ;;  %v1460_v24 = vcombine.high %v8642_v20, %v8642_v20 }
  0xc0   : > { %7165 = vmatprep.subr.bf16.mxu1 %v7922_v27  ;;  %v1491_v27 = vcombine.high %v1481_v23, %v1481_v23 }
  0xc1   : > { %7144 = vmatpush3.bf16.msra.mxu0 %v7921_v26  ;;  %v7976_v26 = vld [vmem:[%s8378_s28 + $0x6b8] sm:$0xff]  }
  0xc2   : > { %7145 = vmatprep.subr.bf16.mxu0 %v7924_v29  ;;  %v7977_v29 = vld [vmem:[%s8378_s28 + $0x740] sm:$0xff]  }
  0xc3   : > { %7166 = vmatpush3.bf16.msra.mxu1 %v7923_v28  ;;  %v1467_v28 = vrot.slane %v1451_v15, %v8416_v42  ;;  %v8012_v15 = vld [vmem:[%s8378_s28 + $0x8c0] sm:$0xff]  }
  0xc4   : > { %7167 = vmatprep.subr.bf16.mxu1 %v7926_v31  ;;  %v1488_v31 = vrot.slane %v1460_v24, %v8416_v42  ;;  %v8020_v24 = vld [vmem:[%s8378_s28 + $0x8d0] sm:$0xff]  }
  0xc5   : > { %7146 = vmatpush3.bf16.msra.mxu0 %v7925_v30  ;;  %v7978_v30 = vld [vmem:[%s8378_s28 + $0x700] sm:$0xff]  }
  0xc6   : > { %7147 = vmatprep.subr.bf16.mxu0 %v7928_v33  ;;  %v7980_v33 = vld [vmem:[%s8378_s28 + $0x780] sm:$0xff]  }
  0xc7   : > { %7168 = vmatpush3.bf16.msra.mxu1 %v7927_v32  ;;  %v7979_v32 = vld [vmem:[%s8378_s28 + $0x7c0] sm:$0xff]  }
  0xc8   : > { %7169 = vmatprep.subr.bf16.mxu1 %v7930_v35  ;;  %v7981_v35 = vld [vmem:[%s8378_s28 + $0x748] sm:$0xff]  }
  0xc9   : > { %7148 = vmatpush3.bf16.msra.mxu0 %v7929_v34  ;;  %v1489_v34 = vcombine.high %v1467_v28, %v1467_v28 }
  0xca   : > { %7149 = vmatprep.subr.bf16.mxu0 %v7932_v37  ;;  %v1492_v37 = vcombine.high %v1488_v31, %v1488_v31 }
  0xcb   : > { %7170 = vmatpush3.bf16.msra.mxu1 %v7931_v36  ;;  %v7982_v36 = vld [vmem:[%s8378_s28 + $0x708] sm:$0xff]  }
  0xcc   : > { %7171 = vmatprep.subr.bf16.mxu1 %v7934_v39  ;;  %v7984_v39 = vld [vmem:[%s8378_s28 + $0x788] sm:$0xff]  }
  0xcd   : > { %7150 = vmatpush3.bf16.msra.mxu0 %v7933_v38  ;;  %v7983_v38 = vld [vmem:[%s8378_s28 + $0x7c8] sm:$0xff]  }
  0xce   : > { %7151 = vmatprep.subr.bf16.mxu0 %v7936_v41  ;;  %v7986_v41 = vld [vmem:[%s8378_s28 + $0x710] sm:$0xff]  }
  0xcf   : > { %7172 = vmatpush3.bf16.msra.mxu1 %v7935_v40  ;;  %v7985_v40 = vld [vmem:[%s8378_s28 + $0x750] sm:$0xff]  }
  0xd0   : > { %7173 = vmatprep.subr.bf16.mxu1 %v7938_v44  ;;  %v7988_v44 = vld [vmem:[%s8378_s28 + $0x790] sm:$0xff]  }
  0xd1   : > { %7152 = vmatpush3.bf16.msra.mxu0 %v7937_v43  ;;  %v7987_v43 = vld [vmem:[%s8378_s28 + $0x7d0] sm:$0xff]  }
  0xd2   : > { %7153 = vmatprep.subr.bf16.mxu0 %v7940_v46  ;;  %v7990_v46 = vld [vmem:[%s8378_s28 + $0x718] sm:$0xff]  }
  0xd3   : > { %7174 = vmatpush3.bf16.msra.mxu1 %v7939_v45  ;;  %v7989_v45 = vld [vmem:[%s8378_s28 + $0x758] sm:$0xff]  }
  0xd4   : > { %7175 = vmatprep.subr.bf16.mxu1 %v7942_v48  ;;  %v7992_v48 = vld [vmem:[%s8378_s28 + $0x798] sm:$0xff]  }
  0xd5   : > { %7154 = vmatpush3.bf16.msra.mxu0 %v7941_v47  ;;  %v7991_v47 = vld [vmem:[%s8378_s28 + $0x7d8] sm:$0xff]  }
  0xd6   : > { %7183 = vmatprep.subr.bf16.mxu0 %v7945_v51  ;;  %v7995_v51 = vld [vmem:[%s8378_s28 + $0x7e0] sm:$0xff]  }
  0xd7   : > { %7176 = vmatpush3.bf16.msra.mxu1 %v7944_v49  ;;  %v7993_v49 = vld [vmem:[%s8378_s28 + $0x760] sm:$0xff]  }
  0xd8   : > { %5321 = vmatmul.mubr.bf16.vlgmr.msra.gmra.mrb[20].mxu0 %v1425_v50  ;;  %7205 = vmatprep.subr.bf16.mxu1 %v7947_v53  ;;  %v7994_v50 = vld [vmem:[%s8378_s28 + $0x720] sm:$0xff]   ;;  %v7997_v53 = vld [vmem:[%s8378_s28 + $0x768] sm:$0xff]  }
  0xd9   : > { %7184 = vmatpush3.bf16.msra.mxu0 %v7946_v52  ;;  %5400 = vmatprep.mubr.bf16.mxu0 %v1481_v23  ;;  %v7996_v52 = vld [vmem:[%s8378_s28 + $0x7a0] sm:$0xff]   ;;  %v8019_v23 = vld [vmem:[%s8378_s28 + $0x810] sm:$0xff]  }
  0xda   : > { %5361 = vmatmul.mubr.bf16.vlgmr.msra.gmra.mrb[20].mxu1 %v1441_v55  ;;  %7185 = vmatprep.subr.bf16.mxu0 %v7949_v56  ;;  %v7999_v55 = vld [vmem:[%s8378_s28 + $0x7e8] sm:$0xff]  }
  0xdb   : > { %7206 = vmatpush3.bf16.msra.mxu1 %v7948_v54  ;;  %5440 = vmatprep.mubr.bf16.mxu1 %v1491_v27  ;;  %v7998_v54 = vld [vmem:[%s8378_s28 + $0x728] sm:$0xff]   ;;  %v8023_v27 = vld [vmem:[%s8378_s28 + $0x818] sm:$0xff]  }
  0xdc   : > { %7207 = vmatprep.subr.bf16.mxu1 %v7951_v58  ;;  %v8000_v56 = vld [vmem:[%s8378_s28 + $0x7a8] sm:$0xff]  }
  0xdd   : > { %7186 = vmatpush3.bf16.msra.mxu0 %v7950_v57  ;;  %v8001_v57 = vld [vmem:[%s8378_s28 + $0x770] sm:$0xff]  }
  0xde   : > { %7187 = vmatprep.subr.bf16.mxu0 %v7953_v60 }
  0xdf   : > { %7208 = vmatpush3.bf16.msra.mxu1 %v7952_v59  ;;  %v8002_v59 = vld [vmem:[%s8378_s28 + $0x730] sm:$0xff]  }
  0xe0   : > { %7209 = vmatprep.subr.bf16.mxu1 %v7955_v62 }
  0xe1   : > { %7188 = vmatpush3.bf16.msra.mxu0 %v7954_v61  ;;  %v8003_v61 = vld [vmem:[%s8378_s28 + $0x7f0] sm:$0xff]  }
  0xe2   : > { %7189 = vmatprep.subr.bf16.mxu0 %v7957_v0 }
  0xe3   : > { %7210 = vmatpush3.bf16.msra.mxu1 %v7956_v63 }
  0xe4   : > { %7211 = vmatprep.subr.bf16.mxu1 %v7959_v2  ;;  %v8005_v2 = vld [vmem:[%s8378_s28 + $0x778] sm:$0xff]  }
  0xe5   : > { %7190 = vmatpush3.bf16.msra.mxu0 %v7958_v1  ;;  %v8004_v1 = vld [vmem:[%s8378_s28 + $0x7b0] sm:$0xff]  }
  0xe6   : > { %7191 = vmatprep.subr.bf16.mxu0 %v7961_v4 }
  0xe7   : > { %7212 = vmatpush3.bf16.msra.mxu1 %v7960_v3 }
  0xe8   : > { %7213 = vmatprep.subr.bf16.mxu1 %v7963_v6  ;;  %v8006_v6 = vld [vmem:[%s8378_s28 + $0x738] sm:$0xff]  }
  0xe9   : > { %7192 = vmatpush3.bf16.msra.mxu0 %v7962_v5 }
  0xea   : > { %7193 = vmatprep.subr.bf16.mxu0 %v7965_v8  ;;  %v8007_v8 = vld [vmem:[%s8378_s28 + $0x7f8] sm:$0xff]  }
  0xeb   : > { %7214 = vmatpush3.bf16.msra.mxu1 %v7964_v7 }
  0xec   : > { %7215 = vmatprep.subr.bf16.mxu1 %v7967_v10 }
  0xed   : > { %7194 = vmatpush3.bf16.msra.mxu0 %v7966_v9 }
  0xee   : > { %7195 = vmatprep.subr.bf16.mxu0 %v7969_v12  ;;  %v1474_v12 = vrot.slane %v8642_v20, %v8416_v42  ;;  %v8016_v20 = vld [vmem:[%s8378_s28 + $0x8c8] sm:$0xff]  }
  0xef   : > { %7216 = vmatpush3.bf16.msra.mxu1 %v7968_v11  ;;  %v8009_v11 = vld [vmem:[%s8378_s28 + $0x7b8] sm:$0xff]  }
  0xf0   : > { %7217 = vmatprep.subr.bf16.mxu1 %v7971_v17  ;;  %v1490_v17 = vcombine.high %v1474_v12, %v1474_v12 }
  0xf1   : > { %7196 = vmatpush3.bf16.msra.mxu0 %v7970_v14  ;;  %v8011_v14 = vld [vmem:[%s8378_s28 + $0x800] sm:$0xff]  }
  0xf2   : > { %7197 = vmatprep.subr.bf16.mxu0 %v7973_v21  ;;  %v8017_v21 = vld [vmem:[%s8378_s28 + $0x888] sm:$0xff]  }
  0xf3   : > { %7218 = vmatpush3.bf16.msra.mxu1 %v7972_v18  ;;  %v8014_v18 = vld [vmem:[%s8378_s28 + $0x848] sm:$0xff]  }
  0xf4   : > { %7219 = vmatprep.subr.bf16.mxu1 %v7975_v25  ;;  %v8021_v25 = vld [vmem:[%s8378_s28 + $0x890] sm:$0xff]  }
  0xf5   : > { %7198 = vmatpush3.bf16.msra.mxu0 %v7974_v22  ;;  %v8018_v22 = vld [vmem:[%s8378_s28 + $0x850] sm:$0xff]  }
  0xf6   : > { %7227 = vmatprep.subr.bf16.mxu0 %v7977_v29  ;;  %v8025_v29 = vld [vmem:[%s8378_s28 + $0x898] sm:$0xff]  }
  0xf7   : > { %7220 = vmatpush3.bf16.msra.mxu1 %v7976_v26  ;;  %v8022_v26 = vld [vmem:[%s8378_s28 + $0x858] sm:$0xff]  }
  0xf8   : > { %5401 = vmatmul.mubr.bf16.vlgmr.msra.gmra.mrb[24].mxu0 %v1467_v28  ;;  %7249 = vmatprep.subr.bf16.mxu1 %v7979_v32  ;;  %v8024_v28 = vld [vmem:[%s8378_s28 + $0x8d8] sm:$0xff]   ;;  %v8028_v32 = vld [vmem:[%s8378_s28 + $0x8e0] sm:$0xff]  }
  0xf9   : > { %7228 = vmatpush3.bf16.msra.mxu0 %v7978_v30  ;;  %5480 = vmatprep.mubr.bf16.mxu0 %v1488_v31  ;;  %v8026_v30 = vld [vmem:[%s8378_s28 + $0x860] sm:$0xff]  }
  0xfa   : > { %5441 = vmatmul.mubr.bf16.vlgmr.msra.gmra.mrb[24].mxu1 %v1489_v34  ;;  %7229 = vmatprep.subr.bf16.mxu0 %v7981_v35  ;;  %v8027_v31 = vld [vmem:[%s8378_s28 + $0x820] sm:$0xff]   ;;  %v8030_v34 = vld [vmem:[%s8378_s28 + $0x868] sm:$0xff]  }
  0xfb   : > { %7250 = vmatpush3.bf16.msra.mxu1 %v7980_v33  ;;  %5520 = vmatprep.mubr.bf16.mxu1 %v1492_v37  ;;  %v8029_v33 = vld [vmem:[%s8378_s28 + $0x8a0] sm:$0xff]   ;;  %v8031_v35 = vld [vmem:[%s8378_s28 + $0x828] sm:$0xff]  }
  0xfc   : > { %7251 = vmatprep.subr.bf16.mxu1 %v7983_v38  ;;  %v8033_v37 = vld [vmem:[%s8378_s28 + $0x8a8] sm:$0xff]   ;;  %v8034_v38 = vld [vmem:[%s8378_s28 + $0x870] sm:$0xff]  }
  0xfd   : > { %7230 = vmatpush3.bf16.msra.mxu0 %v7982_v36  ;;  %v8032_v36 = vld [vmem:[%s8378_s28 + $0x8e8] sm:$0xff]  }
  0xfe   : > { %7231 = vmatprep.subr.bf16.mxu0 %v7985_v40 }
  0xff   : > { %7252 = vmatpush3.bf16.msra.mxu1 %v7984_v39  ;;  %v243_v39 = vld [vmem:[%s8373_s24 + $0x20] sm:$0xff] }
 0x100   : > { %7253 = vmatprep.subr.bf16.mxu1 %v7987_v43  ;;  %v1500_v43 = vrot.slane %v243_v39, %v8416_v42 }
 0x101   : > { %7232 = vmatpush3.bf16.msra.mxu0 %v7986_v41  ;;  %v8035_v41 = vld [vmem:[%s8378_s28 + $0x830] sm:$0xff]  }
 0x102   : > { %7233 = vmatprep.subr.bf16.mxu0 %v7989_v45 }
 0x103   : > { %7254 = vmatpush3.bf16.msra.mxu1 %v7988_v44  ;;  %v1493_v44 = vcombine.high %v243_v39, %v243_v39  ;;  %v8069_v39 = vld [vmem:[%s8378_s28 + $0x9b0] sm:$0xff]  }
 0x104   : > { %7255 = vmatprep.subr.bf16.mxu1 %v7991_v47 }
 0x105   : > { %7234 = vmatpush3.bf16.msra.mxu0 %v7990_v46  ;;  %v8036_v46 = vld [vmem:[%s8378_s28 + $0x8f0] sm:$0xff]  }
 0x106   : > { %7235 = vmatprep.subr.bf16.mxu0 %v7993_v49 }
 0x107   : > { %7256 = vmatpush3.bf16.msra.mxu1 %v7992_v48 }
 0x108   : > { %7257 = vmatprep.subr.bf16.mxu1 %v7995_v51  ;;  %v8719_v51 = vrot.slane %v1493_v44, %v8416_v42 }
 0x109   : > { %7236 = vmatpush3.bf16.msra.mxu0 %v7994_v50  ;;  %v1508_v50 = vcombine.high %v1500_v43, %v1500_v43 }
 0x10a   : > { %7237 = vmatprep.subr.bf16.mxu0 %v7997_v53 }
 0x10b   : > { %v6935_v58 = vpop.f32.mrb[0].mxu0  ;;  %7258 = vmatpush3.bf16.msra.mxu1 %v7996_v52 }
 0x10c   : > { %v6936_v60 = vpop.f32.mrb[1].mxu0  ;;  %7259 = vmatprep.subr.bf16.mxu1 %v7999_v55  ;;  %v6957_v62 = vpop.f32.mrb[0].mxu1  ;;  %v8038_v55 = vld [vmem:[%s8378_s28 + $0x878] sm:$0xff]  }
 0x10d   : > { %v6937_v63 = vadd.f32 %v6936_v60, %v6935_v58  ;;  %v6938_v0 = vpop.f32.mrb[2].mxu0  ;;  %7238 = vmatpush3.bf16.msra.mxu0 %v7998_v54  ;;  %v6958_v3 = vpop.f32.mrb[1].mxu1  ;;  %v8037_v54 = vld [vmem:[%s8378_s28 + $0x8b0] sm:$0xff]   ;;  %v8039_v58 = vld [vmem:[%s8378_s28 + $0x838] sm:$0xff]  }
 0x10e   : > { %v6939_v4 = vpop.f32.mrb[3].mxu0  ;;  %7239 = vmatprep.subr.bf16.mxu0 %v8001_v57  ;;  %v6959_v5 = vadd.f32 %v6958_v3, %v6957_v62  ;;  %v6960_v7 = vpop.f32.mrb[2].mxu1  ;;  %v8040_v60 = vld [vmem:[%s8378_s28 + $0x8f8] sm:$0xff]   ;;  %v1509_v62 = vcombine.high %v8719_v51, %v8719_v51  ;;  %v1516_v3 = vrot.slane %v1500_v43, %v8416_v42 }
 0x10f   : > { %7260 = vmatpush3.bf16.msra.mxu1 %v8000_v56  ;;  %v6961_v9 = vpop.f32.mrb[3].mxu1  ;;  %v8041_v0 = vld [vmem:[%s8378_s28 + $0x8b8] sm:$0xff]   ;;  %v8042_v4 = vld [vmem:[%s8378_s28 + $0x940] sm:$0xff]  }
 0x110   : > { %7261 = vmatprep.subr.bf16.mxu1 %v8003_v61  ;;  %v8684_v10 = vadd.f32 %v6959_v5, %v6937_v63  ;;  %v8043_v5 = vld [vmem:[%s8378_s28 + $0x900] sm:$0xff]   ;;  %v1538_v9 = vcombine.high %v1516_v3, %v1516_v3 }
 0x111   : > { %7240 = vmatpush3.bf16.msra.mxu0 %v8002_v59  ;;  %v1530_v59 = vrot.slane %v1508_v50, %v8416_v42  ;;  %v8044_v7 = vld [vmem:[%s8378_s28 + $0x9c0] sm:$0xff]  }
 0x112   : > { %7241 = vmatprep.subr.bf16.mxu0 %v8005_v2 }
 0x113   : > { %7262 = vmatpush3.bf16.msra.mxu1 %v8004_v1  ;;  %v1540_v1 = vcombine.high %v1530_v59, %v1530_v59 }
 0x114   : > { %7263 = vmatprep.subr.bf16.mxu1 %v8007_v8  ;;  %v8045_v8 = vld [vmem:[%s8378_s28 + $0x980] sm:$0xff]  }
 0x115   : > { %7242 = vmatpush3.bf16.msra.mxu0 %v8006_v6  ;;  %v1537_v6 = vrot.slane %v1509_v62, %v8416_v42  ;;  %v8083_v62 = vld [vmem:[%s8378_s28 + $0xa50] sm:$0xff]  }
 0x116   : > { %7271 = vmatprep.subr.bf16.mxu0 %v8010_v13  ;;  %v8048_v13 = vld [vmem:[%s8378_s28 + $0x9c8] sm:$0xff]  }
 0x117   : > { %7264 = vmatpush3.bf16.msra.mxu1 %v8009_v11  ;;  %v8047_v11 = vld [vmem:[%s8378_s28 + $0x908] sm:$0xff]  }
 0x118   : > { %5481 = vmatmul.mubr.bf16.vlgmr.msra.gmra.mrb[28].mxu0 %v1474_v12  ;;  %7293 = vmatprep.subr.bf16.mxu1 %v8012_v15  ;;  %v1541_v12 = vcombine.high %v1537_v6, %v1537_v6  ;;  %v8050_v15 = vld [vmem:[%s8378_s28 + $0x950] sm:$0xff]  }
 0x119   : > { %7272 = vmatpush3.bf16.msra.mxu0 %v8011_v14  ;;  %5560 = vmatprep.mubr.bf16.mxu0 %v1530_v59  ;;  %v8049_v14 = vld [vmem:[%s8378_s28 + $0x988] sm:$0xff]  }
 0x11a   : > { %5521 = vmatmul.mubr.bf16.vlgmr.msra.gmra.mrb[28].mxu1 %v1490_v17  ;;  %7273 = vmatprep.subr.bf16.mxu0 %v8014_v18  ;;  %v8052_v17 = vld [vmem:[%s8378_s28 + $0x9d0] sm:$0xff]   ;;  %v8079_v59 = vld [vmem:[%s8378_s28 + $0xa48] sm:$0xff]  }
 0x11b   : > { %7294 = vmatpush3.bf16.msra.mxu1 %v8013_v16  ;;  %5600 = vmatprep.mubr.bf16.mxu1 %v1540_v1  ;;  %v8051_v16 = vld [vmem:[%s8378_s28 + $0x910] sm:$0xff]  }
 0x11c   : > { %7295 = vmatprep.subr.bf16.mxu1 %v8016_v20  ;;  %v8053_v18 = vld [vmem:[%s8378_s28 + $0x990] sm:$0xff]   ;;  %v8055_v20 = vld [vmem:[%s8378_s28 + $0x918] sm:$0xff]  }
 0x11d   : > { %7274 = vmatpush3.bf16.msra.mxu0 %v8015_v19  ;;  %v8054_v19 = vld [vmem:[%s8378_s28 + $0x958] sm:$0xff]   ;;  %v8086_v1 = vld [vmem:[%s8378_s28 + $0xa90] sm:$0xff]  }
 0x11e   : > { %7275 = vmatprep.subr.bf16.mxu0 %v8018_v22  ;;  %v8057_v22 = vld [vmem:[%s8378_s28 + $0x998] sm:$0xff]  }
 0x11f   : > { %7296 = vmatpush3.bf16.msra.mxu1 %v8017_v21  ;;  %v8056_v21 = vld [vmem:[%s8378_s28 + $0x9d8] sm:$0xff]  }
 0x120   : > { %7297 = vmatprep.subr.bf16.mxu1 %v8020_v24  ;;  %v8059_v24 = vld [vmem:[%s8378_s28 + $0x920] sm:$0xff]  }
 0x121   : > { %7276 = vmatpush3.bf16.msra.mxu0 %v8019_v23  ;;  %v8058_v23 = vld [vmem:[%s8378_s28 + $0x960] sm:$0xff]  }
 0x122   : > { %7277 = vmatprep.subr.bf16.mxu0 %v8022_v26  ;;  %v8061_v26 = vld [vmem:[%s8378_s28 + $0x9a0] sm:$0xff]  }
 0x123   : > { %7298 = vmatpush3.bf16.msra.mxu1 %v8021_v25  ;;  %v8060_v25 = vld [vmem:[%s8378_s28 + $0x9e0] sm:$0xff]  }
 0x124   : > { %7299 = vmatprep.subr.bf16.mxu1 %v8024_v28  ;;  %v8063_v28 = vld [vmem:[%s8378_s28 + $0x928] sm:$0xff]  }
 0x125   : > { %7278 = vmatpush3.bf16.msra.mxu0 %v8023_v27  ;;  %v8062_v27 = vld [vmem:[%s8378_s28 + $0x968] sm:$0xff]  }
 0x126   : > { %7279 = vmatprep.subr.bf16.mxu0 %v8026_v30  ;;  %v8065_v30 = vld [vmem:[%s8378_s28 + $0x9a8] sm:$0xff]  }
 0x127   : > { %7300 = vmatpush3.bf16.msra.mxu1 %v8025_v29  ;;  %v8064_v29 = vld [vmem:[%s8378_s28 + $0x9e8] sm:$0xff]  }
 0x128   : > { %7301 = vmatprep.subr.bf16.mxu1 %v8028_v32 }
 0x129   : > { %7280 = vmatpush3.bf16.msra.mxu0 %v8027_v31  ;;  %v8066_v31 = vld [vmem:[%s8378_s28 + $0x970] sm:$0xff]  }
 0x12a   : > { %7281 = vmatprep.subr.bf16.mxu0 %v8030_v34 }
 0x12b   : > { %v6979_v40 = vpop.f32.mrb[4].mxu0  ;;  %7302 = vmatpush3.bf16.msra.mxu1 %v8029_v33  ;;  %v8067_v33 = vld [vmem:[%s8378_s28 + $0x930] sm:$0xff]  }
 0x12c   : > { %v6980_v45 = vpop.f32.mrb[5].mxu0  ;;  %7303 = vmatprep.subr.bf16.mxu1 %v8032_v36  ;;  %v7001_v49 = vpop.f32.mrb[4].mxu1 }
 0x12d   : > { %v6981_v47 = vadd.f32 %v6980_v45, %v6979_v40  ;;  %v6982_v48 = vpop.f32.mrb[6].mxu0  ;;  %7282 = vmatpush3.bf16.msra.mxu0 %v8031_v35  ;;  %v7002_v53 = vpop.f32.mrb[5].mxu1  ;;  %v8068_v35 = vld [vmem:[%s8378_s28 + $0x9f0] sm:$0xff]   ;;  %v8070_v40 = vld [vmem:[%s8378_s28 + $0x978] sm:$0xff]  }
 0x12e   : > { %v6983_v52 = vpop.f32.mrb[7].mxu0  ;;  %7283 = vmatprep.subr.bf16.mxu0 %v8034_v38  ;;  %v7003_v57 = vadd.f32 %v7002_v53, %v7001_v49  ;;  %v7004_v61 = vpop.f32.mrb[6].mxu1  ;;  %v8072_v48 = vld [vmem:[%s8378_s28 + $0x9f8] sm:$0xff]   ;;  %v1523_v53 = vrot.slane %v8719_v51, %v8416_v42  ;;  %v8081_v51 = vld [vmem:[%s8378_s28 + $0xac8] sm:$0xff]  }
 0x12f   : > { %v5003_v56 = vadd.f32 %v6981_v47, %v8684_v10  ;;  %7304 = vmatpush3.bf16.msra.mxu1 %v8033_v37  ;;  %v7005_v2 = vpop.f32.mrb[7].mxu1  ;;  %v8046_v10 = vld [vmem:[%s8378_s28 + $0x948] sm:$0xff]   ;;  %v8074_v52 = vld [vmem:[%s8378_s28 + $0x9b8] sm:$0xff]  }
 0x130   : > { %7305 = vmatprep.subr.bf16.mxu1 %v8036_v46  ;;  %v8071_v46 = vld [vmem:[%s8378_s28 + $0x938] sm:$0xff]   ;;  %v8082_v61 = vld [vmem:[%s8378_s28 + $0xa88] sm:$0xff]  }
 0x131   : > { %v8729_v63 = vadd.f32 %v7003_v57, %v5003_v56  ;;  %7284 = vmatpush3.bf16.msra.mxu0 %v8035_v41  ;;  %v8077_v56 = vld [vmem:[%s8378_s28 + $0xac0] sm:$0xff]   ;;  %v8087_v2 = vld [vmem:[%s8378_s28 + $0xa58] sm:$0xff]  }
 0x132   : > { %7285 = vmatprep.subr.bf16.mxu0 %v8038_v55  ;;  %v8076_v55 = vld [vmem:[%s8378_s28 + $0xa00] sm:$0xff]  }
 0x133   : > { %7306 = vmatpush3.bf16.msra.mxu1 %v8037_v54  ;;  %v8075_v54 = vld [vmem:[%s8378_s28 + $0xa40] sm:$0xff]  }
 0x134   : > { %7307 = vmatprep.subr.bf16.mxu1 %v8040_v60  ;;  %v8078_v57 = vld [vmem:[%s8378_s28 + $0xa80] sm:$0xff]   ;;  %v8080_v60 = vld [vmem:[%s8378_s28 + $0xa08] sm:$0xff]  }
 0x135   : > { %7286 = vmatpush3.bf16.msra.mxu0 %v8039_v58  ;;  %v1539_v58 = vcombine.high %v1523_v53, %v1523_v53 }
 0x136   : > { %7315 = vmatprep.subr.bf16.mxu0 %v8042_v4  ;;  %v8089_v4 = vld [vmem:[%s8378_s28 + $0xad8] sm:$0xff]  }
 0x137   : > { %7308 = vmatpush3.bf16.msra.mxu1 %v8041_v0  ;;  %v8085_v0 = vld [vmem:[%s8378_s28 + $0xad0] sm:$0xff]  }
 0x138   : > { %5561 = vmatmul.mubr.bf16.vlgmr.msra.gmra.mrb[32].mxu0 %v1516_v3  ;;  %7337 = vmatprep.subr.bf16.mxu1 %v8044_v7  ;;  %v8088_v3 = vld [vmem:[%s8378_s28 + $0xa18] sm:$0xff]   ;;  %v8092_v7 = vld [vmem:[%s8378_s28 + $0xa20] sm:$0xff]  }
 0x139   : > { %7316 = vmatpush3.bf16.msra.mxu0 %v8043_v5  ;;  %5640 = vmatprep.mubr.bf16.mxu0 %v1537_v6  ;;  %v8090_v5 = vld [vmem:[%s8378_s28 + $0xa98] sm:$0xff]   ;;  %v8091_v6 = vld [vmem:[%s8378_s28 + $0xa60] sm:$0xff]  }
 0x13a   : > { %5601 = vmatmul.mubr.bf16.vlgmr.msra.gmra.mrb[32].mxu1 %v1538_v9  ;;  %7317 = vmatprep.subr.bf16.mxu0 %v8046_v10  ;;  %v8094_v9 = vld [vmem:[%s8378_s28 + $0xaa0] sm:$0xff]   ;;  %v8095_v10 = vld [vmem:[%s8378_s28 + $0xa68] sm:$0xff]  }
 0x13b   : > { %7338 = vmatpush3.bf16.msra.mxu1 %v8045_v8  ;;  %5680 = vmatprep.mubr.bf16.mxu1 %v1541_v12  ;;  %v8093_v8 = vld [vmem:[%s8378_s28 + $0xae0] sm:$0xff]   ;;  %v8097_v12 = vld [vmem:[%s8378_s28 + $0xae8] sm:$0xff]  }
 0x13c   : > { %7339 = vmatprep.subr.bf16.mxu1 %v8048_v13  ;;  %v8098_v13 = vld [vmem:[%s8378_s28 + $0xaa8] sm:$0xff]  }
 0x13d   : > { %7318 = vmatpush3.bf16.msra.mxu0 %v8047_v11  ;;  %v8096_v11 = vld [vmem:[%s8378_s28 + $0xa28] sm:$0xff]  }
 0x13e   : > { %7319 = vmatprep.subr.bf16.mxu0 %v8050_v15 }
 0x13f   : > { %7340 = vmatpush3.bf16.msra.mxu1 %v8049_v14  ;;  %v8099_v14 = vld [vmem:[%s8378_s28 + $0xa70] sm:$0xff]  }
 0x140   : > { %7341 = vmatprep.subr.bf16.mxu1 %v8052_v17  ;;  %v244_v17 = vld [vmem:[%s8373_s24 + $0x28] sm:$0xff] }
 0x141   : > { %7320 = vmatpush3.bf16.msra.mxu0 %v8051_v16  ;;  %v8100_v16 = vld [vmem:[%s8378_s28 + $0xa30] sm:$0xff]  }
 0x142   : > { %7321 = vmatprep.subr.bf16.mxu0 %v8054_v19  ;;  %v8101_v19 = vld [vmem:[%s8378_s28 + $0xaf0] sm:$0xff]  }
 0x143   : > { %7342 = vmatpush3.bf16.msra.mxu1 %v8053_v18 }
 0x144   : > { %7343 = vmatprep.subr.bf16.mxu1 %v8056_v21  ;;  %v1542_v21 = vcombine.high %v244_v17, %v244_v17 }
 0x145   : > { %7322 = vmatpush3.bf16.msra.mxu0 %v8055_v20  ;;  %v1549_v20 = vrot.slane %v244_v17, %v8416_v42 }
 0x146   : > { %7323 = vmatprep.subr.bf16.mxu0 %v8058_v23 }
 0x147   : > { %7344 = vmatpush3.bf16.msra.mxu1 %v8057_v22 }
 0x148   : > { %7345 = vmatprep.subr.bf16.mxu1 %v8060_v25 }
 0x149   : > { %7324 = vmatpush3.bf16.msra.mxu0 %v8059_v24 }
 0x14a   : > { %7325 = vmatprep.subr.bf16.mxu0 %v8062_v27  ;;  %v8102_v27 = vld [vmem:[%s8378_s28 + $0xab0] sm:$0xff]  }
 0x14b   : > { %v7023_v32 = vpop.f32.mrb[8].mxu0  ;;  %7346 = vmatpush3.bf16.msra.mxu1 %v8061_v26 }
 0x14c   : > { %v7024_v34 = vpop.f32.mrb[9].mxu0  ;;  %7347 = vmatprep.subr.bf16.mxu1 %v8064_v29  ;;  %v1557_v29 = vcombine.high %v1549_v20, %v1549_v20 }
 0x14d   : > { %v7025_v36 = vadd.f32 %v7024_v34, %v7023_v32  ;;  %v7026_v37 = vpop.f32.mrb[10].mxu0  ;;  %v7045_v38 = vpop.f32.mrb[8].mxu1  ;;  %7326 = vmatpush3.bf16.msra.mxu0 %v8063_v28  ;;  %v8103_v28 = vld [vmem:[%s8378_s28 + $0xa78] sm:$0xff]  }
 0x14e   : > { %v7027_v41 = vpop.f32.mrb[11].mxu0  ;;  %v7046_v43 = vpop.f32.mrb[9].mxu1  ;;  %7327 = vmatprep.subr.bf16.mxu0 %v8066_v31  ;;  %v8105_v34 = vld [vmem:[%s8378_s28 + $0xaf8] sm:$0xff]  }
 0x14f   : > { %v5083_v44 = vadd.f32 %v7025_v36, %v8729_v63  ;;  %v7047_v45 = vadd.f32 %v7046_v43, %v7045_v38  ;;  %7348 = vmatpush3.bf16.msra.mxu1 %v8065_v30  ;;  %v7048_v47 = vpop.f32.mrb[10].mxu1  ;;  %v8084_v63 = vld [vmem:[%s8378_s28 + $0xa10] sm:$0xff]   ;;  %v8803_v30 = vrot.slane %v1542_v21, %v8416_v42  ;;  %v1565_v41 = vrot.slane %v1549_v20, %v8416_v42  ;;  %v8107_v43 = vld [vmem:[%s8378_s28 + $0xb40] sm:$0xff]   ;;  %v8136_v21 = vld [vmem:[%s8378_s28 + $0xb38] sm:$0xff]  }
 0x150   : > { %7349 = vmatprep.subr.bf16.mxu1 %v8068_v35  ;;  %v7049_v49 = vpop.f32.mrb[11].mxu1  ;;  %v1579_v35 = vrot.slane %v1557_v29, %v8416_v42  ;;  %v8109_v47 = vld [vmem:[%s8378_s28 + $0xbc0] sm:$0xff]  }
 0x151   : > { %v8766_v50 = vadd.f32 %v7047_v45, %v5083_v44  ;;  %7328 = vmatpush3.bf16.msra.mxu0 %v8067_v33  ;;  %v8104_v33 = vld [vmem:[%s8378_s28 + $0xa38] sm:$0xff]   ;;  %v1558_v37 = vcombine.high %v8803_v30, %v8803_v30  ;;  %v8108_v45 = vld [vmem:[%s8378_s28 + $0xb00] sm:$0xff]   ;;  %v1587_v49 = vcombine.high %v1565_v41, %v1565_v41 }
 0x152   : > { %7329 = vmatprep.subr.bf16.mxu0 %v8070_v40  ;;  %v1589_v44 = vcombine.high %v1579_v35, %v1579_v35  ;;  %v8141_v29 = vld [vmem:[%s8378_s28 + $0xc00] sm:$0xff]  }
 0x153   : > { %7350 = vmatpush3.bf16.msra.mxu1 %v8069_v39  ;;  %v8106_v39 = vld [vmem:[%s8378_s28 + $0xab8] sm:$0xff]  }
 0x154   : > { %7351 = vmatprep.subr.bf16.mxu1 %v8072_v48  ;;  %v8110_v48 = vld [vmem:[%s8378_s28 + $0xb80] sm:$0xff]  }
 0x155   : > { %7330 = vmatpush3.bf16.msra.mxu0 %v8071_v46  ;;  %v1586_v46 = vrot.slane %v1558_v37, %v8416_v42  ;;  %v8148_v37 = vld [vmem:[%s8378_s28 + $0xc50] sm:$0xff]  }
 0x156   : > { %7359 = vmatprep.subr.bf16.mxu0 %v8075_v54  ;;  %v8113_v54 = vld [vmem:[%s8378_s28 + $0xbc8] sm:$0xff]  }
 0x157   : > { %7352 = vmatpush3.bf16.msra.mxu1 %v8074_v52  ;;  %v8112_v52 = vld [vmem:[%s8378_s28 + $0xb08] sm:$0xff]  }
 0x158   : > { %5641 = vmatmul.mubr.bf16.vlgmr.msra.gmra.mrb[36].mxu0 %v1523_v53  ;;  %7381 = vmatprep.subr.bf16.mxu1 %v8077_v56  ;;  %v1590_v53 = vcombine.high %v1586_v46, %v1586_v46  ;;  %v8115_v56 = vld [vmem:[%s8378_s28 + $0xb50] sm:$0xff]  }
 0x159   : > { %7360 = vmatpush3.bf16.msra.mxu0 %v8076_v55  ;;  %5720 = vmatprep.mubr.bf16.mxu0 %v1579_v35  ;;  %v8114_v55 = vld [vmem:[%s8378_s28 + $0xb88] sm:$0xff]  }
 0x15a   : > { %5681 = vmatmul.mubr.bf16.vlgmr.msra.gmra.mrb[36].mxu1 %v1539_v58  ;;  %7361 = vmatprep.subr.bf16.mxu0 %v8079_v59  ;;  %v8117_v58 = vld [vmem:[%s8378_s28 + $0xbd0] sm:$0xff]   ;;  %v8145_v35 = vld [vmem:[%s8378_s28 + $0xc08] sm:$0xff]  }
 0x15b   : > { %7382 = vmatpush3.bf16.msra.mxu1 %v8078_v57  ;;  %5760 = vmatprep.mubr.bf16.mxu1 %v1589_v44  ;;  %v8116_v57 = vld [vmem:[%s8378_s28 + $0xb10] sm:$0xff]   ;;  %v8154_v44 = vld [vmem:[%s8378_s28 + $0xcd8] sm:$0xff]  }
 0x15c   : > { %7383 = vmatprep.subr.bf16.mxu1 %v8081_v51  ;;  %v8118_v59 = vld [vmem:[%s8378_s28 + $0xb90] sm:$0xff]   ;;  %v8120_v51 = vld [vmem:[%s8378_s28 + $0xb18] sm:$0xff]  }
 0x15d   : > { %7362 = vmatpush3.bf16.msra.mxu0 %v8080_v60  ;;  %v8119_v60 = vld [vmem:[%s8378_s28 + $0xb58] sm:$0xff]  }
 0x15e   : > { %7363 = vmatprep.subr.bf16.mxu0 %v8083_v62  ;;  %v8122_v62 = vld [vmem:[%s8378_s28 + $0xb98] sm:$0xff]  }
 0x15f   : > { %7384 = vmatpush3.bf16.msra.mxu1 %v8082_v61  ;;  %v8121_v61 = vld [vmem:[%s8378_s28 + $0xbd8] sm:$0xff]  }
 0x160   : > { %7385 = vmatprep.subr.bf16.mxu1 %v8085_v0  ;;  %v8124_v0 = vld [vmem:[%s8378_s28 + $0xb20] sm:$0xff]  }
 0x161   : > { %7364 = vmatpush3.bf16.msra.mxu0 %v8084_v63  ;;  %v8123_v63 = vld [vmem:[%s8378_s28 + $0xb60] sm:$0xff]  }
 0x162   : > { %7365 = vmatprep.subr.bf16.mxu0 %v8087_v2  ;;  %v8126_v2 = vld [vmem:[%s8378_s28 + $0xba0] sm:$0xff]  }
 0x163   : > { %7386 = vmatpush3.bf16.msra.mxu1 %v8086_v1  ;;  %v8125_v1 = vld [vmem:[%s8378_s28 + $0xbe0] sm:$0xff]  }
 0x164   : > { %7387 = vmatprep.subr.bf16.mxu1 %v8089_v4  ;;  %v8128_v4 = vld [vmem:[%s8378_s28 + $0xb28] sm:$0xff]  }
 0x165   : > { %7366 = vmatpush3.bf16.msra.mxu0 %v8088_v3  ;;  %v8127_v3 = vld [vmem:[%s8378_s28 + $0xb68] sm:$0xff]  }
 0x166   : > { %7367 = vmatprep.subr.bf16.mxu0 %v8091_v6  ;;  %v8130_v6 = vld [vmem:[%s8378_s28 + $0xba8] sm:$0xff]  }
 0x167   : > { %7388 = vmatpush3.bf16.msra.mxu1 %v8090_v5  ;;  %v8129_v5 = vld [vmem:[%s8378_s28 + $0xbe8] sm:$0xff]  }
 0x168   : > { %7389 = vmatprep.subr.bf16.mxu1 %v8093_v8 }
 0x169   : > { %7368 = vmatpush3.bf16.msra.mxu0 %v8092_v7  ;;  %v8131_v7 = vld [vmem:[%s8378_s28 + $0xb70] sm:$0xff]  }
 0x16a   : > { %7369 = vmatprep.subr.bf16.mxu0 %v8095_v10 }
 0x16b   : > { %v7067_v15 = vpop.f32.mrb[12].mxu0  ;;  %7390 = vmatpush3.bf16.msra.mxu1 %v8094_v9  ;;  %v8132_v9 = vld [vmem:[%s8378_s28 + $0xb30] sm:$0xff]  }
 0x16c   : > { %v7068_v18 = vpop.f32.mrb[13].mxu0  ;;  %7391 = vmatprep.subr.bf16.mxu1 %v8097_v12 }
 0x16d   : > { %v7069_v22 = vadd.f32 %v7068_v18, %v7067_v15  ;;  %v7070_v23 = vpop.f32.mrb[14].mxu0  ;;  %v7089_v24 = vpop.f32.mrb[12].mxu1  ;;  %7370 = vmatpush3.bf16.msra.mxu0 %v8096_v11  ;;  %v8133_v11 = vld [vmem:[%s8378_s28 + $0xbf0] sm:$0xff]  }
 0x16e   : > { %v7071_v25 = vpop.f32.mrb[15].mxu0  ;;  %v7090_v26 = vpop.f32.mrb[13].mxu1  ;;  %7371 = vmatprep.subr.bf16.mxu0 %v8099_v14  ;;  %v8134_v15 = vld [vmem:[%s8378_s28 + $0xbb0] sm:$0xff]   ;;  %v8137_v23 = vld [vmem:[%s8378_s28 + $0xbf8] sm:$0xff]  }
 0x16f   : > { %v5163_v31 = vadd.f32 %v7069_v22, %v8766_v50  ;;  %v7091_v32 = vadd.f32 %v7090_v26, %v7089_v24  ;;  %7392 = vmatpush3.bf16.msra.mxu1 %v8098_v13  ;;  %v7092_v36 = vpop.f32.mrb[14].mxu1  ;;  %v8111_v50 = vld [vmem:[%s8378_s28 + $0xb48] sm:$0xff]   ;;  %v8139_v26 = vld [vmem:[%s8378_s28 + $0xbb8] sm:$0xff]  }
 0x170   : > { %7393 = vmatprep.subr.bf16.mxu1 %v8101_v19  ;;  %v7093_v40 = vpop.f32.mrb[15].mxu1  ;;  %v8147_v36 = vld [vmem:[%s8378_s28 + $0xc88] sm:$0xff]  }
 0x171   : > { %v8811_v38 = vadd.f32 %v7091_v32, %v5163_v31  ;;  %7372 = vmatpush3.bf16.msra.mxu0 %v8100_v16  ;;  %v8135_v16 = vld [vmem:[%s8378_s28 + $0xb78] sm:$0xff]   ;;  %v8142_v31 = vld [vmem:[%s8378_s28 + $0xcc0] sm:$0xff]   ;;  %v8151_v40 = vld [vmem:[%s8378_s28 + $0xc90] sm:$0xff]  }
 0x172   : > { %7373 = vmatprep.subr.bf16.mxu0 %v8103_v28  ;;  %v8140_v28 = vld [vmem:[%s8378_s28 + $0xc40] sm:$0xff]  }
 0x173   : > { %7394 = vmatpush3.bf16.msra.mxu1 %v8102_v27  ;;  %v1572_v27 = vrot.slane %v8803_v30, %v8416_v42  ;;  %v8143_v32 = vld [vmem:[%s8378_s28 + $0xc80] sm:$0xff]   ;;  %v8146_v30 = vld [vmem:[%s8378_s28 + $0xcc8] sm:$0xff]  }
 0x174   : > { %7395 = vmatprep.subr.bf16.mxu1 %v8105_v34  ;;  %v8144_v34 = vld [vmem:[%s8378_s28 + $0xc48] sm:$0xff]  }
 0x175   : > { %7374 = vmatpush3.bf16.msra.mxu0 %v8104_v33  ;;  %v1588_v33 = vcombine.high %v1572_v27, %v1572_v27 }
 0x176   : > { %7403 = vmatprep.subr.bf16.mxu0 %v8107_v43  ;;  %v8153_v43 = vld [vmem:[%s8378_s28 + $0xc18] sm:$0xff]  }
 0x177   : > { %7396 = vmatpush3.bf16.msra.mxu1 %v8106_v39  ;;  %v8150_v39 = vld [vmem:[%s8378_s28 + $0xcd0] sm:$0xff]  }
 0x178   : > { %5721 = vmatmul.mubr.bf16.vlgmr.msra.gmra.mrb[40].mxu0 %v1565_v41  ;;  %7425 = vmatprep.subr.bf16.mxu1 %v8109_v47  ;;  %v8152_v41 = vld [vmem:[%s8378_s28 + $0xc58] sm:$0xff]   ;;  %v8157_v47 = vld [vmem:[%s8378_s28 + $0xc20] sm:$0xff]  }
 0x179   : > { %7404 = vmatpush3.bf16.msra.mxu0 %v8108_v45  ;;  %5800 = vmatprep.mubr.bf16.mxu0 %v1586_v46  ;;  %v8155_v45 = vld [vmem:[%s8378_s28 + $0xc98] sm:$0xff]   ;;  %v8156_v46 = vld [vmem:[%s8378_s28 + $0xc60] sm:$0xff]  }
 0x17a   : > { %5761 = vmatmul.mubr.bf16.vlgmr.msra.gmra.mrb[40].mxu1 %v1587_v49  ;;  %7405 = vmatprep.subr.bf16.mxu0 %v8111_v50  ;;  %v8159_v49 = vld [vmem:[%s8378_s28 + $0xca0] sm:$0xff]   ;;  %v8160_v50 = vld [vmem:[%s8378_s28 + $0xc68] sm:$0xff]  }
 0x17b   : > { %7426 = vmatpush3.bf16.msra.mxu1 %v8110_v48  ;;  %5840 = vmatprep.mubr.bf16.mxu1 %v1590_v53  ;;  %v8158_v48 = vld [vmem:[%s8378_s28 + $0xce0] sm:$0xff]   ;;  %v8162_v53 = vld [vmem:[%s8378_s28 + $0xce8] sm:$0xff]  }
 0x17c   : > { %7427 = vmatprep.subr.bf16.mxu1 %v8113_v54  ;;  %v8163_v54 = vld [vmem:[%s8378_s28 + $0xca8] sm:$0xff]  }
 0x17d   : > { %7406 = vmatpush3.bf16.msra.mxu0 %v8112_v52  ;;  %v8161_v52 = vld [vmem:[%s8378_s28 + $0xc28] sm:$0xff]  }
 0x17e   : > { %7407 = vmatprep.subr.bf16.mxu0 %v8115_v56 }
 0x17f   : > { %7428 = vmatpush3.bf16.msra.mxu1 %v8114_v55  ;;  %v8164_v55 = vld [vmem:[%s8378_s28 + $0xc70] sm:$0xff]  }
 0x180   : > { %7429 = vmatprep.subr.bf16.mxu1 %v8117_v58 }
 0x181   : > { %7408 = vmatpush3.bf16.msra.mxu0 %v8116_v57  ;;  %v8165_v57 = vld [vmem:[%s8378_s28 + $0xc30] sm:$0xff]  }
 0x182   : > { %7409 = vmatprep.subr.bf16.mxu0 %v8119_v60  ;;  %v245_v60 = vld [vmem:[%s8373_s24 + $0x30] sm:$0xff] }
 0x183   : > { %7430 = vmatpush3.bf16.msra.mxu1 %v8118_v59  ;;  %v8166_v59 = vld [vmem:[%s8378_s28 + $0xcf0] sm:$0xff]  }
 0x184   : > { %7431 = vmatprep.subr.bf16.mxu1 %v8121_v61 }
 0x185   : > { %7410 = vmatpush3.bf16.msra.mxu0 %v8120_v51 }
 0x186   : > { %7411 = vmatprep.subr.bf16.mxu0 %v8123_v63  ;;  %v1598_v63 = vrot.slane %v245_v60, %v8416_v42 }
 0x187   : > { %7432 = vmatpush3.bf16.msra.mxu1 %v8122_v62 }
 0x188   : > { %7433 = vmatprep.subr.bf16.mxu1 %v8125_v1 }
 0x189   : > { %7412 = vmatpush3.bf16.msra.mxu0 %v8124_v0  ;;  %v1591_v0 = vcombine.high %v245_v60, %v245_v60 }
 0x18a   : > { %7413 = vmatprep.subr.bf16.mxu0 %v8127_v3  ;;  %v8167_v3 = vld [vmem:[%s8378_s28 + $0xcb0] sm:$0xff]  }
 0x18b   : > { %v7111_v8 = vpop.f32.mrb[16].mxu0  ;;  %7434 = vmatpush3.bf16.msra.mxu1 %v8126_v2 }
 0x18c   : > { %v7112_v10 = vpop.f32.mrb[17].mxu0  ;;  %7435 = vmatprep.subr.bf16.mxu1 %v8129_v5 }
 0x18d   : > { %v7113_v12 = vadd.f32 %v7112_v10, %v7111_v8  ;;  %v7114_v13 = vpop.f32.mrb[18].mxu0  ;;  %v7133_v14 = vpop.f32.mrb[16].mxu1  ;;  %7414 = vmatpush3.bf16.msra.mxu0 %v8128_v4  ;;  %v8168_v4 = vld [vmem:[%s8378_s28 + $0xc78] sm:$0xff]   ;;  %v1606_v8 = vcombine.high %v1598_v63, %v1598_v63 }
 0x18e   : > { %v7115_v17 = vpop.f32.mrb[19].mxu0  ;;  %v7134_v18 = vpop.f32.mrb[17].mxu1  ;;  %7415 = vmatprep.subr.bf16.mxu0 %v8131_v7  ;;  %v8169_v7 = vld [vmem:[%s8378_s28 + $0xc38] sm:$0xff]  }
 0x18f   : > { %v5243_v19 = vadd.f32 %v7113_v12, %v8811_v38  ;;  %v7135_v20 = vadd.f32 %v7134_v18, %v7133_v14  ;;  %7436 = vmatpush3.bf16.msra.mxu1 %v8130_v6  ;;  %v7136_v22 = vpop.f32.mrb[18].mxu1  ;;  %v8149_v38 = vld [vmem:[%s8378_s28 + $0xc10] sm:$0xff]   ;;  %v1628_v13 = vrot.slane %v1606_v8, %v8416_v42  ;;  %v8171_v14 = vld [vmem:[%s8378_s28 + $0xcb8] sm:$0xff]   ;;  %v8172_v17 = vld [vmem:[%s8378_s28 + $0xd40] sm:$0xff]  }
 0x190   : > { %7437 = vmatprep.subr.bf16.mxu1 %v8133_v11  ;;  %v7137_v24 = vpop.f32.mrb[19].mxu1  ;;  %v8888_v11 = vrot.slane %v1591_v0, %v8416_v42 }
 0x191   : > { %v8848_v25 = vadd.f32 %v7135_v20, %v5243_v19  ;;  %7416 = vmatpush3.bf16.msra.mxu0 %v8132_v9  ;;  %v8170_v9 = vld [vmem:[%s8378_s28 + $0xcf8] sm:$0xff]   ;;  %v1638_v19 = vcombine.high %v1628_v13, %v1628_v13  ;;  %v8173_v20 = vld [vmem:[%s8378_s28 + $0xd00] sm:$0xff]  }
 0x192   : > { %7417 = vmatprep.subr.bf16.mxu0 %v8135_v16  ;;  %v1614_v16 = vrot.slane %v1598_v63, %v8416_v42  ;;  %v1607_v18 = vcombine.high %v8888_v11, %v8888_v11  ;;  %v8202_v63 = vld [vmem:[%s8378_s28 + $0xdf8] sm:$0xff]  }
 0x193   : > { %7438 = vmatpush3.bf16.msra.mxu1 %v8134_v15 }
 0x194   : > { %7439 = vmatprep.subr.bf16.mxu1 %v8137_v23  ;;  %v1635_v22 = vrot.slane %v1607_v18, %v8416_v42  ;;  %v8175_v23 = vld [vmem:[%s8378_s28 + $0xd80] sm:$0xff]   ;;  %v1636_v24 = vcombine.high %v1614_v16, %v1614_v16  ;;  %v8218_v18 = vld [vmem:[%s8378_s28 + $0xe18] sm:$0xff]  }
 0x195   : > { %7418 = vmatpush3.bf16.msra.mxu0 %v8136_v21  ;;  %v8174_v21 = vld [vmem:[%s8378_s28 + $0xdc0] sm:$0xff]  }
 0x196   : > { %7447 = vmatprep.subr.bf16.mxu0 %v8140_v28  ;;  %v8178_v28 = vld [vmem:[%s8378_s28 + $0xdc8] sm:$0xff]  }
 0x197   : > { %7440 = vmatpush3.bf16.msra.mxu1 %v8139_v26  ;;  %v8177_v26 = vld [vmem:[%s8378_s28 + $0xd08] sm:$0xff]  }
 0x198   : > { %5801 = vmatmul.mubr.bf16.vlgmr.msra.gmra.mrb[44].mxu0 %v1572_v27  ;;  %7469 = vmatprep.subr.bf16.mxu1 %v8142_v31  ;;  %v1639_v27 = vcombine.high %v1635_v22, %v1635_v22  ;;  %v8180_v31 = vld [vmem:[%s8378_s28 + $0xd50] sm:$0xff]  }
 0x199   : > { %7448 = vmatpush3.bf16.msra.mxu0 %v8141_v29  ;;  %5880 = vmatprep.mubr.bf16.mxu0 %v1628_v13  ;;  %v8179_v29 = vld [vmem:[%s8378_s28 + $0xd88] sm:$0xff]   ;;  %v8213_v13 = vld [vmem:[%s8378_s28 + $0xe50] sm:$0xff]  }
 0x19a   : > { %5841 = vmatmul.mubr.bf16.vlgmr.msra.gmra.mrb[44].mxu1 %v1588_v33  ;;  %7449 = vmatprep.subr.bf16.mxu0 %v8144_v34  ;;  %v8182_v33 = vld [vmem:[%s8378_s28 + $0xdd0] sm:$0xff]  }
 0x19b   : > { %7470 = vmatpush3.bf16.msra.mxu1 %v8143_v32  ;;  %5920 = vmatprep.mubr.bf16.mxu1 %v1638_v19  ;;  %v8181_v32 = vld [vmem:[%s8378_s28 + $0xd10] sm:$0xff]   ;;  %v8219_v19 = vld [vmem:[%s8378_s28 + $0xed8] sm:$0xff]  }
 0x19c   : > { %7471 = vmatprep.subr.bf16.mxu1 %v8146_v30  ;;  %v8183_v34 = vld [vmem:[%s8378_s28 + $0xd90] sm:$0xff]   ;;  %v8185_v30 = vld [vmem:[%s8378_s28 + $0xd18] sm:$0xff]  }
 0x19d   : > { %7450 = vmatpush3.bf16.msra.mxu0 %v8145_v35  ;;  %v8184_v35 = vld [vmem:[%s8378_s28 + $0xd58] sm:$0xff]  }
 0x19e   : > { %7451 = vmatprep.subr.bf16.mxu0 %v8148_v37  ;;  %v8187_v37 = vld [vmem:[%s8378_s28 + $0xd98] sm:$0xff]  }
 0x19f   : > { %7472 = vmatpush3.bf16.msra.mxu1 %v8147_v36  ;;  %v8186_v36 = vld [vmem:[%s8378_s28 + $0xdd8] sm:$0xff]  }
 0x1a0   : > { %7473 = vmatprep.subr.bf16.mxu1 %v8150_v39  ;;  %v8189_v39 = vld [vmem:[%s8378_s28 + $0xd20] sm:$0xff]  }
 0x1a1   : > { %7452 = vmatpush3.bf16.msra.mxu0 %v8149_v38  ;;  %v8188_v38 = vld [vmem:[%s8378_s28 + $0xd60] sm:$0xff]  }
 0x1a2   : > { %7453 = vmatprep.subr.bf16.mxu0 %v8152_v41  ;;  %v8191_v41 = vld [vmem:[%s8378_s28 + $0xda0] sm:$0xff]  }
 0x1a3   : > { %7474 = vmatpush3.bf16.msra.mxu1 %v8151_v40  ;;  %v8190_v40 = vld [vmem:[%s8378_s28 + $0xde0] sm:$0xff]  }
 0x1a4   : > { %7475 = vmatprep.subr.bf16.mxu1 %v8154_v44  ;;  %v8193_v44 = vld [vmem:[%s8378_s28 + $0xd28] sm:$0xff]  }
 0x1a5   : > { %7454 = vmatpush3.bf16.msra.mxu0 %v8153_v43  ;;  %v8192_v43 = vld [vmem:[%s8378_s28 + $0xd68] sm:$0xff]  }
 0x1a6   : > { %7455 = vmatprep.subr.bf16.mxu0 %v8156_v46  ;;  %v8195_v46 = vld [vmem:[%s8378_s28 + $0xda8] sm:$0xff]  }
 0x1a7   : > { %7476 = vmatpush3.bf16.msra.mxu1 %v8155_v45  ;;  %v8194_v45 = vld [vmem:[%s8378_s28 + $0xde8] sm:$0xff]  }
 0x1a8   : > { %7477 = vmatprep.subr.bf16.mxu1 %v8158_v48 }
 0x1a9   : > { %7456 = vmatpush3.bf16.msra.mxu0 %v8157_v47  ;;  %v8196_v47 = vld [vmem:[%s8378_s28 + $0xd70] sm:$0xff]  }
 0x1aa   : > { %7457 = vmatprep.subr.bf16.mxu0 %v8160_v50 }
 0x1ab   : > { %v7155_v56 = vpop.f32.mrb[20].mxu0  ;;  %7478 = vmatpush3.bf16.msra.mxu1 %v8159_v49  ;;  %v8197_v49 = vld [vmem:[%s8378_s28 + $0xd30] sm:$0xff]  }
 0x1ac   : > { %v7156_v58 = vpop.f32.mrb[21].mxu0  ;;  %7479 = vmatprep.subr.bf16.mxu1 %v8162_v53 }
 0x1ad   : > { %v7157_v51 = vadd.f32 %v7156_v58, %v7155_v56  ;;  %v7158_v61 = vpop.f32.mrb[22].mxu0  ;;  %v7177_v62 = vpop.f32.mrb[20].mxu1  ;;  %7458 = vmatpush3.bf16.msra.mxu0 %v8161_v52  ;;  %v8198_v52 = vld [vmem:[%s8378_s28 + $0xdf0] sm:$0xff]  }
 0x1ae   : > { %v7159_v1 = vpop.f32.mrb[23].mxu0  ;;  %v7178_v2 = vpop.f32.mrb[21].mxu1  ;;  %7459 = vmatprep.subr.bf16.mxu0 %v8164_v55  ;;  %v8199_v56 = vld [vmem:[%s8378_s28 + $0xdb0] sm:$0xff]   ;;  %v8201_v61 = vld [vmem:[%s8378_s28 + $0xd38] sm:$0xff]  }
 0x1af   : > { %v5323_v5 = vadd.f32 %v7157_v51, %v8848_v25  ;;  %v7179_v6 = vadd.f32 %v7178_v2, %v7177_v62  ;;  %7480 = vmatpush3.bf16.msra.mxu1 %v8163_v54  ;;  %v7180_v10 = vpop.f32.mrb[22].mxu1  ;;  %v8176_v25 = vld [vmem:[%s8378_s28 + $0xd48] sm:$0xff]   ;;  %v8204_v2 = vld [vmem:[%s8378_s28 + $0xdb8] sm:$0xff]  }
 0x1b0   : > { %7481 = vmatprep.subr.bf16.mxu1 %v8166_v59  ;;  %v7181_v15 = vpop.f32.mrb[23].mxu1  ;;  %v8210_v10 = vld [vmem:[%s8378_s28 + $0xe08] sm:$0xff]  }
 0x1b1   : > { %v8890_v12 = vadd.f32 %v7179_v6, %v5323_v5  ;;  %7460 = vmatpush3.bf16.msra.mxu0 %v8165_v57  ;;  %v8200_v57 = vld [vmem:[%s8378_s28 + $0xd78] sm:$0xff]   ;;  %v8206_v5 = vld [vmem:[%s8378_s28 + $0xe00] sm:$0xff]   ;;  %v8215_v15 = vld [vmem:[%s8378_s28 + $0xed0] sm:$0xff]  }
 0x1b2   : > { %7461 = vmatprep.subr.bf16.mxu0 %v8168_v4  ;;  %v8205_v4 = vld [vmem:[%s8378_s28 + $0xe40] sm:$0xff]  }
 0x1b3   : > { %7482 = vmatpush3.bf16.msra.mxu1 %v8167_v3  ;;  %v1621_v3 = vrot.slane %v8888_v11, %v8416_v42  ;;  %v8207_v6 = vld [vmem:[%s8378_s28 + $0xec0] sm:$0xff]   ;;  %v8211_v11 = vld [vmem:[%s8378_s28 + $0xec8] sm:$0xff]  }
 0x1b4   : > { %7483 = vmatprep.subr.bf16.mxu1 %v8170_v9  ;;  %v8209_v9 = vld [vmem:[%s8378_s28 + $0xe48] sm:$0xff]  }
 0x1b5   : > { %7462 = vmatpush3.bf16.msra.mxu0 %v8169_v7  ;;  %v8208_v7 = vld [vmem:[%s8378_s28 + $0xe80] sm:$0xff]   ;;  %v1637_v8 = vcombine.high %v1621_v3, %v1621_v3 }
 0x1b6   : > { %7491 = vmatprep.subr.bf16.mxu0 %v8172_v17  ;;  %v8217_v17 = vld [vmem:[%s8378_s28 + $0xe58] sm:$0xff]  }
 0x1b7   : > { %7484 = vmatpush3.bf16.msra.mxu1 %v8171_v14  ;;  %v8214_v14 = vld [vmem:[%s8378_s28 + $0xe10] sm:$0xff]  }
 0x1b8   : > { %5881 = vmatmul.mubr.bf16.vlgmr.msra.gmra.mrb[48].mxu0 %v1614_v16  ;;  %7513 = vmatprep.subr.bf16.mxu1 %v8174_v21  ;;  %v8216_v16 = vld [vmem:[%s8378_s28 + $0xe90] sm:$0xff]   ;;  %v8221_v21 = vld [vmem:[%s8378_s28 + $0xe60] sm:$0xff]  }
 0x1b9   : > { %7492 = vmatpush3.bf16.msra.mxu0 %v8173_v20  ;;  %5960 = vmatprep.mubr.bf16.mxu0 %v1635_v22  ;;  %v8220_v20 = vld [vmem:[%s8378_s28 + $0xe98] sm:$0xff]   ;;  %v8222_v22 = vld [vmem:[%s8378_s28 + $0xe20] sm:$0xff]  }
 0x1ba   : > { %5921 = vmatmul.mubr.bf16.vlgmr.msra.gmra.mrb[48].mxu1 %v1636_v24  ;;  %7493 = vmatprep.subr.bf16.mxu0 %v8176_v25  ;;  %v8224_v24 = vld [vmem:[%s8378_s28 + $0xea0] sm:$0xff]   ;;  %v8225_v25 = vld [vmem:[%s8378_s28 + $0xe68] sm:$0xff]  }
 0x1bb   : > { %7514 = vmatpush3.bf16.msra.mxu1 %v8175_v23  ;;  %6000 = vmatprep.mubr.bf16.mxu1 %v1639_v27  ;;  %v8223_v23 = vld [vmem:[%s8378_s28 + $0xee0] sm:$0xff]   ;;  %v8227_v27 = vld [vmem:[%s8378_s28 + $0xee8] sm:$0xff]  }
 0x1bc   : > { %7515 = vmatprep.subr.bf16.mxu1 %v8178_v28  ;;  %v8228_v28 = vld [vmem:[%s8378_s28 + $0xea8] sm:$0xff]  }
 0x1bd   : > { %7494 = vmatpush3.bf16.msra.mxu0 %v8177_v26  ;;  %v8226_v26 = vld [vmem:[%s8378_s28 + $0xe28] sm:$0xff]  }
 0x1be   : > { %7495 = vmatprep.subr.bf16.mxu0 %v8180_v31 }
 0x1bf   : > { %7516 = vmatpush3.bf16.msra.mxu1 %v8179_v29  ;;  %v8229_v29 = vld [vmem:[%s8378_s28 + $0xe70] sm:$0xff]  }
 0x1c0   : > { %7517 = vmatprep.subr.bf16.mxu1 %v8182_v33 }
 0x1c1   : > { %7496 = vmatpush3.bf16.msra.mxu0 %v8181_v32  ;;  %v8230_v32 = vld [vmem:[%s8378_s28 + $0xe30] sm:$0xff]  }
 0x1c2   : > { %7497 = vmatprep.subr.bf16.mxu0 %v8184_v35 }
 0x1c3   : > { %7518 = vmatpush3.bf16.msra.mxu1 %v8183_v34  ;;  %v8231_v34 = vld [vmem:[%s8378_s28 + $0xef0] sm:$0xff]  }
 0x1c4   : > { %7519 = vmatprep.subr.bf16.mxu1 %v8186_v36 }
 0x1c5   : > { %7498 = vmatpush3.bf16.msra.mxu0 %v8185_v30 }
 0x1c6   : > { %7499 = vmatprep.subr.bf16.mxu0 %v8188_v38  ;;  %v246_v38 = vld [vmem:[%s8373_s24 + $0x38] sm:$0xff] }
 0x1c7   : > { %7520 = vmatpush3.bf16.msra.mxu1 %v8187_v37  ;;  %v8233_v37 = vld [vmem:[%s8378_s28 + $0xe78] sm:$0xff]  }
 0x1c8   : > { %7521 = vmatprep.subr.bf16.mxu1 %v8190_v40 }
 0x1c9   : > { %7500 = vmatpush3.bf16.msra.mxu0 %v8189_v39 }
 0x1ca   : > { %7501 = vmatprep.subr.bf16.mxu0 %v8192_v43  ;;  %v1640_v43 = vcombine.high %v246_v38, %v246_v38 }
 0x1cb   : > { %v7199_v48 = vpop.f32.mrb[24].mxu0  ;;  %7522 = vmatpush3.bf16.msra.mxu1 %v8191_v41  ;;  %v1647_v41 = vrot.slane %v246_v38, %v8416_v42 }
 0x1cc   : > { %v7200_v50 = vpop.f32.mrb[25].mxu0  ;;  %7523 = vmatprep.subr.bf16.mxu1 %v8194_v45 }
 0x1cd   : > { %v7201_v53 = vadd.f32 %v7200_v50, %v7199_v48  ;;  %v7202_v54 = vpop.f32.mrb[26].mxu0  ;;  %v7221_v55 = vpop.f32.mrb[24].mxu1  ;;  %7502 = vmatpush3.bf16.msra.mxu0 %v8193_v44  ;;  %v8235_v48 = vld [vmem:[%s8378_s28 + $0xef8] sm:$0xff]  }
 0x1ce   : > { %v7203_v58 = vpop.f32.mrb[27].mxu0  ;;  %v7222_v59 = vpop.f32.mrb[25].mxu1  ;;  %7503 = vmatprep.subr.bf16.mxu0 %v8196_v47  ;;  %v8234_v54 = vld [vmem:[%s8378_s28 + $0xe38] sm:$0xff]  }
 0x1cf   : > { %v5403_v60 = vadd.f32 %v7201_v53, %v8890_v12  ;;  %v7223_v51 = vadd.f32 %v7222_v59, %v7221_v55  ;;  %7524 = vmatpush3.bf16.msra.mxu1 %v8195_v46  ;;  %v7224_v62 = vpop.f32.mrb[26].mxu1  ;;  %v8212_v12 = vld [vmem:[%s8378_s28 + $0xe88] sm:$0xff]   ;;  %v8232_v46 = vld [vmem:[%s8378_s28 + $0xeb0] sm:$0xff]   ;;  %v8236_v59 = vld [vmem:[%s8378_s28 + $0xeb8] sm:$0xff]  }
 0x1d0   : > { %7525 = vmatprep.subr.bf16.mxu1 %v8198_v52  ;;  %v7225_v0 = vpop.f32.mrb[27].mxu1  ;;  %v8969_v52 = vrot.slane %v1640_v43, %v8416_v42  ;;  %v8238_v62 = vld [vmem:[%s8378_s28 + $0xf00] sm:$0xff]   ;;  %v8269_v43 = vld [vmem:[%s8378_s28 + $0xfb8] sm:$0xff]  }
 0x1d1   : > { %v8930_v1 = vadd.f32 %v7223_v51, %v5403_v60  ;;  %7504 = vmatpush3.bf16.msra.mxu0 %v8197_v49  ;;  %v1655_v49 = vcombine.high %v1647_v41, %v1647_v41  ;;  %v8239_v51 = vld [vmem:[%s8378_s28 + $0xfc0] sm:$0xff]   ;;  %v8241_v0 = vld [vmem:[%s8378_s28 + $0xf48] sm:$0xff]  }
 0x1d2   : > { %7505 = vmatprep.subr.bf16.mxu0 %v8200_v57  ;;  %v8237_v57 = vld [vmem:[%s8378_s28 + $0xf40] sm:$0xff]   ;;  %v1656_v58 = vcombine.high %v8969_v52, %v8969_v52 }
 0x1d3   : > { %7526 = vmatpush3.bf16.msra.mxu1 %v8199_v56  ;;  %v1677_v55 = vrot.slane %v1655_v49, %v8416_v42  ;;  %v1663_v56 = vrot.slane %v1647_v41, %v8416_v42  ;;  %v1670_v41 = vrot.slane %v8969_v52, %v8416_v42  ;;  %v8273_v49 = vld [vmem:[%s8378_s28 + $0x1018] sm:$0xff]   ;;  %v8275_v52 = vld [vmem:[%s8378_s28 + $0x1028] sm:$0xff]  }
 0x1d4   : > { %7527 = vmatprep.subr.bf16.mxu1 %v8202_v63 }
 0x1d5   : > { %7506 = vmatpush3.bf16.msra.mxu0 %v8201_v61  ;;  %v1687_v60 = vcombine.high %v1677_v55, %v1677_v55  ;;  %v1684_v61 = vrot.slane %v1656_v58, %v8416_v42  ;;  %v1685_v63 = vcombine.high %v1663_v56, %v1663_v56  ;;  %v8276_v58 = vld [vmem:[%s8378_s28 + $0x1030] sm:$0xff]  }
 0x1d6   : > { %7535 = vmatprep.subr.bf16.mxu0 %v8205_v4  ;;  %v8242_v4 = vld [vmem:[%s8378_s28 + $0xf08] sm:$0xff]  }
 0x1d7   : > { %7528 = vmatpush3.bf16.msra.mxu1 %v8204_v2  ;;  %v1688_v2 = vcombine.high %v1684_v61, %v1684_v61 }
 0x1d8   : > { %5961 = vmatmul.mubr.bf16.vlgmr.msra.gmra.mrb[52].mxu0 %v1621_v3  ;;  %7557 = vmatprep.subr.bf16.mxu1 %v8207_v6  ;;  %v8243_v3 = vld [vmem:[%s8378_s28 + $0xfc8] sm:$0xff]  }
 0x1d9   : > { %7536 = vmatpush3.bf16.msra.mxu0 %v8206_v5  ;;  %6040 = vmatprep.mubr.bf16.mxu0 %v1677_v55  ;;  %v8245_v5 = vld [vmem:[%s8378_s28 + $0xf50] sm:$0xff]   ;;  %v8244_v6 = vld [vmem:[%s8378_s28 + $0xf88] sm:$0xff]  }
 0x1da   : > { %6001 = vmatmul.mubr.bf16.vlgmr.msra.gmra.mrb[52].mxu1 %v1637_v8  ;;  %7537 = vmatprep.subr.bf16.mxu0 %v8209_v9  ;;  %v8246_v8 = vld [vmem:[%s8378_s28 + $0xf10] sm:$0xff]   ;;  %v8249_v9 = vld [vmem:[%s8378_s28 + $0xf58] sm:$0xff]  }
 0x1db   : > { %7558 = vmatpush3.bf16.msra.mxu1 %v8208_v7  ;;  %6080 = vmatprep.mubr.bf16.mxu1 %v1687_v60  ;;  %v8247_v7 = vld [vmem:[%s8378_s28 + $0xfd0] sm:$0xff]  }
 0x1dc   : > { %7559 = vmatprep.subr.bf16.mxu1 %v8211_v11  ;;  %v8251_v11 = vld [vmem:[%s8378_s28 + $0xfd8] sm:$0xff]  }
 0x1dd   : > { %7538 = vmatpush3.bf16.msra.mxu0 %v8210_v10  ;;  %v8248_v10 = vld [vmem:[%s8378_s28 + $0xf90] sm:$0xff]  }
 0x1de   : > { %7539 = vmatprep.subr.bf16.mxu0 %v8213_v13  ;;  %v8253_v13 = vld [vmem:[%s8378_s28 + $0xf60] sm:$0xff]  }
 0x1df   : > { %7560 = vmatpush3.bf16.msra.mxu1 %v8212_v12  ;;  %v8250_v12 = vld [vmem:[%s8378_s28 + $0xf18] sm:$0xff]  }
 0x1e0   : > { %7561 = vmatprep.subr.bf16.mxu1 %v8215_v15  ;;  %v8255_v15 = vld [vmem:[%s8378_s28 + $0xfe0] sm:$0xff]  }
 0x1e1   : > { %7540 = vmatpush3.bf16.msra.mxu0 %v8214_v14  ;;  %v8252_v14 = vld [vmem:[%s8378_s28 + $0xf98] sm:$0xff]  }
 0x1e2   : > { %7541 = vmatprep.subr.bf16.mxu0 %v8217_v17  ;;  %v8257_v17 = vld [vmem:[%s8378_s28 + $0xf68] sm:$0xff]  }
 0x1e3   : > { %7562 = vmatpush3.bf16.msra.mxu1 %v8216_v16  ;;  %v8254_v16 = vld [vmem:[%s8378_s28 + $0xf20] sm:$0xff]  }
 0x1e4   : > { %7563 = vmatprep.subr.bf16.mxu1 %v8219_v19  ;;  %v8259_v19 = vld [vmem:[%s8378_s28 + $0xfe8] sm:$0xff]  }
 0x1e5   : > { %7542 = vmatpush3.bf16.msra.mxu0 %v8218_v18  ;;  %v8256_v18 = vld [vmem:[%s8378_s28 + $0xfa0] sm:$0xff]  }
 0x1e6   : > { %7543 = vmatprep.subr.bf16.mxu0 %v8221_v21  ;;  %v8261_v21 = vld [vmem:[%s8378_s28 + $0xf70] sm:$0xff]  }
 0x1e7   : > { %7564 = vmatpush3.bf16.msra.mxu1 %v8220_v20  ;;  %v8258_v20 = vld [vmem:[%s8378_s28 + $0xf28] sm:$0xff]  }
 0x1e8   : > { %7565 = vmatprep.subr.bf16.mxu1 %v8223_v23  ;;  %v8260_v23 = vld [vmem:[%s8378_s28 + $0xfa8] sm:$0xff]  }
 0x1e9   : > { %7544 = vmatpush3.bf16.msra.mxu0 %v8222_v22 }
 0x1ea   : > { %7545 = vmatprep.subr.bf16.mxu0 %v8225_v25  ;;  %v8263_v25 = vld [vmem:[%s8378_s28 + $0xff0] sm:$0xff]  }
 0x1eb   : > { %v7243_v31 = vpop.f32.mrb[28].mxu0  ;;  %7566 = vmatpush3.bf16.msra.mxu1 %v8224_v24 }
 0x1ec   : > { %v7244_v33 = vpop.f32.mrb[29].mxu0  ;;  %7567 = vmatprep.subr.bf16.mxu1 %v8227_v27 }
 0x1ed   : > { %v7245_v35 = vadd.f32 %v7244_v33, %v7243_v31  ;;  %v7246_v30 = vpop.f32.mrb[30].mxu0  ;;  %v7265_v36 = vpop.f32.mrb[28].mxu1  ;;  %7546 = vmatpush3.bf16.msra.mxu0 %v8226_v26  ;;  %v8265_v31 = vld [vmem:[%s8378_s28 + $0xf78] sm:$0xff]  }
 0x1ee   : > { %v7247_v39 = vpop.f32.mrb[31].mxu0  ;;  %v7266_v40 = vpop.f32.mrb[29].mxu1  ;;  %7547 = vmatprep.subr.bf16.mxu0 %v8229_v29  ;;  %v8262_v29 = vld [vmem:[%s8378_s28 + $0xf30] sm:$0xff]  }
 0x1ef   : > { %v5483_v44 = vadd.f32 %v7245_v35, %v8930_v1  ;;  %v7267_v45 = vadd.f32 %v7266_v40, %v7265_v36  ;;  %7568 = vmatpush3.bf16.msra.mxu1 %v8228_v28  ;;  %v7268_v47 = vpop.f32.mrb[30].mxu1  ;;  %v8240_v1 = vld [vmem:[%s8378_s28 + $0xf80] sm:$0xff]   ;;  %v8264_v30 = vld [vmem:[%s8378_s28 + $0xfb0] sm:$0xff]   ;;  %v8266_v40 = vld [vmem:[%s8378_s28 + $0xf38] sm:$0xff]  }
 0x1f0   : > { %7569 = vmatprep.subr.bf16.mxu1 %v8231_v34  ;;  %v7269_v50 = vpop.f32.mrb[31].mxu1  ;;  %v8271_v47 = vld [vmem:[%s8378_s28 + $0x1008] sm:$0xff]  }
 0x1f1   : > { %v8971_v53 = vadd.f32 %v7267_v45, %v5483_v44  ;;  %7548 = vmatpush3.bf16.msra.mxu0 %v8230_v32  ;;  %v8270_v44 = vld [vmem:[%s8378_s28 + $0x1000] sm:$0xff]   ;;  %v8322_v45 = vmov 0.0  }
 0x1f2   : > { %7549 = vmatprep.subr.bf16.mxu0 %v8233_v37  ;;  %v8267_v37 = vld [vmem:[%s8378_s28 + $0xff8] sm:$0xff]   ;;  %v8274_v50 = vld [vmem:[%s8378_s28 + $0x1020] sm:$0xff]  }
 0x1f3   : > { %7570 = vmatpush3.bf16.msra.mxu1 %v8232_v46  ;;  %v1686_v46 = vcombine.high %v1670_v41, %v1670_v41 }
 0x1f4   : > { %7571 = vmatprep.subr.bf16.mxu1 %v8235_v48  ;;  %v8272_v48 = vld [vmem:[%s8378_s28 + $0x1010] sm:$0xff]  }
 0x1f5   : > { %7550 = vmatpush3.bf16.msra.mxu0 %v8234_v54 }
 0x1f6   : > { %7579 = vmatprep.subr.bf16.mxu0 %v8237_v57 }
 0x1f7   : > { %7572 = vmatpush3.bf16.msra.mxu1 %v8236_v59 }
 0x1f8   : > { %6041 = vmatmul.mubr.bf16.vlgmr.msra.gmra.mrb[56].mxu0 %v1663_v56  ;;  %7601 = vmatprep.subr.bf16.mxu1 %v8239_v51 }
 0x1f9   : > { %7580 = vmatpush3.bf16.msra.mxu0 %v8238_v62  ;;  %6120 = vmatprep.mubr.bf16.mxu0 %v1684_v61 }
 0x1fa   : > { %6081 = vmatmul.mubr.bf16.vlgmr.msra.gmra.mrb[56].mxu1 %v1685_v63  ;;  %7581 = vmatprep.subr.bf16.mxu0 %v8241_v0 }
 0x1fb   : > { %7602 = vmatpush3.bf16.msra.mxu1 %v8240_v1  ;;  %6160 = vmatprep.mubr.bf16.mxu1 %v1688_v2  ;;  %v8277_v1 = vld [vmem:[%s8378_s28 + $0x1038] sm:$0xff]   ;;  %v6391_v2 = vld.sshfl [vmem:[%s8373_s24 + $0x40] sm:$0x1 pattern:$0x75316420] }
 0x1fc   : > { %7603 = vmatprep.subr.bf16.mxu1 %v8243_v3  ;;  %v1702_v3 = vrot.slane %v6391_v2, %v8416_v42 }
 0x1fd   : > { %7582 = vmatpush3.bf16.msra.mxu0 %v8242_v4 }
 0x1fe   : > { %7583 = vmatprep.subr.bf16.mxu0 %v8245_v5 }
 0x1ff   : > { %7604 = vmatpush3.bf16.msra.mxu1 %v8244_v6 }
 0x200   : > { %7605 = vmatprep.subr.bf16.mxu1 %v8247_v7 }
 0x201   : > { %7584 = vmatpush3.bf16.msra.mxu0 %v8246_v8 }
 0x202   : > { %7585 = vmatprep.subr.bf16.mxu0 %v8249_v9 }
 0x203   : > { %7606 = vmatpush3.bf16.msra.mxu1 %v8248_v10 }
 0x204   : > { %7607 = vmatprep.subr.bf16.mxu1 %v8251_v11 }
 0x205   : > { %7586 = vmatpush3.bf16.msra.mxu0 %v8250_v12 }
 0x206   : > { %7587 = vmatprep.subr.bf16.mxu0 %v8253_v13 }
 0x207   : > { %7608 = vmatpush3.bf16.msra.mxu1 %v8252_v14 }
 0x208   : > { %7609 = vmatprep.subr.bf16.mxu1 %v8255_v15 }
 0x209   : > { %7588 = vmatpush3.bf16.msra.mxu0 %v8254_v16 }
 0x20a   : > { %7589 = vmatprep.subr.bf16.mxu0 %v8257_v17 }
 0x20b   : > { %v7287_v22 = vpop.f32.mrb[32].mxu0  ;;  %7610 = vmatpush3.bf16.msra.mxu1 %v8256_v18 }
 0x20c   : > { %v7288_v24 = vpop.f32.mrb[33].mxu0  ;;  %7611 = vmatprep.subr.bf16.mxu1 %v8259_v19 }
 0x20d   : > { %v7289_v26 = vadd.f32 %v7288_v24, %v7287_v22  ;;  %v7290_v27 = vpop.f32.mrb[34].mxu0  ;;  %v7309_v28 = vpop.f32.mrb[32].mxu1  ;;  %7590 = vmatpush3.bf16.msra.mxu0 %v8258_v20 }
 0x20e   : > { %v7291_v32 = vpop.f32.mrb[35].mxu0  ;;  %v7310_v33 = vpop.f32.mrb[33].mxu1  ;;  %7591 = vmatprep.subr.bf16.mxu0 %v8261_v21 }
 0x20f   : > { %v5563_v34 = vadd.f32 %v7289_v26, %v8971_v53  ;;  %v7311_v35 = vadd.f32 %v7310_v33, %v7309_v28  ;;  %7612 = vmatpush3.bf16.msra.mxu1 %v8260_v23  ;;  %v7312_v36 = vpop.f32.mrb[34].mxu1 }
 0x210   : > { %7613 = vmatprep.subr.bf16.mxu1 %v8263_v25  ;;  %v7313_v38 = vpop.f32.mrb[35].mxu1 }
 0x211   : > { %v5603_v39 = vadd.f32 %v7311_v35, %v5563_v34  ;;  %7592 = vmatpush3.bf16.msra.mxu0 %v8262_v29 }
 0x212   : > { %7593 = vmatprep.subr.bf16.mxu0 %v8265_v31 }
 0x213   : > { %7614 = vmatpush3.bf16.msra.mxu1 %v8264_v30 }
 0x214   : > { %7615 = vmatprep.subr.bf16.mxu1 %v8267_v37 }
 0x215   : > { %7594 = vmatpush3.bf16.msra.mxu0 %v8266_v40 }
 0x216   : > { %7649 = vmatprep.subr.bf16.mxu0 %v8322_v45 }
 0x217   : > { %7616 = vmatpush3.bf16.msra.mxu1 %v8269_v43 }
 0x218   : > { %6121 = vmatmul.mubr.bf16.vlgmr.msra.gmra.mrb[60].mxu0 %v1670_v41 }
 0x219   : > { %7650 = vmatpush3.bf16.msra.mxu0 %v8270_v44  ;;  %7665 = vmatprep.mubr.msk.bf16.mxu0 %vm8323_vm0, %v8322_v45 }
 0x21a   : > { %6161 = vmatmul.mubr.bf16.vlgmr.msra.gmra.mrb[60].mxu1 %v1686_v46  ;;  %7651 = vmatprep.subr.bf16.mxu0 %v8322_v45 }
 0x21d   : > { %7652 = vmatpush3.bf16.msra.mxu0 %v8271_v47 }
 0x21e   : > { %7653 = vmatprep.subr.bf16.mxu0 %v8322_v45 }
 0x221   : > { %7654 = vmatpush3.bf16.msra.mxu0 %v8272_v48 }
 0x222   : > { %7655 = vmatprep.subr.bf16.mxu0 %v8322_v45 }
 0x225   : > { %7656 = vmatpush3.bf16.msra.mxu0 %v8273_v49 }
 0x226   : > { %7657 = vmatprep.subr.bf16.mxu0 %v8322_v45 }
 0x229   : > { %7658 = vmatpush3.bf16.msra.mxu0 %v8274_v50 }
 0x22a   : > { %7659 = vmatprep.subr.bf16.mxu0 %v8322_v45 }
 0x22b   : > { %v7331_v53 = vpop.f32.mrb[36].mxu0 }
 0x22c   : > { %v7332_v54 = vpop.f32.mrb[37].mxu0 }
 0x22d   : > { %v7333_v55 = vadd.f32 %v7332_v54, %v7331_v53  ;;  %v7334_v56 = vpop.f32.mrb[38].mxu0  ;;  %v7353_v57 = vpop.f32.mrb[36].mxu1  ;;  %7660 = vmatpush3.bf16.msra.mxu0 %v8275_v52 }
 0x22e   : > { %v7335_v59 = vpop.f32.mrb[39].mxu0  ;;  %v7354_v60 = vpop.f32.mrb[37].mxu1  ;;  %7661 = vmatprep.subr.bf16.mxu0 %v8322_v45 }
 0x22f   : > { %v5643_v51 = vadd.f32 %v7333_v55, %v5603_v39  ;;  %v7355_v61 = vadd.f32 %v7354_v60, %v7353_v57  ;;  %v7356_v62 = vpop.f32.mrb[38].mxu1 }
 0x230   : > { %v7357_v63 = vpop.f32.mrb[39].mxu1 }
 0x231   : > { %v5683_v0 = vadd.f32 %v7355_v61, %v5643_v51  ;;  %7662 = vmatpush3.bf16.msra.mxu0 %v8276_v58 }
 0x232   : > { %7663 = vmatprep.subr.bf16.mxu0 %v8322_v45 }
 0x235   : > { %7664 = vmatpush3.bf16.msra.mxu0 %v8277_v1 }
 0x238   : > { %7666 = vmatmul.mubr.bf16.vlgmr.msra.gmra.mrb[64].mxu0 %v1702_v3 }
 0x24b   : > { %v7375_v4 = vpop.f32.mrb[40].mxu0 }
 0x24c   : > { %v7376_v5 = vpop.f32.mrb[41].mxu0 }
 0x24d   : > { %v7377_v6 = vadd.f32 %v7376_v5, %v7375_v4  ;;  %v7378_v7 = vpop.f32.mrb[42].mxu0  ;;  %v7397_v8 = vpop.f32.mrb[40].mxu1 }
 0x24e   : > { %v7379_v9 = vpop.f32.mrb[43].mxu0  ;;  %v7398_v10 = vpop.f32.mrb[41].mxu1 }
 0x24f   : > { %v5723_v11 = vadd.f32 %v7377_v6, %v5683_v0  ;;  %v7399_v12 = vadd.f32 %v7398_v10, %v7397_v8  ;;  %v7400_v13 = vpop.f32.mrb[42].mxu1 }
 0x250   : > { %v7401_v14 = vpop.f32.mrb[43].mxu1 }
 0x251   : > { %v5763_v15 = vadd.f32 %v7399_v12, %v5723_v11  ;;  %v238_v12 = vld [vmem:[#allocation2] sm:$0x3] }
 0x26b   : > { %v7419_v16 = vpop.f32.mrb[44].mxu0 }
 0x26c   : > { %v7420_v17 = vpop.f32.mrb[45].mxu0 }
 0x26d   : > { %v7421_v18 = vadd.f32 %v7420_v17, %v7419_v16  ;;  %v7422_v19 = vpop.f32.mrb[46].mxu0  ;;  %v7441_v20 = vpop.f32.mrb[44].mxu1 }
 0x26e   : > { %v7423_v42 = vpop.f32.mrb[47].mxu0  ;;  %v7442_v21 = vpop.f32.mrb[45].mxu1  ;;  %v6224_v19 = vld [vmem:[%s9112_s3] sm:$0xff] (!%p6912_p6) }
 0x26f   : > { %v5803_v22 = vadd.f32 %v7421_v18, %v5763_v15  ;;  %v7443_v23 = vadd.f32 %v7442_v21, %v7441_v20  ;;  %v7444_v24 = vpop.f32.mrb[46].mxu1  ;;  %v6225_v20 = vld [vmem:[%s9112_s3 + $0x8] sm:$0xff] (!%p6912_p6)  ;;  %v6226_v42 = vld [vmem:[%s9112_s3 + $0x10] sm:$0xff] (!%p6912_p6)  ;;  %v8324_v21 = vmov (!%p6912_p6), 0.0|0.0  }
 0x270   : > { %v7445_v25 = vpop.f32.mrb[47].mxu1  ;;  %7704 = vmatprep.subr.bf16.mxu0 (!%p6912_p6), %v8324_v21  ;;  %v8326_v24 = vmov (!%p6912_p6), 0.0  }
 0x271   : > { %v5843_v26 = vadd.f32 %v7443_v23, %v5803_v22  ;;  %v7705_v22 = vpack.c.bf16 (!%p6912_p6), %v6225_v20, %v6224_v19  ;;  %v6227_v23 = vld [vmem:[%s9112_s3 + $0x18] sm:$0xff] (!%p6912_p6)  ;;  %7701 = vmatprep.mubr.msk.f32.mxu0 (!%p6912_p6), %vm8325_vm1, %v8326_v24 }
 0x272   : > { %v7708_v25 = vpack.c.bf16 (!%p6912_p6), %v6227_v23, %v6226_v42 }
 0x273   : > { %7706 = vmatpush3.bf16.msra.mxu0 (!%p6912_p6), %v7705_v22 }
 0x274   : > { %7707 = vmatprep.subr.bf16.mxu0 (!%p6912_p6), %v8324_v21 }
 0x277   : > { %7709 = vmatpush3.bf16.msra.mxu0 (!%p6912_p6), %v7708_v25 }
 0x278   : > { %7710 = vmatprep.subr.bf16.mxu0 (!%p6912_p6), %v8324_v21 }
 0x28b   : > { %v7463_v27 = vpop.f32.mrb[48].mxu0 }
 0x28c   : > { %v7464_v28 = vpop.f32.mrb[49].mxu0 }
 0x28d   : > { %v7465_v29 = vadd.f32 %v7464_v28, %v7463_v27  ;;  %v7466_v31 = vpop.f32.mrb[50].mxu0  ;;  %v7485_v32 = vpop.f32.mrb[48].mxu1  ;;  %v6229_v27 = vld [vmem:[%s9112_s3 + $0x28] sm:$0xff] (!%p6912_p6) }
 0x28e   : > { %v7467_v33 = vpop.f32.mrb[51].mxu0  ;;  %v7486_v34 = vpop.f32.mrb[49].mxu1  ;;  %v6231_v31 = vld [vmem:[%s9112_s3 + $0x38] sm:$0xff] (!%p6912_p6) }
 0x28f   : > { %v5883_v35 = vadd.f32 %v7465_v29, %v5843_v26  ;;  %v7487_v30 = vadd.f32 %v7486_v34, %v7485_v32  ;;  %v7488_v36 = vpop.f32.mrb[50].mxu1  ;;  %v6228_v26 = vld [vmem:[%s9112_s3 + $0x20] sm:$0xff] (!%p6912_p6)  ;;  %v6230_v29 = vld [vmem:[%s9112_s3 + $0x30] sm:$0xff] (!%p6912_p6)  ;;  %v6233_v34 = vld [vmem:[%s9112_s3 + $0x48] sm:$0xff] (!%p6912_p6) }
 0x290   : > { %v7489_v37 = vpop.f32.mrb[51].mxu1  ;;  %v7711_v28 = vpack.c.bf16 (!%p6912_p6), %v6229_v27, %v6228_v26  ;;  %v7714_v32 = vpack.c.bf16 (!%p6912_p6), %v6231_v31, %v6230_v29  ;;  %v6232_v33 = vld [vmem:[%s9112_s3 + $0x40] sm:$0xff] (!%p6912_p6)  ;;  %v6235_v36 = vld [vmem:[%s9112_s3 + $0x58] sm:$0xff] (!%p6912_p6) }
 0x291   : > { %v5923_v38 = vadd.f32 %v7487_v30, %v5883_v35  ;;  %v7717_v35 = vpack.c.bf16 (!%p6912_p6), %v6233_v34, %v6232_v33  ;;  %v6234_v30 = vld [vmem:[%s9112_s3 + $0x50] sm:$0xff] (!%p6912_p6) }
 0x292   : > { %7712 = vmatpush3.bf16.msra.mxu0 (!%p6912_p6), %v7711_v28  ;;  %v7720_v37 = vpack.c.bf16 (!%p6912_p6), %v6235_v36, %v6234_v30 }
 0x293   : > { %7713 = vmatprep.subr.bf16.mxu0 (!%p6912_p6), %v8324_v21 }
 0x296   : > { %7715 = vmatpush3.bf16.msra.mxu0 (!%p6912_p6), %v7714_v32 }
 0x297   : > { %7716 = vmatprep.subr.bf16.mxu0 (!%p6912_p6), %v8324_v21 }
 0x29a   : > { %7718 = vmatpush3.bf16.msra.mxu0 (!%p6912_p6), %v7717_v35 }
 0x29b   : > { %7719 = vmatprep.subr.bf16.mxu0 (!%p6912_p6), %v8324_v21 }
 0x29e   : > { %7721 = vmatpush3.bf16.msra.mxu0 (!%p6912_p6), %v7720_v37 }
 0x29f   : > { %7722 = vmatprep.subr.bf16.mxu0 (!%p6912_p6), %v8324_v21 }
 0x2ab   : > { %v7507_v39 = vpop.f32.mrb[52].mxu0 }
 0x2ac   : > { %v7508_v40 = vpop.f32.mrb[53].mxu0 }
 0x2ad   : > { %v7509_v41 = vadd.f32 %v7508_v40, %v7507_v39  ;;  %v7510_v43 = vpop.f32.mrb[54].mxu0  ;;  %v7529_v44 = vpop.f32.mrb[52].mxu1  ;;  %v6237_v39 = vld [vmem:[%s9112_s3 + $0x68] sm:$0xff] (!%p6912_p6) }
 0x2ae   : > { %v7511_v45 = vpop.f32.mrb[55].mxu0  ;;  %v7530_v46 = vpop.f32.mrb[53].mxu1  ;;  %v6913_v43 = vld [vmem:[%s9111_s2] ss:$0 sm:$0xff] (!%p6912_p6) }
 0x2af   : > { %v5963_v47 = vadd.f32 %v7509_v41, %v5923_v38  ;;  %v7531_v48 = vadd.f32 %v7530_v46, %v7529_v44  ;;  %v7532_v49 = vpop.f32.mrb[54].mxu1  ;;  %v6236_v38 = vld [vmem:[%s9112_s3 + $0x60] sm:$0xff] (!%p6912_p6)  ;;  %v6238_v44 = vld [vmem:[%s9112_s3 + $0x70] sm:$0xff] (!%p6912_p6)  ;;  %v6239_v45 = vld [vmem:[%s9112_s3 + $0x78] sm:$0xff] (!%p6912_p6) }
 0x2b0   : > { %v7533_v50 = vpop.f32.mrb[55].mxu1  ;;  %v7723_v40 = vpack.c.bf16 (!%p6912_p6), %v6237_v39, %v6236_v38  ;;  %v6914_v49 = vld [vmem:[%s9113_s4] ss:$0 sm:$0xff] (!%p6912_p6) }
 0x2b1   : > { %v6003_v52 = vadd.f32 %v7531_v48, %v5963_v47  ;;  %v7726_v47 = vpack.c.bf16 (!%p6912_p6), %v6239_v45, %v6238_v44 }
 0x2b2   : > { %7724 = vmatpush3.bf16.msra.mxu0 (!%p6912_p6), %v7723_v40 }
 0x2b3   : > { %7725 = vmatprep.subr.bf16.mxu0 (!%p6912_p6), %v8324_v21 }
 0x2b6   : > { %7727 = vmatpush3.bf16.msra.mxu0 (!%p6912_p6), %v7726_v47 }
 0x2cb   : > { %v7551_v53 = vpop.f32.mrb[56].mxu0 }
 0x2cc   : > { %v7552_v54 = vpop.f32.mrb[57].mxu0 }
 0x2cd   : > { %v7553_v55 = vadd.f32 %v7552_v54, %v7551_v53  ;;  %v7554_v56 = vpop.f32.mrb[58].mxu0  ;;  %v7573_v57 = vpop.f32.mrb[56].mxu1 }
 0x2ce   : > { %v7555_v58 = vpop.f32.mrb[59].mxu0  ;;  %v7574_v59 = vpop.f32.mrb[57].mxu1 }
 0x2cf   : > { %v6043_v60 = vadd.f32 %v7553_v55, %v6003_v52  ;;  %v7575_v51 = vadd.f32 %v7574_v59, %v7573_v57  ;;  %v7576_v61 = vpop.f32.mrb[58].mxu1 }
 0x2d0   : > { %v7577_v62 = vpop.f32.mrb[59].mxu1 }
 0x2d1   : > { %v6083_v63 = vadd.f32 %v7575_v51, %v6043_v60 }
 0x2eb   : > { %v7595_v0 = vpop.f32.mrb[60].mxu0 }
 0x2ec   : > { %v7596_v1 = vpop.f32.mrb[61].mxu0 }
 0x2ed   : > { %v7597_v2 = vadd.f32 %v7596_v1, %v7595_v0  ;;  %v7598_v3 = vpop.f32.mrb[62].mxu0  ;;  %v7617_v4 = vpop.f32.mrb[60].mxu1 }
 0x2ee   : > { %v7599_v5 = vpop.f32.mrb[63].mxu0  ;;  %v7618_v6 = vpop.f32.mrb[61].mxu1 }
 0x2ef   : > { %v6123_v7 = vadd.f32 %v7597_v2, %v6083_v63  ;;  %v7619_v8 = vadd.f32 %v7618_v6, %v7617_v4  ;;  %v7620_v9 = vpop.f32.mrb[62].mxu1 }
 0x2f0   : > { %v7621_v10 = vpop.f32.mrb[63].mxu1 }
 0x2f1   : > { %v6163_v11 = vadd.f32 %v7619_v8, %v6123_v7 }
 0x30a   : > { %6213 = sbr.rel (%p6912_p6) target bundleno = 1325 (0x52d), region = 48 }
 0x30b   : > { %v6202_v13 = vpop.f32.mrb[64].mxu0 }
 0x30c   : > { %v6203_v14 = vadd.f32 %v6202_v13, %v6163_v11  ;;  %v7667_v15 = vpop.f32.mrb[65].mxu0 }
 0x30d   : > { %v6205_v16 = vpop.f32.mrb[66].mxu0 }
 0x30e   : > { %v6208_v17 = vadd.f32 %v6203_v14, %v238_v12  ;;  %v7668_v18 = vpop.f32.mrb[67].mxu0 }
 0x310   : > { %6209 = vst [vmem:[#allocation2] sm:$0x3] %v6208_v17 }
 0x317   : > { %v6214_v41 = vld [vmem:[#allocation2] sm:$0x3] }
 0x318   : > { %v6222_v46 = vadd.f32 %v6913_v43, %v6214_v41 }
 0x31a   : > { %v6223_v48 = vmax.f32 %v6222_v46, 0.0 }
 0x31c   : > { %7702 = vmatmul.mubr.f32.vlgmr.msra.gmra.mrb[0].mxu0 %v6223_v48 }
 0x3ef   : > { %v6313_v50 = vpop.f32.mrb[0].mxu0 }
 0x3f0   : > { %v6314_v52 = vadd.f32 %v6914_v49, %v6313_v50  ;;  %v7703_v53 = vpop.f32.mrb[1].mxu0 }
 0x3f2   : > { %v6318_v54 = vsel %vm6317_vm2, %v6314_v52, -inf }
 0x3f3   : > { %6319 = vmax.xlane.f32.xlu0 %v6318_v54 }
 0x480   : > { %v6320_v55 = vpop.xlane.xlu0 %6319 }
 0x481   : > { %v6321_v56 = vsub.f32 %v6314_v52, %v6320_v55 }
 0x483   : > { %v6322_v57 = vmul.f32 1.442695, %v6321_v56 }
 0x485   : > { %8278 = vpow2.f32 %v6322_v57 }
 0x48f   : > { %v8279_v58 = vpop.eup %8278 }
 0x490   : > { %v6324_v59 = vsel %vm6317_vm2, %v8279_v58, 0.0 }
 0x491   : > { %6325 = vadd.xlane.f32.xlu0 %v6324_v59 }
 0x51e   : > { %v6326_v60 = vpop.xlane.xlu0 %6325 }
 0x51f   : > { %8280 = vrcp.f32 %v6326_v60 }
 0x529   : > { %v8281_v51 = vpop.eup %8280 }
 0x52a   : > { %v6328_v61 = vmul.f32 %v8281_v51, %v8279_v58 }
 0x52c   : > { %6329 = vst.msk [vmem:[#allocation3] sm:$0x3] %vm6317_vm2, %v6328_v61 }
 0x52d PF: > { %p7732_p7 = scmp.eq.s32.totalorder %s8364_s19, 3  ;;  %s8327_s17 = smov [#allocation3]  }
 0x52e   : > { %s6337_s20 = sshll.u32 %s8327_s17, 4  ;;  %s6338_s20 = int_to_ptr.vmem [resolvable:$true] %s6337_s20 }
 0x52f   : > { %s8282_s21 = scalar_lea.vmem %s6338_s20, 32  ;;  %p8289_p11 = scmp.lt.s32.totalorder %s6338_s20, %s6338_s20 }
 0x530   : > { %p8283_p8 = scmp.ne.s32.totalorder %s6338_s20, %s8282_s21  ;;  %p8290_p12 = scmp.lt.s32.totalorder %s8282_s21, %s8282_s21 }
 0x532   : > { %p8284_p9 = pnand %p8283_p8, %p7732_p7  ;;  %p8291_p13 = por %p8290_p12, %p8289_p11 }
 0x534   : > { %p8285_p10 = pneg %p8284_p9 }
 0x536   : > { %p8292_p0 = pnand %p8291_p13, %p8285_p10 }
 0x538   : > { %8295 = shalt.err (!%p8292_p0)
}
 0x539   : > { %s8296_s24 = scalar_lea.hbm %s9114_s5, 32 }
 0x53a   : > { %p8297_p1 = scmp.ne.s32.totalorder %s9114_s5, %s8296_s24  ;;  %p8302_p4 = scmp.lt.u32.totalorder %s8296_s24, %s9114_s5 }
 0x53c   : > { %p8298_p2 = pnand %p8297_p1, %p7732_p7 }
 0x53e   : > { %p8299_p3 = pneg %p8298_p2 }
 0x540   : > { %p8304_p5 = pnand %p8302_p4, %p8299_p3 }
 0x542   : > { %8307 = shalt.err (!%p8304_p5)
}
 0x543   : > { %7729 = dma.vmem_to_hbm [thread:$0]  (%p7732_p7), %s6338_s20, 32, %s9114_s5, [#allocation4]  }
 0x544   : > { %8313 = dma.done.wait (%p7732_p7), [#allocation4], 32  }
 0x545   : > { %8315 = vsyncadd (%p7732_p7), [#allocation4], 4294967264 }
 0x546 PF: > { %s16_s18 = sadd.s32 1, %s8318_s18  }
 0x547   : > { %p13_p6 = scmp.ge.s32.totalorder %s16_s18, 6  }
 0x549   :  { %15 = sbr.rel (!%p13_p6) target bundleno = 1 (0x1), region = 78 }
 0x550   :  { %6350 = vsyncpa [#allocation4], 1 }
 0x551   :  { %6352 = vsyncpa [#allocation4 + $0x1], 1 }

</bundles_post_ra>
